<compile_context>
chip_gen: v6e
topology: v6e:2x2x1
jax: 0.10.0
libtpu: 0.0.40
codegen_flags: <defaults>
</compile_context>

<pallas_src>
import numpy as np
import jax
import jax.numpy as jnp
from jax.experimental import pallas as pl
from jax.experimental.pallas import tpu as pltpu

H = W = 7
HW = H * W                       # 49 spatial positions
CIN = 128
COUT = 32
C_PRE = 640 + 10 * COUT          # 960 channels concatenated before the conv output
C_TOTAL = C_PRE + COUT + COUT    # 1024
EPS = 1e-5
N_INV = 1.0 / HW                 # BN batch stats: batch=1, 7x7 spatial


def _tap_shift(kh, kw):
    # flat-index shift of tap (kh, kw) in the flattened (H*W,) spatial layout
    return (kh - 1) * W + (kw - 1)


def _premask_np():
    """(288, 49) source-validity mask, rows ordered (tap k, out-channel co).
    premask[k*32+co, q] = 1 iff spatial position q is a legal in-image read for
    tap k.  Multiplying the pre-shift activations by this mask makes the
    subsequent wrap-around lane roll exactly equal to a zero-padded shift."""
    m = np.zeros((9, HW), np.float32)
    for kh in range(3):
        for kw in range(3):
            k = kh * 3 + kw
            s = _tap_shift(kh, kw)
            for p in range(HW):
                h, w = divmod(p, W)
                if 0 <= h + kh - 1 < H and 0 <= w + kw - 1 < W:
                    m[k, p + s] = 1.0          # p + s is always in [0, 49) here
    return np.repeat(m, COUT, axis=0)          # (288, 49)


_PREMASK_NP = _premask_np()
# the 8 non-center taps: (tap index, flat shift)
_SIDE_TAPS = tuple((kh * 3 + kw, _tap_shift(kh, kw))
                   for kh in range(3) for kw in range(3)
                   if not (kh == 1 and kw == 1))


def _lane_roll(x, s):
    """out[:, p] = x[:, (p + s) % HW] for a static shift s.
    Implemented as two static lane slices + one minor-dim concat (XLU/VPU work,
    no MXU op); the wrapped lanes are already zeroed by the validity mask."""
    s = s % HW
    if s == 0:
        return x
    return jnp.concatenate([x[:, s:], x[:, :s]], axis=1)


def fused_kernel(x445_ref, w_ref, pm_ref, x369_ref, mid_ref, x453_ref,
                 gamma_ref, beta_ref, o_ref):
    # ---- one-pass BatchNorm (training statistics over the 49 spatial
    # positions, batch=1), affine folded into a single fused multiply-add.
    # Channels are independent, so per-slab stats equal stats on the
    # concatenated tensor.
    def bn_store(x, c0):
        c1 = c0 + x.shape[0]
        g = gamma_ref[c0:c1, :]                       # (C, 1)
        b = beta_ref[c0:c1, :]                        # (C, 1)
        mean = jnp.sum(x, axis=1, keepdims=True) * N_INV
        msq = jnp.sum(x * x, axis=1, keepdims=True) * N_INV
        var = msq - mean * mean
        scale = g * jax.lax.rsqrt(var + EPS)          # rsqrt -> EUP slot
        shift = b - mean * scale
        o_ref[c0:c1, :] = x * scale + shift           # 32-aligned channel slice

    # ---- 3x3 conv (pad 1), channel-major: ONE MXU matmul, then fold each
    # tap's spatial shift with a static lane roll on its (32,49) slab.
    #   y[k*32+co, q] = sum_ci W[co,ci,k] * x445[ci,q]
    y = jnp.dot(w_ref[...], x445_ref[...],
                preferred_element_type=jnp.float32)   # (288, 49)
    ym = y * pm_ref[...]                              # fold zero-padding mask
    conv = ym[4 * COUT:5 * COUT, :]                   # center tap (shift 0)
    for k, s in _SIDE_TAPS:
        conv = conv + _lane_roll(ym[k * COUT:(k + 1) * COUT, :], s)

    # ---- BN every slab straight into its channel slice of the fused output
    bn_store(x369_ref[...], 0)
    bn_store(mid_ref[...], 640)
    bn_store(conv, C_PRE)
    bn_store(x453_ref[...], C_PRE + COUT)


def prepare_params(conv_w, gamma, beta):
    """One-time parameter re-layout, hoisted out of the per-step hot path."""
    # wstk[(kh*3+kw)*32 + co, ci] = conv_w[co, ci, kh, kw]
    wstk = jnp.transpose(conv_w, (2, 3, 0, 1)).reshape(9 * COUT, CIN)
    premask = jnp.asarray(_PREMASK_NP)
    gamma2 = gamma.reshape(C_TOTAL, 1)
    beta2 = beta.reshape(C_TOTAL, 1)
    return wstk, premask, gamma2, beta2


@jax.jit
def forward(x445, x369, smalls, x453, wstk, premask, gamma2, beta2):
    """x445: (1,128,7,7); x369: (1,640,7,7); smalls: list of ten (1,32,7,7);
    x453: (1,32,7,7); wstk/premask/gamma2/beta2 from prepare_params()."""
    # TODO(synk): BN batch statistics hardcode batch size 1 (N_INV = 1/49).
    mid = jnp.concatenate([s.reshape(COUT, HW) for s in smalls], axis=0)  # (320,49)
    args = [x445.reshape(CIN, HW), wstk, premask,
            x369.reshape(640, HW), mid, x453.reshape(COUT, HW),
            gamma2, beta2]

    vmem = pl.BlockSpec(memory_space=pltpu.MemorySpace.VMEM)
    out = pl.pallas_call(
        fused_kernel,
        out_shape=jax.ShapeDtypeStruct((C_TOTAL, HW), jnp.float32),
        in_specs=[vmem] * len(args),
        out_specs=vmem,
        cost_estimate=pl.CostEstimate(flops=8_000_000, transcendentals=1024,
                                      bytes_accessed=800_000),
    )(*args)

    # channel-major (1024, 49) is already NCHW order -> pure reshape
    return out.reshape(1, C_TOTAL, H, W)


def reference(x445, others, x453, conv_w, gamma, beta):
    conv = jax.lax.conv_general_dilated(
        x445, conv_w, window_strides=(1, 1), padding=((1, 1), (1, 1)),
        dimension_numbers=('NCHW', 'OIHW', 'NCHW'))
    full = jnp.concatenate(others + [conv, x453], axis=1)
    mean = jnp.mean(full, axis=(0, 2, 3), keepdims=True)
    var = jnp.mean((full - mean) ** 2, axis=(0, 2, 3), keepdims=True)
    return ((full - mean) * jax.lax.rsqrt(var + EPS)
            * gamma.reshape(1, -1, 1, 1) + beta.reshape(1, -1, 1, 1))


if __name__ == "__main__":
    key = jax.random.PRNGKey(0)
    keys = jax.random.split(key, 16)

    # inputs (same shapes as the PyTorch module; already small: 7x7 spatial)
    x369 = jax.random.normal(keys[0], (1, 640, 7, 7), jnp.float32)
    smalls = [jax.random.normal(keys[i + 1], (1, 32, 7, 7), jnp.float32)
              for i in range(10)]
    x445 = jax.random.normal(keys[11], (1, 128, 7, 7), jnp.float32)
    x453 = jax.random.normal(keys[12], (1, 32, 7, 7), jnp.float32)

    # deterministic parameter init (synthetic; not a checkpoint load)
    conv_w = jax.random.normal(keys[13], (32, 128, 3, 3), jnp.float32) * 0.05
    gamma = 1.0 + 0.1 * jax.random.normal(keys[14], (C_TOTAL,), jnp.float32)
    beta = 0.1 * jax.random.normal(keys[15], (C_TOTAL,), jnp.float32)

    # one-time parameter preparation (hoisted out of the per-call hot path)
    wstk, premask, gamma2, beta2 = prepare_params(conv_w, gamma, beta)

    out = jax.block_until_ready(
        forward(x445, x369, smalls, x453, wstk, premask, gamma2, beta2))
    ref = reference(x445, [x369] + smalls, x453, conv_w, gamma, beta)

    assert out.shape == (1, 1024, 7, 7), out.shape
    err = float(jnp.max(jnp.abs(out - ref)))
    assert jnp.allclose(out, ref, atol=1e-3, rtol=1e-3), err
    # TODO(synk): BatchNorm running_mean/running_var momentum updates (training
    # side-effect buffers) are not materialized; only the forward output is.
    print("KERNEL_OK")
</pallas_src>

<mosaic_0001>
module attributes {stable_mosaic.version = 11 : i64} {
  func.func @fused_kernel(%arg0: memref<128x49xf32, #tpu.memory_space<vmem>>, %arg1: memref<288x128xf32, #tpu.memory_space<vmem>>, %arg2: memref<288x49xf32, #tpu.memory_space<vmem>>, %arg3: memref<640x49xf32, #tpu.memory_space<vmem>>, %arg4: memref<320x49xf32, #tpu.memory_space<vmem>>, %arg5: memref<32x49xf32, #tpu.memory_space<vmem>>, %arg6: memref<1024x1xf32, #tpu.memory_space<vmem>>, %arg7: memref<1024x1xf32, #tpu.memory_space<vmem>>, %arg8: memref<1024x49xf32, #tpu.memory_space<vmem>>) attributes {dimension_semantics = [], scalar_prefetch = 0 : i64, scratch_operands = 0 : i64, tpu.core_type = #tpu.core_type<tc>} {
    %c0 = arith.constant 0 : index
    %c0_0 = arith.constant 0 : index
    %0 = vector.load %arg1[%c0, %c0_0] : memref<288x128xf32, #tpu.memory_space<vmem>>, vector<288x128xf32>
    %c0_1 = arith.constant 0 : index
    %c0_2 = arith.constant 0 : index
    %1 = vector.load %arg0[%c0_1, %c0_2] : memref<128x49xf32, #tpu.memory_space<vmem>>, vector<128x49xf32>
    %cst = arith.constant dense<0.000000e+00> : vector<288x49xf32>
    %2 = tpu.matmul %0, %1, %cst {dimension_numbers = #tpu.dot_dimension_numbers<[1], [0], [0], [1], [0, 0, 1, 1], [], []>} : vector<288x128xf32>, vector<128x49xf32>, vector<288x49xf32> -> vector<288x49xf32>
    %c0_3 = arith.constant 0 : index
    %c0_4 = arith.constant 0 : index
    %3 = vector.load %arg2[%c0_3, %c0_4] : memref<288x49xf32, #tpu.memory_space<vmem>>, vector<288x49xf32>
    %4 = arith.mulf %2, %3 : vector<288x49xf32>
    %5 = vector.extract_strided_slice %4 {offsets = [128, 0], sizes = [32, 49], strides = [1, 1]} : vector<288x49xf32> to vector<32x49xf32>
    %6 = vector.extract_strided_slice %4 {offsets = [0, 0], sizes = [32, 49], strides = [1, 1]} : vector<288x49xf32> to vector<32x49xf32>
    %7 = vector.extract_strided_slice %6 {offsets = [0, 41], sizes = [32, 8], strides = [1, 1]} : vector<32x49xf32> to vector<32x8xf32>
    %8 = vector.extract_strided_slice %6 {offsets = [0, 0], sizes = [32, 41], strides = [1, 1]} : vector<32x49xf32> to vector<32x41xf32>
    %9 = tpu.concatenate %7, %8 in 1 : vector<32x8xf32>, vector<32x41xf32> -> vector<32x49xf32>
    %10 = arith.addf %5, %9 : vector<32x49xf32>
    %11 = vector.extract_strided_slice %4 {offsets = [32, 0], sizes = [32, 49], strides = [1, 1]} : vector<288x49xf32> to vector<32x49xf32>
    %12 = vector.extract_strided_slice %11 {offsets = [0, 42], sizes = [32, 7], strides = [1, 1]} : vector<32x49xf32> to vector<32x7xf32>
    %13 = vector.extract_strided_slice %11 {offsets = [0, 0], sizes = [32, 42], strides = [1, 1]} : vector<32x49xf32> to vector<32x42xf32>
    %14 = tpu.concatenate %12, %13 in 1 : vector<32x7xf32>, vector<32x42xf32> -> vector<32x49xf32>
    %15 = arith.addf %10, %14 : vector<32x49xf32>
    %16 = vector.extract_strided_slice %4 {offsets = [64, 0], sizes = [32, 49], strides = [1, 1]} : vector<288x49xf32> to vector<32x49xf32>
    %17 = vector.extract_strided_slice %16 {offsets = [0, 43], sizes = [32, 6], strides = [1, 1]} : vector<32x49xf32> to vector<32x6xf32>
    %18 = vector.extract_strided_slice %16 {offsets = [0, 0], sizes = [32, 43], strides = [1, 1]} : vector<32x49xf32> to vector<32x43xf32>
    %19 = tpu.concatenate %17, %18 in 1 : vector<32x6xf32>, vector<32x43xf32> -> vector<32x49xf32>
    %20 = arith.addf %15, %19 : vector<32x49xf32>
    %21 = vector.extract_strided_slice %4 {offsets = [96, 0], sizes = [32, 49], strides = [1, 1]} : vector<288x49xf32> to vector<32x49xf32>
    %22 = vector.extract_strided_slice %21 {offsets = [0, 48], sizes = [32, 1], strides = [1, 1]} : vector<32x49xf32> to vector<32x1xf32>
    %23 = vector.extract_strided_slice %21 {offsets = [0, 0], sizes = [32, 48], strides = [1, 1]} : vector<32x49xf32> to vector<32x48xf32>
    %24 = tpu.concatenate %22, %23 in 1 : vector<32x1xf32>, vector<32x48xf32> -> vector<32x49xf32>
    %25 = arith.addf %20, %24 : vector<32x49xf32>
    %26 = vector.extract_strided_slice %4 {offsets = [160, 0], sizes = [32, 49], strides = [1, 1]} : vector<288x49xf32> to vector<32x49xf32>
    %27 = vector.extract_strided_slice %26 {offsets = [0, 1], sizes = [32, 48], strides = [1, 1]} : vector<32x49xf32> to vector<32x48xf32>
    %28 = vector.extract_strided_slice %26 {offsets = [0, 0], sizes = [32, 1], strides = [1, 1]} : vector<32x49xf32> to vector<32x1xf32>
    %29 = tpu.concatenate %27, %28 in 1 : vector<32x48xf32>, vector<32x1xf32> -> vector<32x49xf32>
    %30 = arith.addf %25, %29 : vector<32x49xf32>
    %31 = vector.extract_strided_slice %4 {offsets = [192, 0], sizes = [32, 49], strides = [1, 1]} : vector<288x49xf32> to vector<32x49xf32>
    %32 = vector.extract_strided_slice %31 {offsets = [0, 6], sizes = [32, 43], strides = [1, 1]} : vector<32x49xf32> to vector<32x43xf32>
    %33 = vector.extract_strided_slice %31 {offsets = [0, 0], sizes = [32, 6], strides = [1, 1]} : vector<32x49xf32> to vector<32x6xf32>
    %34 = tpu.concatenate %32, %33 in 1 : vector<32x43xf32>, vector<32x6xf32> -> vector<32x49xf32>
    %35 = arith.addf %30, %34 : vector<32x49xf32>
    %36 = vector.extract_strided_slice %4 {offsets = [224, 0], sizes = [32, 49], strides = [1, 1]} : vector<288x49xf32> to vector<32x49xf32>
    %37 = vector.extract_strided_slice %36 {offsets = [0, 7], sizes = [32, 42], strides = [1, 1]} : vector<32x49xf32> to vector<32x42xf32>
    %38 = vector.extract_strided_slice %36 {offsets = [0, 0], sizes = [32, 7], strides = [1, 1]} : vector<32x49xf32> to vector<32x7xf32>
    %39 = tpu.concatenate %37, %38 in 1 : vector<32x42xf32>, vector<32x7xf32> -> vector<32x49xf32>
    %40 = arith.addf %35, %39 : vector<32x49xf32>
    %41 = vector.extract_strided_slice %4 {offsets = [256, 0], sizes = [32, 49], strides = [1, 1]} : vector<288x49xf32> to vector<32x49xf32>
    %42 = vector.extract_strided_slice %41 {offsets = [0, 8], sizes = [32, 41], strides = [1, 1]} : vector<32x49xf32> to vector<32x41xf32>
    %43 = vector.extract_strided_slice %41 {offsets = [0, 0], sizes = [32, 8], strides = [1, 1]} : vector<32x49xf32> to vector<32x8xf32>
    %44 = tpu.concatenate %42, %43 in 1 : vector<32x41xf32>, vector<32x8xf32> -> vector<32x49xf32>
    %45 = arith.addf %40, %44 : vector<32x49xf32>
    %c0_5 = arith.constant 0 : index
    %c0_6 = arith.constant 0 : index
    %46 = vector.load %arg3[%c0_5, %c0_6] : memref<640x49xf32, #tpu.memory_space<vmem>>, vector<640x49xf32>
    %c0_7 = arith.constant 0 : index
    %c0_8 = arith.constant 0 : index
    %47 = vector.load %arg6[%c0_7, %c0_8] : memref<1024x1xf32, #tpu.memory_space<vmem>>, vector<640x1xf32>
    %c0_9 = arith.constant 0 : index
    %c0_10 = arith.constant 0 : index
    %48 = vector.load %arg7[%c0_9, %c0_10] : memref<1024x1xf32, #tpu.memory_space<vmem>>, vector<640x1xf32>
    %cst_11 = arith.constant dense<0.000000e+00> : vector<640xf32>
    %49 = vector.multi_reduction <add>, %46, %cst_11 [1] : vector<640x49xf32> to vector<640xf32>
    %50 = vector.shape_cast %49 : vector<640xf32> to vector<640x1xf32>
    %cst_12 = arith.constant 0.0204081628 : f32
    %51 = vector.broadcast %cst_12 : f32 to vector<640x1xf32>
    %52 = arith.mulf %50, %51 : vector<640x1xf32>
    %53 = arith.mulf %46, %46 : vector<640x49xf32>
    %cst_13 = arith.constant dense<0.000000e+00> : vector<640xf32>
    %54 = vector.multi_reduction <add>, %53, %cst_13 [1] : vector<640x49xf32> to vector<640xf32>
    %55 = vector.shape_cast %54 : vector<640xf32> to vector<640x1xf32>
    %cst_14 = arith.constant 0.0204081628 : f32
    %56 = vector.broadcast %cst_14 : f32 to vector<640x1xf32>
    %57 = arith.mulf %55, %56 : vector<640x1xf32>
    %58 = arith.mulf %52, %52 : vector<640x1xf32>
    %59 = arith.subf %57, %58 : vector<640x1xf32>
    %cst_15 = arith.constant 9.99999974E-6 : f32
    %60 = vector.broadcast %cst_15 : f32 to vector<640x1xf32>
    %61 = arith.addf %59, %60 : vector<640x1xf32>
    %62 = math.rsqrt %61 : vector<640x1xf32>
    %63 = arith.mulf %47, %62 : vector<640x1xf32>
    %64 = arith.mulf %52, %63 : vector<640x1xf32>
    %65 = arith.subf %48, %64 : vector<640x1xf32>
    %66 = vector.broadcast %63 : vector<640x1xf32> to vector<640x49xf32>
    %67 = arith.mulf %46, %66 : vector<640x49xf32>
    %68 = vector.broadcast %65 : vector<640x1xf32> to vector<640x49xf32>
    %69 = arith.addf %67, %68 : vector<640x49xf32>
    %c0_16 = arith.constant 0 : index
    %c0_17 = arith.constant 0 : index
    %70 = vector.load %arg8[%c0_16, %c0_17] : memref<1024x49xf32, #tpu.memory_space<vmem>>, vector<640x49xf32>
    tpu.vector_store %arg8[%c0_16, %c0_17], %69 {strides = array<i32>} : memref<1024x49xf32, #tpu.memory_space<vmem>>, vector<640x49xf32>,
    %c0_18 = arith.constant 0 : index
    %c0_19 = arith.constant 0 : index
    %71 = vector.load %arg4[%c0_18, %c0_19] : memref<320x49xf32, #tpu.memory_space<vmem>>, vector<320x49xf32>
    %c640 = arith.constant 640 : index
    %c0_20 = arith.constant 0 : index
    %72 = vector.load %arg6[%c640, %c0_20] : memref<1024x1xf32, #tpu.memory_space<vmem>>, vector<320x1xf32>
    %c640_21 = arith.constant 640 : index
    %c0_22 = arith.constant 0 : index
    %73 = vector.load %arg7[%c640_21, %c0_22] : memref<1024x1xf32, #tpu.memory_space<vmem>>, vector<320x1xf32>
    %cst_23 = arith.constant dense<0.000000e+00> : vector<320xf32>
    %74 = vector.multi_reduction <add>, %71, %cst_23 [1] : vector<320x49xf32> to vector<320xf32>
    %75 = vector.shape_cast %74 : vector<320xf32> to vector<320x1xf32>
    %cst_24 = arith.constant 0.0204081628 : f32
    %76 = vector.broadcast %cst_24 : f32 to vector<320x1xf32>
    %77 = arith.mulf %75, %76 : vector<320x1xf32>
    %78 = arith.mulf %71, %71 : vector<320x49xf32>
    %cst_25 = arith.constant dense<0.000000e+00> : vector<320xf32>
    %79 = vector.multi_reduction <add>, %78, %cst_25 [1] : vector<320x49xf32> to vector<320xf32>
    %80 = vector.shape_cast %79 : vector<320xf32> to vector<320x1xf32>
    %cst_26 = arith.constant 0.0204081628 : f32
    %81 = vector.broadcast %cst_26 : f32 to vector<320x1xf32>
    %82 = arith.mulf %80, %81 : vector<320x1xf32>
    %83 = arith.mulf %77, %77 : vector<320x1xf32>
    %84 = arith.subf %82, %83 : vector<320x1xf32>
    %cst_27 = arith.constant 9.99999974E-6 : f32
    %85 = vector.broadcast %cst_27 : f32 to vector<320x1xf32>
    %86 = arith.addf %84, %85 : vector<320x1xf32>
    %87 = math.rsqrt %86 : vector<320x1xf32>
    %88 = arith.mulf %72, %87 : vector<320x1xf32>
    %89 = arith.mulf %77, %88 : vector<320x1xf32>
    %90 = arith.subf %73, %89 : vector<320x1xf32>
    %91 = vector.broadcast %88 : vector<320x1xf32> to vector<320x49xf32>
    %92 = arith.mulf %71, %91 : vector<320x49xf32>
    %93 = vector.broadcast %90 : vector<320x1xf32> to vector<320x49xf32>
    %94 = arith.addf %92, %93 : vector<320x49xf32>
    %c640_28 = arith.constant 640 : index
    %c0_29 = arith.constant 0 : index
    %95 = vector.load %arg8[%c640_28, %c0_29] : memref<1024x49xf32, #tpu.memory_space<vmem>>, vector<320x49xf32>
    tpu.vector_store %arg8[%c640_28, %c0_29], %94 {strides = array<i32>} : memref<1024x49xf32, #tpu.memory_space<vmem>>, vector<320x49xf32>,
    %c960 = arith.constant 960 : index
    %c0_30 = arith.constant 0 : index
    %96 = vector.load %arg6[%c960, %c0_30] : memref<1024x1xf32, #tpu.memory_space<vmem>>, vector<32x1xf32>
    %c960_31 = arith.constant 960 : index
    %c0_32 = arith.constant 0 : index
    %97 = vector.load %arg7[%c960_31, %c0_32] : memref<1024x1xf32, #tpu.memory_space<vmem>>, vector<32x1xf32>
    %cst_33 = arith.constant dense<0.000000e+00> : vector<32xf32>
    %98 = vector.multi_reduction <add>, %45, %cst_33 [1] : vector<32x49xf32> to vector<32xf32>
    %99 = vector.shape_cast %98 : vector<32xf32> to vector<32x1xf32>
    %cst_34 = arith.constant 0.0204081628 : f32
    %100 = vector.broadcast %cst_34 : f32 to vector<32x1xf32>
    %101 = arith.mulf %99, %100 : vector<32x1xf32>
    %102 = arith.mulf %45, %45 : vector<32x49xf32>
    %cst_35 = arith.constant dense<0.000000e+00> : vector<32xf32>
    %103 = vector.multi_reduction <add>, %102, %cst_35 [1] : vector<32x49xf32> to vector<32xf32>
    %104 = vector.shape_cast %103 : vector<32xf32> to vector<32x1xf32>
    %cst_36 = arith.constant 0.0204081628 : f32
    %105 = vector.broadcast %cst_36 : f32 to vector<32x1xf32>
    %106 = arith.mulf %104, %105 : vector<32x1xf32>
    %107 = arith.mulf %101, %101 : vector<32x1xf32>
    %108 = arith.subf %106, %107 : vector<32x1xf32>
    %cst_37 = arith.constant 9.99999974E-6 : f32
    %109 = vector.broadcast %cst_37 : f32 to vector<32x1xf32>
    %110 = arith.addf %108, %109 : vector<32x1xf32>
    %111 = math.rsqrt %110 : vector<32x1xf32>
    %112 = arith.mulf %96, %111 : vector<32x1xf32>
    %113 = arith.mulf %101, %112 : vector<32x1xf32>
    %114 = arith.subf %97, %113 : vector<32x1xf32>
    %115 = vector.broadcast %112 : vector<32x1xf32> to vector<32x49xf32>
    %116 = arith.mulf %45, %115 : vector<32x49xf32>
    %117 = vector.broadcast %114 : vector<32x1xf32> to vector<32x49xf32>
    %118 = arith.addf %116, %117 : vector<32x49xf32>
    %c960_38 = arith.constant 960 : index
    %c0_39 = arith.constant 0 : index
    %119 = vector.load %arg8[%c960_38, %c0_39] : memref<1024x49xf32, #tpu.memory_space<vmem>>, vector<32x49xf32>
    tpu.vector_store %arg8[%c960_38, %c0_39], %118 {strides = array<i32>} : memref<1024x49xf32, #tpu.memory_space<vmem>>, vector<32x49xf32>,
    %c0_40 = arith.constant 0 : index
    %c0_41 = arith.constant 0 : index
    %120 = vector.load %arg5[%c0_40, %c0_41] : memref<32x49xf32, #tpu.memory_space<vmem>>, vector<32x49xf32>
    %c992 = arith.constant 992 : index
    %c0_42 = arith.constant 0 : index
    %121 = vector.load %arg6[%c992, %c0_42] : memref<1024x1xf32, #tpu.memory_space<vmem>>, vector<32x1xf32>
    %c992_43 = arith.constant 992 : index
    %c0_44 = arith.constant 0 : index
    %122 = vector.load %arg7[%c992_43, %c0_44] : memref<1024x1xf32, #tpu.memory_space<vmem>>, vector<32x1xf32>
    %cst_45 = arith.constant dense<0.000000e+00> : vector<32xf32>
    %123 = vector.multi_reduction <add>, %120, %cst_45 [1] : vector<32x49xf32> to vector<32xf32>
    %124 = vector.shape_cast %123 : vector<32xf32> to vector<32x1xf32>
    %cst_46 = arith.constant 0.0204081628 : f32
    %125 = vector.broadcast %cst_46 : f32 to vector<32x1xf32>
    %126 = arith.mulf %124, %125 : vector<32x1xf32>
    %127 = arith.mulf %120, %120 : vector<32x49xf32>
    %cst_47 = arith.constant dense<0.000000e+00> : vector<32xf32>
    %128 = vector.multi_reduction <add>, %127, %cst_47 [1] : vector<32x49xf32> to vector<32xf32>
    %129 = vector.shape_cast %128 : vector<32xf32> to vector<32x1xf32>
    %cst_48 = arith.constant 0.0204081628 : f32
    %130 = vector.broadcast %cst_48 : f32 to vector<32x1xf32>
    %131 = arith.mulf %129, %130 : vector<32x1xf32>
    %132 = arith.mulf %126, %126 : vector<32x1xf32>
    %133 = arith.subf %131, %132 : vector<32x1xf32>
    %cst_49 = arith.constant 9.99999974E-6 : f32
    %134 = vector.broadcast %cst_49 : f32 to vector<32x1xf32>
    %135 = arith.addf %133, %134 : vector<32x1xf32>
    %136 = math.rsqrt %135 : vector<32x1xf32>
    %137 = arith.mulf %121, %136 : vector<32x1xf32>
    %138 = arith.mulf %126, %137 : vector<32x1xf32>
    %139 = arith.subf %122, %138 : vector<32x1xf32>
    %140 = vector.broadcast %137 : vector<32x1xf32> to vector<32x49xf32>
    %141 = arith.mulf %120, %140 : vector<32x49xf32>
    %142 = vector.broadcast %139 : vector<32x1xf32> to vector<32x49xf32>
    %143 = arith.addf %141, %142 : vector<32x49xf32>
    %c992_50 = arith.constant 992 : index
    %c0_51 = arith.constant 0 : index
    %144 = vector.load %arg8[%c992_50, %c0_51] : memref<1024x49xf32, #tpu.memory_space<vmem>>, vector<32x49xf32>
    tpu.vector_store %arg8[%c992_50, %c0_51], %143 {strides = array<i32>} : memref<1024x49xf32, #tpu.memory_space<vmem>>, vector<32x49xf32>,
    return
  }
}

</mosaic_0001>

<bundles_post_ra>
// kernel: forward.1
= control target key start
LH: loop header
LB: loop body
LE: loop exit
PB: predicated region body
PF: predicated region fallthrough
CT: control target
= control target key end

     0   :  { %vm934_vm0 = vcmask 400384   ;;  %s5410_s13 = smov 8   ;;  %s5411_s14 = smov 87   ;;  %vm426_vm1 = vcmask 64512   ;;  %vm463_vm2 = vcmask 56320   ;;  %vm500_vm3 = vcmask 48128   ;;  %s11244_s0 = inlined_call_operand.vmem [shape: f32[128,49], index: 0, kind: input, shape index: {}]   ;;  %s11245_s1 = inlined_call_operand.vmem [shape: f32[288,128], index: 1, kind: input, shape index: {}]   ;;  %s11246_s3 = inlined_call_operand.vmem [shape: f32[640,49], index: 3, kind: input, shape index: {}]   ;;  %s11247_s2 = inlined_call_operand.vmem [shape: f32[288,49], index: 2, kind: input, shape index: {}]   ;;  %s11248_s4 = inlined_call_operand.vmem [shape: f32[320,49], index: 4, kind: input, shape index: {}]   ;;  %s11249_s5 = inlined_call_operand.vmem [shape: f32[32,49], index: 5, kind: input, shape index: {}]   ;;  %s11250_s6 = inlined_call_operand.vmem [shape: f32[1024,1], index: 6, kind: input, shape index: {}]   ;;  %s11251_s7 = inlined_call_operand.vmem [shape: f32[1024,1], index: 7, kind: input, shape index: {}]   ;;  %s11252_s8 = inlined_call_operand.vmem [shape: f32[1024,49], index: 8, kind: output, shape index: {}]  }
   0x1   :  { %v80_v0 = vld [vmem:[%s11244_s0 + $0x78] sm:$0xff]  ;;  %v79_v1 = vld [vmem:[%s11244_s0 + $0x70] sm:$0xff]  ;;  %v78_v2 = vld [vmem:[%s11244_s0 + $0x68] sm:$0xff]  ;;  %s5412_s21 = smov 127   ;;  %s5413_s22 = smov 48   ;;  %vm574_vm4 = vcmask 392192  }
   0x2   :  { %4843 = vmatprep.subr.mxu0 %v80_v0  ;;  %4929 = vmatprep.subr.mxu1 %v80_v0  ;;  %v77_v3 = vld [vmem:[%s11244_s0 + $0x60] sm:$0xff]  ;;  %v76_v4 = vld [vmem:[%s11244_s0 + $0x58] sm:$0xff]  ;;  %v75_v5 = vld [vmem:[%s11244_s0 + $0x50] sm:$0xff]  ;;  %s5414_s26 = smov 86   ;;  %s5415_s9 = smov 7   ;;  %vm537_vm5 = vcmask 7168  }
   0x3   :  { %4844 = vmatpush3.msra.mxu0 %v80_v0  ;;  %4945 = vmatpush3.msra.mxu1 %v80_v0  ;;  %v74_v6 = vld [vmem:[%s11244_s0 + $0x48] sm:$0xff]  ;;  %v73_v7 = vld [vmem:[%s11244_s0 + $0x40] sm:$0xff]  ;;  %v72_v8 = vld [vmem:[%s11244_s0 + $0x38] sm:$0xff]  ;;  %s5416_s17 = smov 122   ;;  %s5419_s27 = smov 6   ;;  %vm611_vm6 = vcmask 351232  }
   0x4   :  { %4845 = vmatprep.subr.mxu0 %v79_v1  ;;  %4930 = vmatprep.subr.mxu1 %v79_v1  ;;  %v71_v9 = vld [vmem:[%s11244_s0 + $0x30] sm:$0xff]  ;;  %v70_v10 = vld [vmem:[%s11244_s0 + $0x28] sm:$0xff]  ;;  %v69_v11 = vld [vmem:[%s11244_s0 + $0x20] sm:$0xff]  ;;  %s5421_s18 = smov 42   ;;  %s5422_s19 = smov 80   ;;  %vm648_vm7 = vcmask 343040  }
   0x5   :  { %4846 = vmatpush3.msra.mxu0 %v79_v1  ;;  %4946 = vmatpush3.msra.mxu1 %v79_v1  ;;  %v68_v12 = vld [vmem:[%s11244_s0 + $0x18] sm:$0xff]  ;;  %v67_v13 = vld [vmem:[%s11244_s0 + $0x10] sm:$0xff]  ;;  %v29_v14 = vld [vmem:[%s11245_s1] sm:$0xff]  ;;  %s5423_s23 = smov 1   ;;  %s5424_s10 = smov 120   ;;  %vm685_vm8 = vcmask 334848  }
   0x6   :  { %4847 = vmatprep.subr.mxu0 %v78_v2  ;;  %4931 = vmatprep.subr.mxu1 %v78_v2  ;;  %v66_v15 = vld [vmem:[%s11244_s0 + $0x8] sm:$0xff]  ;;  %v65_v16 = vld [vmem:[%s11244_s0] sm:$0xff]  ;;  %v31_v20 = vld [vmem:[%s11245_s1 + $0x10] sm:$0xff]  ;;  %s5418_s0 = smov 85  }
   0x7   :  { %4848 = vmatpush3.msra.mxu0 %v78_v2  ;;  %4947 = vmatpush3.msra.mxu1 %v78_v2  ;;  %v694_v17 = vld [vmem:[%s11246_s3] sm:$0xff]  ;;  %v30_v18 = vld [vmem:[%s11245_s1 + $0x8] sm:$0xff]  ;;  %v47_v21 = vld [vmem:[%s11245_s1 + $0x90] sm:$0xff] }
   0x8   :  { %4849 = vmatprep.subr.mxu0 %v77_v3  ;;  %4932 = vmatprep.subr.mxu1 %v77_v3  ;;  %v695_v19 = vld [vmem:[%s11246_s3 + $0x8] sm:$0xff]  ;;  %v48_v22 = vld [vmem:[%s11245_s1 + $0x98] sm:$0xff]  ;;  %v935_v23 = vsel %vm934_vm0, %v694_v17, 0.0  ;;  %v49_v24 = vld [vmem:[%s11245_s1 + $0xa0] sm:$0xff] }
   0x9   :  { %4850 = vmatpush3.msra.mxu0 %v77_v3  ;;  %4948 = vmatpush3.msra.mxu1 %v77_v3  ;;  %v696_v25 = vld [vmem:[%s11246_s3 + $0x10] sm:$0xff]  ;;  %v938_v26 = vsel %vm934_vm0, %v695_v19, 0.0  ;;  %v32_v27 = vld [vmem:[%s11245_s1 + $0x18] sm:$0xff]  ;;  %v698_v28 = vld [vmem:[%s11246_s3 + $0x20] sm:$0xff] }
   0xa   :  { %4851 = vmatprep.subr.mxu0 %v76_v4  ;;  %4933 = vmatprep.subr.mxu1 %v76_v4  ;;  %v33_v29 = vld [vmem:[%s11245_s1 + $0x20] sm:$0xff]  ;;  %v50_v30 = vld [vmem:[%s11245_s1 + $0xa8] sm:$0xff]  ;;  %v941_v31 = vsel %vm934_vm0, %v696_v25, 0.0  ;;  %v51_v32 = vld [vmem:[%s11245_s1 + $0xb0] sm:$0xff]  ;;  %v947_v34 = vsel %vm934_vm0, %v698_v28, 0.0 }
   0xb   :  { %4852 = vmatpush3.msra.mxu0 %v76_v4  ;;  %4949 = vmatpush3.msra.mxu1 %v76_v4  ;;  %v697_v33 = vld [vmem:[%s11246_s3 + $0x18] sm:$0xff]  ;;  %v34_v35 = vld [vmem:[%s11245_s1 + $0x28] sm:$0xff]  ;;  %v700_v36 = vld [vmem:[%s11246_s3 + $0x30] sm:$0xff] }
   0xc   :  { %4853 = vmatprep.subr.mxu0 %v75_v5  ;;  %4934 = vmatprep.subr.mxu1 %v75_v5  ;;  %v35_v37 = vld [vmem:[%s11245_s1 + $0x30] sm:$0xff]  ;;  %v52_v38 = vld [vmem:[%s11245_s1 + $0xb8] sm:$0xff]  ;;  %v944_v39 = vsel %vm934_vm0, %v697_v33, 0.0  ;;  %v53_v40 = vld [vmem:[%s11245_s1 + $0xc0] sm:$0xff]  ;;  %v953_v42 = vsel %vm934_vm0, %v700_v36, 0.0 }
   0xd   :  { %4854 = vmatpush3.msra.mxu0 %v75_v5  ;;  %4950 = vmatpush3.msra.mxu1 %v75_v5  ;;  %v699_v41 = vld [vmem:[%s11246_s3 + $0x28] sm:$0xff]  ;;  %v36_v43 = vld [vmem:[%s11245_s1 + $0x38] sm:$0xff]  ;;  %v702_v44 = vld [vmem:[%s11246_s3 + $0x40] sm:$0xff] }
   0xe   :  { %4855 = vmatprep.subr.mxu0 %v74_v6  ;;  %4935 = vmatprep.subr.mxu1 %v74_v6  ;;  %v37_v45 = vld [vmem:[%s11245_s1 + $0x40] sm:$0xff]  ;;  %v54_v46 = vld [vmem:[%s11245_s1 + $0xc8] sm:$0xff]  ;;  %v950_v47 = vsel %vm934_vm0, %v699_v41, 0.0  ;;  %v55_v48 = vld [vmem:[%s11245_s1 + $0xd0] sm:$0xff]  ;;  %v959_v50 = vsel %vm934_vm0, %v702_v44, 0.0 }
   0xf   :  { %4856 = vmatpush3.msra.mxu0 %v74_v6  ;;  %4951 = vmatpush3.msra.mxu1 %v74_v6  ;;  %v701_v49 = vld [vmem:[%s11246_s3 + $0x38] sm:$0xff]  ;;  %v38_v51 = vld [vmem:[%s11245_s1 + $0x48] sm:$0xff]  ;;  %v704_v52 = vld [vmem:[%s11246_s3 + $0x50] sm:$0xff] }
  0x10   :  { %4857 = vmatprep.subr.mxu0 %v73_v7  ;;  %4936 = vmatprep.subr.mxu1 %v73_v7  ;;  %v39_v53 = vld [vmem:[%s11245_s1 + $0x50] sm:$0xff]  ;;  %v56_v54 = vld [vmem:[%s11245_s1 + $0xd8] sm:$0xff]  ;;  %v956_v55 = vsel %vm934_vm0, %v701_v49, 0.0  ;;  %v57_v56 = vld [vmem:[%s11245_s1 + $0xe0] sm:$0xff]  ;;  %v965_v58 = vsel %vm934_vm0, %v704_v52, 0.0 }
  0x11   :  { %4858 = vmatpush3.msra.mxu0 %v73_v7  ;;  %4952 = vmatpush3.msra.mxu1 %v73_v7  ;;  %v703_v57 = vld [vmem:[%s11246_s3 + $0x48] sm:$0xff]  ;;  %v40_v59 = vld [vmem:[%s11245_s1 + $0x58] sm:$0xff]  ;;  %v706_v60 = vld [vmem:[%s11246_s3 + $0x60] sm:$0xff] }
  0x12   :  { %4859 = vmatprep.subr.mxu0 %v72_v8  ;;  %4937 = vmatprep.subr.mxu1 %v72_v8  ;;  %v41_v61 = vld [vmem:[%s11245_s1 + $0x60] sm:$0xff]  ;;  %v58_v62 = vld [vmem:[%s11245_s1 + $0xe8] sm:$0xff]  ;;  %v962_v63 = vsel %vm934_vm0, %v703_v57, 0.0  ;;  %v705_v0 = vld [vmem:[%s11246_s3 + $0x58] sm:$0xff]  ;;  %v971_v1 = vsel %vm934_vm0, %v706_v60, 0.0 }
  0x13   :  { %4860 = vmatpush3.msra.mxu0 %v72_v8  ;;  %4953 = vmatpush3.msra.mxu1 %v72_v8  ;;  %v59_v2 = vld [vmem:[%s11245_s1 + $0xf0] sm:$0xff]  ;;  %v42_v3 = vld [vmem:[%s11245_s1 + $0x68] sm:$0xff]  ;;  %v968_v6 = vsel %vm934_vm0, %v705_v0, 0.0  ;;  %v60_v7 = vld [vmem:[%s11245_s1 + $0xf8] sm:$0xff] }
  0x14   :  { %4861 = vmatprep.subr.mxu0 %v71_v9  ;;  %4938 = vmatprep.subr.mxu1 %v71_v9  ;;  %v708_v4 = vld [vmem:[%s11246_s3 + $0x70] sm:$0xff]  ;;  %v707_v8 = vld [vmem:[%s11246_s3 + $0x68] sm:$0xff]  ;;  %v714_v25 = vld [vmem:[%s11246_s3 + $0xa0] sm:$0xff] }
  0x15   :  { %4862 = vmatpush3.msra.mxu0 %v71_v9  ;;  %4954 = vmatpush3.msra.mxu1 %v71_v9  ;;  %v43_v5 = vld [vmem:[%s11245_s1 + $0x70] sm:$0xff]  ;;  %v977_v9 = vsel %vm934_vm0, %v708_v4, 0.0  ;;  %v995_v28 = vsel %vm934_vm0, %v714_v25, 0.0  ;;  %v718_v33 = vld [vmem:[%s11246_s3 + $0xc0] sm:$0xff] }
  0x16   :  { %4863 = vmatprep.subr.mxu0 %v70_v10  ;;  %4939 = vmatprep.subr.mxu1 %v70_v10  ;;  %v712_v19 = vld [vmem:[%s11246_s3 + $0x90] sm:$0xff]  ;;  %v1007_v36 = vsel %vm934_vm0, %v718_v33, 0.0  ;;  %v722_v41 = vld [vmem:[%s11246_s3 + $0xe0] sm:$0xff]  ;;  %v747_v33 = vld [vmem:[%s11246_s3 + $0x1a8] sm:$0xff] }
  0x17   :  { %4864 = vmatpush3.msra.mxu0 %v70_v10  ;;  %4955 = vmatpush3.msra.mxu1 %v70_v10  ;;  %v61_v10 = vld [vmem:[%s11245_s1 + $0x100] sm:$0xff]  ;;  %v1019_v44 = vsel %vm934_vm0, %v722_v41, 0.0 }
  0x18   :  { %4865 = vmatprep.subr.mxu0 %v69_v11  ;;  %4940 = vmatprep.subr.mxu1 %v69_v11  ;;  %v726_v49 = vld [vmem:[%s11246_s3 + $0x100] sm:$0xff] }
  0x19   :  { %4866 = vmatpush3.msra.mxu0 %v69_v11  ;;  %4956 = vmatpush3.msra.mxu1 %v69_v11  ;;  %v710_v11 = vld [vmem:[%s11246_s3 + $0x80] sm:$0xff]  ;;  %v1031_v52 = vsel %vm934_vm0, %v726_v49, 0.0 }
  0x1a   :  { %4867 = vmatprep.subr.mxu0 %v68_v12  ;;  %4941 = vmatprep.subr.mxu1 %v68_v12  ;;  %v983_v17 = vsel %vm934_vm0, %v710_v11, 0.0  ;;  %v730_v57 = vld [vmem:[%s11246_s3 + $0x120] sm:$0xff]  ;;  %v737_v11 = vld [vmem:[%s11246_s3 + $0x158] sm:$0xff] }
  0x1b   :  { %4868 = vmatpush3.msra.mxu0 %v68_v12  ;;  %4957 = vmatpush3.msra.mxu1 %v68_v12  ;;  %v44_v12 = vld [vmem:[%s11245_s1 + $0x78] sm:$0xff]  ;;  %v1043_v60 = vsel %vm934_vm0, %v730_v57, 0.0 }
  0x1c   :  { %4869 = vmatprep.subr.mxu0 %v67_v13  ;;  %4875 = vmatprep.mubr.f32.mxu0 %v29_v14  ;;  %v974_v14 = vsel %vm934_vm0, %v707_v8, 0.0  ;;  %v329_v57 = vld [vmem:[%s11247_s2 + $0x18] sm:$0xff] }
  0x1d   :  { %4870 = vmatpush3.msra.mxu0 %v67_v13  ;;  %4942 = vmatprep.subr.mxu1 %v67_v13 }
  0x1e   :  { %4871 = vmatprep.subr.mxu0 %v66_v15  ;;  %4958 = vmatpush3.msra.mxu1 %v67_v13  ;;  %v45_v13 = vld [vmem:[%s11245_s1 + $0x80] sm:$0xff] }
  0x1f   :  { %4872 = vmatpush3.msra.mxu0 %v66_v15  ;;  %4943 = vmatprep.subr.mxu1 %v66_v15 }
  0x20   :  { %4873 = vmatprep.subr.mxu0 %v65_v16  ;;  %4959 = vmatpush3.msra.mxu1 %v66_v15  ;;  %v62_v15 = vld [vmem:[%s11245_s1 + $0x108] sm:$0xff] }
  0x21   :  { %4874 = vmatpush3.msra.mxu0 %v65_v16  ;;  %4944 = vmatprep.subr.mxu1 %v65_v16 }
  0x22   :  { %4876 = vmatmul.mubr.f32.vlgmr.msra.gmra.mxu0 %v30_v18  ;;  %4960 = vmatpush3.msra.mxu1 %v65_v16  ;;  %v709_v16 = vld [vmem:[%s11246_s3 + $0x78] sm:$0xff]  ;;  %v63_v18 = vld [vmem:[%s11245_s1 + $0x110] sm:$0xff] }
  0x23   :  { %4878 = vmatprep.mubr.f32.mxu0 %v31_v20  ;;  %4902 = vmatprep.mubr.f32.mxu1 %v47_v21  ;;  %v46_v20 = vld [vmem:[%s11245_s1 + $0x88] sm:$0xff]  ;;  %v980_v21 = vsel %vm934_vm0, %v709_v16, 0.0 }
  0x24   :  { %4903 = vmatmul.mubr.f32.vlgmr.msra.gmra.mxu1 %v48_v22  ;;  %936 = vadd.xlane.f32.xlu0 %v935_v23  ;;  %v64_v22 = vld [vmem:[%s11245_s1 + $0x118] sm:$0xff]  ;;  %v5702_v23 = vld [vmem:[%s11246_s3 + $0x88] sm:$0xff] }
  0x25   :  { %4905 = vmatprep.mubr.f32.mxu1 %v49_v24  ;;  %939 = vadd.xlane.f32.xlu1 %v938_v26  ;;  %v989_v24 = vsel %vm934_vm0, %v712_v19, 0.0  ;;  %v986_v26 = vsel %vm934_vm0, %v5702_v23, 0.0  ;;  %v741_v19 = vld [vmem:[%s11246_s3 + $0x178] sm:$0xff] }
  0x26   :  { %4879 = vmatmul.mubr.f32.gmra.mxu0 %v32_v27  ;;  %v5713_v27 = vld [vmem:[%s11246_s3 + $0x98] sm:$0xff] }
  0x27   :  { %4881 = vmatprep.mubr.f32.mxu0 %v33_v29  ;;  %v716_v29 = vld [vmem:[%s11246_s3 + $0xb0] sm:$0xff] }
  0x28   :  { %4906 = vmatmul.mubr.f32.gmra.mxu1 %v50_v30  ;;  %942 = vadd.xlane.f32.xlu0 %v941_v31  ;;  %v992_v30 = vsel %vm934_vm0, %v5713_v27, 0.0  ;;  %v5724_v31 = vld [vmem:[%s11246_s3 + $0xa8] sm:$0xff] }
  0x29   :  { %4908 = vmatprep.mubr.f32.mxu1 %v51_v32  ;;  %948 = vadd.xlane.f32.xlu1 %v947_v34  ;;  %v1001_v32 = vsel %vm934_vm0, %v716_v29, 0.0  ;;  %v998_v34 = vsel %vm934_vm0, %v5724_v31, 0.0  ;;  %v745_v29 = vld [vmem:[%s11246_s3 + $0x198] sm:$0xff] }
  0x2a   :  { %4882 = vmatmul.mubr.f32.gmra.mxu0 %v34_v35  ;;  %v5735_v35 = vld [vmem:[%s11246_s3 + $0xb8] sm:$0xff] }
  0x2b   :  { %4884 = vmatprep.mubr.f32.mxu0 %v35_v37  ;;  %v720_v37 = vld [vmem:[%s11246_s3 + $0xd0] sm:$0xff] }
  0x2c   :  { %4909 = vmatmul.mubr.f32.gmra.mxu1 %v52_v38  ;;  %945 = vadd.xlane.f32.xlu0 %v944_v39  ;;  %v1004_v38 = vsel %vm934_vm0, %v5735_v35, 0.0  ;;  %v719_v39 = vld [vmem:[%s11246_s3 + $0xc8] sm:$0xff] }
  0x2d   :  { %4911 = vmatprep.mubr.f32.mxu1 %v53_v40  ;;  %954 = vadd.xlane.f32.xlu1 %v953_v42  ;;  %v1013_v40 = vsel %vm934_vm0, %v720_v37, 0.0  ;;  %v1010_v42 = vsel %vm934_vm0, %v719_v39, 0.0 }
  0x2e   :  { %4885 = vmatmul.mubr.f32.gmra.mxu0 %v36_v43  ;;  %v721_v43 = vld [vmem:[%s11246_s3 + $0xd8] sm:$0xff] }
  0x2f   :  { %4887 = vmatprep.mubr.f32.mxu0 %v37_v45  ;;  %v724_v45 = vld [vmem:[%s11246_s3 + $0xf0] sm:$0xff] }
  0x30   :  { %4912 = vmatmul.mubr.f32.gmra.mxu1 %v54_v46  ;;  %951 = vadd.xlane.f32.xlu0 %v950_v47  ;;  %v1016_v46 = vsel %vm934_vm0, %v721_v43, 0.0  ;;  %v723_v47 = vld [vmem:[%s11246_s3 + $0xe8] sm:$0xff] }
  0x31   :  { %4914 = vmatprep.mubr.f32.mxu1 %v55_v48  ;;  %960 = vadd.xlane.f32.xlu1 %v959_v50  ;;  %v1025_v48 = vsel %vm934_vm0, %v724_v45, 0.0  ;;  %v1022_v50 = vsel %vm934_vm0, %v723_v47, 0.0 }
  0x32   :  { %4888 = vmatmul.mubr.f32.gmra.mxu0 %v38_v51  ;;  %v725_v51 = vld [vmem:[%s11246_s3 + $0xf8] sm:$0xff] }
  0x33   :  { %4890 = vmatprep.mubr.f32.mxu0 %v39_v53  ;;  %v728_v53 = vld [vmem:[%s11246_s3 + $0x110] sm:$0xff] }
  0x34   :  { %4915 = vmatmul.mubr.f32.gmra.mxu1 %v56_v54  ;;  %957 = vadd.xlane.f32.xlu0 %v956_v55  ;;  %v1028_v54 = vsel %vm934_vm0, %v725_v51, 0.0  ;;  %v727_v55 = vld [vmem:[%s11246_s3 + $0x108] sm:$0xff] }
  0x35   :  { %4917 = vmatprep.mubr.f32.mxu1 %v57_v56  ;;  %966 = vadd.xlane.f32.xlu1 %v965_v58  ;;  %v1037_v56 = vsel %vm934_vm0, %v728_v53, 0.0  ;;  %v1034_v58 = vsel %vm934_vm0, %v727_v55, 0.0 }
  0x36   :  { %4891 = vmatmul.mubr.f32.gmra.mxu0 %v40_v59  ;;  %v729_v59 = vld [vmem:[%s11246_s3 + $0x118] sm:$0xff] }
  0x37   :  { %4893 = vmatprep.mubr.f32.mxu0 %v41_v61  ;;  %v732_v61 = vld [vmem:[%s11246_s3 + $0x130] sm:$0xff] }
  0x38   :  { %4918 = vmatmul.mubr.f32.gmra.mxu1 %v58_v62  ;;  %963 = vadd.xlane.f32.xlu0 %v962_v63  ;;  %v1040_v62 = vsel %vm934_vm0, %v729_v59, 0.0  ;;  %v731_v63 = vld [vmem:[%s11246_s3 + $0x128] sm:$0xff]  ;;  %v1049_v0 = vsel %vm934_vm0, %v732_v61, 0.0 }
  0x39   :  { %972 = vadd.xlane.f32.xlu1 %v971_v1  ;;  %4920 = vmatprep.mubr.f32.mxu1 %v59_v2  ;;  %v734_v1 = vld [vmem:[%s11246_s3 + $0x140] sm:$0xff]  ;;  %v1046_v2 = vsel %vm934_vm0, %v731_v63, 0.0 }
  0x3a   :  { %4894 = vmatmul.mubr.f32.gmra.mxu0 %v42_v3  ;;  %v733_v3 = vld [vmem:[%s11246_s3 + $0x138] sm:$0xff]  ;;  %v1055_v4 = vsel %vm934_vm0, %v734_v1, 0.0  ;;  %v347_v1 = vld [vmem:[%s11247_s2 + $0xa8] sm:$0xff] }
  0x3b   :  { %4896 = vmatprep.mubr.f32.mxu0 %v43_v5  ;;  %v736_v5 = vld [vmem:[%s11246_s3 + $0x150] sm:$0xff] }
  0x3c   :  { %969 = vadd.xlane.f32.xlu0 %v968_v6  ;;  %4921 = vmatmul.mubr.f32.gmra.mxu1 %v60_v7  ;;  %v1052_v6 = vsel %vm934_vm0, %v733_v3, 0.0  ;;  %v735_v7 = vld [vmem:[%s11246_s3 + $0x148] sm:$0xff]  ;;  %v1061_v8 = vsel %vm934_vm0, %v736_v5, 0.0  ;;  %v328_v5 = vld [vmem:[%s11247_s2 + $0x10] sm:$0xff] }
  0x3d   :  { %978 = vadd.xlane.f32.xlu1 %v977_v9  ;;  %4923 = vmatprep.mubr.f32.mxu1 %v61_v10  ;;  %v738_v9 = vld [vmem:[%s11246_s3 + $0x160] sm:$0xff]  ;;  %v1058_v10 = vsel %vm934_vm0, %v735_v7, 0.0 }
  0x3e   :  { %4897 = vmatmul.mubr.f32.gmra.mxu0 %v44_v12  ;;  %v1067_v12 = vsel %vm934_vm0, %v738_v9, 0.0 }
  0x3f   :  { %4899 = vmatprep.mubr.f32.mxu0 %v45_v13  ;;  %v740_v13 = vld [vmem:[%s11246_s3 + $0x170] sm:$0xff] }
  0x40   :  { %975 = vadd.xlane.f32.xlu0 %v974_v14  ;;  %4924 = vmatmul.mubr.f32.gmra.mxu1 %v62_v15  ;;  %v1064_v14 = vsel %vm934_vm0, %v737_v11, 0.0  ;;  %v739_v15 = vld [vmem:[%s11246_s3 + $0x168] sm:$0xff]  ;;  %v1073_v16 = vsel %vm934_vm0, %v740_v13, 0.0 }
  0x41   :  { %984 = vadd.xlane.f32.xlu1 %v983_v17  ;;  %4926 = vmatprep.mubr.f32.mxu1 %v63_v18  ;;  %v742_v17 = vld [vmem:[%s11246_s3 + $0x180] sm:$0xff]  ;;  %v1070_v18 = vsel %vm934_vm0, %v739_v15, 0.0  ;;  %v331_v15 = vld [vmem:[%s11247_s2 + $0x28] sm:$0xff] }
  0x42   :  { %4900 = vmatmul.mubr.f32.gmra.mxu0 %v46_v20  ;;  %v1079_v20 = vsel %vm934_vm0, %v742_v17, 0.0  ;;  %v330_v17 = vld [vmem:[%s11247_s2 + $0x20] sm:$0xff] }
  0x44   :  { %981 = vadd.xlane.f32.xlu0 %v980_v21  ;;  %4927 = vmatmul.mubr.f32.gmra.mxu1 %v64_v22  ;;  %v744_v21 = vld [vmem:[%s11246_s3 + $0x190] sm:$0xff]  ;;  %v1076_v22 = vsel %vm934_vm0, %v741_v19, 0.0 }
  0x45   :  { %990 = vadd.xlane.f32.xlu1 %v989_v24  ;;  %v743_v24 = vld [vmem:[%s11246_s3 + $0x188] sm:$0xff]  ;;  %v1085_v25 = vsel %vm934_vm0, %v744_v21, 0.0 }
  0x48   :  { %987 = vadd.xlane.f32.xlu0 %v986_v26  ;;  %v746_v26 = vld [vmem:[%s11246_s3 + $0x1a0] sm:$0xff] }
  0x49   :  { %996 = vadd.xlane.f32.xlu1 %v995_v28  ;;  %v1082_v28 = vsel %vm934_vm0, %v743_v24, 0.0 }
  0x4c   :  { %993 = vadd.xlane.f32.xlu0 %v992_v30  ;;  %v1091_v30 = vsel %vm934_vm0, %v746_v26, 0.0  ;;  %v349_v26 = vld [vmem:[%s11247_s2 + $0xb8] sm:$0xff] }
  0x4d   :  { %1002 = vadd.xlane.f32.xlu1 %v1001_v32  ;;  %v1088_v32 = vsel %vm934_vm0, %v745_v29, 0.0  ;;  %v348_v29 = vld [vmem:[%s11247_s2 + $0xb0] sm:$0xff] }
  0x50   :  { %999 = vadd.xlane.f32.xlu0 %v998_v34  ;;  %v1094_v34 = vsel %vm934_vm0, %v747_v33, 0.0 }
  0x51   :  { %1008 = vadd.xlane.f32.xlu1 %v1007_v36 }
  0x54   :  { %1005 = vadd.xlane.f32.xlu0 %v1004_v38 }
  0x55   :  { %1014 = vadd.xlane.f32.xlu1 %v1013_v40 }
  0x58   :  { %1011 = vadd.xlane.f32.xlu0 %v1010_v42 }
  0x59   :  { %1020 = vadd.xlane.f32.xlu1 %v1019_v44 }
  0x5c   :  { %1017 = vadd.xlane.f32.xlu0 %v1016_v46 }
  0x5d   :  { %1026 = vadd.xlane.f32.xlu1 %v1025_v48 }
  0x60   :  { %1023 = vadd.xlane.f32.xlu0 %v1022_v50 }
  0x61   :  { %1032 = vadd.xlane.f32.xlu1 %v1031_v52  ;;  %v327_v52 = vld [vmem:[%s11247_s2 + $0x8] sm:$0xff] }
  0x64   :  { %1029 = vadd.xlane.f32.xlu0 %v1028_v54 }
  0x65   :  { %1038 = vadd.xlane.f32.xlu1 %v1037_v56  ;;  %v326_v56 = vld [vmem:[%s11247_s2] sm:$0xff] }
  0x68   :  { %1035 = vadd.xlane.f32.xlu0 %v1034_v58 }
  0x69   :  { %1044 = vadd.xlane.f32.xlu1 %v1043_v60 }
  0x6c   :  { %1041 = vadd.xlane.f32.xlu0 %v1040_v62 }
  0x6d   :  { %1050 = vadd.xlane.f32.xlu1 %v1049_v0 }
  0x70   :  { %1047 = vadd.xlane.f32.xlu0 %v1046_v2 }
  0x71   :  { %1056 = vadd.xlane.f32.xlu1 %v1055_v4 }
  0x74   :  { %1053 = vadd.xlane.f32.xlu0 %v1052_v6 }
  0x75   :  { %1062 = vadd.xlane.f32.xlu1 %v1061_v8 }
  0x78   :  { %1059 = vadd.xlane.f32.xlu0 %v1058_v10  ;;  %v346_v10 = vld [vmem:[%s11247_s2 + $0xa0] sm:$0xff] }
  0x79   :  { %1068 = vadd.xlane.f32.xlu1 %v1067_v12 }
  0x7c   :  { %1065 = vadd.xlane.f32.xlu0 %v1064_v14 }
  0x7d   :  { %1074 = vadd.xlane.f32.xlu1 %v1073_v16 }
  0x80   :  { %1071 = vadd.xlane.f32.xlu0 %v1070_v18 }
  0x81   :  { %1080 = vadd.xlane.f32.xlu1 %v1079_v20 }
  0x84   :  { %1077 = vadd.xlane.f32.xlu0 %v1076_v22 }
  0x85   :  { %1086 = vadd.xlane.f32.xlu1 %v1085_v25 }
  0x88   :  { %1083 = vadd.xlane.f32.xlu0 %v1082_v28 }
  0x89   :  { %1092 = vadd.xlane.f32.xlu1 %v1091_v30 }
  0x8c   :  { %1089 = vadd.xlane.f32.xlu0 %v1088_v32 }
  0x90   :  { %1095 = vadd.xlane.f32.xlu0 %v1094_v34 }
  0xad   :  { %v5856_v36 = vpop.xlane.xlu0 %936 }
  0xae   :  { %11402 = vst [vmem:[#allocation2_spill] sm:$0xff] %v5856_v36  ;;  %v5860_v38 = vpop.xlane.xlu1 %939  ;;  %v6297_v36 = vld [vmem:[%s11246_s3 + $0x250] sm:$0xff] }
  0xaf   :  { %11404 = vst [vmem:[#allocation4_spill] sm:$0xff] %v5860_v38  ;;  %v6279_v38 = vld [vmem:[%s11246_s3 + $0x240] sm:$0xff] }
  0xb1   :  { %v5858_v37 = vpop.xlane.xlu0 %942 }
  0xb2   :  { %11403 = vst [vmem:[#allocation3_spill] sm:$0xff] %v5858_v37  ;;  %v5864_v40 = vpop.xlane.xlu1 %948  ;;  %v6292_v37 = vld [vmem:[%s11246_s3 + $0x268] sm:$0xff] }
  0xb3   :  { %11406 = vst [vmem:[#allocation6_spill] sm:$0xff] %v5864_v40 }
  0xb5   :  { %v5862_v39 = vpop.xlane.xlu0 %945 }
  0xb6   :  { %11405 = vst [vmem:[#allocation5_spill] sm:$0xff] %v5862_v39  ;;  %v5868_v42 = vpop.xlane.xlu1 %954  ;;  %v1151_v39 = vsel %vm934_vm0, %v6279_v38, 0.0 }
  0xb7   :  { %11408 = vst [vmem:[#allocation8_spill] sm:$0xff] %v5868_v42 }
  0xb9   :  { %v5866_v41 = vpop.xlane.xlu0 %951 }
  0xba   :  { %11407 = vst [vmem:[#allocation7_spill] sm:$0xff] %v5866_v41  ;;  %v5872_v44 = vpop.xlane.xlu1 %960  ;;  %v6274_v41 = vld [vmem:[%s11246_s3 + $0x258] sm:$0xff] }
  0xbb   :  { %11410 = vst [vmem:[#allocation10_spill] sm:$0xff] %v5872_v44 }
  0xbd   :  { %v5870_v43 = vpop.xlane.xlu0 %957 }
  0xbe   :  { %11409 = vst [vmem:[#allocation9_spill] sm:$0xff] %v5870_v43  ;;  %v5876_v46 = vpop.xlane.xlu1 %966  ;;  %v6258_v43 = vld [vmem:[%s11246_s3 + $0x248] sm:$0xff] }
  0xbf   :  { %11412 = vst [vmem:[#allocation12_spill] sm:$0xff] %v5876_v46 }
  0xc1   :  { %v5874_v45 = vpop.xlane.xlu0 %963 }
  0xc2   :  { %11411 = vst [vmem:[#allocation11_spill] sm:$0xff] %v5874_v45  ;;  %v5880_v48 = vpop.xlane.xlu1 %972 }
  0xc3   :  { %11414 = vst [vmem:[#allocation14_spill] sm:$0xff] %v5880_v48  ;;  %v6247_v48 = vld [vmem:[%s11246_s3 + $0x220] sm:$0xff] }
  0xc4   :  { %v1139_v44 = vsel %vm934_vm0, %v6247_v48, 0.0 }
  0xc5   :  { %v5878_v47 = vpop.xlane.xlu0 %969 }
  0xc6   :  { %11413 = vst [vmem:[#allocation13_spill] sm:$0xff] %v5878_v47  ;;  %v5884_v50 = vpop.xlane.xlu1 %978  ;;  %v6229_v47 = vld [vmem:[%s11246_s3 + $0x210] sm:$0xff] }
  0xc7   :  { %11416 = vst [vmem:[#allocation16_spill] sm:$0xff] %v5884_v50  ;;  %v1133_v45 = vsel %vm934_vm0, %v6229_v47, 0.0  ;;  %v6242_v50 = vld [vmem:[%s11246_s3 + $0x238] sm:$0xff] }
  0xc9   :  { %v5882_v49 = vpop.xlane.xlu0 %975 }
  0xca   :  { %11415 = vst [vmem:[#allocation15_spill] sm:$0xff] %v5882_v49  ;;  %v5900_v59 = vpop.xlane.xlu1 %984 }
  0xcb   :  { %11418 = vst [vmem:[#allocation18_spill] sm:$0xff] %v5900_v59 }
  0xcd   :  { %v5886_v51 = vpop.xlane.xlu0 %981 }
  0xce   :  { %11417 = vst [vmem:[#allocation17_spill] sm:$0xff] %v5886_v51  ;;  %v5911_v2 = vpop.xlane.xlu1 %990  ;;  %v6208_v51 = vld [vmem:[%s11246_s3 + $0x218] sm:$0xff] }
  0xcf   :  { %11420 = vst [vmem:[#allocation20_spill] sm:$0xff] %v5911_v2  ;;  %v6224_v2 = vld [vmem:[%s11246_s3 + $0x228] sm:$0xff] }
  0xd1   :  { %v5902_v60 = vpop.xlane.xlu0 %987 }
  0xd2   :  { %11419 = vst [vmem:[#allocation19_spill] sm:$0xff] %v5902_v60  ;;  %v5922_v11 = vpop.xlane.xlu1 %996  ;;  %v6197_v60 = vld [vmem:[%s11246_s3 + $0x1f0] sm:$0xff] }
  0xd3   :  { %11422 = vst [vmem:[#allocation22_spill] sm:$0xff] %v5922_v11 }
  0xd5   :  { %v5913_v3 = vpop.xlane.xlu0 %993 }
  0xd6   :  { %11421 = vst [vmem:[#allocation21_spill] sm:$0xff] %v5913_v3  ;;  %v5934_v18 = vpop.xlane.xlu1 %1002 }
  0xd7   :  { %11424 = vst [vmem:[#allocation24_spill] sm:$0xff] %v5934_v18  ;;  %v1121_v18 = vsel %vm934_vm0, %v6197_v60, 0.0 }
  0xd9   :  { %v5924_v12 = vpop.xlane.xlu0 %999 }
  0xda   :  { %11423 = vst [vmem:[#allocation23_spill] sm:$0xff] %v5924_v12  ;;  %v5940_v24 = vpop.xlane.xlu1 %1008 }
  0xdb   :  { %11426 = vst [vmem:[#allocation26_spill] sm:$0xff] %v5940_v24  ;;  %v6192_v24 = vld [vmem:[%s11246_s3 + $0x208] sm:$0xff] }
  0xdd   :  { %v5936_v19 = vpop.xlane.xlu0 %1005 }
  0xde   :  { %11425 = vst [vmem:[#allocation25_spill] sm:$0xff] %v5936_v19  ;;  %v5950_v34 = vpop.xlane.xlu1 %1014 }
  0xdf   :  { %11428 = vst [vmem:[#allocation28_spill] sm:$0xff] %v5950_v34  ;;  %v6179_v34 = vld [vmem:[%s11246_s3 + $0x1e0] sm:$0xff] }
  0xe0   :  { %v1115_v3 = vsel %vm934_vm0, %v6179_v34, 0.0 }
  0xe1   :  { %v5942_v25 = vpop.xlane.xlu0 %1011 }
  0xe2   :  { %v4877_v53 = vpop.f32.mrf.mxu0  ;;  %11427 = vst [vmem:[#allocation27_spill] sm:$0xff] %v5942_v25  ;;  %v6158_v25 = vld [vmem:[%s11246_s3 + $0x1e8] sm:$0xff] }
  0xe3   :  { %v363_v54 = vmul.f32 %v4877_v53, %v327_v52  ;;  %v333_v53 = vld [vmem:[%s11247_s2 + $0x38] sm:$0xff] }
  0xe4   :  { %v147_v55 = vpop.f32.mrf.mxu0  ;;  %v5897_v58 = vpop.f32.mrf.mxu1 }
  0xe5   :  { %416 = vrot.lane.b32.xlu1 %v363_v54, %s5410_s13  ;;  %404 = vrot.lane.b32.xlu0 %v363_v54, %s5411_s14  ;;  %v362_v62 = vmul.f32 %v326_v56, %v147_v55  ;;  %v5952_v52 = vpop.xlane.xlu0 %1017  ;;  %v332_v55 = vld [vmem:[%s11247_s2 + $0x30] sm:$0xff] }
  0xe6   :  { %v4880_v61 = vpop.f32.mrf.mxu0  ;;  %v5904_v0 = vpop.f32.mrf.mxu1  ;;  %11429 = vst [vmem:[#allocation29_spill] sm:$0xff] %v5952_v52 }
  0xe7   :  { %v365_v63 = vmul.f32 %v4880_v61, %v329_v57  ;;  %v5964_v61 = vpop.xlane.xlu1 %1020 }
  0xe8   :  { %v157_v4 = vpop.f32.mrf.mxu0  ;;  %v4907_v6 = vpop.f32.mrf.mxu1  ;;  %11430 = vst [vmem:[#allocation30_spill] sm:$0xff] %v5964_v61  ;;  %v6174_v61 = vld [vmem:[%s11246_s3 + $0x1f8] sm:$0xff] }
  0xe9   :  { %402 = vrot.lane.b32.xlu0 %v362_v62, %s5411_s14  ;;  %408 = vrot.lane.b32.xlu1 %v365_v63, %s5411_s14  ;;  %v383_v7 = vmul.f32 %v4907_v6, %v347_v1  ;;  %v364_v8 = vmul.f32 %v328_v5, %v157_v4  ;;  %v351_v1 = vld [vmem:[%s11247_s2 + $0xc8] sm:$0xff]  ;;  %v350_v5 = vld [vmem:[%s11247_s2 + $0xc0] sm:$0xff] }
  0xea   :  { %v247_v9 = vpop.f32.mrf.mxu1  ;;  %v4883_v13 = vpop.f32.mrf.mxu0 }
  0xeb   :  { %v382_v14 = vmul.f32 %v346_v10, %v247_v9  ;;  %v367_v20 = vmul.f32 %v4883_v13, %v331_v15  ;;  %v5974_v6 = vpop.xlane.xlu1 %1026  ;;  %v335_v15 = vld [vmem:[%s11247_s2 + $0x48] sm:$0xff] }
  0xec   :  { %v167_v16 = vpop.f32.mrf.mxu0  ;;  %v4910_v22 = vpop.f32.mrf.mxu1  ;;  %11432 = vst [vmem:[#allocation32_spill] sm:$0xff] %v5974_v6 }
  0xed   :  { %414 = vrot.lane.b32.xlu0 %v362_v62, %s5410_s13  ;;  %420 = vrot.lane.b32.xlu1 %v365_v63, %s5410_s13  ;;  %v366_v21 = vmul.f32 %v330_v17, %v167_v16  ;;  %v385_v30 = vmul.f32 %v4910_v22, %v349_v26  ;;  %v5966_v62 = vpop.xlane.xlu0 %1023  ;;  %v334_v17 = vld [vmem:[%s11247_s2 + $0x40] sm:$0xff] }
  0xee   :  { %v257_v28 = vpop.f32.mrf.mxu1  ;;  %v4886_v33 = vpop.f32.mrf.mxu0  ;;  %11431 = vst [vmem:[#allocation31_spill] sm:$0xff] %v5966_v62  ;;  %v6147_v62 = vld [vmem:[%s11246_s3 + $0x1c0] sm:$0xff] }
  0xef   :  { %v384_v32 = vmul.f32 %v348_v29, %v257_v28  ;;  %v369_v56 = vmul.f32 %v4886_v33, %v333_v53  ;;  %v5980_v13 = vpop.xlane.xlu1 %1032  ;;  %v353_v29 = vld [vmem:[%s11247_s2 + $0xd8] sm:$0xff] }
  0xf0   :  { %v177_v54 = vpop.f32.mrf.mxu0  ;;  %v4913_v63 = vpop.f32.mrf.mxu1  ;;  %11434 = vst [vmem:[#allocation34_spill] sm:$0xff] %v5980_v13  ;;  %v1103_v13 = vsel %vm934_vm0, %v6147_v62, 0.0 }
  0xf1   :  { %552 = vrot.lane.b32.xlu1 %v383_v7, %s5412_s21  ;;  %418 = vrot.lane.b32.xlu0 %v364_v8, %s5410_s13  ;;  %v368_v57 = vmul.f32 %v332_v55, %v177_v54  ;;  %s5420_s13 = smov 121  }
  0xf2   :  { %v267_v4 = vpop.f32.mrf.mxu1  ;;  %v4889_v10 = vpop.f32.mrf.mxu0 }
  0xf3   :  { %v386_v9 = vmul.f32 %v350_v5, %v267_v4  ;;  %v5990_v26 = vpop.xlane.xlu1 %1038 }
  0xf4   :  { %v187_v16 = vpop.f32.mrf.mxu0  ;;  %v4916_v22 = vpop.f32.mrf.mxu1  ;;  %11436 = vst [vmem:[#allocation36_spill] sm:$0xff] %v5990_v26  ;;  %v6142_v26 = vld [vmem:[%s11246_s3 + $0x1d8] sm:$0xff] }
  0xf5   :  { %564 = vrot.lane.b32.xlu1 %v383_v7, %s5413_s22  ;;  %550 = vrot.lane.b32.xlu0 %v382_v14, %s5412_s21  ;;  %v5976_v7 = vpop.xlane.xlu0 %1029  ;;  %v389_v33 = vmul.f32 %v4916_v22, %v353_v29 }
  0xf6   :  { %11433 = vst [vmem:[#allocation33_spill] sm:$0xff] %v5976_v7 }
  0xf7   :  { %v6000_v54 = vpop.xlane.xlu1 %1044 }
  0xf8   :  { %11438 = vst [vmem:[#allocation38_spill] sm:$0xff] %v6000_v54 }
  0xf9   :  { %562 = vrot.lane.b32.xlu0 %v382_v14, %s5413_s22  ;;  %406 = vrot.lane.b32.xlu1 %v364_v8, %s5411_s14  ;;  %v387_v8 = vmul.f32 %v4913_v63, %v351_v1  ;;  %v5982_v14 = vpop.xlane.xlu0 %1035  ;;  %v336_v1 = vld [vmem:[%s11247_s2 + $0x50] sm:$0xff]  ;;  %s5425_s14 = smov 41  }
  0xfa   :  { %11435 = vst [vmem:[#allocation35_spill] sm:$0xff] %v5982_v14 }
  0xfb   :  { %v6012_v4 = vpop.xlane.xlu1 %1050 }
  0xfc   :  { %11440 = vst [vmem:[#allocation40_spill] sm:$0xff] %v6012_v4 }
  0xfd   :  { %441 = vrot.lane.b32.xlu1 %v367_v20, %s5414_s26  ;;  %439 = vrot.lane.b32.xlu0 %v366_v21, %s5414_s26  ;;  %v5992_v28 = vpop.xlane.xlu0 %1041 }
  0xfe   :  { %11437 = vst [vmem:[#allocation37_spill] sm:$0xff] %v5992_v28  ;;  %v6124_v28 = vld [vmem:[%s11246_s3 + $0x1c8] sm:$0xff] }
  0xff   :  { %v1106_v7 = vsel %vm934_vm0, %v6124_v28, 0.0 }
 0x101   :  { %453 = vrot.lane.b32.xlu1 %v367_v20, %s5415_s9  ;;  %451 = vrot.lane.b32.xlu0 %v366_v21, %s5415_s9  ;;  %v371_v20 = vmul.f32 %v4889_v10, %v335_v15  ;;  %v370_v21 = vmul.f32 %v334_v17, %v187_v16  ;;  %v6002_v55 = vpop.xlane.xlu0 %1047  ;;  %v6016_v15 = vpop.xlane.xlu1 %1056  ;;  %v355_v17 = vld [vmem:[%s11247_s2 + $0xe8] sm:$0xff] }
 0x102   :  { %11439 = vst [vmem:[#allocation39_spill] sm:$0xff] %v6002_v55  ;;  %11442 = vst [vmem:[#allocation42_spill] sm:$0xff] %v6016_v15  ;;  %v6129_v15 = vld [vmem:[%s11246_s3 + $0x1b0] sm:$0xff] }
 0x103   :  { %v1097_v54 = vsel %vm934_vm0, %v6129_v15, 0.0 }
 0x105   :  { %556 = vrot.lane.b32.xlu1 %v385_v30, %s5412_s21  ;;  %554 = vrot.lane.b32.xlu0 %v384_v32, %s5412_s21  ;;  %v6014_v5 = vpop.xlane.xlu0 %1053 }
 0x106   :  { %11441 = vst [vmem:[#allocation41_spill] sm:$0xff] %v6014_v5 }
 0x109   :  { %568 = vrot.lane.b32.xlu1 %v385_v30, %s5413_s22  ;;  %566 = vrot.lane.b32.xlu0 %v384_v32, %s5413_s22  ;;  %s5417_s22 = smov 43   ;;  %v277_v30 = vpop.f32.mrf.mxu1  ;;  %v352_v32 = vld [vmem:[%s11247_s2 + $0xd0] sm:$0xff]  ;;  %v6018_v16 = vpop.xlane.xlu0 %1059 }
 0x10a   :  { %v388_v53 = vmul.f32 %v352_v32, %v277_v30  ;;  %11443 = vst [vmem:[#allocation43_spill] sm:$0xff] %v6018_v16  ;;  %v6026_v32 = vpop.xlane.xlu1 %1062 }
 0x10b   :  { %v4919_v10 = vpop.f32.mrf.mxu1  ;;  %11444 = vst [vmem:[#allocation44_spill] sm:$0xff] %v6026_v32 }
 0x10c   :  { %v391_v22 = vmul.f32 %v4919_v10, %v355_v17  ;;  %v357_v17 = vld [vmem:[%s11247_s2 + $0xf8] sm:$0xff] }
 0x10d   :  { %445 = vrot.lane.b32.xlu1 %v369_v56, %s5414_s26  ;;  %443 = vrot.lane.b32.xlu0 %v368_v57, %s5414_s26 }
 0x111   :  { %457 = vrot.lane.b32.xlu1 %v369_v56, %s5415_s9  ;;  %455 = vrot.lane.b32.xlu0 %v368_v57, %s5415_s9  ;;  %v4892_v56 = vpop.f32.mrf.mxu0  ;;  %v337_v57 = vld [vmem:[%s11247_s2 + $0x58] sm:$0xff] }
 0x113   :  { %v197_v63 = vpop.f32.mrf.mxu0 }
 0x115   :  { %589 = vrot.lane.b32.xlu1 %v387_v8, %s5416_s17  ;;  %587 = vrot.lane.b32.xlu0 %v386_v9, %s5416_s17  ;;  %v4895_v30 = vpop.f32.mrf.mxu0 }
 0x119   :  { %601 = vrot.lane.b32.xlu1 %v387_v8, %s5417_s22  ;;  %599 = vrot.lane.b32.xlu0 %v386_v9, %s5417_s22  ;;  %v373_v8 = vmul.f32 %v4892_v56, %v337_v57  ;;  %v372_v9 = vmul.f32 %v336_v1, %v197_v63  ;;  %v207_v56 = vpop.f32.mrf.mxu0  ;;  %v338_v57 = vld [vmem:[%s11247_s2 + $0x60] sm:$0xff] }
 0x11a   :  { %v374_v1 = vmul.f32 %v338_v57, %v207_v56 }
 0x11b   :  { %v4898_v56 = vpop.f32.mrf.mxu0 }
 0x11d   :  { %478 = vrot.lane.b32.xlu1 %v371_v20, %s5418_s0  ;;  %476 = vrot.lane.b32.xlu0 %v370_v21, %s5418_s0  ;;  %v217_v16 = vpop.f32.mrf.mxu0 }
 0x121   :  { %490 = vrot.lane.b32.xlu1 %v371_v20, %s5419_s27  ;;  %488 = vrot.lane.b32.xlu0 %v370_v21, %s5419_s27  ;;  %v287_v20 = vpop.f32.mrf.mxu1  ;;  %v354_v21 = vld [vmem:[%s11247_s2 + $0xe0] sm:$0xff] }
 0x122   :  { %v390_v29 = vmul.f32 %v354_v21, %v287_v20  ;;  %v356_v21 = vld [vmem:[%s11247_s2 + $0xf0] sm:$0xff] }
 0x123   :  { %v4922_v10 = vpop.f32.mrf.mxu1 }
 0x125   :  { %593 = vrot.lane.b32.xlu1 %v389_v33, %s5416_s17  ;;  %591 = vrot.lane.b32.xlu0 %v388_v53, %s5416_s17  ;;  %v297_v20 = vpop.f32.mrf.mxu1 }
 0x129   :  { %605 = vrot.lane.b32.xlu1 %v389_v33, %s5417_s22  ;;  %603 = vrot.lane.b32.xlu0 %v388_v53, %s5417_s22  ;;  %v6028_v33 = vpop.xlane.xlu0 %1065  ;;  %v339_v53 = vld [vmem:[%s11247_s2 + $0x68] sm:$0xff] }
 0x12a   :  { %11445 = vst [vmem:[#allocation45_spill] sm:$0xff] %v6028_v33  ;;  %v375_v63 = vmul.f32 %v4895_v30, %v339_v53  ;;  %v393_v30 = vmul.f32 %v4922_v10, %v357_v17  ;;  %v392_v53 = vmul.f32 %v356_v21, %v297_v20  ;;  %v341_v33 = vld [vmem:[%s11247_s2 + $0x78] sm:$0xff]  ;;  %v340_v10 = vld [vmem:[%s11247_s2 + $0x70] sm:$0xff] }
 0x12b   :  { %v377_v17 = vmul.f32 %v4898_v56, %v341_v33 }
 0x12d   :  { %482 = vrot.lane.b32.xlu1 %v373_v8, %s5418_s0  ;;  %480 = vrot.lane.b32.xlu0 %v372_v9, %s5418_s0 }
 0x131   :  { %494 = vrot.lane.b32.xlu1 %v373_v8, %s5419_s27  ;;  %492 = vrot.lane.b32.xlu0 %v372_v9, %s5419_s27  ;;  %v6036_v8 = vpop.xlane.xlu1 %1068  ;;  %v6038_v9 = vpop.xlane.xlu0 %1071 }
 0x132   :  { %11446 = vst [vmem:[#allocation46_spill] sm:$0xff] %v6036_v8  ;;  %11447 = vst [vmem:[#allocation47_spill] sm:$0xff] %v6038_v9 }
 0x135   :  { %626 = vrot.lane.b32.xlu1 %v391_v22, %s5420_s13  ;;  %624 = vrot.lane.b32.xlu0 %v390_v29, %s5420_s13 }
 0x139   :  { %638 = vrot.lane.b32.xlu1 %v391_v22, %s5421_s18  ;;  %636 = vrot.lane.b32.xlu0 %v390_v29, %s5421_s18  ;;  %v6046_v22 = vpop.xlane.xlu1 %1074  ;;  %v6048_v29 = vpop.xlane.xlu0 %1077 }
 0x13a   :  { %11448 = vst [vmem:[#allocation48_spill] sm:$0xff] %v6046_v22  ;;  %11449 = vst [vmem:[#allocation49_spill] sm:$0xff] %v6048_v29 }
 0x13d   :  { %515 = vrot.lane.b32.xlu1 %v375_v63, %s5422_s19  ;;  %513 = vrot.lane.b32.xlu0 %v374_v1, %s5422_s19  ;;  %v6050_v57 = vpop.xlane.xlu1 %1080  ;;  %v6052_v9 = vpop.xlane.xlu0 %1083 }
 0x13e   :  { %11450 = vst [vmem:[#allocation50_spill] sm:$0xff] %v6050_v57  ;;  %11451 = vst [vmem:[#allocation51_spill] sm:$0xff] %v6052_v9  ;;  %v359_v9 = vld [vmem:[%s11247_s2 + $0x108] sm:$0xff]  ;;  %v358_v57 = vld [vmem:[%s11247_s2 + $0x100] sm:$0xff] }
 0x141   :  { %527 = vrot.lane.b32.xlu1 %v375_v63, %s5423_s23  ;;  %525 = vrot.lane.b32.xlu0 %v374_v1, %s5423_s23  ;;  %v376_v63 = vmul.f32 %v340_v10, %v217_v16  ;;  %v4925_v1 = vpop.f32.mrf.mxu1  ;;  %v6060_v20 = vpop.xlane.xlu1 %1086  ;;  %v361_v10 = vld [vmem:[%s11247_s2 + $0x118] sm:$0xff] }
 0x142   :  { %11452 = vst [vmem:[#allocation52_spill] sm:$0xff] %v6060_v20  ;;  %v6062_v21 = vpop.xlane.xlu0 %1089  ;;  %v395_v33 = vmul.f32 %v4925_v1, %v359_v9  ;;  %v360_v9 = vld [vmem:[%s11247_s2 + $0x110] sm:$0xff] }
 0x143   :  { %11453 = vst [vmem:[#allocation53_spill] sm:$0xff] %v6062_v21  ;;  %v307_v29 = vpop.f32.mrf.mxu1 }
 0x144   :  { %v394_v16 = vmul.f32 %v358_v57, %v307_v29 }
 0x145   :  { %630 = vrot.lane.b32.xlu1 %v393_v30, %s5420_s13  ;;  %628 = vrot.lane.b32.xlu0 %v392_v53, %s5420_s13  ;;  %v4928_v56 = vpop.f32.mrf.mxu1 }
 0x146   :  { %v397_v57 = vmul.f32 %v4928_v56, %v361_v10 }
 0x147   :  { %v317_v21 = vpop.f32.mrf.mxu1 }
 0x149   :  { %642 = vrot.lane.b32.xlu1 %v393_v30, %s5421_s18  ;;  %640 = vrot.lane.b32.xlu0 %v392_v53, %s5421_s18  ;;  %v6070_v30 = vpop.xlane.xlu1 %1092  ;;  %v6072_v53 = vpop.xlane.xlu0 %1095 }
 0x14a   :  { %11454 = vst [vmem:[#allocation54_spill] sm:$0xff] %v6070_v30  ;;  %11455 = vst [vmem:[#allocation55_spill] sm:$0xff] %v6072_v53 }
 0x14d   :  { %519 = vrot.lane.b32.xlu1 %v377_v17, %s5422_s19  ;;  %517 = vrot.lane.b32.xlu0 %v376_v63, %s5422_s19 }
 0x151   :  { %531 = vrot.lane.b32.xlu1 %v377_v17, %s5423_s23  ;;  %529 = vrot.lane.b32.xlu0 %v376_v63, %s5423_s23  ;;  %v396_v63 = vmul.f32 %v360_v9, %v317_v21 }
 0x155   :  { %663 = vrot.lane.b32.xlu1 %v395_v33, %s5424_s10  ;;  %661 = vrot.lane.b32.xlu0 %v394_v16, %s5424_s10 }
 0x157   :  { %v6080_v17 = vpop.permute.xlu1 %416  ;;  %v6082_v29 = vpop.permute.xlu0 %404 }
 0x159   :  { %675 = vrot.lane.b32.xlu1 %v395_v33, %s5425_s14  ;;  %673 = vrot.lane.b32.xlu0 %v394_v16, %s5425_s14 }
 0x15b   :  { %v6084_v1 = vpop.permute.xlu0 %402  ;;  %v6086_v53 = vpop.permute.xlu1 %408 }
 0x15d   :  { %667 = vrot.lane.b32.xlu1 %v397_v57, %s5424_s10  ;;  %665 = vrot.lane.b32.xlu0 %v396_v63, %s5424_s10 }
 0x15f   :  { %v6088_v30 = vpop.permute.xlu0 %414  ;;  %v6090_v20 = vpop.permute.xlu1 %420 }
 0x161   :  { %679 = vrot.lane.b32.xlu1 %v397_v57, %s5425_s14  ;;  %677 = vrot.lane.b32.xlu0 %v396_v63, %s5425_s14  ;;  %v6115_v63 = vld [vmem:[%s11246_s3 + $0x1b8] sm:$0xff] }
 0x162   :  { %v1100_v32 = vsel %vm934_vm0, %v6115_v63, 0.0 }
 0x163   :  { %v6092_v22 = vpop.permute.xlu1 %552  ;;  %v6094_v5 = vpop.permute.xlu0 %418 }
 0x164   :  { %11456 = vst [vmem:[#allocation56_spill] sm:$0xff] %v6092_v22 }
 0x167   :  { %v6096_v56 = vpop.permute.xlu0 %550  ;;  %v6098_v33 = vpop.permute.xlu1 %564 }
 0x168   :  { %11457 = vst [vmem:[#allocation57_spill] sm:$0xff] %v6096_v56  ;;  %11458 = vst [vmem:[#allocation58_spill] sm:$0xff] %v6098_v33  ;;  %v7052_v33 = vld [vmem:[%s11248_s4 + $0x108] sm:$0xff] }
 0x169   :  { %11570 = vst [vmem:[#allocation170_spill] sm:$0xff] %v7052_v33 }
 0x16b   :  { %v6100_v21 = vpop.permute.xlu0 %562  ;;  %v6102_v16 = vpop.permute.xlu1 %406 }
 0x16c   :  { %11459 = vst [vmem:[#allocation59_spill] sm:$0xff] %v6100_v21  ;;  %v5238_v21 = vld [vmem:[%s11246_s3] sm:$0xff] }
 0x16f   :  { %v6104_v10 = vpop.permute.xlu0 %439  ;;  %v6106_v9 = vpop.permute.xlu1 %441 }
 0x173   :  { %v6108_v8 = vpop.permute.xlu0 %451  ;;  %v6110_v57 = vpop.permute.xlu1 %453 }
 0x177   :  { %v6117_v55 = vpop.permute.xlu0 %554  ;;  %v6131_v14 = vpop.permute.xlu1 %556 }
 0x178   :  { %11460 = vst [vmem:[#allocation60_spill] sm:$0xff] %v6117_v55  ;;  %11461 = vst [vmem:[#allocation61_spill] sm:$0xff] %v6131_v14  ;;  %v1157_v14 = vsel %vm934_vm0, %v6297_v36, 0.0 }
 0x17b   :  { %v6133_v4 = vpop.permute.xlu0 %566  ;;  %v6151_v52 = vpop.permute.xlu1 %568 }
 0x17c   :  { %11462 = vst [vmem:[#allocation62_spill] sm:$0xff] %v6133_v4  ;;  %11463 = vst [vmem:[#allocation63_spill] sm:$0xff] %v6151_v52  ;;  %v6308_v52 = vld [vmem:[%s11246_s3 + $0x278] sm:$0xff]  ;;  %v5236_v4 = vld [vmem:[%s11246_s3 + $0x8] sm:$0xff] }
 0x17f   :  { %v6160_v6 = vpop.permute.xlu0 %443  ;;  %v6181_v12 = vpop.permute.xlu1 %445 }
 0x180   :  { %1101 = vadd.xlane.f32.xlu0 %v1100_v32  ;;  %v1112_v32 = vsel %vm934_vm0, %v6142_v26, 0.0  ;;  %11464 = vst [vmem:[#allocation64_spill] sm:$0xff] %v6160_v6  ;;  %11465 = vst [vmem:[#allocation65_spill] sm:$0xff] %v6181_v12  ;;  %v1255_v12 = vmul.f32 %v5238_v21, %v5238_v21  ;;  %v5241_v21 = vld [vmem:[%s11246_s3 + $0x38] sm:$0xff] }
 0x184   :  { %1107 = vadd.xlane.f32.xlu0 %v1106_v7  ;;  %v6165_v7 = vld [vmem:[%s11246_s3 + $0x1d0] sm:$0xff] }
 0x185   :  { %1098 = vadd.xlane.f32.xlu1 %v1097_v54  ;;  %v1118_v54 = vsel %vm934_vm0, %v6158_v25, 0.0  ;;  %v1109_v19 = vsel %vm934_vm0, %v6165_v7, 0.0 }
 0x188   :  { %1113 = vadd.xlane.f32.xlu0 %v1112_v32  ;;  %v1124_v32 = vsel %vm934_vm0, %v6174_v61, 0.0 }
 0x189   :  { %1104 = vadd.xlane.f32.xlu1 %v1103_v13  ;;  %v6183_v13 = vpop.permute.xlu0 %455 }
 0x18c   :  { %1119 = vadd.xlane.f32.xlu0 %v1118_v54  ;;  %v6201_v54 = vpop.permute.xlu1 %457 }
 0x18d   :  { %1110 = vadd.xlane.f32.xlu1 %v1109_v19  ;;  %v1130_v19 = vsel %vm934_vm0, %v6192_v24, 0.0  ;;  %11466 = vst [vmem:[#allocation66_spill] sm:$0xff] %v6201_v54  ;;  %v6210_v11 = vpop.permute.xlu0 %587 }
 0x18e   :  { %11467 = vst [vmem:[#allocation67_spill] sm:$0xff] %v6210_v11  ;;  %v1256_v11 = vmul.f32 %v5236_v4, %v5236_v4  ;;  %v5237_v4 = vld [vmem:[%s11246_s3 + $0x18] sm:$0xff] }
 0x190   :  { %1125 = vadd.xlane.f32.xlu0 %v1124_v32  ;;  %v6215_v32 = vld [vmem:[%s11246_s3 + $0x200] sm:$0xff]  ;;  %v6231_v59 = vpop.permute.xlu1 %589 }
 0x191   :  { %1116 = vadd.xlane.f32.xlu1 %v1115_v3  ;;  %v1136_v3 = vsel %vm934_vm0, %v6208_v51, 0.0  ;;  %v1127_v49 = vsel %vm934_vm0, %v6215_v32, 0.0  ;;  %11468 = vst [vmem:[#allocation68_spill] sm:$0xff] %v6231_v59 }
 0x194   :  { %1131 = vadd.xlane.f32.xlu0 %v1130_v19  ;;  %v1142_v19 = vsel %vm934_vm0, %v6224_v2, 0.0 }
 0x195   :  { %1122 = vadd.xlane.f32.xlu1 %v1121_v18  ;;  %v6233_v18 = vpop.permute.xlu0 %599 }
 0x196   :  { %11469 = vst [vmem:[#allocation69_spill] sm:$0xff] %v6233_v18 }
 0x198   :  { %1137 = vadd.xlane.f32.xlu0 %v1136_v3  ;;  %v6251_v3 = vpop.permute.xlu1 %601 }
 0x199   :  { %1128 = vadd.xlane.f32.xlu1 %v1127_v49  ;;  %v1148_v49 = vsel %vm934_vm0, %v6242_v50, 0.0  ;;  %11470 = vst [vmem:[#allocation70_spill] sm:$0xff] %v6251_v3  ;;  %v6260_v46 = vpop.permute.xlu0 %476  ;;  %v1258_v3 = vmul.f32 %v5237_v4, %v5237_v4  ;;  %v1335_v4 = vsel %vm934_vm0, %v1255_v12, 0.0  ;;  %v5242_v12 = vld [vmem:[%s11246_s3 + $0x20] sm:$0xff] }
 0x19c   :  { %1143 = vadd.xlane.f32.xlu0 %v1142_v19  ;;  %v6265_v19 = vld [vmem:[%s11246_s3 + $0x230] sm:$0xff]  ;;  %v6281_v40 = vpop.permute.xlu1 %478 }
 0x19d   :  { %1134 = vadd.xlane.f32.xlu1 %v1133_v45  ;;  %v1154_v45 = vsel %vm934_vm0, %v6258_v43, 0.0  ;;  %v1145_v42 = vsel %vm934_vm0, %v6265_v19, 0.0 }
 0x1a0   :  { %1149 = vadd.xlane.f32.xlu0 %v1148_v49  ;;  %v1160_v49 = vsel %vm934_vm0, %v6274_v41, 0.0 }
 0x1a1   :  { %1140 = vadd.xlane.f32.xlu1 %v1139_v44  ;;  %v6283_v44 = vpop.permute.xlu0 %488 }
 0x1a4   :  { %1155 = vadd.xlane.f32.xlu0 %v1154_v45  ;;  %v6301_v45 = vpop.permute.xlu1 %490 }
 0x1a5   :  { %1146 = vadd.xlane.f32.xlu1 %v1145_v42  ;;  %v1166_v42 = vsel %vm934_vm0, %v6292_v37, 0.0  ;;  %v6310_v55 = vpop.permute.xlu0 %591 }
 0x1a6   :  { %11471 = vst [vmem:[#allocation71_spill] sm:$0xff] %v6310_v55  ;;  %v6327_v55 = vld [vmem:[%s11246_s3 + $0x270] sm:$0xff] }
 0x1a7   :  { %v1169_v56 = vsel %vm934_vm0, %v6327_v55, 0.0 }
 0x1a8   :  { %1161 = vadd.xlane.f32.xlu0 %v1160_v49  ;;  %v6315_v49 = vld [vmem:[%s11246_s3 + $0x260] sm:$0xff]  ;;  %v6329_v59 = vpop.permute.xlu1 %593 }
 0x1a9   :  { %1152 = vadd.xlane.f32.xlu1 %v1151_v39  ;;  %v1172_v39 = vsel %vm934_vm0, %v6308_v52, 0.0  ;;  %v1163_v18 = vsel %vm934_vm0, %v6315_v49, 0.0  ;;  %11472 = vst [vmem:[#allocation72_spill] sm:$0xff] %v6329_v59 }
 0x1ac   :  { %1167 = vadd.xlane.f32.xlu0 %v1166_v42  ;;  %v1338_v42 = vsel %vm934_vm0, %v1256_v11, 0.0  ;;  %v5239_v11 = vld [vmem:[%s11246_s3 + $0x28] sm:$0xff]  ;;  %v6346_v59 = vpop.permute.xlu1 %605 }
 0x1ad   :  { %1158 = vadd.xlane.f32.xlu1 %v1157_v14  ;;  %v6331_v14 = vpop.permute.xlu0 %603  ;;  %11474 = vst [vmem:[#allocation74_spill] sm:$0xff] %v6346_v59 }
 0x1ae   :  { %11473 = vst [vmem:[#allocation73_spill] sm:$0xff] %v6331_v14  ;;  %v5240_v14 = vld [vmem:[%s11246_s3 + $0x10] sm:$0xff] }
 0x1af   :  { %v1257_v54 = vmul.f32 %v5240_v14, %v5240_v14 }
 0x1b0   :  { %1173 = vadd.xlane.f32.xlu0 %v1172_v39  ;;  %v1344_v39 = vsel %vm934_vm0, %v1258_v3, 0.0  ;;  %v1262_v3 = vmul.f32 %v5241_v21, %v5241_v21  ;;  %v6362_v59 = vpop.permute.xlu1 %482  ;;  %v5244_v21 = vld [vmem:[%s11246_s3 + $0x30] sm:$0xff] }
 0x1b1   :  { %1164 = vadd.xlane.f32.xlu1 %v1163_v18  ;;  %v1260_v18 = vmul.f32 %v5239_v11, %v5239_v11  ;;  %v6352_v22 = vpop.permute.xlu0 %480  ;;  %v1259_v11 = vmul.f32 %v5242_v12, %v5242_v12  ;;  %11476 = vst [vmem:[#allocation76_spill] sm:$0xff] %v6362_v59  ;;  %v1261_v12 = vmul.f32 %v5244_v21, %v5244_v21 }
 0x1b2   :  { %11475 = vst [vmem:[#allocation75_spill] sm:$0xff] %v6352_v22 }
 0x1b4   :  { %1339 = vadd.xlane.f32.xlu0 %v1338_v42  ;;  %v1341_v42 = vsel %vm934_vm0, %v1257_v54, 0.0  ;;  %v1347_v54 = vsel %vm934_vm0, %v1259_v11, 0.0  ;;  %v6378_v59 = vpop.permute.xlu1 %494  ;;  %v5246_v11 = vld [vmem:[%s11246_s3 + $0x40] sm:$0xff] }
 0x1b5   :  { %1170 = vadd.xlane.f32.xlu1 %v1169_v56  ;;  %v1350_v56 = vsel %vm934_vm0, %v1260_v18, 0.0  ;;  %v6364_v14 = vpop.permute.xlu0 %492  ;;  %v5243_v18 = vld [vmem:[%s11246_s3 + $0x48] sm:$0xff]  ;;  %11478 = vst [vmem:[#allocation78_spill] sm:$0xff] %v6378_v59  ;;  %v1263_v22 = vmul.f32 %v5246_v11, %v5246_v11 }
 0x1b6   :  { %11477 = vst [vmem:[#allocation77_spill] sm:$0xff] %v6364_v14 }
 0x1b7   :  { %v1359_v21 = vsel %vm934_vm0, %v1263_v22, 0.0 }
 0x1b8   :  { %1345 = vadd.xlane.f32.xlu0 %v1344_v39  ;;  %v1356_v39 = vsel %vm934_vm0, %v1262_v3, 0.0  ;;  %v5245_v3 = vld [vmem:[%s11246_s3 + $0x58] sm:$0xff]  ;;  %v6394_v59 = vpop.permute.xlu1 %626 }
 0x1b9   :  { %1336 = vadd.xlane.f32.xlu1 %v1335_v4  ;;  %v1264_v4 = vmul.f32 %v5243_v18, %v5243_v18  ;;  %v1353_v18 = vsel %vm934_vm0, %v1261_v12, 0.0  ;;  %v6384_v14 = vpop.permute.xlu0 %624  ;;  %v5248_v12 = vld [vmem:[%s11246_s3 + $0x50] sm:$0xff]  ;;  %11480 = vst [vmem:[#allocation80_spill] sm:$0xff] %v6394_v59 }
 0x1ba   :  { %11479 = vst [vmem:[#allocation79_spill] sm:$0xff] %v6384_v14 }
 0x1bc   :  { %1351 = vadd.xlane.f32.xlu0 %v1350_v56  ;;  %v1362_v56 = vsel %vm934_vm0, %v1264_v4, 0.0  ;;  %v5247_v4 = vld [vmem:[%s11246_s3 + $0x68] sm:$0xff] }
 0x1bd   :  { %1342 = vadd.xlane.f32.xlu1 %v1341_v42  ;;  %v1266_v42 = vmul.f32 %v5245_v3, %v5245_v3  ;;  %v1265_v3 = vmul.f32 %v5248_v12, %v5248_v12  ;;  %v6396_v11 = vpop.permute.xlu0 %636 }
 0x1be   :  { %11481 = vst [vmem:[#allocation81_spill] sm:$0xff] %v6396_v11 }
 0x1bf   :  { %v1365_v22 = vsel %vm934_vm0, %v1265_v3, 0.0  ;;  %v5251_v3 = vld [vmem:[%s11246_s3 + $0x70] sm:$0xff] }
 0x1c0   :  { %1357 = vadd.xlane.f32.xlu0 %v1356_v39  ;;  %v1368_v39 = vsel %vm934_vm0, %v1266_v42, 0.0  ;;  %v5249_v42 = vld [vmem:[%s11246_s3 + $0x78] sm:$0xff] }
 0x1c1   :  { %1348 = vadd.xlane.f32.xlu1 %v1347_v54  ;;  %v1268_v54 = vmul.f32 %v5247_v4, %v5247_v4  ;;  %v5250_v4 = vld [vmem:[%s11246_s3 + $0x60] sm:$0xff]  ;;  %v6415_v11 = vpop.permute.xlu0 %513 }
 0x1c2   :  { %v1267_v12 = vmul.f32 %v5250_v4, %v5250_v4  ;;  %11483 = vst [vmem:[#allocation83_spill] sm:$0xff] %v6415_v11 }
 0x1c4   :  { %1363 = vadd.xlane.f32.xlu0 %v1362_v56  ;;  %v1374_v56 = vsel %vm934_vm0, %v1268_v54, 0.0  ;;  %v6409_v54 = vpop.permute.xlu1 %638  ;;  %v1371_v14 = vsel %vm934_vm0, %v1267_v12, 0.0 }
 0x1c5   :  { %1354 = vadd.xlane.f32.xlu1 %v1353_v18  ;;  %v1270_v18 = vmul.f32 %v5249_v42, %v5249_v42  ;;  %11482 = vst [vmem:[#allocation82_spill] sm:$0xff] %v6409_v54  ;;  %v1269_v42 = vmul.f32 %v5251_v3, %v5251_v3  ;;  %v6426_v3 = vpop.permute.xlu0 %525 }
 0x1c6   :  { %11484 = vst [vmem:[#allocation84_spill] sm:$0xff] %v6426_v3  ;;  %v7070_v3 = vld [vmem:[%s11248_s4 + $0x118] sm:$0xff] }
 0x1c7   :  { %11574 = vst [vmem:[#allocation174_spill] sm:$0xff] %v7070_v3 }
 0x1c8   :  { %1369 = vadd.xlane.f32.xlu0 %v1368_v39  ;;  %v1380_v39 = vsel %vm934_vm0, %v1270_v18, 0.0  ;;  %v1274_v18 = vmul.f32 %v5713_v27, %v5713_v27  ;;  %v6424_v12 = vpop.permute.xlu1 %515 }
 0x1c9   :  { %1360 = vadd.xlane.f32.xlu1 %v1359_v21  ;;  %v1272_v21 = vmul.f32 %v5702_v23, %v5702_v23  ;;  %v1377_v23 = vsel %vm934_vm0, %v1269_v42, 0.0  ;;  %v6444_v59 = vpop.permute.xlu0 %628 }
 0x1ca   :  { %11485 = vst [vmem:[#allocation85_spill] sm:$0xff] %v6444_v59 }
 0x1cc   :  { %1375 = vadd.xlane.f32.xlu0 %v1374_v56  ;;  %v1386_v56 = vsel %vm934_vm0, %v1272_v21, 0.0  ;;  %v5253_v21 = vld [vmem:[%s11246_s3 + $0x90] sm:$0xff] }
 0x1cd   :  { %1366 = vadd.xlane.f32.xlu1 %v1365_v22  ;;  %v5252_v22 = vld [vmem:[%s11246_s3 + $0x80] sm:$0xff]  ;;  %v1273_v42 = vmul.f32 %v5253_v21, %v5253_v21  ;;  %v5256_v21 = vld [vmem:[%s11246_s3 + $0xb0] sm:$0xff] }
 0x1ce   :  { %v1271_v4 = vmul.f32 %v5252_v22, %v5252_v22 }
 0x1d0   :  { %1381 = vadd.xlane.f32.xlu0 %v1380_v39  ;;  %v1276_v39 = vmul.f32 %v5724_v31, %v5724_v31  ;;  %v1383_v27 = vsel %vm934_vm0, %v1271_v4, 0.0  ;;  %v5254_v31 = vld [vmem:[%s11246_s3 + $0xa0] sm:$0xff] }
 0x1d1   :  { %1372 = vadd.xlane.f32.xlu1 %v1371_v14  ;;  %v1392_v14 = vsel %vm934_vm0, %v1274_v18, 0.0  ;;  %v1389_v18 = vsel %vm934_vm0, %v1273_v42, 0.0  ;;  %v1275_v4 = vmul.f32 %v5254_v31, %v5254_v31  ;;  %v1277_v42 = vmul.f32 %v5256_v21, %v5256_v21  ;;  %v6456_v31 = vpop.permute.xlu0 %640 }
 0x1d2   :  { %v1398_v22 = vsel %vm934_vm0, %v1276_v39, 0.0  ;;  %v5255_v39 = vld [vmem:[%s11246_s3 + $0xc8] sm:$0xff]  ;;  %11487 = vst [vmem:[#allocation87_spill] sm:$0xff] %v6456_v31 }
 0x1d4   :  { %1387 = vadd.xlane.f32.xlu0 %v1386_v56  ;;  %v1278_v56 = vmul.f32 %v5735_v35, %v5735_v35  ;;  %v1280_v35 = vmul.f32 %v5255_v39, %v5255_v39  ;;  %v5258_v39 = vld [vmem:[%s11246_s3 + $0xc0] sm:$0xff] }
 0x1d5   :  { %1378 = vadd.xlane.f32.xlu1 %v1377_v23  ;;  %v6438_v23 = vpop.permute.xlu1 %527  ;;  %v1279_v21 = vmul.f32 %v5258_v39, %v5258_v39  ;;  %v6476_v31 = vpop.permute.xlu0 %517 }
 0x1d6   :  { %11489 = vst [vmem:[#allocation89_spill] sm:$0xff] %v6476_v31 }
 0x1d8   :  { %1393 = vadd.xlane.f32.xlu0 %v1392_v14  ;;  %v1404_v14 = vsel %vm934_vm0, %v1278_v56, 0.0  ;;  %v5257_v56 = vld [vmem:[%s11246_s3 + $0xd8] sm:$0xff] }
 0x1d9   :  { %1384 = vadd.xlane.f32.xlu1 %v1383_v27  ;;  %v1395_v27 = vsel %vm934_vm0, %v1275_v4, 0.0  ;;  %v6454_v54 = vpop.permute.xlu1 %630  ;;  %v1401_v4 = vsel %vm934_vm0, %v1277_v42, 0.0  ;;  %v5260_v42 = vld [vmem:[%s11246_s3 + $0xd0] sm:$0xff] }
 0x1da   :  { %11486 = vst [vmem:[#allocation86_spill] sm:$0xff] %v6454_v54  ;;  %v1281_v59 = vmul.f32 %v5260_v42, %v5260_v42  ;;  %v6488_v42 = vpop.permute.xlu0 %529 }
 0x1db   :  { %11491 = vst [vmem:[#allocation91_spill] sm:$0xff] %v6488_v42 }
 0x1dc   :  { %1399 = vadd.xlane.f32.xlu0 %v1398_v22  ;;  %v1410_v22 = vsel %vm934_vm0, %v1280_v35, 0.0  ;;  %v5259_v35 = vld [vmem:[%s11246_s3 + $0xe8] sm:$0xff]  ;;  %v1413_v39 = vsel %vm934_vm0, %v1281_v59, 0.0 }
 0x1dd   :  { %1390 = vadd.xlane.f32.xlu1 %v1389_v18  ;;  %v1282_v18 = vmul.f32 %v5257_v56, %v5257_v56  ;;  %v6470_v54 = vpop.permute.xlu1 %642  ;;  %v1407_v56 = vsel %vm934_vm0, %v1279_v21, 0.0  ;;  %v5262_v21 = vld [vmem:[%s11246_s3 + $0xe0] sm:$0xff] }
 0x1de   :  { %11488 = vst [vmem:[#allocation88_spill] sm:$0xff] %v6470_v54  ;;  %v6508_v42 = vpop.permute.xlu0 %661 }
 0x1df   :  { %11493 = vst [vmem:[#allocation93_spill] sm:$0xff] %v6508_v42 }
 0x1e0   :  { %1405 = vadd.xlane.f32.xlu0 %v1404_v14  ;;  %v1416_v14 = vsel %vm934_vm0, %v1282_v18, 0.0  ;;  %v5261_v18 = vld [vmem:[%s11246_s3 + $0xf8] sm:$0xff] }
 0x1e1   :  { %1396 = vadd.xlane.f32.xlu1 %v1395_v27  ;;  %v1284_v27 = vmul.f32 %v5259_v35, %v5259_v35  ;;  %v1283_v35 = vmul.f32 %v5262_v21, %v5262_v21  ;;  %v6486_v54 = vpop.permute.xlu1 %519 }
 0x1e2   :  { %11490 = vst [vmem:[#allocation90_spill] sm:$0xff] %v6486_v54 }
 0x1e3   :  { %v1419_v59 = vsel %vm934_vm0, %v1283_v35, 0.0  ;;  %v5266_v35 = vld [vmem:[%s11246_s3 + $0x100] sm:$0xff] }
 0x1e4   :  { %1411 = vadd.xlane.f32.xlu0 %v1410_v22  ;;  %v1422_v22 = vsel %vm934_vm0, %v1284_v27, 0.0  ;;  %v5263_v27 = vld [vmem:[%s11246_s3 + $0x108] sm:$0xff]  ;;  %v1287_v31 = vmul.f32 %v5266_v35, %v5266_v35  ;;  %v6520_v35 = vpop.permute.xlu0 %673 }
 0x1e5   :  { %1402 = vadd.xlane.f32.xlu1 %v1401_v4  ;;  %v1286_v4 = vmul.f32 %v5261_v18, %v5261_v18  ;;  %v5264_v18 = vld [vmem:[%s11246_s3 + $0xf0] sm:$0xff]  ;;  %v6502_v54 = vpop.permute.xlu1 %531  ;;  %11495 = vst [vmem:[#allocation95_spill] sm:$0xff] %v6520_v35 }
 0x1e6   :  { %v1285_v21 = vmul.f32 %v5264_v18, %v5264_v18  ;;  %11492 = vst [vmem:[#allocation92_spill] sm:$0xff] %v6502_v54  ;;  %v1431_v18 = vsel %vm934_vm0, %v1287_v31, 0.0 }
 0x1e8   :  { %1417 = vadd.xlane.f32.xlu0 %v1416_v14  ;;  %v1428_v14 = vsel %vm934_vm0, %v1286_v4, 0.0  ;;  %v5265_v4 = vld [vmem:[%s11246_s3 + $0x118] sm:$0xff] }
 0x1e9   :  { %1408 = vadd.xlane.f32.xlu1 %v1407_v56  ;;  %v1288_v56 = vmul.f32 %v5263_v27, %v5263_v27  ;;  %v1425_v27 = vsel %vm934_vm0, %v1285_v21, 0.0  ;;  %v5268_v21 = vld [vmem:[%s11246_s3 + $0x110] sm:$0xff]  ;;  %v6518_v54 = vpop.permute.xlu1 %663 }
 0x1ea   :  { %11494 = vst [vmem:[#allocation94_spill] sm:$0xff] %v6518_v54  ;;  %v6540_v54 = vpop.permute.xlu0 %665 }
 0x1eb   :  { %11497 = vst [vmem:[#allocation97_spill] sm:$0xff] %v6540_v54 }
 0x1ec   :  { %1423 = vadd.xlane.f32.xlu0 %v1422_v22  ;;  %v1434_v22 = vsel %vm934_vm0, %v1288_v56, 0.0  ;;  %v5267_v56 = vld [vmem:[%s11246_s3 + $0x128] sm:$0xff] }
 0x1ed   :  { %1414 = vadd.xlane.f32.xlu1 %v1413_v39  ;;  %v1290_v39 = vmul.f32 %v5265_v4, %v5265_v4  ;;  %v1289_v4 = vmul.f32 %v5268_v21, %v5268_v21  ;;  %v6534_v42 = vpop.permute.xlu1 %675 }
 0x1ee   :  { %11496 = vst [vmem:[#allocation96_spill] sm:$0xff] %v6534_v42 }
 0x1ef   :  { %v1437_v31 = vsel %vm934_vm0, %v1289_v4, 0.0  ;;  %v5272_v4 = vld [vmem:[%s11246_s3 + $0x130] sm:$0xff] }
 0x1f0   :  { %1429 = vadd.xlane.f32.xlu0 %v1428_v14  ;;  %v1440_v14 = vsel %vm934_vm0, %v1290_v39, 0.0  ;;  %v5269_v39 = vld [vmem:[%s11246_s3 + $0x138] sm:$0xff]  ;;  %v1293_v35 = vmul.f32 %v5272_v4, %v5272_v4  ;;  %v6552_v4 = vpop.permute.xlu0 %677 }
 0x1f1   :  { %1420 = vadd.xlane.f32.xlu1 %v1419_v59  ;;  %v1292_v59 = vmul.f32 %v5267_v56, %v5267_v56  ;;  %v5270_v56 = vld [vmem:[%s11246_s3 + $0x120] sm:$0xff]  ;;  %v6550_v42 = vpop.permute.xlu1 %667  ;;  %11499 = vst [vmem:[#allocation99_spill] sm:$0xff] %v6552_v4 }
 0x1f2   :  { %v1291_v21 = vmul.f32 %v5270_v56, %v5270_v56  ;;  %v1449_v56 = vsel %vm934_vm0, %v1293_v35, 0.0  ;;  %11498 = vst [vmem:[#allocation98_spill] sm:$0xff] %v6550_v42 }
 0x1f4   :  { %1435 = vadd.xlane.f32.xlu0 %v1434_v22  ;;  %v1446_v22 = vsel %vm934_vm0, %v1292_v59, 0.0  ;;  %v5271_v59 = vld [vmem:[%s11246_s3 + $0x148] sm:$0xff] }
 0x1f5   :  { %1426 = vadd.xlane.f32.xlu1 %v1425_v27  ;;  %v1294_v27 = vmul.f32 %v5269_v39, %v5269_v39  ;;  %v1443_v39 = vsel %vm934_vm0, %v1291_v21, 0.0  ;;  %v5274_v21 = vld [vmem:[%s11246_s3 + $0x140] sm:$0xff]  ;;  %v6568_v54 = vpop.permute.xlu1 %679 }
 0x1f6   :  { %11501 = vst [vmem:[#allocation101_spill] sm:$0xff] %v6568_v54  ;;  %v5280_v54 = vld [vmem:[%s11246_s3 + $0x170] sm:$0xff] }
 0x1f8   :  { %1441 = vadd.xlane.f32.xlu0 %v1440_v14  ;;  %v1452_v14 = vsel %vm934_vm0, %v1294_v27, 0.0  ;;  %v5273_v27 = vld [vmem:[%s11246_s3 + $0x158] sm:$0xff] }
 0x1f9   :  { %1432 = vadd.xlane.f32.xlu1 %v1431_v18  ;;  %v1296_v18 = vmul.f32 %v5271_v59, %v5271_v59  ;;  %v1295_v59 = vmul.f32 %v5274_v21, %v5274_v21 }
 0x1fb   :  { %v1455_v35 = vsel %vm934_vm0, %v1295_v59, 0.0 }
 0x1fc   :  { %1447 = vadd.xlane.f32.xlu0 %v1446_v22  ;;  %v1458_v22 = vsel %vm934_vm0, %v1296_v18, 0.0  ;;  %v5275_v18 = vld [vmem:[%s11246_s3 + $0x168] sm:$0xff] }
 0x1fd   :  { %1438 = vadd.xlane.f32.xlu1 %v1437_v31  ;;  %v1298_v31 = vmul.f32 %v5273_v27, %v5273_v27  ;;  %v5276_v27 = vld [vmem:[%s11246_s3 + $0x150] sm:$0xff] }
 0x1fe   :  { %v1297_v21 = vmul.f32 %v5276_v27, %v5276_v27 }
 0x200   :  { %1453 = vadd.xlane.f32.xlu0 %v1452_v14  ;;  %v1464_v14 = vsel %vm934_vm0, %v1298_v31, 0.0  ;;  %v5277_v31 = vld [vmem:[%s11246_s3 + $0x178] sm:$0xff]  ;;  %v1461_v59 = vsel %vm934_vm0, %v1297_v21, 0.0 }
 0x201   :  { %1444 = vadd.xlane.f32.xlu1 %v1443_v39  ;;  %v1300_v39 = vmul.f32 %v5275_v18, %v5275_v18  ;;  %v1302_v42 = vmul.f32 %v5277_v31, %v5277_v31  ;;  %v5278_v18 = vld [vmem:[%s11246_s3 + $0x160] sm:$0xff] }
 0x202   :  { %v1299_v27 = vmul.f32 %v5278_v18, %v5278_v18  ;;  %v1301_v18 = vmul.f32 %v5280_v54, %v5280_v54 }
 0x204   :  { %1459 = vadd.xlane.f32.xlu0 %v1458_v22  ;;  %v1467_v21 = vsel %vm934_vm0, %v1299_v27, 0.0  ;;  %v1473_v27 = vsel %vm934_vm0, %v1301_v18, 0.0 }
 0x205   :  { %1450 = vadd.xlane.f32.xlu1 %v1449_v56  ;;  %v1470_v56 = vsel %vm934_vm0, %v1300_v39, 0.0  ;;  %v1476_v39 = vsel %vm934_vm0, %v1302_v42, 0.0 }
 0x208   :  { %1465 = vadd.xlane.f32.xlu0 %v1464_v14 }
 0x209   :  { %1456 = vadd.xlane.f32.xlu1 %v1455_v35  ;;  %v6562_v22 = vpop.xlane.xlu0 %1101  ;;  %v5279_v35 = vld [vmem:[%s11246_s3 + $0x188] sm:$0xff] }
 0x20a   :  { %11500 = vst [vmem:[#allocation100_spill] sm:$0xff] %v6562_v22  ;;  %v1304_v31 = vmul.f32 %v5279_v35, %v5279_v35 }
 0x20c   :  { %1471 = vadd.xlane.f32.xlu0 %v1470_v56  ;;  %v1482_v42 = vsel %vm934_vm0, %v1304_v31, 0.0 }
 0x20d   :  { %1462 = vadd.xlane.f32.xlu1 %v1461_v59  ;;  %v6574_v14 = vpop.xlane.xlu0 %1107  ;;  %v5281_v59 = vld [vmem:[%s11246_s3 + $0x198] sm:$0xff] }
 0x20e   :  { %11502 = vst [vmem:[#allocation102_spill] sm:$0xff] %v6574_v14  ;;  %v6580_v22 = vpop.xlane.xlu1 %1098  ;;  %v1306_v35 = vmul.f32 %v5281_v59, %v5281_v59 }
 0x20f   :  { %11503 = vst [vmem:[#allocation103_spill] sm:$0xff] %v6580_v22  ;;  %v5282_v22 = vld [vmem:[%s11246_s3 + $0x180] sm:$0xff] }
 0x210   :  { %1477 = vadd.xlane.f32.xlu0 %v1476_v39  ;;  %v1303_v54 = vmul.f32 %v5282_v22, %v5282_v22  ;;  %v1488_v31 = vsel %vm934_vm0, %v1306_v35, 0.0 }
 0x211   :  { %1468 = vadd.xlane.f32.xlu1 %v1467_v21  ;;  %v6586_v56 = vpop.xlane.xlu0 %1113  ;;  %v5283_v21 = vld [vmem:[%s11246_s3 + $0x1a8] sm:$0xff] }
 0x212   :  { %11504 = vst [vmem:[#allocation104_spill] sm:$0xff] %v6586_v56  ;;  %v6592_v14 = vpop.xlane.xlu1 %1104  ;;  %v1308_v59 = vmul.f32 %v5283_v21, %v5283_v21  ;;  %v1479_v18 = vsel %vm934_vm0, %v1303_v54, 0.0  ;;  %v5285_v54 = vld [vmem:[%s11246_s3 + $0x1a0] sm:$0xff] }
 0x213   :  { %11505 = vst [vmem:[#allocation105_spill] sm:$0xff] %v6592_v14  ;;  %v5284_v14 = vld [vmem:[%s11246_s3 + $0x190] sm:$0xff] }
 0x214   :  { %1483 = vadd.xlane.f32.xlu0 %v1482_v42  ;;  %v1305_v22 = vmul.f32 %v5284_v14, %v5284_v14  ;;  %v1494_v35 = vsel %vm934_vm0, %v1308_v59, 0.0  ;;  %v1312_v59 = vmul.f32 %v6124_v28, %v6124_v28 }
 0x215   :  { %1474 = vadd.xlane.f32.xlu1 %v1473_v27  ;;  %v6598_v39 = vpop.xlane.xlu0 %1119  ;;  %v1310_v27 = vmul.f32 %v6115_v63, %v6115_v63 }
 0x216   :  { %11506 = vst [vmem:[#allocation106_spill] sm:$0xff] %v6598_v39  ;;  %v6604_v56 = vpop.xlane.xlu1 %1110  ;;  %v1485_v21 = vsel %vm934_vm0, %v1305_v22, 0.0  ;;  %v1309_v22 = vmul.f32 %v6129_v15, %v6129_v15 }
 0x217   :  { %11507 = vst [vmem:[#allocation107_spill] sm:$0xff] %v6604_v56  ;;  %v1307_v56 = vmul.f32 %v5285_v54, %v5285_v54  ;;  %v1311_v54 = vmul.f32 %v6147_v62, %v6147_v62 }
 0x218   :  { %1489 = vadd.xlane.f32.xlu0 %v1488_v31  ;;  %v1500_v31 = vsel %vm934_vm0, %v1310_v27, 0.0  ;;  %v1497_v28 = vsel %vm934_vm0, %v1309_v22, 0.0 }
 0x219   :  { %1480 = vadd.xlane.f32.xlu1 %v1479_v18  ;;  %v6610_v42 = vpop.xlane.xlu0 %1125  ;;  %v1491_v63 = vsel %vm934_vm0, %v1307_v56, 0.0 }
 0x21a   :  { %11508 = vst [vmem:[#allocation108_spill] sm:$0xff] %v6610_v42  ;;  %v6615_v39 = vpop.xlane.xlu1 %1116 }
 0x21b   :  { %11509 = vst [vmem:[#allocation109_spill] sm:$0xff] %v6615_v39 }
 0x21c   :  { %1495 = vadd.xlane.f32.xlu0 %v1494_v35  ;;  %v1506_v35 = vsel %vm934_vm0, %v1312_v59, 0.0 }
 0x21d   :  { %1486 = vadd.xlane.f32.xlu1 %v1485_v21  ;;  %v6621_v14 = vpop.xlane.xlu0 %1131  ;;  %v1314_v21 = vmul.f32 %v6142_v26, %v6142_v26  ;;  %v1503_v26 = vsel %vm934_vm0, %v1311_v54, 0.0 }
 0x21e   :  { %11510 = vst [vmem:[#allocation110_spill] sm:$0xff] %v6621_v14  ;;  %v6626_v18 = vpop.xlane.xlu1 %1122  ;;  %v6836_v14 = vld [vmem:[%s11248_s4 + $0x48] sm:$0xff] }
 0x21f   :  { %11511 = vst [vmem:[#allocation111_spill] sm:$0xff] %v6626_v18  ;;  %v1512_v15 = vsel %vm934_vm0, %v1314_v21, 0.0  ;;  %v6854_v18 = vld [vmem:[%s11248_s4 + $0x58] sm:$0xff] }
 0x220   :  { %1501 = vadd.xlane.f32.xlu0 %v1500_v31  ;;  %v1316_v31 = vmul.f32 %v6158_v25, %v6158_v25  ;;  %v3408_v39 = vsel %vm934_vm0, %v6854_v18, 0.0 }
 0x221   :  { %1492 = vadd.xlane.f32.xlu1 %v1491_v63  ;;  %v6631_v42 = vpop.xlane.xlu0 %1137  ;;  %v1313_v63 = vmul.f32 %v6165_v7, %v6165_v7 }
 0x222   :  { %11512 = vst [vmem:[#allocation112_spill] sm:$0xff] %v6631_v42  ;;  %v6636_v27 = vpop.xlane.xlu1 %1128  ;;  %v1518_v62 = vsel %vm934_vm0, %v1316_v31, 0.0 }
 0x223   :  { %11513 = vst [vmem:[#allocation113_spill] sm:$0xff] %v6636_v27  ;;  %v1509_v25 = vsel %vm934_vm0, %v1313_v63, 0.0 }
 0x224   :  { %1507 = vadd.xlane.f32.xlu0 %v1506_v35  ;;  %v1318_v35 = vmul.f32 %v6174_v61, %v6174_v61 }
 0x225   :  { %1498 = vadd.xlane.f32.xlu1 %v1497_v28  ;;  %v6641_v56 = vpop.xlane.xlu0 %1143  ;;  %v1315_v28 = vmul.f32 %v6179_v34, %v6179_v34 }
 0x226   :  { %11514 = vst [vmem:[#allocation114_spill] sm:$0xff] %v6641_v56  ;;  %v6646_v59 = vpop.xlane.xlu1 %1134  ;;  %v1524_v7 = vsel %vm934_vm0, %v1318_v35, 0.0 }
 0x227   :  { %11515 = vst [vmem:[#allocation115_spill] sm:$0xff] %v6646_v59  ;;  %v1515_v61 = vsel %vm934_vm0, %v1315_v28, 0.0 }
 0x228   :  { %1513 = vadd.xlane.f32.xlu0 %v1512_v15  ;;  %v1320_v15 = vmul.f32 %v6192_v24, %v6192_v24 }
 0x229   :  { %1504 = vadd.xlane.f32.xlu1 %v1503_v26  ;;  %v6651_v22 = vpop.xlane.xlu0 %1149  ;;  %v1317_v26 = vmul.f32 %v6197_v60, %v6197_v60 }
 0x22a   :  { %11516 = vst [vmem:[#allocation116_spill] sm:$0xff] %v6651_v22  ;;  %v6656_v21 = vpop.xlane.xlu1 %1140  ;;  %v1530_v34 = vsel %vm934_vm0, %v1320_v15, 0.0 }
 0x22b   :  { %11517 = vst [vmem:[#allocation117_spill] sm:$0xff] %v6656_v21  ;;  %v1521_v24 = vsel %vm934_vm0, %v1317_v26, 0.0  ;;  %v3402_v21 = vsel %vm934_vm0, %v6836_v14, 0.0 }
 0x22c   :  { %1519 = vadd.xlane.f32.xlu0 %v1518_v62  ;;  %v1322_v62 = vmul.f32 %v6208_v51, %v6208_v51 }
 0x22d   :  { %1510 = vadd.xlane.f32.xlu1 %v1509_v25  ;;  %v6661_v54 = vpop.xlane.xlu0 %1155  ;;  %v1319_v25 = vmul.f32 %v6215_v32, %v6215_v32 }
 0x22e   :  { %11518 = vst [vmem:[#allocation118_spill] sm:$0xff] %v6661_v54  ;;  %v6666_v31 = vpop.xlane.xlu1 %1146  ;;  %v1536_v60 = vsel %vm934_vm0, %v1322_v62, 0.0 }
 0x22f   :  { %11519 = vst [vmem:[#allocation119_spill] sm:$0xff] %v6666_v31  ;;  %v1527_v51 = vsel %vm934_vm0, %v1319_v25, 0.0 }
 0x230   :  { %1525 = vadd.xlane.f32.xlu0 %v1524_v7  ;;  %v1324_v7 = vmul.f32 %v6224_v2, %v6224_v2 }
 0x231   :  { %1516 = vadd.xlane.f32.xlu1 %v1515_v61  ;;  %v6671_v63 = vpop.xlane.xlu0 %1161  ;;  %v1321_v61 = vmul.f32 %v6229_v47, %v6229_v47 }
 0x232   :  { %11520 = vst [vmem:[#allocation120_spill] sm:$0xff] %v6671_v63  ;;  %v6676_v35 = vpop.xlane.xlu1 %1152  ;;  %v1542_v32 = vsel %vm934_vm0, %v1324_v7, 0.0 }
 0x233   :  { %11521 = vst [vmem:[#allocation121_spill] sm:$0xff] %v6676_v35  ;;  %v1533_v2 = vsel %vm934_vm0, %v1321_v61, 0.0 }
 0x234   :  { %1531 = vadd.xlane.f32.xlu0 %v1530_v34  ;;  %v1326_v34 = vmul.f32 %v6242_v50, %v6242_v50 }
 0x235   :  { %1522 = vadd.xlane.f32.xlu1 %v1521_v24  ;;  %v6681_v28 = vpop.xlane.xlu0 %1167  ;;  %v1323_v24 = vmul.f32 %v6247_v48, %v6247_v48 }
 0x236   :  { %11522 = vst [vmem:[#allocation122_spill] sm:$0xff] %v6681_v28  ;;  %v6686_v15 = vpop.xlane.xlu1 %1158  ;;  %v1548_v47 = vsel %vm934_vm0, %v1326_v34, 0.0 }
 0x237   :  { %11523 = vst [vmem:[#allocation123_spill] sm:$0xff] %v6686_v15  ;;  %v1539_v50 = vsel %vm934_vm0, %v1323_v24, 0.0  ;;  %v6818_v15 = vld [vmem:[%s11248_s4 + $0x38] sm:$0xff] }
 0x238   :  { %1537 = vadd.xlane.f32.xlu0 %v1536_v60  ;;  %v1328_v60 = vmul.f32 %v6258_v43, %v6258_v43  ;;  %v3396_v42 = vsel %vm934_vm0, %v6818_v15, 0.0 }
 0x239   :  { %1528 = vadd.xlane.f32.xlu1 %v1527_v51  ;;  %v6691_v26 = vpop.xlane.xlu0 %1173  ;;  %v1325_v51 = vmul.f32 %v6265_v19, %v6265_v19 }
 0x23a   :  { %11524 = vst [vmem:[#allocation124_spill] sm:$0xff] %v6691_v26  ;;  %v6696_v62 = vpop.xlane.xlu1 %1164  ;;  %v1554_v48 = vsel %vm934_vm0, %v1328_v60, 0.0  ;;  %v6782_v26 = vld [vmem:[%s11248_s4 + $0x18] sm:$0xff] }
 0x23b   :  { %11525 = vst [vmem:[#allocation125_spill] sm:$0xff] %v6696_v62  ;;  %v1545_v43 = vsel %vm934_vm0, %v1325_v51, 0.0  ;;  %v3384_v28 = vsel %vm934_vm0, %v6782_v26, 0.0 }
 0x23c   :  { %1543 = vadd.xlane.f32.xlu0 %v1542_v32  ;;  %v1330_v32 = vmul.f32 %v6274_v41, %v6274_v41 }
 0x23d   :  { %1534 = vadd.xlane.f32.xlu1 %v1533_v2  ;;  %v6701_v25 = vpop.xlane.xlu0 %1339  ;;  %v1327_v2 = vmul.f32 %v6279_v38, %v6279_v38 }
 0x23e   :  { %11526 = vst [vmem:[#allocation126_spill] sm:$0xff] %v6701_v25  ;;  %v6706_v7 = vpop.xlane.xlu1 %1170  ;;  %v1560_v19 = vsel %vm934_vm0, %v1330_v32, 0.0  ;;  %v6998_v25 = vld [vmem:[%s11248_s4 + $0xd8] sm:$0xff] }
 0x23f   :  { %11527 = vst [vmem:[#allocation127_spill] sm:$0xff] %v6706_v7  ;;  %v1551_v41 = vsel %vm934_vm0, %v1327_v2, 0.0  ;;  %v6800_v7 = vld [vmem:[%s11248_s4 + $0x28] sm:$0xff] }
 0x240   :  { %1549 = vadd.xlane.f32.xlu0 %v1548_v47  ;;  %v1332_v47 = vmul.f32 %v6292_v37, %v6292_v37  ;;  %v3390_v22 = vsel %vm934_vm0, %v6800_v7, 0.0 }
 0x241   :  { %1540 = vadd.xlane.f32.xlu1 %v1539_v50  ;;  %v6711_v61 = vpop.xlane.xlu0 %1345  ;;  %v1329_v50 = vmul.f32 %v6297_v36, %v6297_v36 }
 0x242   :  { %11528 = vst [vmem:[#allocation128_spill] sm:$0xff] %v6711_v61  ;;  %v6716_v34 = vpop.xlane.xlu1 %1336  ;;  %v1566_v38 = vsel %vm934_vm0, %v1332_v47, 0.0  ;;  %v7016_v61 = vld [vmem:[%s11248_s4 + $0xe8] sm:$0xff] }
 0x243   :  { %11529 = vst [vmem:[#allocation129_spill] sm:$0xff] %v6716_v34  ;;  %v1557_v37 = vsel %vm934_vm0, %v1329_v50, 0.0  ;;  %v7034_v34 = vld [vmem:[%s11248_s4 + $0xf8] sm:$0xff] }
 0x244   :  { %1555 = vadd.xlane.f32.xlu0 %v1554_v48  ;;  %v1334_v48 = vmul.f32 %v6308_v52, %v6308_v52  ;;  %v6750_v52 = vld [vmem:[%s11248_s4] sm:$0xff] }
 0x245   :  { %1546 = vadd.xlane.f32.xlu1 %v1545_v43  ;;  %v6721_v24 = vpop.xlane.xlu0 %1351  ;;  %v1331_v43 = vmul.f32 %v6315_v49, %v6315_v49  ;;  %v3375_v50 = vsel %vm934_vm0, %v6750_v52, 0.0  ;;  %v3535_v6 = vmul.f32 %v6750_v52, %v6750_v52 }
 0x246   :  { %11530 = vst [vmem:[#allocation130_spill] sm:$0xff] %v6721_v24  ;;  %v6726_v60 = vpop.xlane.xlu1 %1342  ;;  %v1572_v36 = vsel %vm934_vm0, %v1334_v48, 0.0 }
 0x247   :  { %11531 = vst [vmem:[#allocation131_spill] sm:$0xff] %v6726_v60  ;;  %v1563_v47 = vsel %vm934_vm0, %v1331_v43, 0.0 }
 0x248   :  { %1561 = vadd.xlane.f32.xlu0 %v1560_v19 }
 0x249   :  { %1552 = vadd.xlane.f32.xlu1 %v1551_v41  ;;  %v6731_v51 = vpop.xlane.xlu0 %1357  ;;  %v1333_v41 = vmul.f32 %v6327_v55, %v6327_v55  ;;  %v6769_v55 = vld [vmem:[%s11248_s4 + $0x8] sm:$0xff] }
 0x24a   :  { %11532 = vst [vmem:[#allocation132_spill] sm:$0xff] %v6731_v51  ;;  %v6736_v32 = vpop.xlane.xlu1 %1348  ;;  %v6962_v51 = vld [vmem:[%s11248_s4 + $0xb8] sm:$0xff] }
 0x24b   :  { %11533 = vst [vmem:[#allocation133_spill] sm:$0xff] %v6736_v32  ;;  %v1569_v48 = vsel %vm934_vm0, %v1333_v41, 0.0  ;;  %v3378_v41 = vsel %vm934_vm0, %v6769_v55, 0.0 }
 0x24c   :  { %1567 = vadd.xlane.f32.xlu0 %v1566_v38 }
 0x24d   :  { %1558 = vadd.xlane.f32.xlu1 %v1557_v37  ;;  %v6741_v2 = vpop.xlane.xlu0 %1363  ;;  %v6764_v37 = vld [vmem:[%s11248_s4 + $0x10] sm:$0xff] }
 0x24e   :  { %11534 = vst [vmem:[#allocation134_spill] sm:$0xff] %v6741_v2  ;;  %v6744_v19 = vpop.xlane.xlu1 %1354  ;;  %v6926_v2 = vld [vmem:[%s11248_s4 + $0x98] sm:$0xff]  ;;  %v3537_v52 = vmul.f32 %v6764_v37, %v6764_v37 }
 0x24f   :  { %11535 = vst [vmem:[#allocation135_spill] sm:$0xff] %v6744_v19  ;;  %v6980_v19 = vld [vmem:[%s11248_s4 + $0xc8] sm:$0xff] }
 0x250   :  { %1573 = vadd.xlane.f32.xlu0 %v1572_v36  ;;  %v3381_v36 = vsel %vm934_vm0, %v6764_v37, 0.0  ;;  %v3540_v37 = vmul.f32 %v6800_v7, %v6800_v7 }
 0x251   :  { %1564 = vadd.xlane.f32.xlu1 %v1563_v47  ;;  %v6754_v49 = vpop.xlane.xlu0 %1369 }
 0x252   :  { %11536 = vst [vmem:[#allocation136_spill] sm:$0xff] %v6754_v49  ;;  %v6758_v38 = vpop.xlane.xlu1 %1360  ;;  %v6908_v49 = vld [vmem:[%s11248_s4 + $0x88] sm:$0xff] }
 0x253   :  { %11537 = vst [vmem:[#allocation137_spill] sm:$0xff] %v6758_v38  ;;  %v6944_v38 = vld [vmem:[%s11248_s4 + $0xa8] sm:$0xff] }
 0x254   :  { %3376 = vadd.xlane.f32.xlu0 %v3375_v50  ;;  %v6787_v50 = vld [vmem:[%s11248_s4 + $0x20] sm:$0xff] }
 0x255   :  { %1570 = vadd.xlane.f32.xlu1 %v1569_v48  ;;  %v6771_v43 = vpop.xlane.xlu0 %1375  ;;  %v3387_v54 = vsel %vm934_vm0, %v6787_v50, 0.0 }
 0x256   :  { %11538 = vst [vmem:[#allocation138_spill] sm:$0xff] %v6771_v43  ;;  %v6775_v47 = vpop.xlane.xlu1 %1366  ;;  %v6890_v43 = vld [vmem:[%s11248_s4 + $0x78] sm:$0xff] }
 0x257   :  { %11539 = vst [vmem:[#allocation139_spill] sm:$0xff] %v6775_v47 }
 0x258   :  { %3382 = vadd.xlane.f32.xlu0 %v3381_v36  ;;  %v6805_v36 = vld [vmem:[%s11248_s4 + $0x30] sm:$0xff] }
 0x259   :  { %3379 = vadd.xlane.f32.xlu1 %v3378_v41  ;;  %v6789_v48 = vpop.xlane.xlu0 %1381  ;;  %v3393_v56 = vsel %vm934_vm0, %v6805_v36, 0.0 }
 0x25a   :  { %11540 = vst [vmem:[#allocation140_spill] sm:$0xff] %v6789_v48  ;;  %v6793_v63 = vpop.xlane.xlu1 %1372 }
 0x25b   :  { %11541 = vst [vmem:[#allocation141_spill] sm:$0xff] %v6793_v63 }
 0x25c   :  { %3385 = vadd.xlane.f32.xlu0 %v3384_v28  ;;  %v6823_v28 = vld [vmem:[%s11248_s4 + $0x40] sm:$0xff] }
 0x25d   :  { %3388 = vadd.xlane.f32.xlu1 %v3387_v54  ;;  %v6807_v41 = vpop.xlane.xlu0 %1387  ;;  %v3399_v31 = vsel %vm934_vm0, %v6823_v28, 0.0 }
 0x25e   :  { %11542 = vst [vmem:[#allocation142_spill] sm:$0xff] %v6807_v41  ;;  %v6811_v62 = vpop.xlane.xlu1 %1378  ;;  %v6872_v41 = vld [vmem:[%s11248_s4 + $0x68] sm:$0xff] }
 0x25f   :  { %11543 = vst [vmem:[#allocation143_spill] sm:$0xff] %v6811_v62 }
 0x260   :  { %3391 = vadd.xlane.f32.xlu0 %v3390_v22  ;;  %v6841_v22 = vld [vmem:[%s11248_s4 + $0x50] sm:$0xff] }
 0x261   :  { %3394 = vadd.xlane.f32.xlu1 %v3393_v56  ;;  %v6825_v54 = vpop.xlane.xlu0 %1393  ;;  %v3405_v27 = vsel %vm934_vm0, %v6841_v22, 0.0 }
 0x262   :  { %11544 = vst [vmem:[#allocation144_spill] sm:$0xff] %v6825_v54  ;;  %v6829_v35 = vpop.xlane.xlu1 %1384 }
 0x263   :  { %11545 = vst [vmem:[#allocation145_spill] sm:$0xff] %v6829_v35 }
 0x264   :  { %3397 = vadd.xlane.f32.xlu0 %v3396_v42  ;;  %v6859_v42 = vld [vmem:[%s11248_s4 + $0x60] sm:$0xff] }
 0x265   :  { %3400 = vadd.xlane.f32.xlu1 %v3399_v31  ;;  %v6843_v56 = vpop.xlane.xlu0 %1399  ;;  %v3411_v54 = vsel %vm934_vm0, %v6859_v42, 0.0 }
 0x266   :  { %11546 = vst [vmem:[#allocation146_spill] sm:$0xff] %v6843_v56  ;;  %v6847_v59 = vpop.xlane.xlu1 %1390 }
 0x267   :  { %11547 = vst [vmem:[#allocation147_spill] sm:$0xff] %v6847_v59 }
 0x268   :  { %3403 = vadd.xlane.f32.xlu0 %v3402_v21  ;;  %v6877_v21 = vld [vmem:[%s11248_s4 + $0x70] sm:$0xff] }
 0x269   :  { %3406 = vadd.xlane.f32.xlu1 %v3405_v27  ;;  %v6861_v31 = vpop.xlane.xlu0 %1405 }
 0x26a   :  { %11548 = vst [vmem:[#allocation148_spill] sm:$0xff] %v6861_v31  ;;  %v6865_v56 = vpop.xlane.xlu1 %1396  ;;  %v3414_v31 = vsel %vm934_vm0, %v6872_v41, 0.0 }
 0x26b   :  { %11549 = vst [vmem:[#allocation149_spill] sm:$0xff] %v6865_v56  ;;  %v3417_v56 = vsel %vm934_vm0, %v6877_v21, 0.0 }
 0x26c   :  { %3409 = vadd.xlane.f32.xlu0 %v3408_v39  ;;  %v6895_v39 = vld [vmem:[%s11248_s4 + $0x80] sm:$0xff] }
 0x26d   :  { %3412 = vadd.xlane.f32.xlu1 %v3411_v54  ;;  %v6879_v27 = vpop.xlane.xlu0 %1411  ;;  %v3423_v59 = vsel %vm934_vm0, %v6895_v39, 0.0 }
 0x26e   :  { %11550 = vst [vmem:[#allocation150_spill] sm:$0xff] %v6879_v27  ;;  %v6883_v48 = vpop.xlane.xlu1 %1402  ;;  %v3420_v27 = vsel %vm934_vm0, %v6890_v43, 0.0 }
 0x26f   :  { %11551 = vst [vmem:[#allocation151_spill] sm:$0xff] %v6883_v48 }
 0x270   :  { %3415 = vadd.xlane.f32.xlu0 %v3414_v31  ;;  %v6913_v31 = vld [vmem:[%s11248_s4 + $0x90] sm:$0xff] }
 0x271   :  { %3418 = vadd.xlane.f32.xlu1 %v3417_v56  ;;  %v6897_v54 = vpop.xlane.xlu0 %1417  ;;  %v3429_v35 = vsel %vm934_vm0, %v6913_v31, 0.0 }
 0x272   :  { %11552 = vst [vmem:[#allocation152_spill] sm:$0xff] %v6897_v54  ;;  %v6901_v48 = vpop.xlane.xlu1 %1408  ;;  %v3426_v54 = vsel %vm934_vm0, %v6908_v49, 0.0 }
 0x273   :  { %11553 = vst [vmem:[#allocation153_spill] sm:$0xff] %v6901_v48 }
 0x274   :  { %3421 = vadd.xlane.f32.xlu0 %v3420_v27  ;;  %v6931_v27 = vld [vmem:[%s11248_s4 + $0xa0] sm:$0xff] }
 0x275   :  { %3424 = vadd.xlane.f32.xlu1 %v3423_v59  ;;  %v6915_v56 = vpop.xlane.xlu0 %1423  ;;  %v3435_v62 = vsel %vm934_vm0, %v6931_v27, 0.0 }
 0x276   :  { %11554 = vst [vmem:[#allocation154_spill] sm:$0xff] %v6915_v56  ;;  %v6919_v48 = vpop.xlane.xlu1 %1414  ;;  %v3432_v56 = vsel %vm934_vm0, %v6926_v2, 0.0 }
 0x277   :  { %11555 = vst [vmem:[#allocation155_spill] sm:$0xff] %v6919_v48 }
 0x278   :  { %3427 = vadd.xlane.f32.xlu0 %v3426_v54  ;;  %v6949_v54 = vld [vmem:[%s11248_s4 + $0xb0] sm:$0xff] }
 0x279   :  { %3430 = vadd.xlane.f32.xlu1 %v3429_v35  ;;  %v6933_v59 = vpop.xlane.xlu0 %1429  ;;  %v3441_v63 = vsel %vm934_vm0, %v6949_v54, 0.0 }
 0x27a   :  { %11556 = vst [vmem:[#allocation156_spill] sm:$0xff] %v6933_v59  ;;  %v6937_v48 = vpop.xlane.xlu1 %1420  ;;  %v3438_v59 = vsel %vm934_vm0, %v6944_v38, 0.0 }
 0x27b   :  { %11557 = vst [vmem:[#allocation157_spill] sm:$0xff] %v6937_v48 }
 0x27c   :  { %3433 = vadd.xlane.f32.xlu0 %v3432_v56  ;;  %v6967_v56 = vld [vmem:[%s11248_s4 + $0xc0] sm:$0xff] }
 0x27d   :  { %3436 = vadd.xlane.f32.xlu1 %v3435_v62  ;;  %v6951_v35 = vpop.xlane.xlu0 %1435  ;;  %v3447_v47 = vsel %vm934_vm0, %v6967_v56, 0.0 }
 0x27e   :  { %11558 = vst [vmem:[#allocation158_spill] sm:$0xff] %v6951_v35  ;;  %v6955_v48 = vpop.xlane.xlu1 %1426  ;;  %v3444_v35 = vsel %vm934_vm0, %v6962_v51, 0.0 }
 0x27f   :  { %11559 = vst [vmem:[#allocation159_spill] sm:$0xff] %v6955_v48 }
 0x280   :  { %3439 = vadd.xlane.f32.xlu0 %v3438_v59  ;;  %v6985_v59 = vld [vmem:[%s11248_s4 + $0xd0] sm:$0xff] }
 0x281   :  { %3442 = vadd.xlane.f32.xlu1 %v3441_v63  ;;  %v6969_v62 = vpop.xlane.xlu0 %1441  ;;  %v3453_v24 = vsel %vm934_vm0, %v6985_v59, 0.0 }
 0x282   :  { %11560 = vst [vmem:[#allocation160_spill] sm:$0xff] %v6969_v62  ;;  %v6973_v48 = vpop.xlane.xlu1 %1432  ;;  %v3450_v62 = vsel %vm934_vm0, %v6980_v19, 0.0 }
 0x283   :  { %11561 = vst [vmem:[#allocation161_spill] sm:$0xff] %v6973_v48 }
 0x284   :  { %3445 = vadd.xlane.f32.xlu0 %v3444_v35  ;;  %v7003_v35 = vld [vmem:[%s11248_s4 + $0xe0] sm:$0xff] }
 0x285   :  { %3448 = vadd.xlane.f32.xlu1 %v3447_v47  ;;  %v6987_v63 = vpop.xlane.xlu0 %1447  ;;  %v3459_v32 = vsel %vm934_vm0, %v7003_v35, 0.0 }
 0x286   :  { %11562 = vst [vmem:[#allocation162_spill] sm:$0xff] %v6987_v63  ;;  %v6991_v48 = vpop.xlane.xlu1 %1438  ;;  %v3456_v63 = vsel %vm934_vm0, %v6998_v25, 0.0 }
 0x287   :  { %11563 = vst [vmem:[#allocation163_spill] sm:$0xff] %v6991_v48 }
 0x288   :  { %3451 = vadd.xlane.f32.xlu0 %v3450_v62  ;;  %v7021_v62 = vld [vmem:[%s11248_s4 + $0xf0] sm:$0xff] }
 0x289   :  { %3454 = vadd.xlane.f32.xlu1 %v3453_v24  ;;  %v7005_v47 = vpop.xlane.xlu0 %1453  ;;  %v3465_v60 = vsel %vm934_vm0, %v7021_v62, 0.0 }
 0x28a   :  { %11564 = vst [vmem:[#allocation164_spill] sm:$0xff] %v7005_v47  ;;  %v7009_v48 = vpop.xlane.xlu1 %1444  ;;  %v3462_v47 = vsel %vm934_vm0, %v7016_v61, 0.0 }
 0x28b   :  { %11565 = vst [vmem:[#allocation165_spill] sm:$0xff] %v7009_v48 }
 0x28c   :  { %3457 = vadd.xlane.f32.xlu0 %v3456_v63  ;;  %v7039_v63 = vld [vmem:[%s11248_s4 + $0x100] sm:$0xff] }
 0x28d   :  { %3460 = vadd.xlane.f32.xlu1 %v3459_v32  ;;  %v7023_v24 = vpop.xlane.xlu0 %1459  ;;  %v3471_v4 = vsel %vm934_vm0, %v7039_v63, 0.0 }
 0x28e   :  { %11566 = vst [vmem:[#allocation166_spill] sm:$0xff] %v7023_v24  ;;  %v7027_v48 = vpop.xlane.xlu1 %1450  ;;  %v3468_v24 = vsel %vm934_vm0, %v7034_v34, 0.0 }
 0x28f   :  { %11567 = vst [vmem:[#allocation167_spill] sm:$0xff] %v7027_v48 }
 0x290   :  { %3463 = vadd.xlane.f32.xlu0 %v3462_v47  ;;  %v7057_v47 = vld [vmem:[%s11248_s4 + $0x110] sm:$0xff] }
 0x291   :  { %3466 = vadd.xlane.f32.xlu1 %v3465_v60  ;;  %v7041_v32 = vpop.xlane.xlu0 %1465  ;;  %11571 = vst [vmem:[#allocation171_spill] sm:$0xff] %v7057_v47  ;;  %v3477_v11 = vsel %vm934_vm0, %v7057_v47, 0.0 }
 0x292   :  { %11568 = vst [vmem:[#allocation168_spill] sm:$0xff] %v7041_v32  ;;  %v7045_v48 = vpop.xlane.xlu1 %1456  ;;  %v3474_v32 = vsel %vm934_vm0, %v7052_v33, 0.0  ;;  %v7088_v33 = vld [vmem:[%s11248_s4 + $0x128] sm:$0xff] }
 0x293   :  { %11569 = vst [vmem:[#allocation169_spill] sm:$0xff] %v7045_v48  ;;  %11578 = vst [vmem:[#allocation178_spill] sm:$0xff] %v7088_v33 }
 0x294   :  { %3469 = vadd.xlane.f32.xlu0 %v3468_v24  ;;  %v7075_v24 = vld [vmem:[%s11248_s4 + $0x120] sm:$0xff] }
 0x295   :  { %3472 = vadd.xlane.f32.xlu1 %v3471_v4  ;;  %v7059_v60 = vpop.xlane.xlu0 %1471  ;;  %11575 = vst [vmem:[#allocation175_spill] sm:$0xff] %v7075_v24  ;;  %v3483_v47 = vsel %vm934_vm0, %v7075_v24, 0.0 }
 0x296   :  { %11572 = vst [vmem:[#allocation172_spill] sm:$0xff] %v7059_v60  ;;  %v7063_v48 = vpop.xlane.xlu1 %1462  ;;  %v3480_v60 = vsel %vm934_vm0, %v7070_v3, 0.0  ;;  %v7106_v3 = vld [vmem:[%s11248_s4 + $0x138] sm:$0xff] }
 0x297   :  { %11573 = vst [vmem:[#allocation173_spill] sm:$0xff] %v7063_v48 }
 0x298   :  { %3475 = vadd.xlane.f32.xlu0 %v3474_v32  ;;  %v7093_v32 = vld [vmem:[%s11248_s4 + $0x130] sm:$0xff] }
 0x299   :  { %3478 = vadd.xlane.f32.xlu1 %v3477_v11  ;;  %v7077_v4 = vpop.xlane.xlu0 %1477  ;;  %11579 = vst [vmem:[#allocation179_spill] sm:$0xff] %v7093_v32  ;;  %v3489_v24 = vsel %vm934_vm0, %v7093_v32, 0.0 }
 0x29a   :  { %11576 = vst [vmem:[#allocation176_spill] sm:$0xff] %v7077_v4  ;;  %v7081_v48 = vpop.xlane.xlu1 %1468  ;;  %v3486_v4 = vsel %vm934_vm0, %v7088_v33, 0.0  ;;  %v3575_v33 = vsel %vm934_vm0, %v3535_v6, 0.0 }
 0x29b   :  { %11577 = vst [vmem:[#allocation177_spill] sm:$0xff] %v7081_v48 }
 0x29c   :  { %3481 = vadd.xlane.f32.xlu0 %v3480_v60  ;;  %v5426_v60 = vmov 0  }
 0x29d   :  { %3484 = vadd.xlane.f32.xlu1 %v3483_v47  ;;  %v7095_v11 = vpop.xlane.xlu0 %1483  ;;  %4979 = vset.pattern.permute.xlu0 %v5426_v60 }
 0x29e   :  { %11580 = vst [vmem:[#allocation180_spill] sm:$0xff] %v7095_v11  ;;  %v7099_v48 = vpop.xlane.xlu1 %1474  ;;  %4978 = vset.pattern.permute.xlu1 %v5426_v60  ;;  %v3492_v11 = vsel %vm934_vm0, %v7106_v3, 0.0 }
 0x29f   :  { %11581 = vst [vmem:[#allocation181_spill] sm:$0xff] %v7099_v48  ;;  %v3536_v48 = vmul.f32 %v6769_v55, %v6769_v55  ;;  %v3581_v55 = vsel %vm934_vm0, %v3537_v52, 0.0 }
 0x2a0   :  { %3487 = vadd.xlane.f32.xlu0 %v3486_v4  ;;  %v3538_v4 = vmul.f32 %v6782_v26, %v6782_v26 }
 0x2a1   :  { %3490 = vadd.xlane.f32.xlu1 %v3489_v24  ;;  %v7110_v47 = vpop.xlane.xlu0 %1489  ;;  %v3578_v24 = vsel %vm934_vm0, %v3536_v48, 0.0 }
 0x2a2   :  { %11582 = vst [vmem:[#allocation182_spill] sm:$0xff] %v7110_v47  ;;  %v7116_v32 = vpop.xlane.xlu1 %1480 }
 0x2a3   :  { %11583 = vst [vmem:[#allocation183_spill] sm:$0xff] %v7116_v32  ;;  %v3539_v32 = vmul.f32 %v6787_v50, %v6787_v50  ;;  %v3590_v50 = vsel %vm934_vm0, %v3540_v37, 0.0 }
 0x2a4   :  { %3493 = vadd.xlane.f32.xlu0 %v3492_v11  ;;  %v3541_v11 = vmul.f32 %v6805_v36, %v6805_v36 }
 0x2a5   :  { %3576 = vadd.xlane.f32.xlu1 %v3575_v33  ;;  %v7121_v60 = vpop.xlane.xlu0 %1495  ;;  %v3584_v33 = vsel %vm934_vm0, %v3538_v4, 0.0  ;;  %v3587_v26 = vsel %vm934_vm0, %v3539_v32, 0.0 }
 0x2a6   :  { %v7126_v47 = vpop.xlane.xlu1 %1486  ;;  %v3593_v7 = vsel %vm934_vm0, %v3541_v11, 0.0 }
 0x2a8   :  { %3579 = vadd.xlane.f32.xlu0 %v3578_v24  ;;  %v3542_v24 = vmul.f32 %v6818_v15, %v6818_v15 }
 0x2a9   :  { %3582 = vadd.xlane.f32.xlu1 %v3581_v55  ;;  %v7131_v6 = vpop.xlane.xlu0 %1501  ;;  %v3543_v55 = vmul.f32 %v6823_v28, %v6823_v28 }
 0x2aa   :  { %v7136_v48 = vpop.xlane.xlu1 %1492  ;;  %v3596_v36 = vsel %vm934_vm0, %v3542_v24, 0.0 }
 0x2ab   :  { %v3599_v15 = vsel %vm934_vm0, %v3543_v55, 0.0 }
 0x2ac   :  { %3585 = vadd.xlane.f32.xlu0 %v3584_v33  ;;  %v3544_v33 = vmul.f32 %v6836_v14, %v6836_v14 }
 0x2ad   :  { %3588 = vadd.xlane.f32.xlu1 %v3587_v26  ;;  %v7141_v52 = vpop.xlane.xlu0 %1507  ;;  %v3545_v26 = vmul.f32 %v6841_v22, %v6841_v22 }
 0x2ae   :  { %v7146_v4 = vpop.xlane.xlu1 %1498  ;;  %v3602_v28 = vsel %vm934_vm0, %v3544_v33, 0.0 }
 0x2af   :  { %v3605_v14 = vsel %vm934_vm0, %v3545_v26, 0.0 }
 0x2b0   :  { %3591 = vadd.xlane.f32.xlu0 %v3590_v50  ;;  %v3546_v50 = vmul.f32 %v6854_v18, %v6854_v18 }
 0x2b1   :  { %3594 = vadd.xlane.f32.xlu1 %v3593_v7  ;;  %v7151_v32 = vpop.xlane.xlu0 %1513  ;;  %v3547_v7 = vmul.f32 %v6859_v42, %v6859_v42 }
 0x2b2   :  { %v7156_v37 = vpop.xlane.xlu1 %1504  ;;  %v3608_v22 = vsel %vm934_vm0, %v3546_v50, 0.0 }
 0x2b3   :  { %v3611_v18 = vsel %vm934_vm0, %v3547_v7, 0.0 }
 0x2b4   :  { %3597 = vadd.xlane.f32.xlu0 %v3596_v36  ;;  %v3548_v36 = vmul.f32 %v6872_v41, %v6872_v41 }
 0x2b5   :  { %3600 = vadd.xlane.f32.xlu1 %v3599_v15  ;;  %v7161_v11 = vpop.xlane.xlu0 %1519  ;;  %v3549_v15 = vmul.f32 %v6877_v21, %v6877_v21 }
 0x2b6   :  { %v7166_v24 = vpop.xlane.xlu1 %1510  ;;  %v3614_v42 = vsel %vm934_vm0, %v3548_v36, 0.0 }
 0x2b7   :  { %v3617_v41 = vsel %vm934_vm0, %v3549_v15, 0.0 }
 0x2b8   :  { %3603 = vadd.xlane.f32.xlu0 %v3602_v28  ;;  %v3550_v28 = vmul.f32 %v6890_v43, %v6890_v43 }
 0x2b9   :  { %3606 = vadd.xlane.f32.xlu1 %v3605_v14  ;;  %v7171_v55 = vpop.xlane.xlu0 %1525  ;;  %v3551_v14 = vmul.f32 %v6895_v39, %v6895_v39 }
 0x2ba   :  { %v7176_v33 = vpop.xlane.xlu1 %1516  ;;  %v3620_v21 = vsel %vm934_vm0, %v3550_v28, 0.0 }
 0x2bb   :  { %v3623_v43 = vsel %vm934_vm0, %v3551_v14, 0.0 }
 0x2bc   :  { %3609 = vadd.xlane.f32.xlu0 %v3608_v22  ;;  %v3552_v22 = vmul.f32 %v6908_v49, %v6908_v49 }
 0x2bd   :  { %3612 = vadd.xlane.f32.xlu1 %v3611_v18  ;;  %v7181_v26 = vpop.xlane.xlu0 %1531  ;;  %v3553_v18 = vmul.f32 %v6913_v31, %v6913_v31 }
 0x2be   :  { %v7186_v50 = vpop.xlane.xlu1 %1522  ;;  %v3626_v39 = vsel %vm934_vm0, %v3552_v22, 0.0 }
 0x2bf   :  { %v3629_v49 = vsel %vm934_vm0, %v3553_v18, 0.0 }
 0x2c0   :  { %3615 = vadd.xlane.f32.xlu0 %v3614_v42  ;;  %v3554_v42 = vmul.f32 %v6926_v2, %v6926_v2 }
 0x2c1   :  { %3618 = vadd.xlane.f32.xlu1 %v3617_v41  ;;  %v7191_v7 = vpop.xlane.xlu0 %1537  ;;  %v3555_v41 = vmul.f32 %v6931_v27, %v6931_v27 }
 0x2c2   :  { %v7196_v36 = vpop.xlane.xlu1 %1528  ;;  %v3632_v31 = vsel %vm934_vm0, %v3554_v42, 0.0 }
 0x2c3   :  { %v3635_v2 = vsel %vm934_vm0, %v3555_v41, 0.0 }
 0x2c4   :  { %3621 = vadd.xlane.f32.xlu0 %v3620_v21  ;;  %v3556_v21 = vmul.f32 %v6944_v38, %v6944_v38 }
 0x2c5   :  { %3624 = vadd.xlane.f32.xlu1 %v3623_v43  ;;  %v7201_v15 = vpop.xlane.xlu0 %1543  ;;  %v3557_v43 = vmul.f32 %v6949_v54, %v6949_v54 }
 0x2c6   :  { %v7206_v28 = vpop.xlane.xlu1 %1534  ;;  %v3638_v27 = vsel %vm934_vm0, %v3556_v21, 0.0 }
 0x2c7   :  { %v3641_v38 = vsel %vm934_vm0, %v3557_v43, 0.0  ;;  %v4901_v43 = vpop.f32.mrf.mxu0 }
 0x2c8   :  { %3627 = vadd.xlane.f32.xlu0 %v3626_v39  ;;  %v3558_v39 = vmul.f32 %v6962_v51, %v6962_v51 }
 0x2c9   :  { %3630 = vadd.xlane.f32.xlu1 %v3629_v49  ;;  %v7211_v14 = vpop.xlane.xlu0 %1549  ;;  %v3559_v49 = vmul.f32 %v6967_v56, %v6967_v56  ;;  %v343_v56 = vld [vmem:[%s11247_s2 + $0x88] sm:$0xff] }
 0x2ca   :  { %v7216_v22 = vpop.xlane.xlu1 %1540  ;;  %v3644_v54 = vsel %vm934_vm0, %v3558_v39, 0.0 }
 0x2cb   :  { %v3647_v51 = vsel %vm934_vm0, %v3559_v49, 0.0 }
 0x2cc   :  { %3633 = vadd.xlane.f32.xlu0 %v3632_v31  ;;  %v3560_v31 = vmul.f32 %v6980_v19, %v6980_v19  ;;  %v3562_v19 = vmul.f32 %v6998_v25, %v6998_v25  ;;  %v428_v25 = vsel %vm426_vm1, %v6082_v29, %v6080_v17  ;;  %v427_v17 = vsel %vm426_vm1, %v6084_v1, %v6088_v30 }
 0x2cd   :  { %3636 = vadd.xlane.f32.xlu1 %v3635_v2  ;;  %v7221_v18 = vpop.xlane.xlu0 %1555  ;;  %v3561_v2 = vmul.f32 %v6985_v59, %v6985_v59  ;;  %v3563_v59 = vmul.f32 %v7003_v35, %v7003_v35  ;;  %v3564_v35 = vmul.f32 %v7016_v61, %v7016_v61  ;;  %v465_v29 = vsel %vm463_vm2, %v6106_v9, %v6110_v57  ;;  %v345_v61 = vld [vmem:[%s11247_s2 + $0x98] sm:$0xff] }
 0x2ce   :  { %11584 = vst [vmem:[#allocation184_spill] sm:$0xff] %v7221_v18  ;;  %v7226_v42 = vpop.xlane.xlu1 %1546  ;;  %v3650_v39 = vsel %vm934_vm0, %v3560_v31, 0.0  ;;  %v464_v30 = vsel %vm463_vm2, %v6104_v10, %v6108_v8  ;;  %v502_v1 = vsel %vm500_vm3, %v6281_v40, %v6301_v45  ;;  %v3567_v8 = vmul.f32 %v7039_v63, %v7039_v63 }
 0x2cf   :  { %v3653_v49 = vsel %vm934_vm0, %v3561_v2, 0.0  ;;  %v3656_v2 = vsel %vm934_vm0, %v3562_v19, 0.0  ;;  %v3662_v57 = vsel %vm934_vm0, %v3564_v35, 0.0  ;;  %v381_v10 = vmul.f32 %v5897_v58, %v345_v61  ;;  %v11595_v61 = vld [vmem:[#allocation58_spill] sm:$0xff] }
 0x2d0   :  { %3639 = vadd.xlane.f32.xlu0 %v3638_v27  ;;  %v501_v45 = vsel %vm500_vm3, %v6260_v46, %v6283_v44  ;;  %v429_v63 = vsel %vm426_vm1, %v6102_v16, %v6094_v5  ;;  %v11589_v46 = vld [vmem:[#allocation84_spill] sm:$0xff]  ;;  %v11590_v44 = vld [vmem:[#allocation83_spill] sm:$0xff] }
 0x2d1   :  { %3642 = vadd.xlane.f32.xlu1 %v3641_v38  ;;  %v7231_v41 = vpop.xlane.xlu0 %1561 }
 0x2d2   :  { %11585 = vst [vmem:[#allocation185_spill] sm:$0xff] %v7231_v41  ;;  %v7236_v21 = vpop.xlane.xlu1 %1552  ;;  %v379_v41 = vmul.f32 %v4901_v43, %v343_v56  ;;  %v3659_v43 = vsel %vm934_vm0, %v3563_v59, 0.0  ;;  %v3565_v56 = vmul.f32 %v7021_v62, %v7021_v62  ;;  %v3566_v62 = vmul.f32 %v7034_v34, %v7034_v34 }
 0x2d3   :  { %v539_v34 = vsel %vm537_vm5, %v6424_v12, %v6438_v23 }
 0x2d4   :  { %3645 = vadd.xlane.f32.xlu0 %v3644_v54  ;;  %v227_v54 = vpop.f32.mrf.mxu0  ;;  %v432_v19 = vadd.f32 %v428_v25, %v379_v41 }
 0x2d5   :  { %3648 = vadd.xlane.f32.xlu1 %v3647_v51  ;;  %v7244_v27 = vpop.xlane.xlu0 %1567  ;;  %v342_v51 = vld [vmem:[%s11247_s2 + $0x80] sm:$0xff] }
 0x2d6   :  { %11586 = vst [vmem:[#allocation186_spill] sm:$0xff] %v7244_v27  ;;  %v7249_v38 = vpop.xlane.xlu1 %1558  ;;  %v378_v27 = vmul.f32 %v342_v51, %v227_v54  ;;  %v3665_v54 = vsel %vm934_vm0, %v3565_v56, 0.0  ;;  %v11594_v56 = vld [vmem:[#allocation171_spill] sm:$0xff] }
 0x2d8   :  { %3651 = vadd.xlane.f32.xlu0 %v3650_v39  ;;  %v344_v39 = vld [vmem:[%s11247_s2 + $0x90] sm:$0xff]  ;;  %v431_v41 = vadd.f32 %v427_v17, %v378_v27  ;;  %v430_v27 = vsel %vm426_vm1, %v6086_v53, %v6090_v20  ;;  %v3668_v20 = vsel %vm934_vm0, %v3566_v62, 0.0  ;;  %v11592_v53 = vld [vmem:[#allocation170_spill] sm:$0xff] }
 0x2d9   :  { %3654 = vadd.xlane.f32.xlu1 %v3653_v49  ;;  %v7260_v31 = vpop.xlane.xlu0 %1573  ;;  %v469_v49 = vadd.f32 %v465_v29, %v432_v19  ;;  %v380_v40 = vmul.f32 %v344_v39, %v5904_v0  ;;  %v11588_v0 = vld [vmem:[#allocation64_spill] sm:$0xff]  ;;  %v3568_v23 = vmul.f32 %v11592_v53, %v11592_v53  ;;  %v434_v29 = vadd.f32 %v430_v27, %v381_v10 }
 0x2da   :  { %v7265_v18 = vpop.xlane.xlu1 %1564  ;;  %v468_v51 = vadd.f32 %v464_v30, %v431_v41  ;;  %v466_v25 = vsel %vm463_vm2, %v11588_v0, %v6183_v13  ;;  %v3569_v13 = vmul.f32 %v11594_v56, %v11594_v56  ;;  %v11596_v39 = vld [vmem:[#allocation56_spill] sm:$0xff]  ;;  %v11597_v30 = vld [vmem:[#allocation77_spill] sm:$0xff]  ;;  %v11599_v41 = vld [vmem:[#allocation66_spill] sm:$0xff] }
 0x2db   :  { %v506_v58 = vadd.f32 %v502_v1, %v469_v49  ;;  %v433_v17 = vadd.f32 %v429_v63, %v380_v40  ;;  %v576_v19 = vsel %vm574_vm4, %v11596_v39, %v11595_v61  ;;  %v11598_v1 = vld [vmem:[#allocation75_spill] sm:$0xff]  ;;  %v11600_v49 = vld [vmem:[#allocation65_spill] sm:$0xff]  ;;  %v3674_v10 = vsel %vm934_vm0, %v3568_v23, 0.0  ;;  %v11602_v40 = vld [vmem:[#allocation174_spill] sm:$0xff] }
 0x2dc   :  { %3657 = vadd.xlane.f32.xlu0 %v3656_v2  ;;  %v538_v2 = vsel %vm537_vm5, %v11590_v44, %v11589_v46  ;;  %v505_v5 = vadd.f32 %v501_v45, %v468_v51  ;;  %v11603_v63 = vld [vmem:[#allocation91_spill] sm:$0xff]  ;;  %v11604_v51 = vld [vmem:[#allocation89_spill] sm:$0xff]  ;;  %v3677_v46 = vsel %vm934_vm0, %v3569_v13, 0.0  ;;  %v11609_v23 = vld [vmem:[#allocation78_spill] sm:$0xff] }
 0x2dd   :  { %3660 = vadd.xlane.f32.xlu1 %v3659_v43  ;;  %v7288_v9 = vpop.xlane.xlu0 %3376  ;;  %v543_v16 = vadd.f32 %v539_v34, %v506_v58  ;;  %v3671_v43 = vsel %vm934_vm0, %v3567_v8, 0.0  ;;  %v470_v8 = vadd.f32 %v466_v25, %v433_v17  ;;  %v3570_v34 = vmul.f32 %v11602_v40, %v11602_v40  ;;  %v11606_v44 = vld [vmem:[#allocation175_spill] sm:$0xff]  ;;  %v11611_v17 = vld [vmem:[#allocation70_spill] sm:$0xff]  ;;  %v11612_v61 = vld [vmem:[#allocation68_spill] sm:$0xff] }
 0x2de   :  { %11587 = vst [vmem:[#allocation187_spill] sm:$0xff] %v7288_v9  ;;  %v7293_v59 = vpop.xlane.xlu1 %1570  ;;  %v542_v62 = vadd.f32 %v538_v2, %v505_v5  ;;  %v540_v58 = vsel %vm537_vm5, %v11604_v51, %v11603_v63  ;;  %v3571_v25 = vmul.f32 %v11606_v44, %v11606_v44  ;;  %v11607_v2 = vld [vmem:[#allocation59_spill] sm:$0xff]  ;;  %v11610_v5 = vld [vmem:[#allocation76_spill] sm:$0xff]  ;;  %v613_v39 = vsel %vm611_vm6, %v11612_v61, %v11611_v17  ;;  %v11619_v44 = vld [vmem:[#allocation69_spill] sm:$0xff] }
 0x2df   :  { %v580_v27 = vadd.f32 %v576_v19, %v543_v16  ;;  %v11613_v13 = vld [vmem:[#allocation92_spill] sm:$0xff]  ;;  %v3680_v40 = vsel %vm934_vm0, %v3570_v34, 0.0 }
 0x2e0   :  { %3663 = vadd.xlane.f32.xlu0 %v3662_v57  ;;  %v503_v57 = vsel %vm500_vm3, %v11598_v1, %v11597_v30  ;;  %v11614_v30 = vld [vmem:[#allocation90_spill] sm:$0xff] }
 0x2e1   :  { %3666 = vadd.xlane.f32.xlu1 %v3665_v54  ;;  %v7318_v12 = vpop.xlane.xlu0 %3382  ;;  %v467_v54 = vsel %vm463_vm2, %v11600_v49, %v11599_v41  ;;  %v507_v16 = vadd.f32 %v503_v57, %v470_v8  ;;  %v541_v1 = vsel %vm537_vm5, %v11614_v30, %v11613_v13  ;;  %v11616_v57 = vld [vmem:[#allocation178_spill] sm:$0xff]  ;;  %v617_v8 = vadd.f32 %v613_v39, %v580_v27 }
 0x2e2   :  { %11591 = vst [vmem:[#allocation64_spill] sm:$0xff] %v7318_v12  ;;  %v7323_v35 = vpop.xlane.xlu1 %3379  ;;  %v471_v56 = vadd.f32 %v467_v54, %v434_v29  ;;  %v3572_v29 = vmul.f32 %v11616_v57, %v11616_v57  ;;  %v3574_v13 = vmul.f32 %v7106_v3, %v7106_v3  ;;  %v11636_v3 = vld [vmem:[#allocation95_spill] sm:$0xff]  ;;  %v11707_v12 = vld [vmem:[#allocation18_spill] sm:$0xff] }
 0x2e3   :  { %11593 = vst [vmem:[#allocation84_spill] sm:$0xff] %v7323_v35  ;;  %v544_v41 = vadd.f32 %v540_v58, %v507_v16  ;;  %v7593_v9 = vmul.f32 0.020408163, %v11707_v12 }
 0x2e4   :  { %3669 = vadd.xlane.f32.xlu0 %v3668_v20  ;;  %v11608_v20 = vld [vmem:[#allocation57_spill] sm:$0xff]  ;;  %v3686_v39 = vsel %vm934_vm0, %v3572_v29, 0.0 }
 0x2e5   :  { %3672 = vadd.xlane.f32.xlu1 %v3671_v43  ;;  %v7337_v45 = vpop.xlane.xlu0 %3385  ;;  %v575_v53 = vsel %vm574_vm4, %v11608_v20, %v11607_v2  ;;  %v504_v43 = vsel %vm500_vm3, %v11610_v5, %v11609_v23  ;;  %v11620_v2 = vld [vmem:[#allocation67_spill] sm:$0xff]  ;;  %v11622_v20 = vld [vmem:[#allocation60_spill] sm:$0xff] }
 0x2e6   :  { %11601 = vst [vmem:[#allocation83_spill] sm:$0xff] %v7337_v45  ;;  %v7345_v0 = vpop.xlane.xlu1 %3388  ;;  %v579_v19 = vadd.f32 %v575_v53, %v542_v62  ;;  %v508_v54 = vadd.f32 %v504_v43, %v471_v56  ;;  %v3683_v62 = vsel %vm934_vm0, %v3571_v25, 0.0  ;;  %v612_v58 = vsel %vm611_vm6, %v11620_v2, %v11619_v44  ;;  %v11623_v53 = vld [vmem:[#allocation82_spill] sm:$0xff]  ;;  %v11624_v23 = vld [vmem:[#allocation80_spill] sm:$0xff]  ;;  %v11633_v44 = vld [vmem:[#allocation81_spill] sm:$0xff] }
 0x2e7   :  { %11605 = vst [vmem:[#allocation170_spill] sm:$0xff] %v7345_v0  ;;  %v650_v5 = vsel %vm648_vm7, %v11624_v23, %v11623_v53  ;;  %v11625_v25 = vld [vmem:[#allocation96_spill] sm:$0xff]  ;;  %v11626_v56 = vld [vmem:[#allocation94_spill] sm:$0xff]  ;;  %v11634_v2 = vld [vmem:[#allocation79_spill] sm:$0xff]  ;;  %v3692_v23 = vsel %vm934_vm0, %v3574_v13, 0.0 }
 0x2e8   :  { %3675 = vadd.xlane.f32.xlu0 %v3674_v10  ;;  %v11618_v10 = vld [vmem:[#allocation179_spill] sm:$0xff]  ;;  %v545_v27 = vadd.f32 %v541_v1, %v508_v54  ;;  %v616_v43 = vadd.f32 %v612_v58, %v579_v19  ;;  %v687_v17 = vsel %vm685_vm8, %v11626_v56, %v11625_v25  ;;  %v654_v30 = vadd.f32 %v650_v5, %v617_v8  ;;  %v11631_v54 = vld [vmem:[#allocation73_spill] sm:$0xff]  ;;  %v4659_v56 = vld [vmem:[%s11249_s5] sm:$0xff] }
 0x2e9   :  { %3678 = vadd.xlane.f32.xlu1 %v3677_v46  ;;  %v7362_v49 = vpop.xlane.xlu0 %3391  ;;  %v3573_v51 = vmul.f32 %v11618_v10, %v11618_v10  ;;  %v11621_v46 = vld [vmem:[#allocation62_spill] sm:$0xff]  ;;  %v11629_v19 = vld [vmem:[#allocation63_spill] sm:$0xff]  ;;  %v649_v29 = vsel %vm648_vm7, %v11634_v2, %v11633_v44  ;;  %v11637_v8 = vld [vmem:[#allocation93_spill] sm:$0xff]  ;;  %v4671_v44 = vsel %vm934_vm0, %v4659_v56, 0.0 }
 0x2ea   :  { %11615 = vst [vmem:[#allocation171_spill] sm:$0xff] %v7362_v49  ;;  %v7367_v63 = vpop.xlane.xlu1 %3394  ;;  %v577_v34 = vsel %vm574_vm4, %v11622_v20, %v11621_v46  ;;  %v11632_v10 = vld [vmem:[#allocation71_spill] sm:$0xff]  ;;  %v7401_v58 = vadd.f32 %v687_v17, %v654_v30  ;;  %v686_v46 = vsel %vm685_vm8, %v11637_v8, %v11636_v3  ;;  %v653_v20 = vadd.f32 %v649_v29, %v616_v43  ;;  %v11641_v17 = vld [vmem:[#allocation74_spill] sm:$0xff]  ;;  %v11642_v30 = vld [vmem:[#allocation72_spill] sm:$0xff] }
 0x2eb   :  { %11617 = vst [vmem:[#allocation58_spill] sm:$0xff] %v7367_v63  ;;  %v581_v16 = vadd.f32 %v577_v34, %v544_v41  ;;  %v3689_v1 = vsel %vm934_vm0, %v3573_v51, 0.0  ;;  %v11644_v43 = vld [vmem:[#allocation85_spill] sm:$0xff]  ;;  %v4661_v3 = vld [vmem:[%s11249_s5 + $0x10] sm:$0xff] }
 0x2ec   :  { %3681 = vadd.xlane.f32.xlu0 %v3680_v40  ;;  %v11630_v40 = vld [vmem:[#allocation61_spill] sm:$0xff]  ;;  %11635 = vst [vmem:[#allocation75_spill] sm:$0xff] %v7401_v58  ;;  %v7411_v25 = vadd.f32 %v686_v46, %v653_v20  ;;  %v11650_v8 = vld [vmem:[#allocation88_spill] sm:$0xff]  ;;  %v11651_v46 = vld [vmem:[#allocation86_spill] sm:$0xff] }
 0x2ed   :  { %3684 = vadd.xlane.f32.xlu1 %v3683_v62  ;;  %v7384_v61 = vpop.xlane.xlu0 %3397  ;;  %v578_v41 = vsel %vm574_vm4, %v11630_v40, %v11629_v19  ;;  %v614_v62 = vsel %vm611_vm6, %v11632_v10, %v11631_v54  ;;  %v11646_v19 = vld [vmem:[#allocation97_spill] sm:$0xff]  ;;  %v4546_v40 = vsel %vm934_vm0, %v7401_v58, 0.0  ;;  %v11699_v63 = vld [vmem:[#allocation16_spill] sm:$0xff] }
 0x2ee   :  { %11627 = vst [vmem:[#allocation56_spill] sm:$0xff] %v7384_v61  ;;  %v7389_v57 = vpop.xlane.xlu1 %3400  ;;  %v582_v51 = vadd.f32 %v578_v41, %v545_v27  ;;  %v618_v34 = vadd.f32 %v614_v62, %v581_v16  ;;  %11640 = vst [vmem:[#allocation174_spill] sm:$0xff] %v7411_v25  ;;  %v11643_v27 = vld [vmem:[#allocation87_spill] sm:$0xff]  ;;  %v4543_v29 = vsel %vm934_vm0, %v7411_v25, 0.0  ;;  %v11652_v20 = vld [vmem:[#allocation101_spill] sm:$0xff] }
 0x2ef   :  { %11628 = vst [vmem:[#allocation77_spill] sm:$0xff] %v7389_v57  ;;  %v651_v16 = vsel %vm648_vm7, %v11644_v43, %v11643_v27  ;;  %v4677_v27 = vsel %vm934_vm0, %v4661_v3, 0.0  ;;  %v11698_v57 = vld [vmem:[#allocation141_spill] sm:$0xff]  ;;  %v7570_v49 = vmul.f32 0.020408163, %v11699_v63  ;;  %11708 = vst [vmem:[#allocation87_spill] sm:$0xff] %v7593_v9 }
 0x2f0   :  { %3687 = vadd.xlane.f32.xlu0 %v3686_v39  ;;  %v615_v39 = vsel %vm611_vm6, %v11642_v30, %v11641_v17  ;;  %v655_v54 = vadd.f32 %v651_v16, %v618_v34  ;;  %v11653_v34 = vld [vmem:[#allocation98_spill] sm:$0xff] }
 0x2f1   :  { %3690 = vadd.xlane.f32.xlu1 %v3689_v1  ;;  %v7406_v53 = vpop.xlane.xlu0 %3403  ;;  %v11645_v1 = vld [vmem:[#allocation99_spill] sm:$0xff]  ;;  %v619_v41 = vadd.f32 %v615_v39, %v582_v51  ;;  %v652_v51 = vsel %vm648_vm7, %v11651_v46, %v11650_v8  ;;  %11700 = vst [vmem:[#allocation95_spill] sm:$0xff] %v7570_v49 }
 0x2f2   :  { %11638 = vst [vmem:[#allocation66_spill] sm:$0xff] %v7406_v53  ;;  %v7409_v5 = vpop.xlane.xlu1 %3406  ;;  %v688_v13 = vsel %vm685_vm8, %v11646_v19, %v11645_v1  ;;  %v4559_v1 = vmul.f32 %v7411_v25, %v7411_v25 }
 0x2f3   :  { %11639 = vst [vmem:[#allocation65_spill] sm:$0xff] %v7409_v5  ;;  %v7432_v2 = vadd.f32 %v688_v13, %v655_v54  ;;  %v656_v17 = vadd.f32 %v652_v51, %v619_v41  ;;  %v11658_v13 = vld [vmem:[#allocation2_spill] sm:$0xff]  ;;  %v4660_v54 = vld [vmem:[%s11249_s5 + $0x8] sm:$0xff] }
 0x2f4   :  { %3693 = vadd.xlane.f32.xlu0 %v3692_v23  ;;  %v689_v23 = vsel %vm685_vm8, %v11653_v34, %v11652_v20  ;;  %v4563_v46 = vsel %vm934_vm0, %v4559_v1, 0.0  ;;  %v4674_v34 = vsel %vm934_vm0, %v4660_v54, 0.0  ;;  %v4662_v1 = vld [vmem:[%s11249_s5 + $0x18] sm:$0xff] }
 0x2f5   :  { %v7427_v10 = vpop.xlane.xlu0 %3409  ;;  %4547 = vadd.xlane.f32.xlu1 %v4546_v40  ;;  %11649 = vst [vmem:[#allocation175_spill] sm:$0xff] %v7432_v2  ;;  %v7450_v43 = vadd.f32 %v689_v23, %v656_v17  ;;  %v4549_v16 = vsel %vm934_vm0, %v7432_v2, 0.0  ;;  %v7459_v40 = vmul.f32 0.020408163, %v11658_v13  ;;  %v4561_v51 = vmul.f32 %v7432_v2, %v7432_v2  ;;  %v11662_v17 = vld [vmem:[#allocation3_spill] sm:$0xff] }
 0x2f6   :  { %11647 = vst [vmem:[#allocation91_spill] sm:$0xff] %v7427_v10  ;;  %v7429_v62 = vpop.xlane.xlu1 %3412  ;;  %v4687_v13 = vmul.f32 %v4659_v56, %v4659_v56  ;;  %v11688_v10 = vld [vmem:[#allocation139_spill] sm:$0xff] }
 0x2f7   :  { %11648 = vst [vmem:[#allocation89_spill] sm:$0xff] %v7429_v62  ;;  %11656 = vst [vmem:[#allocation78_spill] sm:$0xff] %v7450_v43  ;;  %v1655_v23 = vmul.f32 %v7459_v40, %v7459_v40  ;;  %v4690_v62 = vmul.f32 %v4662_v1, %v4662_v1  ;;  %v1585_v5 = vmul.f32 0.020408163, %v11688_v10 }
 0x2f8   :  { %4544 = vadd.xlane.f32.xlu0 %v4543_v29  ;;  %v11660_v29 = vld [vmem:[#allocation129_spill] sm:$0xff]  ;;  %v4691_v56 = vsel %vm934_vm0, %v4687_v13, 0.0 }
 0x2f9   :  { %v7445_v30 = vpop.xlane.xlu0 %3415  ;;  %4672 = vadd.xlane.f32.xlu1 %v4671_v44  ;;  %v4552_v44 = vsel %vm934_vm0, %v7450_v43, 0.0  ;;  %v1575_v8 = vmul.f32 0.020408163, %v11660_v29  ;;  %v11664_v29 = vld [vmem:[#allocation131_spill] sm:$0xff] }
 0x2fa   :  { %11654 = vst [vmem:[#allocation59_spill] sm:$0xff] %v7445_v30  ;;  %v7447_v39 = vpop.xlane.xlu1 %3418  ;;  %v1577_v2 = vmul.f32 0.020408163, %v11664_v29 }
 0x2fb   :  { %11655 = vst [vmem:[#allocation57_spill] sm:$0xff] %v7447_v39  ;;  %v11671_v39 = vld [vmem:[#allocation6_spill] sm:$0xff] }
 0x2fc   :  { %4550 = vadd.xlane.f32.xlu0 %v4549_v16  ;;  %v7506_v30 = vmul.f32 0.020408163, %v11671_v39 }
 0x2fd   :  { %v7456_v19 = vpop.xlane.xlu0 %3421  ;;  %4678 = vadd.xlane.f32.xlu1 %v4677_v27  ;;  %v7478_v27 = vmul.f32 0.020408163, %v11662_v17 }
 0x2fe   :  { %11657 = vst [vmem:[#allocation76_spill] sm:$0xff] %v7456_v19  ;;  %v7461_v41 = vpop.xlane.xlu1 %3424 }
 0x2ff   :  { %11659 = vst [vmem:[#allocation70_spill] sm:$0xff] %v7461_v41  ;;  %v1657_v17 = vmul.f32 %v7478_v27, %v7478_v27 }
 0x300   :  { %4553 = vadd.xlane.f32.xlu0 %v4552_v44  ;;  %v1735_v44 = vsub.f32 %v1575_v8, %v1655_v23  ;;  %v4689_v8 = vmul.f32 %v4661_v3, %v4661_v3 }
 0x301   :  { %v7472_v20 = vpop.xlane.xlu0 %3427  ;;  %4564 = vadd.xlane.f32.xlu1 %v4563_v46  ;;  %v4569_v46 = vsel %vm934_vm0, %v4561_v51, 0.0  ;;  %v11669_v51 = vld [vmem:[#allocation128_spill] sm:$0xff] }
 0x302   :  { %11661 = vst [vmem:[#allocation68_spill] sm:$0xff] %v7472_v20  ;;  %v7480_v16 = vpop.xlane.xlu1 %3430  ;;  %v4680_v20 = vsel %vm934_vm0, %v4662_v1, 0.0  ;;  %v1578_v23 = vmul.f32 0.020408163, %v11669_v51  ;;  %v1815_v29 = vadd.f32 1e-05, %v1735_v44  ;;  %v4562_v44 = vmul.f32 %v7450_v43, %v7450_v43 }
 0x303   :  { %11663 = vst [vmem:[#allocation92_spill] sm:$0xff] %v7480_v16  ;;  %v11666_v16 = vld [vmem:[#allocation5_spill] sm:$0xff]  ;;  %v4697_v3 = vsel %vm934_vm0, %v4689_v8, 0.0  ;;  %v11674_v51 = vld [vmem:[#allocation4_spill] sm:$0xff]  ;;  %v1659_v8 = vmul.f32 %v7506_v30, %v7506_v30 }
 0x304   :  { %4675 = vadd.xlane.f32.xlu0 %v4674_v34  ;;  %v7493_v41 = vmul.f32 0.020408163, %v11666_v16  ;;  %v4560_v34 = vmul.f32 %v7401_v58, %v7401_v58  ;;  %4980 = vrsqrt.f32 %v1815_v29  ;;  %v7516_v58 = vmul.f32 0.020408163, %v11674_v51  ;;  %v11689_v1 = vld [vmem:[#allocation9_spill] sm:$0xff] }
 0x305   :  { %v7487_v25 = vpop.xlane.xlu0 %3433  ;;  %4570 = vadd.xlane.f32.xlu1 %v4569_v46  ;;  %v1737_v46 = vsub.f32 %v1577_v2, %v1657_v17  ;;  %v11673_v17 = vld [vmem:[#allocation133_spill] sm:$0xff] }
 0x306   :  { %11665 = vst [vmem:[#allocation90_spill] sm:$0xff] %v7487_v25  ;;  %11667 = vst [vmem:[#allocation178_spill] sm:$0xff] %v7493_v41  ;;  %v7495_v19 = vpop.xlane.xlu1 %3436  ;;  %v1658_v16 = vmul.f32 %v7493_v41, %v7493_v41  ;;  %v4566_v13 = vsel %vm934_vm0, %v4560_v34, 0.0  ;;  %v11677_v34 = vld [vmem:[#allocation7_spill] sm:$0xff] }
 0x307   :  { %11668 = vst [vmem:[#allocation179_spill] sm:$0xff] %v7495_v19  ;;  %11675 = vst [vmem:[#allocation62_spill] sm:$0xff] %v7516_v58 }
 0x308   :  { %4681 = vadd.xlane.f32.xlu0 %v4680_v20  ;;  %v1738_v2 = vsub.f32 %v1578_v23, %v1658_v16  ;;  %v1817_v20 = vadd.f32 1e-05, %v1737_v46  ;;  %v11680_v23 = vld [vmem:[#allocation126_spill] sm:$0xff]  ;;  %v4572_v46 = vsel %vm934_vm0, %v4562_v44, 0.0 }
 0x309   :  { %v7501_v25 = vpop.xlane.xlu0 %3439  ;;  %4692 = vadd.xlane.f32.xlu1 %v4691_v56  ;;  %v1579_v56 = vmul.f32 0.020408163, %v11673_v17  ;;  %v1576_v29 = vmul.f32 0.020408163, %v11680_v23 }
 0x30a   :  { %11670 = vst [vmem:[#allocation69_spill] sm:$0xff] %v7501_v25  ;;  %v7508_v19 = vpop.xlane.xlu1 %3442  ;;  %v7523_v25 = vmul.f32 0.020408163, %v11677_v34  ;;  %v1818_v16 = vadd.f32 1e-05, %v1738_v2  ;;  %4982 = vrsqrt.f32 %v1817_v20  ;;  %v11684_v2 = vld [vmem:[#allocation12_spill] sm:$0xff] }
 0x30b   :  { %11672 = vst [vmem:[#allocation67_spill] sm:$0xff] %v7508_v19  ;;  %v4688_v19 = vmul.f32 %v4660_v54, %v4660_v54  ;;  %v1739_v51 = vsub.f32 %v1579_v56, %v1659_v8  ;;  %v1656_v54 = vmul.f32 %v7516_v58, %v7516_v58  ;;  %v7541_v23 = vmul.f32 0.020408163, %v11684_v2  ;;  %v11687_v8 = vld [vmem:[#allocation135_spill] sm:$0xff] }
 0x30c   :  { %4567 = vadd.xlane.f32.xlu0 %v4566_v13  ;;  %11678 = vst [vmem:[#allocation82_spill] sm:$0xff] %v7523_v25  ;;  %v11681_v13 = vld [vmem:[#allocation130_spill] sm:$0xff]  ;;  %v1660_v44 = vmul.f32 %v7523_v25, %v7523_v25  ;;  %4984 = vrsqrt.f32 %v1818_v16  ;;  %v4700_v2 = vsel %vm934_vm0, %v4690_v62, 0.0  ;;  %v1587_v62 = vmul.f32 0.020408163, %v11698_v57 }
 0x30d   :  { %v7518_v39 = vpop.xlane.xlu0 %3445  ;;  %4698 = vadd.xlane.f32.xlu1 %v4697_v3  ;;  %v1580_v17 = vmul.f32 0.020408163, %v11681_v13  ;;  %v11682_v3 = vld [vmem:[#allocation8_spill] sm:$0xff]  ;;  %11685 = vst [vmem:[#allocation94_spill] sm:$0xff] %v7541_v23  ;;  %v1736_v56 = vsub.f32 %v1576_v29, %v1656_v54  ;;  %v1665_v16 = vmul.f32 %v7541_v23, %v7541_v23 }
 0x30e   :  { %11676 = vst [vmem:[#allocation60_spill] sm:$0xff] %v7518_v39  ;;  %v7525_v43 = vpop.xlane.xlu1 %3448  ;;  %v7533_v39 = vmul.f32 0.020408163, %v11682_v3  ;;  %v1819_v3 = vadd.f32 1e-05, %v1739_v51  ;;  %v11697_v54 = vld [vmem:[#allocation132_spill] sm:$0xff] }
 0x30f   :  { %11679 = vst [vmem:[#allocation80_spill] sm:$0xff] %v7525_v43  ;;  %v4694_v43 = vsel %vm934_vm0, %v4688_v19, 0.0  ;;  %v1740_v13 = vsub.f32 %v1580_v17, %v1660_v44  ;;  %v11694_v17 = vld [vmem:[#allocation14_spill] sm:$0xff]  ;;  %v1582_v44 = vmul.f32 0.020408163, %v11697_v54  ;;  %v11706_v54 = vld [vmem:[#allocation143_spill] sm:$0xff] }
 0x310   :  { %4573 = vadd.xlane.f32.xlu0 %v4572_v46  ;;  %v1581_v46 = vmul.f32 0.020408163, %v11687_v8  ;;  %v1661_v19 = vmul.f32 %v7533_v39, %v7533_v39  ;;  %v7561_v51 = vmul.f32 0.020408163, %v11694_v17  ;;  %4986 = vrsqrt.f32 %v1819_v3  ;;  %v11704_v3 = vld [vmem:[#allocation137_spill] sm:$0xff] }
 0x311   :  { %v7535_v34 = vpop.xlane.xlu0 %3451 }
 0x312   :  { %11683 = vst [vmem:[#allocation96_spill] sm:$0xff] %v7535_v34  ;;  %v7543_v20 = vpop.xlane.xlu1 %3454  ;;  %v7550_v34 = vmul.f32 0.020408163, %v11689_v1  ;;  %11695 = vst [vmem:[#allocation81_spill] sm:$0xff] %v7561_v51  ;;  %v1741_v8 = vsub.f32 %v1581_v46, %v1661_v19  ;;  %v1820_v1 = vadd.f32 1e-05, %v1740_v13  ;;  %v1667_v57 = vmul.f32 %v7561_v51, %v7561_v51 }
 0x313   :  { %11686 = vst [vmem:[#allocation63_spill] sm:$0xff] %v7543_v20  ;;  %v11692_v20 = vld [vmem:[#allocation10_spill] sm:$0xff]  ;;  %v1583_v19 = vmul.f32 0.020408163, %v11704_v3 }
 0x314   :  { %4695 = vadd.xlane.f32.xlu0 %v4694_v43  ;;  %11690 = vst [vmem:[#allocation61_spill] sm:$0xff] %v7550_v34  ;;  %v7556_v29 = vmul.f32 0.020408163, %v11692_v20  ;;  %v1816_v43 = vadd.f32 1e-05, %v1736_v56  ;;  %v4981_v20 = vpop.eup %4980  ;;  %v1662_v61 = vmul.f32 %v7550_v34, %v7550_v34  ;;  %v774_v56 = vld [vmem:[%s11250_s6] sm:$0xff]  ;;  %v1747_v0 = vsub.f32 %v1587_v62, %v1667_v57 }
 0x315   :  { %v7552_v53 = vpop.xlane.xlu0 %3457  ;;  %v7588_v45 = vmul.f32 %v4981_v20, %v774_v56  ;;  %v11712_v20 = vld [vmem:[#allocation145_spill] sm:$0xff] }
 0x316   :  { %11691 = vst [vmem:[#allocation73_spill] sm:$0xff] %v7552_v53  ;;  %11693 = vst [vmem:[#allocation71_spill] sm:$0xff] %v7556_v29  ;;  %v7563_v10 = vpop.xlane.xlu1 %3460  ;;  %v1745_v53 = vsub.f32 %v1585_v5, %v1665_v16  ;;  %v1663_v46 = vmul.f32 %v7556_v29, %v7556_v29  ;;  %v11702_v5 = vld [vmem:[#allocation11_spill] sm:$0xff]  ;;  %4988 = vrsqrt.f32 %v1816_v43  ;;  %v1742_v63 = vsub.f32 %v1582_v44, %v1662_v61  ;;  %v776_v61 = vld [vmem:[%s11250_s6 + $0x10] sm:$0xff] }
 0x317   :  { %11696 = vst [vmem:[#allocation79_spill] sm:$0xff] %v7563_v10  ;;  %v7580_v13 = vmul.f32 0.020408163, %v11702_v5  ;;  %v1821_v16 = vadd.f32 1e-05, %v1741_v8  ;;  %4990 = vrsqrt.f32 %v1820_v1  ;;  %v4983_v35 = vpop.eup %4982  ;;  %v1669_v5 = vmul.f32 %v7570_v49, %v7570_v49  ;;  %v11713_v57 = vld [vmem:[#allocation13_spill] sm:$0xff] }
 0x318   :  { %4701 = vadd.xlane.f32.xlu0 %v4700_v2  ;;  %v1825_v10 = vadd.f32 1e-05, %v1745_v53  ;;  %v11710_v53 = vld [vmem:[#allocation134_spill] sm:$0xff]  ;;  %v1743_v8 = vsub.f32 %v1583_v19, %v1663_v46  ;;  %v1822_v62 = vadd.f32 1e-05, %v1742_v63  ;;  %v1671_v46 = vmul.f32 %v7593_v9, %v7593_v9  ;;  %v11715_v19 = vld [vmem:[#allocation20_spill] sm:$0xff] }
 0x319   :  { %v7572_v17 = vpop.xlane.xlu0 %3463  ;;  %11703 = vst [vmem:[#allocation74_spill] sm:$0xff] %v7580_v13  ;;  %v1664_v43 = vmul.f32 %v7580_v13, %v7580_v13  ;;  %v1584_v44 = vmul.f32 0.020408163, %v11710_v53  ;;  %4992 = vrsqrt.f32 %v1821_v16  ;;  %v1591_v56 = vmul.f32 0.020408163, %v11712_v20  ;;  %v4985_v13 = vpop.eup %4984  ;;  %v11718_v16 = vld [vmem:[#allocation136_spill] sm:$0xff] }
 0x31a   :  { %11701 = vst [vmem:[#allocation93_spill] sm:$0xff] %v7572_v17  ;;  %v7585_v2 = vpop.xlane.xlu1 %3466  ;;  %v1589_v17 = vmul.f32 0.020408163, %v11706_v54  ;;  %v7608_v54 = vmul.f32 0.020408163, %v11713_v57  ;;  %4994 = vrsqrt.f32 %v1825_v10  ;;  %v11720_v20 = vld [vmem:[#allocation147_spill] sm:$0xff] }
 0x31b   :  { %11705 = vst [vmem:[#allocation72_spill] sm:$0xff] %v7585_v2  ;;  %v7610_v2 = vmul.f32 %v4983_v35, %v776_v61  ;;  %v7615_v53 = vmul.f32 0.020408163, %v11715_v19  ;;  %v1744_v63 = vsub.f32 %v1584_v44, %v1664_v43  ;;  %v1823_v10 = vadd.f32 1e-05, %v1743_v8  ;;  %v11730_v49 = vld [vmem:[#allocation17_spill] sm:$0xff] }
 0x31c   :  { %v1749_v12 = vsub.f32 %v1589_v17, %v1669_v5  ;;  %11714 = vst [vmem:[#allocation97_spill] sm:$0xff] %v7608_v54  ;;  %v777_v17 = vld [vmem:[%s11250_s6 + $0x18] sm:$0xff]  ;;  %v1586_v5 = vmul.f32 0.020408163, %v11718_v16  ;;  %4996 = vrsqrt.f32 %v1822_v62  ;;  %v1751_v61 = vsub.f32 %v1591_v56, %v1671_v46  ;;  %v11724_v16 = vld [vmem:[#allocation22_spill] sm:$0xff] }
 0x31d   :  { %v7595_v3 = vpop.xlane.xlu0 %3469  ;;  %11716 = vst [vmem:[#allocation88_spill] sm:$0xff] %v7615_v53  ;;  %v1593_v57 = vmul.f32 0.020408163, %v11720_v20  ;;  %v1666_v19 = vmul.f32 %v7608_v54, %v7608_v54  ;;  %v7632_v43 = vmul.f32 %v4985_v13, %v777_v17  ;;  %v4987_v44 = vpop.eup %4986  ;;  %v1673_v8 = vmul.f32 %v7615_v53, %v7615_v53 }
 0x31e   :  { %11709 = vst [vmem:[#allocation85_spill] sm:$0xff] %v7595_v3  ;;  %v7603_v1 = vpop.xlane.xlu1 %3472  ;;  %2217 = vperm.xlu1 %4978, %v7588_v45   ;;  %v1827_v3 = vadd.f32 1e-05, %v1747_v0  ;;  %v1829_v35 = vadd.f32 1e-05, %v1749_v12  ;;  %v778_v12 = vld [vmem:[%s11250_s6 + $0x20] sm:$0xff] }
 0x31f   :  { %11711 = vst [vmem:[#allocation99_spill] sm:$0xff] %v7603_v1  ;;  %11723 = vst [vmem:[#allocation2_spill] sm:$0xff] %v7632_v43  ;;  %v1824_v56 = vadd.f32 1e-05, %v1744_v63  ;;  %v1746_v46 = vsub.f32 %v1586_v5, %v1666_v19  ;;  %v1831_v17 = vadd.f32 1e-05, %v1751_v61  ;;  %v1753_v20 = vsub.f32 %v1593_v57, %v1673_v8 }
 0x320   :  { %4998 = vrsqrt.f32 %v1827_v3  ;;  %v7652_v34 = vmul.f32 0.020408163, %v11730_v49  ;;  %v7654_v63 = vmul.f32 %v4987_v44, %v778_v12  ;;  %v11732_v19 = vld [vmem:[#allocation24_spill] sm:$0xff]  ;;  %v779_v61 = vld [vmem:[%s11250_s6 + $0x28] sm:$0xff] }
 0x321   :  { %v7617_v1 = vpop.xlane.xlu0 %3475  ;;  %5000 = vrsqrt.f32 %v1823_v10  ;;  %v775_v49 = vld [vmem:[%s11250_s6 + $0x8] sm:$0xff]  ;;  %v1826_v57 = vadd.f32 1e-05, %v1746_v46  ;;  %v11735_v8 = vld [vmem:[#allocation140_spill] sm:$0xff] }
 0x322   :  { %11717 = vst [vmem:[#allocation86_spill] sm:$0xff] %v7617_v1  ;;  %v7623_v0 = vpop.xlane.xlu1 %3478  ;;  %2227 = vperm.xlu1 %4978, %v7610_v2   ;;  %v11721_v1 = vld [vmem:[#allocation15_spill] sm:$0xff]  ;;  %5002 = vrsqrt.f32 %v1829_v35  ;;  %11731 = vst [vmem:[#allocation5_spill] sm:$0xff] %v7652_v34  ;;  %v1590_v12 = vmul.f32 0.020408163, %v11735_v8 }
 0x323   :  { %11719 = vst [vmem:[#allocation101_spill] sm:$0xff] %v7623_v0  ;;  %v7630_v9 = vmul.f32 0.020408163, %v11721_v1  ;;  %v7637_v0 = vmul.f32 0.020408163, %v11724_v16  ;;  %v11727_v1 = vld [vmem:[#allocation138_spill] sm:$0xff]  ;;  %v4989_v54 = vpop.eup %4988  ;;  %5004 = vrsqrt.f32 %v1824_v56 }
 0x324   :  { %v1588_v3 = vmul.f32 0.020408163, %v11727_v1  ;;  %v11729_v16 = vld [vmem:[#allocation149_spill] sm:$0xff]  ;;  %v4991_v5 = vpop.eup %4990  ;;  %v7659_v1 = vmul.f32 0.020408163, %v11732_v19  ;;  %5006 = vrsqrt.f32 %v1831_v17  ;;  %v7678_v56 = vmul.f32 %v4989_v54, %v775_v49  ;;  %v11740_v46 = vld [vmem:[#allocation19_spill] sm:$0xff] }
 0x325   :  { %11722 = vst [vmem:[#allocation98_spill] sm:$0xff] %v7630_v9  ;;  %11725 = vst [vmem:[#allocation129_spill] sm:$0xff] %v7637_v0  ;;  %v7639_v62 = vpop.xlane.xlu0 %3481  ;;  %v1595_v53 = vmul.f32 0.020408163, %v11729_v16  ;;  %v1675_v10 = vmul.f32 %v7637_v0, %v7637_v0  ;;  %v1833_v19 = vadd.f32 1e-05, %v1753_v20  ;;  %v1670_v0 = vmul.f32 %v7652_v34, %v7652_v34 }
 0x326   :  { %11726 = vst [vmem:[#allocation3_spill] sm:$0xff] %v7639_v62  ;;  %v7645_v13 = vpop.xlane.xlu1 %3484  ;;  %2232 = vperm.xlu1 %4978, %v7632_v43   ;;  %v1668_v62 = vmul.f32 %v7630_v9, %v7630_v9  ;;  %11733 = vst [vmem:[#allocation128_spill] sm:$0xff] %v7659_v1  ;;  %v11737_v9 = vld [vmem:[#allocation151_spill] sm:$0xff]  ;;  %v7676_v25 = vmul.f32 %v4991_v5, %v779_v61  ;;  %v1677_v8 = vmul.f32 %v7659_v1, %v7659_v1  ;;  %v11743_v20 = vld [vmem:[#allocation26_spill] sm:$0xff] }
 0x327   :  { %11728 = vst [vmem:[#allocation131_spill] sm:$0xff] %v7645_v13  ;;  %v4993_v13 = vpop.eup %4992  ;;  %v1597_v51 = vmul.f32 0.020408163, %v11737_v9  ;;  %11739 = vst [vmem:[#allocation7_spill] sm:$0xff] %v7678_v56  ;;  %v784_v9 = vld [vmem:[%s11250_s6 + $0x50] sm:$0xff]  ;;  %5008 = vrsqrt.f32 %v1826_v57  ;;  %v11746_v49 = vld [vmem:[#allocation142_spill] sm:$0xff] }
 0x328   :  { %v1748_v44 = vsub.f32 %v1588_v3, %v1668_v62  ;;  %11738 = vst [vmem:[#allocation4_spill] sm:$0xff] %v7676_v25  ;;  %v4995_v62 = vpop.eup %4994  ;;  %v7681_v3 = vmul.f32 0.020408163, %v11740_v46  ;;  %v7694_v54 = vmul.f32 0.020408163, %v11743_v20  ;;  %5010 = vrsqrt.f32 %v1833_v19  ;;  %v11747_v34 = vld [vmem:[#allocation153_spill] sm:$0xff] }
 0x329   :  { %v7661_v35 = vpop.xlane.xlu0 %3487  ;;  %v1592_v46 = vmul.f32 0.020408163, %v11746_v49  ;;  %v1757_v1 = vsub.f32 %v1597_v51, %v1677_v8  ;;  %v1599_v23 = vmul.f32 0.020408163, %v11747_v34  ;;  %v7704_v20 = vmul.f32 %v4995_v62, %v784_v9  ;;  %v786_v34 = vld [vmem:[%s11250_s6 + $0x60] sm:$0xff]  ;;  %v11754_v62 = vld [vmem:[#allocation28_spill] sm:$0xff] }
 0x32a   :  { %11734 = vst [vmem:[#allocation6_spill] sm:$0xff] %v7661_v35  ;;  %v7670_v16 = vpop.xlane.xlu1 %3490  ;;  %2237 = vperm.xlu1 %4978, %v7654_v63   ;;  %v1755_v35 = vsub.f32 %v1595_v53, %v1675_v10  ;;  %11741 = vst [vmem:[#allocation126_spill] sm:$0xff] %v7681_v3  ;;  %v780_v53 = vld [vmem:[%s11250_s6 + $0x30] sm:$0xff]  ;;  %v1828_v5 = vadd.f32 1e-05, %v1748_v44  ;;  %v1750_v10 = vsub.f32 %v1590_v12, %v1670_v0  ;;  %v781_v0 = vld [vmem:[%s11250_s6 + $0x38] sm:$0xff] }
 0x32b   :  { %11736 = vst [vmem:[#allocation133_spill] sm:$0xff] %v7670_v16  ;;  %11744 = vst [vmem:[#allocation8_spill] sm:$0xff] %v7694_v54  ;;  %v4997_v16 = vpop.eup %4996  ;;  %v7702_v43 = vmul.f32 %v4993_v13, %v780_v53  ;;  %v1672_v44 = vmul.f32 %v7681_v3, %v7681_v3  ;;  %v11749_v12 = vld [vmem:[#allocation21_spill] sm:$0xff]  ;;  %v1679_v13 = vmul.f32 %v7694_v54, %v7694_v54  ;;  %v7725_v8 = vmul.f32 0.020408163, %v11754_v62  ;;  %v11759_v62 = vld [vmem:[#allocation155_spill] sm:$0xff] }
 0x32c   :  { %11748 = vst [vmem:[#allocation135_spill] sm:$0xff] %v7704_v20  ;;  %v7712_v49 = vmul.f32 0.020408163, %v11749_v12  ;;  %5012 = vrsqrt.f32 %v1828_v5  ;;  %v1830_v53 = vadd.f32 1e-05, %v1750_v10  ;;  %v7732_v3 = vmul.f32 %v4997_v16, %v781_v0  ;;  %v782_v10 = vld [vmem:[%s11250_s6 + $0x40] sm:$0xff] }
 0x32d   :  { %v7685_v17 = vpop.xlane.xlu0 %3493  ;;  %v4999_v57 = vpop.eup %4998  ;;  %11755 = vst [vmem:[#allocation14_spill] sm:$0xff] %v7725_v8  ;;  %v1837_v54 = vadd.f32 1e-05, %v1757_v1  ;;  %v1759_v41 = vsub.f32 %v1599_v23, %v1679_v13  ;;  %v1601_v29 = vmul.f32 0.020408163, %v11759_v62  ;;  %v1681_v23 = vmul.f32 %v7725_v8, %v7725_v8 }
 0x32e   :  { %11742 = vst [vmem:[#allocation130_spill] sm:$0xff] %v7685_v17  ;;  %v7696_v61 = vpop.xlane.xlu1 %3576  ;;  %2242 = vperm.xlu1 %4978, %v7676_v25   ;;  %2222 = vperm.xlu0 %4979, %v7678_v56   ;;  %v1835_v17 = vadd.f32 1e-05, %v1755_v35  ;;  %11750 = vst [vmem:[#allocation139_spill] sm:$0xff] %v7712_v49  ;;  %v11751_v35 = vld [vmem:[#allocation23_spill] sm:$0xff]  ;;  %v5001_v12 = vpop.eup %5000  ;;  %v7735_v5 = vmul.f32 %v4999_v57, %v786_v34  ;;  %v11764_v57 = vld [vmem:[#allocation146_spill] sm:$0xff] }
 0x32f   :  { %11745 = vst [vmem:[#allocation12_spill] sm:$0xff] %v7696_v61  ;;  %v7715_v19 = vmul.f32 0.020408163, %v11751_v35  ;;  %v1752_v35 = vsub.f32 %v1592_v46, %v1672_v44  ;;  %v11757_v61 = vld [vmem:[#allocation144_spill] sm:$0xff]  ;;  %11758 = vst [vmem:[#allocation141_spill] sm:$0xff] %v7732_v3  ;;  %v5003_v25 = vpop.eup %5002  ;;  %v1761_v8 = vsub.f32 %v1601_v29, %v1681_v23 }
 0x330   :  { %5014 = vrsqrt.f32 %v1835_v17  ;;  %11760 = vst [vmem:[#allocation16_spill] sm:$0xff] %v7735_v5  ;;  %v788_v46 = vld [vmem:[%s11250_s6 + $0x70] sm:$0xff]  ;;  %v1674_v17 = vmul.f32 %v7712_v49, %v7712_v49  ;;  %v1596_v44 = vmul.f32 0.020408163, %v11764_v57  ;;  %v5005_v13 = vpop.eup %5004  ;;  %v1839_v57 = vadd.f32 1e-05, %v1759_v41 }
 0x331   :  { %11752 = vst [vmem:[#allocation9_spill] sm:$0xff] %v7715_v19  ;;  %v7717_v51 = vpop.xlane.xlu0 %3579  ;;  %v1676_v16 = vmul.f32 %v7715_v19, %v7715_v19  ;;  %5016 = vrsqrt.f32 %v1830_v53  ;;  %v1832_v62 = vadd.f32 1e-05, %v1752_v35  ;;  %v7759_v19 = vmul.f32 %v5001_v12, %v782_v10  ;;  %v5007_v53 = vpop.eup %5006  ;;  %v11769_v35 = vld [vmem:[#allocation25_spill] sm:$0xff]  ;;  %v11772_v10 = vld [vmem:[#allocation32_spill] sm:$0xff] }
 0x332   :  { %11753 = vst [vmem:[#allocation10_spill] sm:$0xff] %v7717_v51  ;;  %v7727_v9 = vpop.xlane.xlu1 %3582  ;;  %2247 = vperm.xlu1 %4978, %v7702_v43   ;;  %2267 = vperm.xlu0 %4979, %v7704_v20   ;;  %v1594_v51 = vmul.f32 0.020408163, %v11757_v61  ;;  %v11762_v61 = vld [vmem:[#allocation30_spill] sm:$0xff]  ;;  %5018 = vrsqrt.f32 %v1837_v54 }
 0x333   :  { %11756 = vst [vmem:[#allocation132_spill] sm:$0xff] %v7727_v9  ;;  %v7752_v0 = vmul.f32 0.020408163, %v11762_v61  ;;  %11766 = vst [vmem:[#allocation18_spill] sm:$0xff] %v7759_v19  ;;  %v783_v61 = vld [vmem:[%s11250_s6 + $0x48] sm:$0xff]  ;;  %v1756_v54 = vsub.f32 %v1596_v44, %v1676_v16  ;;  %5020 = vrsqrt.f32 %v1832_v62 }
 0x334   :  { %v1754_v9 = vsub.f32 %v1594_v51, %v1674_v17  ;;  %v7771_v51 = vmul.f32 0.020408163, %v11769_v35  ;;  %v7784_v29 = vmul.f32 %v5005_v13, %v783_v61  ;;  %v5009_v17 = vpop.eup %5008  ;;  %5022 = vrsqrt.f32 %v1839_v57  ;;  %v792_v13 = vld [vmem:[%s11250_s6 + $0x90] sm:$0xff]  ;;  %v11779_v62 = vld [vmem:[#allocation27_spill] sm:$0xff]  ;;  %v11782_v57 = vld [vmem:[#allocation34_spill] sm:$0xff] }
 0x335   :  { %v7747_v1 = vpop.xlane.xlu0 %3585  ;;  %11763 = vst [vmem:[#allocation137_spill] sm:$0xff] %v7752_v0  ;;  %v5011_v16 = vpop.eup %5010  ;;  %v1841_v44 = vadd.f32 1e-05, %v1761_v8  ;;  %v7806_v8 = vmul.f32 0.020408163, %v11782_v57  ;;  %v787_v57 = vld [vmem:[%s11250_s6 + $0x68] sm:$0xff] }
 0x336   :  { %11761 = vst [vmem:[#allocation11_spill] sm:$0xff] %v7747_v1  ;;  %v7755_v34 = vpop.xlane.xlu1 %3588  ;;  %2252 = vperm.xlu1 %4978, %v7732_v3   ;;  %2277 = vperm.xlu0 %4979, %v7735_v5   ;;  %v7761_v1 = vmul.f32 %v5003_v25, %v788_v46  ;;  %v790_v3 = vld [vmem:[%s11250_s6 + $0x80] sm:$0xff]  ;;  %11770 = vst [vmem:[#allocation145_spill] sm:$0xff] %v7771_v51  ;;  %v1683_v25 = vmul.f32 %v7752_v0, %v7752_v0  ;;  %v7778_v46 = vmul.f32 0.020408163, %v11772_v10  ;;  %v785_v10 = vld [vmem:[%s11250_s6 + $0x58] sm:$0xff] }
 0x337   :  { %11765 = vst [vmem:[#allocation143_spill] sm:$0xff] %v7755_v34  ;;  %v11768_v34 = vld [vmem:[#allocation157_spill] sm:$0xff]  ;;  %11775 = vst [vmem:[#allocation147_spill] sm:$0xff] %v7784_v29  ;;  %v1834_v23 = vadd.f32 1e-05, %v1754_v9  ;;  %v11778_v0 = vld [vmem:[#allocation159_spill] sm:$0xff]  ;;  %v1678_v9 = vmul.f32 %v7771_v51, %v7771_v51 }
 0x338   :  { %11767 = vst [vmem:[#allocation134_spill] sm:$0xff] %v7761_v1  ;;  %v1603_v49 = vmul.f32 0.020408163, %v11768_v34  ;;  %11773 = vst [vmem:[#allocation20_spill] sm:$0xff] %v7778_v46  ;;  %v11776_v34 = vld [vmem:[#allocation148_spill] sm:$0xff]  ;;  %v11786_v51 = vld [vmem:[#allocation150_spill] sm:$0xff] }
 0x339   :  { %v7773_v12 = vpop.xlane.xlu0 %3591  ;;  %v1598_v35 = vmul.f32 0.020408163, %v11776_v34  ;;  %v1605_v5 = vmul.f32 0.020408163, %v11778_v0  ;;  %11783 = vst [vmem:[#allocation149_spill] sm:$0xff] %v7806_v8  ;;  %v5013_v34 = vpop.eup %5012  ;;  %5024 = vrsqrt.f32 %v1834_v23 }
 0x33a   :  { %11771 = vst [vmem:[#allocation13_spill] sm:$0xff] %v7773_v12  ;;  %v7780_v41 = vpop.xlane.xlu1 %3594  ;;  %2257 = vperm.xlu1 %4978, %v7759_v19   ;;  %2287 = vperm.xlu0 %4979, %v7761_v1   ;;  %v7787_v12 = vmul.f32 %v5007_v53, %v790_v3  ;;  %v7799_v3 = vmul.f32 0.020408163, %v11779_v62  ;;  %v1685_v53 = vmul.f32 %v7778_v46, %v7778_v46  ;;  %5026 = vrsqrt.f32 %v1841_v44 }
 0x33b   :  { %11774 = vst [vmem:[#allocation136_spill] sm:$0xff] %v7780_v41  ;;  %v1763_v41 = vsub.f32 %v1603_v49, %v1683_v25  ;;  %v1836_v49 = vadd.f32 1e-05, %v1756_v54  ;;  %v7812_v25 = vmul.f32 %v5009_v17, %v785_v10  ;;  %v1758_v62 = vsub.f32 %v1598_v35, %v1678_v9  ;;  %v794_v17 = vld [vmem:[%s11250_s6 + $0xa0] sm:$0xff]  ;;  %v11791_v10 = vld [vmem:[#allocation31_spill] sm:$0xff] }
 0x33c   :  { %11777 = vst [vmem:[#allocation15_spill] sm:$0xff] %v7787_v12  ;;  %11780 = vst [vmem:[#allocation22_spill] sm:$0xff] %v7799_v3  ;;  %v7815_v1 = vmul.f32 %v5011_v16, %v792_v13  ;;  %v1765_v46 = vsub.f32 %v1605_v5, %v1685_v53  ;;  %v1680_v23 = vmul.f32 %v7799_v3, %v7799_v3  ;;  %v7830_v16 = vmul.f32 0.020408163, %v11791_v10  ;;  %v11798_v3 = vld [vmem:[#allocation152_spill] sm:$0xff] }
 0x33d   :  { %v7801_v61 = vpop.xlane.xlu0 %3597  ;;  %11785 = vst [vmem:[#allocation24_spill] sm:$0xff] %v7812_v25  ;;  %v5015_v54 = vpop.eup %5014  ;;  %v1687_v5 = vmul.f32 %v7806_v8, %v7806_v8  ;;  %5028 = vrsqrt.f32 %v1836_v49  ;;  %v7843_v9 = vmul.f32 %v5013_v34, %v787_v57  ;;  %v11799_v8 = vld [vmem:[#allocation163_spill] sm:$0xff] }
 0x33e   :  { %11781 = vst [vmem:[#allocation138_spill] sm:$0xff] %v7801_v61  ;;  %v7808_v0 = vpop.xlane.xlu1 %3600  ;;  %2262 = vperm.xlu1 %4978, %v7784_v29   ;;  %2297 = vperm.xlu0 %4979, %v7787_v12   ;;  %v1600_v61 = vmul.f32 0.020408163, %v11786_v51  ;;  %11787 = vst [vmem:[#allocation140_spill] sm:$0xff] %v7815_v1  ;;  %v11788_v29 = vld [vmem:[#allocation161_spill] sm:$0xff]  ;;  %v5017_v53 = vpop.eup %5016  ;;  %v7846_v12 = vmul.f32 %v5015_v54, %v794_v17  ;;  %v11805_v54 = vld [vmem:[#allocation154_spill] sm:$0xff] }
 0x33f   :  { %11784 = vst [vmem:[#allocation17_spill] sm:$0xff] %v7808_v0  ;;  %v1843_v0 = vadd.f32 1e-05, %v1763_v41  ;;  %v1607_v20 = vmul.f32 0.020408163, %v11788_v29  ;;  %v11789_v51 = vld [vmem:[#allocation29_spill] sm:$0xff]  ;;  %v5019_v19 = vpop.eup %5018 }
 0x340   :  { %v7827_v35 = vmul.f32 0.020408163, %v11789_v51  ;;  %11792 = vst [vmem:[#allocation19_spill] sm:$0xff] %v7830_v16  ;;  %v11794_v41 = vld [vmem:[#allocation36_spill] sm:$0xff]  ;;  %11797 = vst [vmem:[#allocation21_spill] sm:$0xff] %v7843_v9  ;;  %v1760_v10 = vsub.f32 %v1600_v61, %v1680_v23  ;;  %v1684_v61 = vmul.f32 %v7830_v16, %v7830_v16  ;;  %v11808_v16 = vld [vmem:[#allocation165_spill] sm:$0xff] }
 0x341   :  { %v7832_v13 = vpop.xlane.xlu0 %3603  ;;  %v7837_v29 = vmul.f32 0.020408163, %v11794_v41  ;;  %v1838_v51 = vadd.f32 1e-05, %v1758_v62  ;;  %v789_v41 = vld [vmem:[%s11250_s6 + $0x78] sm:$0xff]  ;;  %5030 = vrsqrt.f32 %v1843_v0  ;;  %v11800_v62 = vld [vmem:[#allocation38_spill] sm:$0xff] }
 0x342   :  { %11790 = vst [vmem:[#allocation151_spill] sm:$0xff] %v7827_v35  ;;  %11793 = vst [vmem:[#allocation26_spill] sm:$0xff] %v7832_v13  ;;  %v7839_v44 = vpop.xlane.xlu1 %3606  ;;  %2272 = vperm.xlu1 %4978, %v7812_v25   ;;  %2307 = vperm.xlu0 %4979, %v7815_v1   ;;  %v1602_v13 = vmul.f32 0.020408163, %v11798_v3  ;;  %v1845_v49 = vadd.f32 1e-05, %v1765_v46  ;;  %v1682_v34 = vmul.f32 %v7827_v35, %v7827_v35 }
 0x343   :  { %11795 = vst [vmem:[#allocation142_spill] sm:$0xff] %v7837_v29  ;;  %11796 = vst [vmem:[#allocation153_spill] sm:$0xff] %v7839_v44  ;;  %v1767_v44 = vsub.f32 %v1607_v20, %v1687_v5  ;;  %v1609_v25 = vmul.f32 0.020408163, %v11799_v8  ;;  %v7857_v3 = vmul.f32 0.020408163, %v11800_v62  ;;  %v1689_v8 = vmul.f32 %v7837_v29, %v7837_v29 }
 0x344   :  { %v796_v0 = vld [vmem:[%s11250_s6 + $0xb0] sm:$0xff]  ;;  %v11803_v46 = vld [vmem:[#allocation33_spill] sm:$0xff]  ;;  %v1604_v17 = vmul.f32 0.020408163, %v11805_v54  ;;  %v7874_v5 = vmul.f32 %v5017_v53, %v789_v41  ;;  %5032 = vrsqrt.f32 %v1838_v51  ;;  %v1840_v62 = vadd.f32 1e-05, %v1760_v10 }
 0x345   :  { %11801 = vst [vmem:[#allocation23_spill] sm:$0xff] %v7857_v3  ;;  %v7859_v57 = vpop.xlane.xlu0 %3609  ;;  %v7865_v20 = vmul.f32 0.020408163, %v11803_v46  ;;  %v1611_v35 = vmul.f32 0.020408163, %v11808_v16  ;;  %v5021_v46 = vpop.eup %5020  ;;  %5034 = vrsqrt.f32 %v1845_v49  ;;  %v1769_v56 = vsub.f32 %v1609_v25, %v1689_v8  ;;  %v798_v16 = vld [vmem:[%s11250_s6 + $0xc0] sm:$0xff] }
 0x346   :  { %11802 = vst [vmem:[#allocation28_spill] sm:$0xff] %v7859_v57  ;;  %v7870_v23 = vpop.xlane.xlu1 %3612  ;;  %2282 = vperm.xlu1 %4978, %v7843_v9   ;;  %2317 = vperm.xlu0 %4979, %v7846_v12   ;;  %11807 = vst [vmem:[#allocation30_spill] sm:$0xff] %v7874_v5  ;;  %v1762_v57 = vsub.f32 %v1602_v13, %v1682_v34  ;;  %v1847_v1 = vadd.f32 1e-05, %v1767_v44  ;;  %v7877_v29 = vmul.f32 %v5019_v19, %v796_v0  ;;  %v5023_v54 = vpop.eup %5022  ;;  %v11810_v9 = vld [vmem:[#allocation40_spill] sm:$0xff]  ;;  %v791_v13 = vld [vmem:[%s11250_s6 + $0x88] sm:$0xff] }
 0x347   :  { %11804 = vst [vmem:[#allocation144_spill] sm:$0xff] %v7865_v20  ;;  %11806 = vst [vmem:[#allocation155_spill] sm:$0xff] %v7870_v23  ;;  %v1691_v23 = vmul.f32 %v7857_v3, %v7857_v3  ;;  %v7882_v58 = vmul.f32 0.020408163, %v11810_v9  ;;  %v1686_v19 = vmul.f32 %v7865_v20, %v7865_v20  ;;  %v11813_v25 = vld [vmem:[#allocation35_spill] sm:$0xff]  ;;  %v1764_v51 = vsub.f32 %v1604_v17, %v1684_v61  ;;  %v11815_v10 = vld [vmem:[#allocation156_spill] sm:$0xff] }
 0x348   :  { %11809 = vst [vmem:[#allocation146_spill] sm:$0xff] %v7877_v29  ;;  %v7895_v44 = vmul.f32 0.020408163, %v11813_v25  ;;  %v1606_v9 = vmul.f32 0.020408163, %v11815_v10  ;;  %5036 = vrsqrt.f32 %v1840_v62  ;;  %v11817_v0 = vld [vmem:[#allocation167_spill] sm:$0xff]  ;;  %v7903_v3 = vmul.f32 %v5021_v46, %v791_v13 }
 0x349   :  { %11811 = vst [vmem:[#allocation157_spill] sm:$0xff] %v7882_v58  ;;  %v7884_v53 = vpop.xlane.xlu0 %3615  ;;  %v1842_v49 = vadd.f32 1e-05, %v1762_v57  ;;  %v1771_v34 = vsub.f32 %v1611_v35, %v1691_v23  ;;  %v1613_v8 = vmul.f32 0.020408163, %v11817_v0  ;;  %5038 = vrsqrt.f32 %v1847_v1  ;;  %v11820_v10 = vld [vmem:[#allocation42_spill] sm:$0xff] }
 0x34a   :  { %11812 = vst [vmem:[#allocation25_spill] sm:$0xff] %v7884_v53  ;;  %11814 = vst [vmem:[#allocation32_spill] sm:$0xff] %v7895_v44  ;;  %v7898_v41 = vpop.xlane.xlu1 %3618  ;;  %2292 = vperm.xlu1 %4978, %v7874_v5   ;;  %2327 = vperm.xlu0 %4979, %v7877_v29   ;;  %v5025_v53 = vpop.eup %5024  ;;  %v1849_v20 = vadd.f32 1e-05, %v1769_v56  ;;  %v7905_v25 = vmul.f32 %v5023_v54, %v798_v16  ;;  %v1693_v17 = vmul.f32 %v7882_v58, %v7882_v58  ;;  %v793_v35 = vld [vmem:[%s11250_s6 + $0x98] sm:$0xff]  ;;  %v800_v56 = vld [vmem:[%s11250_s6 + $0xd0] sm:$0xff] }
 0x34b   :  { %11816 = vst [vmem:[#allocation148_spill] sm:$0xff] %v7898_v41  ;;  %11818 = vst [vmem:[#allocation159_spill] sm:$0xff] %v7903_v3  ;;  %v5027_v61 = vpop.eup %5026  ;;  %v7910_v41 = vmul.f32 0.020408163, %v11820_v10  ;;  %v1688_v1 = vmul.f32 %v7895_v44, %v7895_v44  ;;  %v1844_v57 = vadd.f32 1e-05, %v1764_v51  ;;  %v1766_v23 = vsub.f32 %v1606_v9, %v1686_v19 }
 0x34c   :  { %11819 = vst [vmem:[#allocation27_spill] sm:$0xff] %v7905_v25  ;;  %v11823_v62 = vld [vmem:[#allocation158_spill] sm:$0xff]  ;;  %v5029_v13 = vpop.eup %5028  ;;  %5040 = vrsqrt.f32 %v1842_v49  ;;  %v1851_v16 = vadd.f32 1e-05, %v1771_v34  ;;  %v1773_v0 = vsub.f32 %v1613_v8, %v1693_v17  ;;  %v11825_v10 = vld [vmem:[#allocation169_spill] sm:$0xff]  ;;  %v7931_v51 = vmul.f32 %v5025_v53, %v793_v35  ;;  %v795_v34 = vld [vmem:[%s11250_s6 + $0xa8] sm:$0xff] }
 0x34d   :  { %11821 = vst [vmem:[#allocation34_spill] sm:$0xff] %v7910_v41  ;;  %v7912_v29 = vpop.xlane.xlu0 %3621  ;;  %v1608_v46 = vmul.f32 0.020408163, %v11823_v62  ;;  %v11826_v58 = vld [vmem:[#allocation37_spill] sm:$0xff]  ;;  %5042 = vrsqrt.f32 %v1849_v20  ;;  %v7933_v19 = vmul.f32 %v5027_v61, %v800_v56  ;;  %v1695_v62 = vmul.f32 %v7910_v41, %v7910_v41  ;;  %v11833_v8 = vld [vmem:[#allocation160_spill] sm:$0xff] }
 0x34e   :  { %11822 = vst [vmem:[#allocation150_spill] sm:$0xff] %v7912_v29  ;;  %v7923_v54 = vpop.xlane.xlu1 %3624  ;;  %2302 = vperm.xlu1 %4978, %v7903_v3   ;;  %2337 = vperm.xlu0 %4979, %v7905_v25   ;;  %v1615_v29 = vmul.f32 0.020408163, %v11825_v10  ;;  %v7929_v5 = vmul.f32 0.020408163, %v11826_v58  ;;  %11828 = vst [vmem:[#allocation31_spill] sm:$0xff] %v7931_v51  ;;  %v5031_v9 = vpop.eup %5030  ;;  %5044 = vrsqrt.f32 %v1844_v57 }
 0x34f   :  { %11824 = vst [vmem:[#allocation161_spill] sm:$0xff] %v7923_v54  ;;  %11829 = vst [vmem:[#allocation36_spill] sm:$0xff] %v7933_v19  ;;  %v11830_v54 = vld [vmem:[#allocation44_spill] sm:$0xff]  ;;  %v802_v58 = vld [vmem:[%s11250_s6 + $0xe0] sm:$0xff]  ;;  %v1846_v20 = vadd.f32 1e-05, %v1766_v23  ;;  %v1768_v53 = vsub.f32 %v1608_v46, %v1688_v1  ;;  %5046 = vrsqrt.f32 %v1851_v16  ;;  %v7959_v1 = vmul.f32 %v5029_v13, %v795_v34 }
 0x350   :  { %11827 = vst [vmem:[#allocation29_spill] sm:$0xff] %v7929_v5  ;;  %v7938_v44 = vmul.f32 0.020408163, %v11830_v54  ;;  %v1610_v61 = vmul.f32 0.020408163, %v11833_v8  ;;  %v1775_v56 = vsub.f32 %v1615_v29, %v1695_v62  ;;  %v11835_v54 = vld [vmem:[#allocation173_spill] sm:$0xff]  ;;  %v1690_v41 = vmul.f32 %v7929_v5, %v7929_v5 }
 0x351   :  { %v7940_v49 = vpop.xlane.xlu0 %3627  ;;  %v1853_v35 = vadd.f32 1e-05, %v1773_v0  ;;  %v1617_v10 = vmul.f32 0.020408163, %v11835_v54  ;;  %v11836_v57 = vld [vmem:[#allocation39_spill] sm:$0xff]  ;;  %11838 = vst [vmem:[#allocation154_spill] sm:$0xff] %v7959_v1  ;;  %v7961_v46 = vmul.f32 %v5031_v9, %v802_v58  ;;  %5048 = vrsqrt.f32 %v1846_v20 }
 0x352   :  { %11831 = vst [vmem:[#allocation152_spill] sm:$0xff] %v7938_v44  ;;  %11832 = vst [vmem:[#allocation163_spill] sm:$0xff] %v7940_v49  ;;  %v7949_v17 = vpop.xlane.xlu1 %3630  ;;  %2312 = vperm.xlu1 %4978, %v7931_v51   ;;  %2347 = vperm.xlu0 %4979, %v7933_v19   ;;  %v5033_v49 = vpop.eup %5032  ;;  %v7957_v23 = vmul.f32 0.020408163, %v11836_v57  ;;  %v11840_v16 = vld [vmem:[#allocation46_spill] sm:$0xff]  ;;  %v797_v62 = vld [vmem:[%s11250_s6 + $0xb8] sm:$0xff]  ;;  %v1770_v34 = vsub.f32 %v1610_v61, %v1690_v41 }
 0x353   :  { %11834 = vst [vmem:[#allocation38_spill] sm:$0xff] %v7949_v17  ;;  %11839 = vst [vmem:[#allocation165_spill] sm:$0xff] %v7961_v46  ;;  %v5035_v8 = vpop.eup %5034  ;;  %v1697_v17 = vmul.f32 %v7938_v44, %v7938_v44  ;;  %v7966_v0 = vmul.f32 0.020408163, %v11840_v16  ;;  %v804_v13 = vld [vmem:[%s11250_s6 + $0xf0] sm:$0xff]  ;;  %v11843_v58 = vld [vmem:[#allocation162_spill] sm:$0xff]  ;;  %5050 = vrsqrt.f32 %v1853_v35  ;;  %v7984_v20 = vmul.f32 %v5033_v49, %v797_v62 }
 0x354   :  { %11837 = vst [vmem:[#allocation33_spill] sm:$0xff] %v7957_v23  ;;  %v1848_v9 = vadd.f32 1e-05, %v1768_v53  ;;  %v1612_v54 = vmul.f32 0.020408163, %v11843_v58  ;;  %v1692_v5 = vmul.f32 %v7957_v23, %v7957_v23  ;;  %v11845_v19 = vld [vmem:[#allocation177_spill] sm:$0xff]  ;;  %v7986_v41 = vmul.f32 %v5035_v8, %v804_v13 }
 0x355   :  { %11841 = vst [vmem:[#allocation40_spill] sm:$0xff] %v7966_v0  ;;  %v7968_v29 = vpop.xlane.xlu0 %3633  ;;  %v1855_v16 = vadd.f32 1e-05, %v1775_v56  ;;  %v5037_v44 = vpop.eup %5036  ;;  %v1619_v51 = vmul.f32 0.020408163, %v11845_v19  ;;  %11846 = vst [vmem:[#allocation167_spill] sm:$0xff] %v7984_v20 }
 0x356   :  { %11842 = vst [vmem:[#allocation35_spill] sm:$0xff] %v7968_v29  ;;  %v7977_v57 = vpop.xlane.xlu1 %3636  ;;  %2322 = vperm.xlu1 %4978, %v7959_v1   ;;  %2357 = vperm.xlu0 %4979, %v7961_v46   ;;  %v1777_v29 = vsub.f32 %v1617_v10, %v1697_v17  ;;  %11847 = vst [vmem:[#allocation42_spill] sm:$0xff] %v7986_v41  ;;  %v5039_v53 = vpop.eup %5038  ;;  %v11848_v61 = vld [vmem:[#allocation41_spill] sm:$0xff]  ;;  %v799_v17 = vld [vmem:[%s11250_s6 + $0xc8] sm:$0xff]  ;;  %5052 = vrsqrt.f32 %v1848_v9  ;;  %v1850_v10 = vadd.f32 1e-05, %v1770_v34 }
 0x357   :  { %11844 = vst [vmem:[#allocation156_spill] sm:$0xff] %v7977_v57  ;;  %v7989_v58 = vmul.f32 0.020408163, %v11848_v61  ;;  %v1699_v57 = vmul.f32 %v7966_v0, %v7966_v0  ;;  %v806_v19 = vld [vmem:[%s11250_s6 + $0x100] sm:$0xff]  ;;  %v11851_v49 = vld [vmem:[#allocation48_spill] sm:$0xff]  ;;  %v1772_v8 = vsub.f32 %v1612_v54, %v1692_v5  ;;  %5054 = vrsqrt.f32 %v1855_v16  ;;  %v11855_v46 = vld [vmem:[#allocation181_spill] sm:$0xff] }
 0x358   :  { %v8002_v56 = vmul.f32 0.020408163, %v11851_v49  ;;  %v11854_v13 = vld [vmem:[#allocation164_spill] sm:$0xff]  ;;  %v1621_v1 = vmul.f32 0.020408163, %v11855_v46  ;;  %v8010_v25 = vmul.f32 %v5037_v44, %v799_v17  ;;  %v8012_v49 = vmul.f32 %v5039_v53, %v806_v19  ;;  %v801_v5 = vld [vmem:[%s11250_s6 + $0xd8] sm:$0xff] }
 0x359   :  { %11849 = vst [vmem:[#allocation158_spill] sm:$0xff] %v7989_v58  ;;  %v7993_v35 = vpop.xlane.xlu0 %3639  ;;  %v1614_v61 = vmul.f32 0.020408163, %v11854_v13  ;;  %v5041_v0 = vpop.eup %5040  ;;  %v1779_v23 = vsub.f32 %v1619_v51, %v1699_v57  ;;  %v1694_v34 = vmul.f32 %v7989_v58, %v7989_v58  ;;  %v11856_v54 = vld [vmem:[#allocation43_spill] sm:$0xff]  ;;  %v808_v44 = vld [vmem:[%s11250_s6 + $0x110] sm:$0xff]  ;;  %v11861_v57 = vld [vmem:[#allocation50_spill] sm:$0xff]  ;;  %5056 = vrsqrt.f32 %v1850_v10 }
 0x35a   :  { %11850 = vst [vmem:[#allocation169_spill] sm:$0xff] %v7993_v35  ;;  %11852 = vst [vmem:[#allocation37_spill] sm:$0xff] %v8002_v56  ;;  %v8004_v62 = vpop.xlane.xlu1 %3642  ;;  %2332 = vperm.xlu1 %4978, %v7984_v20   ;;  %2367 = vperm.xlu0 %4979, %v7986_v41   ;;  %v1857_v35 = vadd.f32 1e-05, %v1777_v29  ;;  %v5043_v9 = vpop.eup %5042  ;;  %v8020_v13 = vmul.f32 0.020408163, %v11856_v54  ;;  %v1701_v46 = vmul.f32 %v8002_v56, %v8002_v56 }
 0x35b   :  { %11853 = vst [vmem:[#allocation44_spill] sm:$0xff] %v8004_v62  ;;  %v11858_v29 = vld [vmem:[#allocation45_spill] sm:$0xff]  ;;  %v8033_v53 = vmul.f32 0.020408163, %v11861_v57  ;;  %v1852_v17 = vadd.f32 1e-05, %v1772_v8  ;;  %v5045_v54 = vpop.eup %5044  ;;  %v8040_v58 = vmul.f32 %v5041_v0, %v801_v5  ;;  %v8043_v10 = vmul.f32 %v5043_v9, %v808_v44 }
 0x35c   :  { %11857 = vst [vmem:[#allocation160_spill] sm:$0xff] %v8020_v13  ;;  %v8023_v16 = vmul.f32 0.020408163, %v11858_v29  ;;  %v1774_v29 = vsub.f32 %v1614_v61, %v1694_v34  ;;  %5058 = vrsqrt.f32 %v1857_v35  ;;  %v5047_v41 = vpop.eup %5046  ;;  %v1859_v56 = vadd.f32 1e-05, %v1779_v23  ;;  %v11865_v57 = vld [vmem:[#allocation183_spill] sm:$0xff] }
 0x35d   :  { %v8025_v51 = vpop.xlane.xlu0 %3645  ;;  %11862 = vst [vmem:[#allocation46_spill] sm:$0xff] %v8033_v53  ;;  %v1781_v20 = vsub.f32 %v1621_v1, %v1701_v46  ;;  %v1623_v3 = vmul.f32 0.020408163, %v11865_v57  ;;  %v803_v8 = vld [vmem:[%s11250_s6 + $0xe8] sm:$0xff]  ;;  %v810_v61 = vld [vmem:[%s11250_s6 + $0x120] sm:$0xff]  ;;  %v1696_v35 = vmul.f32 %v8020_v13, %v8020_v13  ;;  %v1703_v1 = vmul.f32 %v8033_v53, %v8033_v53  ;;  %v11867_v5 = vld [vmem:[#allocation52_spill] sm:$0xff] }
 0x35e   :  { %11859 = vst [vmem:[#allocation173_spill] sm:$0xff] %v8023_v16  ;;  %11860 = vst [vmem:[#allocation39_spill] sm:$0xff] %v8025_v51  ;;  %v8035_v19 = vpop.xlane.xlu1 %3648  ;;  %2342 = vperm.xlu1 %4978, %v8010_v25   ;;  %2377 = vperm.xlu0 %4979, %v8012_v49   ;;  %v11864_v51 = vld [vmem:[#allocation166_spill] sm:$0xff]  ;;  %v1698_v0 = vmul.f32 %v8023_v16, %v8023_v16  ;;  %v8060_v9 = vmul.f32 0.020408163, %v11867_v5  ;;  %5060 = vrsqrt.f32 %v1852_v17  ;;  %v11869_v34 = vld [vmem:[#allocation168_spill] sm:$0xff]  ;;  %v5049_v46 = vpop.eup %5048 }
 0x35f   :  { %11863 = vst [vmem:[#allocation162_spill] sm:$0xff] %v8035_v19  ;;  %v1616_v62 = vmul.f32 0.020408163, %v11864_v51  ;;  %v1618_v51 = vmul.f32 0.020408163, %v11869_v34  ;;  %v8067_v16 = vmul.f32 %v5045_v54, %v803_v8  ;;  %v805_v5 = vld [vmem:[%s11250_s6 + $0xf8] sm:$0xff]  ;;  %5062 = vrsqrt.f32 %v1859_v56 }
 0x360   :  { %11868 = vst [vmem:[#allocation41_spill] sm:$0xff] %v8060_v9  ;;  %v1854_v57 = vadd.f32 1e-05, %v1774_v29  ;;  %v5051_v17 = vpop.eup %5050  ;;  %v1861_v34 = vadd.f32 1e-05, %v1781_v20  ;;  %v1783_v53 = vsub.f32 %v1623_v3, %v1703_v1  ;;  %v812_v13 = vld [vmem:[%s11250_s6 + $0x130] sm:$0xff] }
 0x361   :  { %v8055_v23 = vpop.xlane.xlu0 %3651  ;;  %v1776_v19 = vsub.f32 %v1616_v62, %v1696_v35  ;;  %11871 = vst [vmem:[#allocation164_spill] sm:$0xff] %v8067_v16  ;;  %v11873_v29 = vld [vmem:[#allocation47_spill] sm:$0xff]  ;;  %v11876_v8 = vld [vmem:[#allocation54_spill] sm:$0xff]  ;;  %v1778_v56 = vsub.f32 %v1618_v51, %v1698_v0  ;;  %v11880_v1 = vld [vmem:[#allocation172_spill] sm:$0xff] }
 0x362   :  { %11866 = vst [vmem:[#allocation177_spill] sm:$0xff] %v8055_v23  ;;  %v8063_v44 = vpop.xlane.xlu1 %3654  ;;  %2352 = vperm.xlu1 %4978, %v8040_v58   ;;  %2387 = vperm.xlu0 %4979, %v8043_v10   ;;  %v8069_v23 = vmul.f32 %v5047_v41, %v810_v61  ;;  %v8079_v62 = vmul.f32 0.020408163, %v11873_v29  ;;  %v1705_v41 = vmul.f32 %v8060_v9, %v8060_v9  ;;  %v8086_v61 = vmul.f32 0.020408163, %v11876_v8  ;;  %v807_v8 = vld [vmem:[%s11250_s6 + $0x108] sm:$0xff] }
 0x363   :  { %11870 = vst [vmem:[#allocation48_spill] sm:$0xff] %v8063_v44  ;;  %v1625_v44 = vmul.f32 0.020408163, %v7126_v47  ;;  %v8092_v47 = vmul.f32 %v5049_v46, %v805_v5  ;;  %v5053_v3 = vpop.eup %5052  ;;  %5064 = vrsqrt.f32 %v1854_v57  ;;  %v1856_v35 = vadd.f32 1e-05, %v1776_v19  ;;  %v814_v46 = vld [vmem:[%s11250_s6 + $0x140] sm:$0xff] }
 0x364   :  { %11872 = vst [vmem:[#allocation181_spill] sm:$0xff] %v8069_v23  ;;  %11874 = vst [vmem:[#allocation43_spill] sm:$0xff] %v8079_v62  ;;  %v1620_v29 = vmul.f32 0.020408163, %v11880_v1  ;;  %v5055_v0 = vpop.eup %5054  ;;  %5066 = vrsqrt.f32 %v1861_v34  ;;  %v1863_v51 = vadd.f32 1e-05, %v1783_v53  ;;  %v1700_v19 = vmul.f32 %v8079_v62, %v8079_v62 }
 0x365   :  { %v8081_v54 = vpop.xlane.xlu0 %3657  ;;  %11877 = vst [vmem:[#allocation50_spill] sm:$0xff] %v8086_v61  ;;  %11879 = vst [vmem:[#allocation183_spill] sm:$0xff] %v8092_v47  ;;  %v1627_v9 = vmul.f32 0.020408163, %v7136_v48  ;;  %v11882_v57 = vld [vmem:[#allocation49_spill] sm:$0xff]  ;;  %v11885_v34 = vld [vmem:[#allocation103_spill] sm:$0xff]  ;;  %5068 = vrsqrt.f32 %v1856_v35 }
 0x366   :  { %11875 = vst [vmem:[#allocation45_spill] sm:$0xff] %v8081_v54  ;;  %v8088_v20 = vpop.xlane.xlu1 %3660  ;;  %2362 = vperm.xlu1 %4978, %v8067_v16   ;;  %2397 = vperm.xlu0 %4979, %v8069_v23   ;;  %v8095_v54 = vmul.f32 %v5051_v17, %v812_v13  ;;  %v8107_v13 = vmul.f32 0.020408163, %v11882_v57  ;;  %v1707_v17 = vmul.f32 %v8086_v61, %v8086_v61  ;;  %v8114_v53 = vmul.f32 0.020408163, %v11885_v34  ;;  %v5057_v1 = vpop.eup %5056  ;;  %v11889_v62 = vld [vmem:[#allocation176_spill] sm:$0xff] }
 0x367   :  { %11878 = vst [vmem:[#allocation166_spill] sm:$0xff] %v8088_v20  ;;  %v1785_v20 = vsub.f32 %v1625_v44, %v1705_v41  ;;  %v1858_v44 = vadd.f32 1e-05, %v1778_v56  ;;  %v8120_v41 = vmul.f32 %v5053_v3, %v807_v8  ;;  %v1780_v57 = vsub.f32 %v1620_v29, %v1700_v19  ;;  %v809_v34 = vld [vmem:[%s11250_s6 + $0x118] sm:$0xff]  ;;  %v816_v3 = vld [vmem:[%s11250_s6 + $0x150] sm:$0xff] }
 0x368   :  { %11881 = vst [vmem:[#allocation52_spill] sm:$0xff] %v8095_v54  ;;  %11883 = vst [vmem:[#allocation168_spill] sm:$0xff] %v8107_v13  ;;  %v8123_v23 = vmul.f32 %v5055_v0, %v814_v46  ;;  %5070 = vrsqrt.f32 %v1863_v51  ;;  %v1787_v61 = vsub.f32 %v1627_v9, %v1707_v17  ;;  %v1702_v35 = vmul.f32 %v8107_v13, %v8107_v13  ;;  %v11893_v8 = vld [vmem:[#allocation53_spill] sm:$0xff]  ;;  %v11900_v13 = vld [vmem:[#allocation180_spill] sm:$0xff] }
 0x369   :  { %v8109_v5 = vpop.xlane.xlu0 %3663  ;;  %11886 = vst [vmem:[#allocation54_spill] sm:$0xff] %v8114_v53  ;;  %11888 = vst [vmem:[#allocation49_spill] sm:$0xff] %v8120_v41  ;;  %v5059_v56 = vpop.eup %5058  ;;  %v8138_v0 = vmul.f32 0.020408163, %v11893_v8  ;;  %v1709_v9 = vmul.f32 %v8114_v53, %v8114_v53  ;;  %5072 = vrsqrt.f32 %v1858_v44  ;;  %v8151_v19 = vmul.f32 %v5057_v1, %v809_v34 }
 0x36a   :  { %11884 = vst [vmem:[#allocation47_spill] sm:$0xff] %v8109_v5  ;;  %v8116_v48 = vpop.xlane.xlu1 %3666  ;;  %2372 = vperm.xlu1 %4978, %v8092_v47   ;;  %2407 = vperm.xlu0 %4979, %v8095_v54   ;;  %v1622_v5 = vmul.f32 0.020408163, %v11889_v62  ;;  %11890 = vst [vmem:[#allocation103_spill] sm:$0xff] %v8123_v23  ;;  %v1629_v47 = vmul.f32 0.020408163, %v7146_v4  ;;  %v8154_v54 = vmul.f32 %v5059_v56, %v816_v3 }
 0x36b   :  { %11887 = vst [vmem:[#allocation172_spill] sm:$0xff] %v8116_v48  ;;  %v1865_v48 = vadd.f32 1e-05, %v1785_v20  ;;  %v11891_v62 = vld [vmem:[#allocation51_spill] sm:$0xff]  ;;  %v11896_v20 = vld [vmem:[#allocation105_spill] sm:$0xff]  ;;  %11899 = vst [vmem:[#allocation189_spill] sm:$0xff] %v8151_v19  ;;  %v5061_v17 = vpop.eup %5060 }
 0x36c   :  { %v8135_v29 = vmul.f32 0.020408163, %v11891_v62  ;;  %11894 = vst [vmem:[#allocation51_spill] sm:$0xff] %v8138_v0  ;;  %v8145_v4 = vmul.f32 0.020408163, %v11896_v20  ;;  %v1782_v8 = vsub.f32 %v1622_v5, %v1702_v35  ;;  %v811_v20 = vld [vmem:[%s11250_s6 + $0x128] sm:$0xff]  ;;  %v1706_v5 = vmul.f32 %v8138_v0, %v8138_v0 }
 0x36d   :  { %v8140_v46 = vpop.xlane.xlu0 %3669  ;;  %v1860_v62 = vadd.f32 1e-05, %v1780_v57  ;;  %5074 = vrsqrt.f32 %v1865_v48  ;;  %v1867_v44 = vadd.f32 1e-05, %v1787_v61  ;;  %v1631_v53 = vmul.f32 0.020408163, %v7156_v37 }
 0x36e   :  { %11892 = vst [vmem:[#allocation176_spill] sm:$0xff] %v8135_v29  ;;  %11895 = vst [vmem:[#allocation53_spill] sm:$0xff] %v8140_v46  ;;  %v8147_v51 = vpop.xlane.xlu1 %3672  ;;  %2382 = vperm.xlu1 %4978, %v8120_v41   ;;  %2417 = vperm.xlu0 %4979, %v8123_v23   ;;  %v1624_v46 = vmul.f32 0.020408163, %v11900_v13  ;;  %v5063_v41 = vpop.eup %5062  ;;  %v1704_v1 = vmul.f32 %v8135_v29, %v8135_v29  ;;  %v11901_v57 = vld [vmem:[#allocation107_spill] sm:$0xff]  ;;  %v818_v48 = vld [vmem:[%s11250_s6 + $0x160] sm:$0xff]  ;;  %v1711_v37 = vmul.f32 %v8145_v4, %v8145_v4 }
 0x36f   :  { %11897 = vst [vmem:[#allocation105_spill] sm:$0xff] %v8145_v4  ;;  %11898 = vst [vmem:[#allocation188_spill] sm:$0xff] %v8147_v51  ;;  %v1789_v51 = vsub.f32 %v1629_v47, %v1709_v9  ;;  %v8165_v13 = vmul.f32 0.020408163, %v11901_v57  ;;  %v11903_v61 = vld [vmem:[#allocation55_spill] sm:$0xff]  ;;  %v11905_v56 = vld [vmem:[#allocation182_spill] sm:$0xff]  ;;  %v8182_v9 = vmul.f32 %v5061_v17, %v811_v20  ;;  %5076 = vrsqrt.f32 %v1860_v62 }
 0x370   :  { %v8173_v47 = vmul.f32 0.020408163, %v11903_v61  ;;  %v1626_v3 = vmul.f32 0.020408163, %v11905_v56  ;;  %v1862_v57 = vadd.f32 1e-05, %v1782_v8  ;;  %v5065_v61 = vpop.eup %5064  ;;  %5078 = vrsqrt.f32 %v1867_v44 }
 0x371   :  { %v8167_v34 = vpop.xlane.xlu0 %3675  ;;  %v1633_v0 = vmul.f32 0.020408163, %v7166_v24  ;;  %v1869_v29 = vadd.f32 1e-05, %v1789_v51  ;;  %v1791_v23 = vsub.f32 %v1631_v53, %v1711_v37  ;;  %v8185_v4 = vmul.f32 %v5063_v41, %v818_v48  ;;  %v5067_v56 = vpop.eup %5066  ;;  %v820_v24 = vld [vmem:[%s11250_s6 + $0x170] sm:$0xff] }
 0x372   :  { %11902 = vst [vmem:[#allocation180_spill] sm:$0xff] %v8167_v34  ;;  %11904 = vst [vmem:[#allocation107_spill] sm:$0xff] %v8173_v47  ;;  %v8178_v35 = vpop.xlane.xlu1 %3678  ;;  %2392 = vperm.xlu1 %4978, %v8151_v19   ;;  %2427 = vperm.xlu0 %4979, %v8154_v54   ;;  %v1784_v34 = vsub.f32 %v1624_v46, %v1704_v1  ;;  %v11907_v19 = vld [vmem:[#allocation109_spill] sm:$0xff]  ;;  %v1708_v53 = vmul.f32 %v8173_v47, %v8173_v47  ;;  %v11909_v41 = vld [vmem:[#allocation100_spill] sm:$0xff]  ;;  %5080 = vrsqrt.f32 %v1862_v57  ;;  %v5069_v48 = vpop.eup %5068 }
 0x373   :  { %11906 = vst [vmem:[#allocation55_spill] sm:$0xff] %v8178_v35  ;;  %v1713_v35 = vmul.f32 %v8165_v13, %v8165_v13  ;;  %v8190_v16 = vmul.f32 0.020408163, %v11907_v19  ;;  %v813_v46 = vld [vmem:[%s11250_s6 + $0x138] sm:$0xff]  ;;  %v8203_v51 = vmul.f32 0.020408163, %v11909_v41  ;;  %v1786_v62 = vsub.f32 %v1626_v3, %v1706_v5 }
 0x374   :  { %v1628_v19 = vmul.f32 0.020408163, %v7121_v60  ;;  %v1864_v20 = vadd.f32 1e-05, %v1784_v34  ;;  %v1635_v1 = vmul.f32 0.020408163, %v7176_v33  ;;  %5082 = vrsqrt.f32 %v1869_v29 }
 0x375   :  { %v8192_v17 = vpop.xlane.xlu0 %3681  ;;  %11910 = vst [vmem:[#allocation109_spill] sm:$0xff] %v8203_v51  ;;  %v1793_v44 = vsub.f32 %v1633_v0, %v1713_v35  ;;  %v1871_v37 = vadd.f32 1e-05, %v1791_v23  ;;  %v8213_v41 = vmul.f32 %v5067_v56, %v820_v24  ;;  %v5071_v5 = vpop.eup %5070  ;;  %v1715_v60 = vmul.f32 %v8190_v16, %v8190_v16  ;;  %v11912_v3 = vld [vmem:[#allocation111_spill] sm:$0xff]  ;;  %v822_v23 = vld [vmem:[%s11250_s6 + $0x180] sm:$0xff] }
 0x376   :  { %11908 = vst [vmem:[#allocation182_spill] sm:$0xff] %v8192_v17  ;;  %v8206_v8 = vpop.xlane.xlu1 %3684  ;;  %2402 = vperm.xlu1 %4978, %v8182_v9   ;;  %2437 = vperm.xlu0 %4979, %v8185_v4   ;;  %v8211_v17 = vmul.f32 %v5065_v61, %v813_v46  ;;  %v815_v33 = vld [vmem:[%s11250_s6 + $0x148] sm:$0xff]  ;;  %v1710_v29 = vmul.f32 %v8203_v51, %v8203_v51  ;;  %v1866_v0 = vadd.f32 1e-05, %v1786_v62  ;;  %v1630_v35 = vmul.f32 0.020408163, %v7131_v6  ;;  %v5073_v61 = vpop.eup %5072 }
 0x377   :  { %11911 = vst [vmem:[#allocation100_spill] sm:$0xff] %v8206_v8  ;;  %v8218_v8 = vmul.f32 0.020408163, %v11912_v3  ;;  %v1788_v34 = vsub.f32 %v1628_v19, %v1708_v53  ;;  %5084 = vrsqrt.f32 %v1864_v20  ;;  %v1873_v56 = vadd.f32 1e-05, %v1793_v44  ;;  %v11916_v3 = vld [vmem:[#allocation102_spill] sm:$0xff] }
 0x378   :  { %v1795_v46 = vsub.f32 %v1635_v1, %v1715_v60  ;;  %v1637_v24 = vmul.f32 0.020408163, %v7186_v50  ;;  %5086 = vrsqrt.f32 %v1871_v37  ;;  %v8239_v62 = vmul.f32 %v5069_v48, %v815_v33  ;;  %v817_v50 = vld [vmem:[%s11250_s6 + $0x158] sm:$0xff]  ;;  %v824_v44 = vld [vmem:[%s11250_s6 + $0x190] sm:$0xff] }
 0x379   :  { %11913 = vst [vmem:[#allocation111_spill] sm:$0xff] %v8218_v8  ;;  %v8220_v47 = vpop.xlane.xlu0 %3687  ;;  %v8241_v53 = vmul.f32 %v5071_v5, %v822_v23  ;;  %v1717_v19 = vmul.f32 %v8218_v8, %v8218_v8  ;;  %5088 = vrsqrt.f32 %v1866_v0  ;;  %v1868_v1 = vadd.f32 1e-05, %v1788_v34  ;;  %v11922_v0 = vld [vmem:[#allocation104_spill] sm:$0xff] }
 0x37a   :  { %11914 = vst [vmem:[#allocation190_spill] sm:$0xff] %v8220_v47  ;;  %v8231_v57 = vpop.xlane.xlu1 %3690  ;;  %2412 = vperm.xlu1 %4978, %v8211_v17   ;;  %2447 = vperm.xlu0 %4979, %v8213_v41   ;;  %v8237_v47 = vmul.f32 0.020408163, %v11916_v3  ;;  %v5075_v6 = vpop.eup %5074  ;;  %v1790_v48 = vsub.f32 %v1630_v35, %v1710_v29  ;;  %v1632_v37 = vmul.f32 0.020408163, %v7141_v52  ;;  %5090 = vrsqrt.f32 %v1873_v56  ;;  %v11924_v56 = vld [vmem:[#allocation115_spill] sm:$0xff] }
 0x37b   :  { %11915 = vst [vmem:[#allocation191_spill] sm:$0xff] %v8231_v57  ;;  %v11918_v57 = vld [vmem:[#allocation113_spill] sm:$0xff]  ;;  %v1875_v60 = vadd.f32 1e-05, %v1795_v46  ;;  %v1797_v33 = vsub.f32 %v1637_v24, %v1717_v19  ;;  %v1639_v23 = vmul.f32 0.020408163, %v7196_v36  ;;  %v8267_v29 = vmul.f32 %v5073_v61, %v817_v50 }
 0x37c   :  { %11917 = vst [vmem:[#allocation102_spill] sm:$0xff] %v8237_v47  ;;  %v8246_v51 = vmul.f32 0.020408163, %v11918_v57  ;;  %v5077_v57 = vpop.eup %5076  ;;  %v1712_v3 = vmul.f32 %v8237_v47, %v8237_v47  ;;  %v8265_v34 = vmul.f32 0.020408163, %v11922_v0  ;;  %v8269_v52 = vmul.f32 %v5075_v6, %v824_v44  ;;  %v819_v36 = vld [vmem:[%s11250_s6 + $0x168] sm:$0xff] }
 0x37d   :  { %v8248_v20 = vpop.xlane.xlu0 %3693  ;;  %v5079_v35 = vpop.eup %5078  ;;  %v8274_v46 = vmul.f32 0.020408163, %v11924_v56  ;;  %v826_v61 = vld [vmem:[%s11250_s6 + $0x1a0] sm:$0xff]  ;;  %5092 = vrsqrt.f32 %v1868_v1  ;;  %v1870_v6 = vadd.f32 1e-05, %v1790_v48  ;;  %v8292_v1 = vmul.f32 %v5077_v57, %v819_v36 }
 0x37e   :  { %11919 = vst [vmem:[#allocation113_spill] sm:$0xff] %v8246_v51  ;;  %11920 = vst [vmem:[#allocation192_spill] sm:$0xff] %v8248_v20  ;;  %v8257_v5 = vpop.xlane.xlu1 %4547  ;;  %2422 = vperm.xlu1 %4978, %v8239_v62   ;;  %2457 = vperm.xlu0 %4979, %v8241_v53   ;;  %v1792_v19 = vsub.f32 %v1632_v37, %v1712_v3  ;;  %v1634_v50 = vmul.f32 0.020408163, %v7151_v32  ;;  %5094 = vrsqrt.f32 %v1875_v60  ;;  %v1877_v0 = vadd.f32 1e-05, %v1797_v33 }
 0x37f   :  { %11921 = vst [vmem:[#allocation193_spill] sm:$0xff] %v8257_v5  ;;  %11923 = vst [vmem:[#allocation104_spill] sm:$0xff] %v8265_v34  ;;  %v1719_v5 = vmul.f32 %v8246_v51, %v8246_v51  ;;  %v1714_v20 = vmul.f32 %v8265_v34, %v8265_v34  ;;  %v1641_v51 = vmul.f32 0.020408163, %v7206_v28  ;;  %v8294_v48 = vmul.f32 %v5079_v35, %v826_v61  ;;  %v11928_v37 = vld [vmem:[#allocation106_spill] sm:$0xff]  ;;  %v828_v28 = vld [vmem:[%s11250_s6 + $0x1b0] sm:$0xff] }
 0x380   :  { %11925 = vst [vmem:[#allocation115_spill] sm:$0xff] %v8274_v46  ;;  %v8297_v3 = vmul.f32 0.020408163, %v11928_v37  ;;  %v11931_v33 = vld [vmem:[#allocation117_spill] sm:$0xff]  ;;  %5096 = vrsqrt.f32 %v1870_v6  ;;  %v1872_v57 = vadd.f32 1e-05, %v1792_v19 }
 0x381   :  { %v8276_v24 = vpop.xlane.xlu0 %4544  ;;  %v1799_v56 = vsub.f32 %v1639_v23, %v1719_v5  ;;  %v821_v5 = vld [vmem:[%s11250_s6 + $0x178] sm:$0xff]  ;;  %v8310_v23 = vmul.f32 0.020408163, %v11931_v33  ;;  %v1794_v35 = vsub.f32 %v1634_v50, %v1714_v20  ;;  %v1636_v61 = vmul.f32 0.020408163, %v7161_v11  ;;  %v823_v20 = vld [vmem:[%s11250_s6 + $0x188] sm:$0xff] }
 0x382   :  { %11926 = vst [vmem:[#allocation194_spill] sm:$0xff] %v8276_v24  ;;  %v8285_v44 = vpop.xlane.xlu1 %4672  ;;  %2432 = vperm.xlu1 %4978, %v8267_v29   ;;  %2467 = vperm.xlu0 %4979, %v8269_v52   ;;  %v5081_v24 = vpop.eup %5080  ;;  %11929 = vst [vmem:[#allocation106_spill] sm:$0xff] %v8297_v3  ;;  %5098 = vrsqrt.f32 %v1877_v0  ;;  %v1643_v34 = vmul.f32 0.020408163, %v7216_v22  ;;  %v1716_v19 = vmul.f32 %v8297_v3, %v8297_v3  ;;  %v11934_v50 = vld [vmem:[#allocation108_spill] sm:$0xff]  ;;  %v11935_v0 = vld [vmem:[#allocation110_spill] sm:$0xff] }
 0x383   :  { %11927 = vst [vmem:[#allocation195_spill] sm:$0xff] %v8285_v44  ;;  %v5083_v32 = vpop.eup %5082  ;;  %v1721_v44 = vmul.f32 %v8274_v46, %v8274_v46  ;;  %11932 = vst [vmem:[#allocation117_spill] sm:$0xff] %v8310_v23  ;;  %v1879_v37 = vadd.f32 1e-05, %v1799_v56  ;;  %v8318_v47 = vmul.f32 %v5081_v24, %v821_v5  ;;  %v8328_v11 = vmul.f32 0.020408163, %v11934_v50 }
 0x384   :  { %v8320_v33 = vmul.f32 %v5083_v32, %v828_v28  ;;  %v8331_v56 = vmul.f32 0.020408163, %v11935_v0  ;;  %v830_v22 = vld [vmem:[%s11250_s6 + $0x1c0] sm:$0xff]  ;;  %v1723_v24 = vmul.f32 %v8310_v23, %v8310_v23  ;;  %5100 = vrsqrt.f32 %v1872_v57 }
 0x385   :  { %v8301_v60 = vpop.xlane.xlu0 %4550  ;;  %v1801_v46 = vsub.f32 %v1641_v51, %v1721_v44  ;;  %v11938_v44 = vld [vmem:[#allocation119_spill] sm:$0xff]  ;;  %v1874_v5 = vadd.f32 1e-05, %v1794_v35  ;;  %v1796_v0 = vsub.f32 %v1636_v61, %v1716_v19  ;;  %5102 = vrsqrt.f32 %v1879_v37  ;;  %v825_v35 = vld [vmem:[%s11250_s6 + $0x198] sm:$0xff]  ;;  %v832_v61 = vld [vmem:[%s11250_s6 + $0x1d0] sm:$0xff] }
 0x386   :  { %11930 = vst [vmem:[#allocation196_spill] sm:$0xff] %v8301_v60  ;;  %v8312_v36 = vpop.xlane.xlu1 %4678  ;;  %2442 = vperm.xlu1 %4978, %v8292_v1   ;;  %2477 = vperm.xlu0 %4979, %v8294_v48   ;;  %v5085_v60 = vpop.eup %5084  ;;  %11936 = vst [vmem:[#allocation108_spill] sm:$0xff] %v8331_v56  ;;  %v8341_v32 = vmul.f32 0.020408163, %v11938_v44  ;;  %v1803_v8 = vsub.f32 %v1643_v34, %v1723_v24  ;;  %v1645_v44 = vmul.f32 0.020408163, %v7226_v42 }
 0x387   :  { %11933 = vst [vmem:[#allocation197_spill] sm:$0xff] %v8312_v36  ;;  %v5087_v6 = vpop.eup %5086  ;;  %v8348_v36 = vmul.f32 %v5085_v60, %v823_v20  ;;  %v1881_v23 = vadd.f32 1e-05, %v1801_v46  ;;  %v1720_v60 = vmul.f32 %v8331_v56, %v8331_v56  ;;  %v11942_v34 = vld [vmem:[#allocation121_spill] sm:$0xff]  ;;  %5104 = vrsqrt.f32 %v1874_v5 }
 0x388   :  { %11939 = vst [vmem:[#allocation119_spill] sm:$0xff] %v8341_v32  ;;  %v5089_v50 = vpop.eup %5088  ;;  %v8351_v57 = vmul.f32 %v5087_v6, %v830_v22  ;;  %v1725_v42 = vmul.f32 %v8341_v32, %v8341_v32  ;;  %v8368_v37 = vmul.f32 0.020408163, %v11942_v34  ;;  %v1640_v20 = vmul.f32 0.020408163, %v7181_v26  ;;  %v827_v34 = vld [vmem:[%s11250_s6 + $0x1a8] sm:$0xff] }
 0x389   :  { %v8333_v51 = vpop.xlane.xlu0 %4553  ;;  %v5091_v3 = vpop.eup %5090  ;;  %v1876_v22 = vadd.f32 1e-05, %v1796_v0  ;;  %5106 = vrsqrt.f32 %v1881_v23  ;;  %v1883_v26 = vadd.f32 1e-05, %v1803_v8  ;;  %v1647_v56 = vmul.f32 0.020408163, %v7236_v21 }
 0x38a   :  { %11937 = vst [vmem:[#allocation110_spill] sm:$0xff] %v8333_v51  ;;  %2452 = vperm.xlu1 %4978, %v8318_v47   ;;  %v8344_v28 = vpop.xlane.xlu1 %4564  ;;  %2487 = vperm.xlu0 %4979, %v8320_v33   ;;  %v1638_v51 = vmul.f32 0.020408163, %v7171_v55  ;;  %v1718_v55 = vmul.f32 %v8328_v11, %v8328_v11  ;;  %11943 = vst [vmem:[#allocation121_spill] sm:$0xff] %v8368_v37  ;;  %v5093_v19 = vpop.eup %5092  ;;  %v1805_v32 = vsub.f32 %v1645_v44, %v1725_v42  ;;  %v11945_v0 = vld [vmem:[#allocation112_spill] sm:$0xff] }
 0x38b   :  { %11940 = vst [vmem:[#allocation198_spill] sm:$0xff] %v8344_v28  ;;  %v8375_v28 = vmul.f32 %v5089_v50, %v825_v35  ;;  %v5095_v5 = vpop.eup %5094  ;;  %v11948_v35 = vld [vmem:[#allocation123_spill] sm:$0xff]  ;;  %v1800_v23 = vsub.f32 %v1640_v20, %v1720_v60  ;;  %v8400_v21 = vmul.f32 %v5093_v19, %v827_v34  ;;  %5108 = vrsqrt.f32 %v1876_v22  ;;  %v836_v19 = vld [vmem:[%s11250_s6 + $0x1f0] sm:$0xff] }
 0x38c   :  { %v1798_v24 = vsub.f32 %v1638_v51, %v1718_v55  ;;  %v8387_v51 = vmul.f32 0.020408163, %v11945_v0  ;;  %v1642_v42 = vmul.f32 0.020408163, %v7191_v7  ;;  %5110 = vrsqrt.f32 %v1883_v26  ;;  %v11951_v7 = vld [vmem:[#allocation114_spill] sm:$0xff] }
 0x38d   :  { %v8363_v46 = vpop.xlane.xlu0 %4675  ;;  %v5097_v44 = vpop.eup %5096  ;;  %v1885_v20 = vadd.f32 1e-05, %v1805_v32 }
 0x38e   :  { %11941 = vst [vmem:[#allocation199_spill] sm:$0xff] %v8363_v46  ;;  %2462 = vperm.xlu1 %4978, %v8348_v36   ;;  %v8372_v6 = vpop.xlane.xlu1 %4570  ;;  %2497 = vperm.xlu0 %4979, %v8351_v57   ;;  %v8377_v46 = vmul.f32 %v5091_v3, %v832_v61  ;;  %11946 = vst [vmem:[#allocation112_spill] sm:$0xff] %v8387_v51  ;;  %v1727_v3 = vmul.f32 %v8368_v37, %v8368_v37  ;;  %v8394_v61 = vmul.f32 0.020408163, %v11948_v35  ;;  %v829_v35 = vld [vmem:[%s11250_s6 + $0x1b8] sm:$0xff] }
 0x38f   :  { %11944 = vst [vmem:[#allocation200_spill] sm:$0xff] %v8372_v6  ;;  %v834_v6 = vld [vmem:[%s11250_s6 + $0x1e0] sm:$0xff]  ;;  %v1878_v55 = vadd.f32 1e-05, %v1798_v24  ;;  %v5099_v60 = vpop.eup %5098  ;;  %v1722_v22 = vmul.f32 %v8387_v51, %v8387_v51  ;;  %v8428_v26 = vmul.f32 %v5097_v44, %v829_v35 }
 0x390   :  { %11949 = vst [vmem:[#allocation123_spill] sm:$0xff] %v8394_v61  ;;  %v8403_v0 = vmul.f32 %v5095_v5, %v834_v6  ;;  %v8415_v6 = vmul.f32 0.020408163, %v11951_v7  ;;  %v1729_v34 = vmul.f32 %v8394_v61, %v8394_v61  ;;  %v11954_v5 = vld [vmem:[#allocation125_spill] sm:$0xff]  ;;  %v8431_v37 = vmul.f32 %v5099_v60, %v836_v19  ;;  %v838_v44 = vld [vmem:[%s11250_s6 + $0x200] sm:$0xff] }
 0x391   :  { %v8389_v50 = vpop.xlane.xlu0 %4681  ;;  %v8422_v32 = vmul.f32 0.020408163, %v11954_v5  ;;  %5112 = vrsqrt.f32 %v1878_v55  ;;  %v1802_v7 = vsub.f32 %v1642_v42, %v1722_v22  ;;  %v831_v5 = vld [vmem:[%s11250_s6 + $0x1c8] sm:$0xff] }
 0x392   :  { %11947 = vst [vmem:[#allocation201_spill] sm:$0xff] %v8389_v50  ;;  %2472 = vperm.xlu1 %4978, %v8375_v28   ;;  %v8397_v8 = vpop.xlane.xlu1 %4692  ;;  %2507 = vperm.xlu0 %4979, %v8377_v46   ;;  %v1807_v50 = vsub.f32 %v1647_v56, %v1727_v3  ;;  %11952 = vst [vmem:[#allocation114_spill] sm:$0xff] %v8415_v6  ;;  %v1880_v56 = vadd.f32 1e-05, %v1800_v23  ;;  %v5101_v3 = vpop.eup %5100  ;;  %5114 = vrsqrt.f32 %v1885_v20  ;;  %v11960_v20 = vld [vmem:[#allocation127_spill] sm:$0xff] }
 0x393   :  { %11950 = vst [vmem:[#allocation202_spill] sm:$0xff] %v8397_v8  ;;  %v1649_v8 = vmul.f32 0.020408163, %v7249_v38  ;;  %11955 = vst [vmem:[#allocation125_spill] sm:$0xff] %v8422_v32  ;;  %v5103_v23 = vpop.eup %5102  ;;  %v1724_v55 = vmul.f32 %v8415_v6, %v8415_v6  ;;  %v1731_v60 = vmul.f32 %v8422_v32, %v8422_v32  ;;  %v1882_v22 = vadd.f32 1e-05, %v1802_v7 }
 0x394   :  { %v1887_v61 = vadd.f32 1e-05, %v1807_v50  ;;  %v8450_v50 = vmul.f32 0.020408163, %v11960_v20  ;;  %5116 = vrsqrt.f32 %v1880_v56  ;;  %v5105_v19 = vpop.eup %5104  ;;  %v833_v20 = vld [vmem:[%s11250_s6 + $0x1d8] sm:$0xff] }
 0x395   :  { %v8417_v24 = vpop.xlane.xlu0 %4567  ;;  %v1809_v51 = vsub.f32 %v1649_v8, %v1729_v34  ;;  %v8456_v8 = vmul.f32 %v5101_v3, %v831_v5  ;;  %v1653_v6 = vmul.f32 0.020408163, %v7293_v59  ;;  %v11964_v5 = vld [vmem:[#allocation118_spill] sm:$0xff]  ;;  %v8479_v59 = vmul.f32 %v5105_v19, %v833_v20 }
 0x396   :  { %11953 = vst [vmem:[#allocation203_spill] sm:$0xff] %v8417_v24  ;;  %2482 = vperm.xlu1 %4978, %v8400_v21   ;;  %v8425_v38 = vpop.xlane.xlu1 %4698  ;;  %2517 = vperm.xlu0 %4979, %v8403_v0   ;;  %v1644_v24 = vmul.f32 0.020408163, %v7201_v15  ;;  %v11957_v15 = vld [vmem:[#allocation116_spill] sm:$0xff]  ;;  %11961 = vst [vmem:[#allocation127_spill] sm:$0xff] %v8450_v50  ;;  %5118 = vrsqrt.f32 %v1887_v61 }
 0x397   :  { %11956 = vst [vmem:[#allocation204_spill] sm:$0xff] %v8425_v38  ;;  %v1651_v38 = vmul.f32 0.020408163, %v7265_v18  ;;  %v8443_v42 = vmul.f32 0.020408163, %v11957_v15  ;;  %5120 = vrsqrt.f32 %v1882_v22  ;;  %v842_v22 = vld [vmem:[%s11250_s6 + $0x220] sm:$0xff] }
 0x398   :  { %v1804_v34 = vsub.f32 %v1644_v24, %v1724_v55  ;;  %v1646_v15 = vmul.f32 0.020408163, %v7211_v14  ;;  %v1889_v56 = vadd.f32 1e-05, %v1809_v51  ;;  %v8468_v7 = vmul.f32 0.020408163, %v11964_v5 }
 0x399   :  { %11958 = vst [vmem:[#allocation116_spill] sm:$0xff] %v8443_v42  ;;  %v8445_v35 = vpop.xlane.xlu0 %4573  ;;  %v1811_v32 = vsub.f32 %v1651_v38, %v1731_v60  ;;  %v1726_v3 = vmul.f32 %v8443_v42, %v8443_v42  ;;  %v840_v14 = vld [vmem:[%s11250_s6 + $0x210] sm:$0xff]  ;;  %v1733_v24 = vmul.f32 %v8450_v50, %v8450_v50 }
 0x39a   :  { %11959 = vst [vmem:[#allocation205_spill] sm:$0xff] %v8445_v35  ;;  %2492 = vperm.xlu1 %4978, %v8428_v26   ;;  %v8453_v18 = vpop.permute.xlu1 %2217  ;;  %2527 = vperm.xlu0 %4979, %v8431_v37   ;;  %v8459_v35 = vmul.f32 %v5103_v23, %v838_v44  ;;  %11965 = vst [vmem:[#allocation118_spill] sm:$0xff] %v8468_v7  ;;  %v1884_v61 = vadd.f32 1e-05, %v1804_v34  ;;  %v11967_v23 = vld [vmem:[#allocation184_spill] sm:$0xff]  ;;  %5122 = vrsqrt.f32 %v1889_v56 }
 0x39b   :  { %11962 = vst [vmem:[#allocation206_spill] sm:$0xff] %v8453_v18  ;;  %v5107_v18 = vpop.eup %5106  ;;  %v1806_v38 = vsub.f32 %v1646_v15, %v1726_v3  ;;  %v1648_v44 = vmul.f32 0.020408163, %v11967_v23  ;;  %v1891_v5 = vadd.f32 1e-05, %v1811_v32  ;;  %v1813_v42 = vsub.f32 %v1653_v6, %v1733_v24  ;;  %v11969_v34 = vld [vmem:[#allocation120_spill] sm:$0xff] }
 0x39c   :  { %11963 = vst [vmem:[#allocation207_spill] sm:$0xff] %v8459_v35  ;;  %v5109_v60 = vpop.eup %5108  ;;  %v8484_v50 = vmul.f32 %v5107_v18, %v840_v14  ;;  %v1728_v19 = vmul.f32 %v8468_v7, %v8468_v7  ;;  %v8495_v15 = vmul.f32 0.020408163, %v11969_v34  ;;  %5124 = vrsqrt.f32 %v1884_v61  ;;  %v11972_v3 = vld [vmem:[#allocation185_spill] sm:$0xff]  ;;  %v844_v61 = vld [vmem:[%s11250_s6 + $0x230] sm:$0xff] }
 0x39d   :  { %v8482_v55 = vpop.xlane.xlu0 %4695  ;;  %v1886_v32 = vadd.f32 1e-05, %v1806_v38  ;;  %v1650_v14 = vmul.f32 0.020408163, %v11972_v3  ;;  %5126 = vrsqrt.f32 %v1891_v5  ;;  %v1893_v24 = vadd.f32 1e-05, %v1813_v42 }
 0x39e   :  { %2502 = vperm.xlu1 %4978, %v8456_v8   ;;  %v8476_v51 = vpop.permute.xlu1 %2227  ;;  %2537 = vperm.xlu0 %4979, %v8459_v35   ;;  %11968 = vst [vmem:[#allocation184_spill] sm:$0xff] %v8482_v55  ;;  %v5111_v35 = vpop.eup %5110  ;;  %11970 = vst [vmem:[#allocation120_spill] sm:$0xff] %v8495_v15  ;;  %v1808_v18 = vsub.f32 %v1648_v44, %v1728_v19  ;;  %v837_v34 = vld [vmem:[%s11250_s6 + $0x1f8] sm:$0xff]  ;;  %v11974_v38 = vld [vmem:[#allocation122_spill] sm:$0xff] }
 0x39f   :  { %11966 = vst [vmem:[#allocation208_spill] sm:$0xff] %v8476_v51  ;;  %v835_v51 = vld [vmem:[%s11250_s6 + $0x1e8] sm:$0xff]  ;;  %v5113_v56 = vpop.eup %5112  ;;  %v8504_v23 = vmul.f32 %v5111_v35, %v842_v22  ;;  %v8517_v44 = vmul.f32 0.020408163, %v11974_v38  ;;  %5128 = vrsqrt.f32 %v1886_v32  ;;  %v11977_v22 = vld [vmem:[#allocation186_spill] sm:$0xff] }
 0x3a0   :  { %v8501_v20 = vmul.f32 %v5109_v60, %v835_v51  ;;  %v5115_v55 = vpop.eup %5114  ;;  %v1730_v51 = vmul.f32 %v8495_v15, %v8495_v15  ;;  %v1888_v60 = vadd.f32 1e-05, %v1808_v18  ;;  %v8523_v5 = vmul.f32 %v5113_v56, %v837_v34  ;;  %v839_v38 = vld [vmem:[%s11250_s6 + $0x208] sm:$0xff]  ;;  %v846_v32 = vld [vmem:[%s11250_s6 + $0x240] sm:$0xff]  ;;  %v11979_v56 = vld [vmem:[#allocation124_spill] sm:$0xff] }
 0x3a1   :  { %11975 = vst [vmem:[#allocation122_spill] sm:$0xff] %v8517_v44  ;;  %v5117_v35 = vpop.eup %5116  ;;  %v1652_v3 = vmul.f32 0.020408163, %v11977_v22  ;;  %5130 = vrsqrt.f32 %v1893_v24  ;;  %v1732_v18 = vmul.f32 %v8517_v44, %v8517_v44  ;;  %v1654_v22 = vmul.f32 0.020408163, %v7260_v31 }
 0x3a2   :  { %2512 = vperm.xlu1 %4978, %v8479_v59   ;;  %v8498_v6 = vpop.permute.xlu1 %2232  ;;  %2547 = vperm.xlu0 %4979, %v8484_v50   ;;  %v1810_v19 = vsub.f32 %v1650_v14, %v1730_v51  ;;  %v8539_v14 = vmul.f32 0.020408163, %v11979_v56  ;;  %5132 = vrsqrt.f32 %v1888_v60  ;;  %v8545_v24 = vmul.f32 %v5117_v35, %v839_v38  ;;  %v841_v56 = vld [vmem:[%s11250_s6 + $0x218] sm:$0xff]  ;;  %v848_v60 = vld [vmem:[%s11250_s6 + $0x250] sm:$0xff] }
 0x3a3   :  { %11971 = vst [vmem:[#allocation209_spill] sm:$0xff] %v8498_v6  ;;  %v8509_v6 = vpop.xlane.xlu0 %4701  ;;  %v5119_v15 = vpop.eup %5118  ;;  %v1812_v51 = vsub.f32 %v1652_v3, %v1732_v18 }
 0x3a4   :  { %11973 = vst [vmem:[#allocation185_spill] sm:$0xff] %v8509_v6  ;;  %v8526_v6 = vmul.f32 %v5115_v55, %v844_v61  ;;  %11980 = vst [vmem:[#allocation124_spill] sm:$0xff] %v8539_v14  ;;  %v5121_v34 = vpop.eup %5120  ;;  %v1890_v61 = vadd.f32 1e-05, %v1810_v19  ;;  %v1734_v35 = vmul.f32 %v8539_v14, %v8539_v14  ;;  %v850_v14 = vld [vmem:[%s11250_s6 + $0x260] sm:$0xff] }
 0x3a5   :  { %v8564_v31 = vmul.f32 %v5121_v34, %v841_v56  ;;  %v1892_v3 = vadd.f32 1e-05, %v1812_v51 }
 0x3a6   :  { %2522 = vperm.xlu1 %4978, %v8501_v20   ;;  %v8520_v42 = vpop.permute.xlu1 %2237  ;;  %2557 = vperm.xlu0 %4979, %v8504_v23   ;;  %5134 = vrsqrt.f32 %v1890_v61  ;;  %v1814_v38 = vsub.f32 %v1654_v22, %v1734_v35  ;;  %v845_v35 = vld [vmem:[%s11250_s6 + $0x238] sm:$0xff] }
 0x3a7   :  { %11976 = vst [vmem:[#allocation210_spill] sm:$0xff] %v8520_v42  ;;  %v5123_v44 = vpop.eup %5122  ;;  %5136 = vrsqrt.f32 %v1892_v3  ;;  %v2055_v3 = vmul.f32 %v7588_v45, %v7459_v40  ;;  %v2057_v45 = vmul.f32 %v7610_v2, %v7478_v27  ;;  %v2059_v27 = vmul.f32 %v7654_v63, %v7506_v30 }
 0x3a8   :  { %v2061_v30 = vmul.f32 %v7702_v43, %v7533_v39  ;;  %v11997_v39 = vld [vmem:[#allocation62_spill] sm:$0xff]  ;;  %v11998_v43 = vld [vmem:[#allocation7_spill] sm:$0xff] }
 0x3a9   :  { %v8531_v7 = vpop.permute.xlu0 %2222 }
 0x3aa   :  { %11978 = vst [vmem:[#allocation186_spill] sm:$0xff] %v8531_v7  ;;  %2532 = vperm.xlu1 %4978, %v8523_v5   ;;  %v8542_v55 = vpop.permute.xlu1 %2242  ;;  %2567 = vperm.xlu0 %4979, %v8526_v6   ;;  %v8548_v7 = vmul.f32 %v5119_v15, %v846_v32  ;;  %v5125_v15 = vpop.eup %5124  ;;  %v8566_v32 = vmul.f32 %v5123_v44, %v848_v60  ;;  %v1894_v44 = vadd.f32 1e-05, %v1814_v38 }
 0x3ab   :  { %11981 = vst [vmem:[#allocation211_spill] sm:$0xff] %v8542_v55  ;;  %v5127_v18 = vpop.eup %5126 }
 0x3ac   :  { %v5129_v61 = vpop.eup %5128  ;;  %v8582_v22 = vmul.f32 %v5127_v18, %v850_v14  ;;  %5138 = vrsqrt.f32 %v1894_v44  ;;  %v847_v18 = vld [vmem:[%s11250_s6 + $0x248] sm:$0xff] }
 0x3ad   :  { %v8553_v42 = vpop.permute.xlu0 %2267  ;;  %v8596_v14 = vmul.f32 %v5129_v61, %v845_v35  ;;  %v849_v35 = vld [vmem:[%s11250_s6 + $0x258] sm:$0xff] }
 0x3ae   :  { %11982 = vst [vmem:[#allocation212_spill] sm:$0xff] %v8553_v42  ;;  %2542 = vperm.xlu1 %4978, %v8545_v24   ;;  %v8561_v19 = vpop.permute.xlu1 %2247  ;;  %2577 = vperm.xlu0 %4979, %v8548_v7   ;;  %v843_v42 = vld [vmem:[%s11250_s6 + $0x228] sm:$0xff]  ;;  %11985 = vst [vmem:[#allocation215_spill] sm:$0xff] %v8582_v22  ;;  %v5131_v56 = vpop.eup %5130 }
 0x3af   :  { %v8580_v51 = vmul.f32 %v5125_v15, %v843_v42  ;;  %v5133_v42 = vpop.eup %5132 }
 0x3b1   :  { %v8568_v55 = vpop.permute.xlu0 %2277 }
 0x3b2   :  { %11983 = vst [vmem:[#allocation213_spill] sm:$0xff] %v8568_v55  ;;  %2552 = vperm.xlu1 %4978, %v8564_v31   ;;  %v8577_v34 = vpop.permute.xlu1 %2252  ;;  %2587 = vperm.xlu0 %4979, %v8566_v32  }
 0x3b3   :  { %11984 = vst [vmem:[#allocation214_spill] sm:$0xff] %v8577_v34  ;;  %v852_v34 = vld [vmem:[%s11250_s6 + $0x270] sm:$0xff]  ;;  %v5135_v40 = vpop.eup %5134 }
 0x3b4   :  { %v8598_v15 = vmul.f32 %v5131_v56, %v852_v34  ;;  %v8614_v34 = vmul.f32 %v5133_v42, %v847_v18  ;;  %v5137_v2 = vpop.eup %5136  ;;  %v851_v18 = vld [vmem:[%s11250_s6 + $0x268] sm:$0xff] }
 0x3b5   :  { %v8584_v60 = vpop.permute.xlu0 %2287 }
 0x3b6   :  { %11986 = vst [vmem:[#allocation216_spill] sm:$0xff] %v8584_v60  ;;  %2562 = vperm.xlu1 %4978, %v8580_v51   ;;  %v8593_v55 = vpop.permute.xlu1 %2257  ;;  %2597 = vperm.xlu0 %4979, %v8582_v22   ;;  %11988 = vst [vmem:[#allocation218_spill] sm:$0xff] %v8598_v15  ;;  %v854_v60 = vld [vmem:[%s11251_s7] sm:$0xff]  ;;  %v857_v22 = vld [vmem:[%s11251_s7 + $0x18] sm:$0xff] }
 0x3b7   :  { %11987 = vst [vmem:[#allocation217_spill] sm:$0xff] %v8593_v55  ;;  %v2135_v61 = vsub.f32 %v854_v60, %v2055_v3  ;;  %v8629_v60 = vmul.f32 %v5135_v40, %v849_v35  ;;  %v853_v35 = vld [vmem:[%s11250_s6 + $0x278] sm:$0xff]  ;;  %v864_v55 = vld [vmem:[%s11251_s7 + $0x50] sm:$0xff] }
 0x3b9   :  { %v8602_v38 = vpop.permute.xlu0 %2297  ;;  %v5139_v63 = vpop.eup %5138 }
 0x3ba   :  { %11989 = vst [vmem:[#allocation219_spill] sm:$0xff] %v8602_v38  ;;  %2572 = vperm.xlu1 %4978, %v8596_v14   ;;  %v8611_v44 = vpop.permute.xlu1 %2262  ;;  %2607 = vperm.xlu0 %4979, %v8598_v15   ;;  %v856_v38 = vld [vmem:[%s11251_s7 + $0x10] sm:$0xff]  ;;  %v855_v15 = vld [vmem:[%s11251_s7 + $0x8] sm:$0xff] }
 0x3bb   :  { %11990 = vst [vmem:[#allocation220_spill] sm:$0xff] %v8611_v44  ;;  %v2137_v42 = vsub.f32 %v856_v38, %v2057_v45  ;;  %v8644_v38 = vmul.f32 %v5137_v2, %v851_v18  ;;  %v2056_v2 = vmul.f32 %v11998_v43, %v11997_v39  ;;  %v11999_v18 = vld [vmem:[#allocation71_spill] sm:$0xff]  ;;  %v12005_v39 = vld [vmem:[#allocation94_spill] sm:$0xff] }
 0x3bc   :  { %v12006_v43 = vld [vmem:[#allocation135_spill] sm:$0xff] }
 0x3bd   :  { %v8618_v56 = vpop.permute.xlu0 %2307 }
 0x3be   :  { %11991 = vst [vmem:[#allocation221_spill] sm:$0xff] %v8618_v56  ;;  %2582 = vperm.xlu1 %4978, %v8614_v34   ;;  %v8627_v44 = vpop.permute.xlu1 %2272  ;;  %2697 = vperm.xlu0 %4979, %v2135_v61   ;;  %v858_v56 = vld [vmem:[%s11251_s7 + $0x20] sm:$0xff] }
 0x3bf   :  { %11992 = vst [vmem:[#allocation222_spill] sm:$0xff] %v8627_v44  ;;  %v2139_v45 = vsub.f32 %v858_v56, %v2059_v27  ;;  %v8659_v56 = vmul.f32 %v5139_v63, %v853_v35  ;;  %v12003_v63 = vld [vmem:[#allocation178_spill] sm:$0xff] }
 0x3c0   :  { %v12004_v35 = vld [vmem:[#allocation2_spill] sm:$0xff] }
 0x3c1   :  { %v8633_v3 = vpop.permute.xlu0 %2317 }
 0x3c2   :  { %11993 = vst [vmem:[#allocation223_spill] sm:$0xff] %v8633_v3  ;;  %2592 = vperm.xlu1 %4978, %v8629_v60   ;;  %v8642_v61 = vpop.permute.xlu1 %2282  ;;  %2707 = vperm.xlu0 %4979, %v2137_v42   ;;  %v860_v3 = vld [vmem:[%s11251_s7 + $0x30] sm:$0xff] }
 0x3c3   :  { %11994 = vst [vmem:[#allocation224_spill] sm:$0xff] %v8642_v61  ;;  %v2141_v27 = vsub.f32 %v860_v3, %v2061_v30  ;;  %v2136_v3 = vsub.f32 %v855_v15, %v2056_v2  ;;  %v12010_v2 = vld [vmem:[#allocation4_spill] sm:$0xff] }
 0x3c5   :  { %v8648_v40 = vpop.permute.xlu0 %2327 }
 0x3c6   :  { %11995 = vst [vmem:[#allocation225_spill] sm:$0xff] %v8648_v40  ;;  %2602 = vperm.xlu1 %4978, %v8644_v38   ;;  %v8657_v42 = vpop.permute.xlu1 %2292  ;;  %2717 = vperm.xlu0 %4979, %v2139_v45   ;;  %v12000_v40 = vld [vmem:[#allocation18_spill] sm:$0xff] }
 0x3c7   :  { %11996 = vst [vmem:[#allocation226_spill] sm:$0xff] %v8657_v42  ;;  %v2063_v61 = vmul.f32 %v12000_v40, %v11999_v18  ;;  %v862_v42 = vld [vmem:[%s11251_s7 + $0x40] sm:$0xff]  ;;  %v2058_v40 = vmul.f32 %v12004_v35, %v12003_v63  ;;  %v2065_v18 = vmul.f32 %v12006_v43, %v12005_v39  ;;  %v12011_v35 = vld [vmem:[#allocation81_spill] sm:$0xff]  ;;  %v12012_v39 = vld [vmem:[#allocation16_spill] sm:$0xff] }
 0x3c8   :  { %v2067_v43 = vmul.f32 %v12012_v39, %v12011_v35  ;;  %v12018_v35 = vld [vmem:[#allocation134_spill] sm:$0xff] }
 0x3c9   :  { %v8665_v44 = vpop.permute.xlu0 %2337  ;;  %v2143_v30 = vsub.f32 %v862_v42, %v2063_v61  ;;  %v2138_v15 = vsub.f32 %v857_v22, %v2058_v40  ;;  %v2145_v61 = vsub.f32 %v864_v55, %v2065_v18  ;;  %v12009_v42 = vld [vmem:[#allocation82_spill] sm:$0xff]  ;;  %v12015_v40 = vld [vmem:[#allocation61_spill] sm:$0xff] }
 0x3ca   :  { %12001 = vst [vmem:[#allocation62_spill] sm:$0xff] %v8665_v44  ;;  %2612 = vperm.xlu1 %4978, %v8659_v56   ;;  %v8674_v45 = vpop.permute.xlu1 %2302  ;;  %2727 = vperm.xlu0 %4979, %v2141_v27   ;;  %v2060_v63 = vmul.f32 %v12010_v2, %v12009_v42  ;;  %v12016_v18 = vld [vmem:[#allocation141_spill] sm:$0xff]  ;;  %v12017_v2 = vld [vmem:[#allocation95_spill] sm:$0xff] }
 0x3cb   :  { %12002 = vst [vmem:[#allocation7_spill] sm:$0xff] %v8674_v45  ;;  %v859_v45 = vld [vmem:[%s11251_s7 + $0x28] sm:$0xff]  ;;  %v2062_v42 = vmul.f32 %v12016_v18, %v12015_v40  ;;  %v2069_v39 = vmul.f32 %v12018_v35, %v12017_v2 }
 0x3cc   :  { %v2140_v55 = vsub.f32 %v859_v45, %v2060_v63  ;;  %v12023_v18 = vld [vmem:[#allocation87_spill] sm:$0xff] }
 0x3cd   :  { %v8680_v44 = vpop.permute.xlu0 %2347  ;;  %v12024_v2 = vld [vmem:[#allocation15_spill] sm:$0xff] }
 0x3ce   :  { %12007 = vst [vmem:[#allocation71_spill] sm:$0xff] %v8680_v44  ;;  %2702 = vperm.xlu1 %4978, %v2136_v3   ;;  %v8688_v27 = vpop.permute.xlu1 %2312  ;;  %2737 = vperm.xlu0 %4979, %v2143_v30   ;;  %v866_v3 = vld [vmem:[%s11251_s7 + $0x60] sm:$0xff]  ;;  %v2071_v35 = vmul.f32 %v12024_v2, %v12023_v18  ;;  %v12029_v18 = vld [vmem:[#allocation140_spill] sm:$0xff] }
 0x3cf   :  { %12008 = vst [vmem:[#allocation18_spill] sm:$0xff] %v8688_v27  ;;  %v2147_v22 = vsub.f32 %v866_v3, %v2067_v43  ;;  %v861_v27 = vld [vmem:[%s11251_s7 + $0x38] sm:$0xff]  ;;  %v12021_v43 = vld [vmem:[#allocation74_spill] sm:$0xff]  ;;  %v12022_v3 = vld [vmem:[#allocation147_spill] sm:$0xff] }
 0x3d0   :  { %v2142_v45 = vsub.f32 %v861_v27, %v2062_v42  ;;  %v2064_v40 = vmul.f32 %v12022_v3, %v12021_v43  ;;  %v12028_v3 = vld [vmem:[#allocation88_spill] sm:$0xff] }
 0x3d1   :  { %v8694_v44 = vpop.permute.xlu0 %2357  ;;  %v2073_v2 = vmul.f32 %v12029_v18, %v12028_v3 }
 0x3d2   :  { %12013 = vst [vmem:[#allocation178_spill] sm:$0xff] %v8694_v44  ;;  %2712 = vperm.xlu1 %4978, %v2138_v15   ;;  %v8702_v30 = vpop.permute.xlu1 %2322  ;;  %2747 = vperm.xlu0 %4979, %v2145_v61   ;;  %v868_v15 = vld [vmem:[%s11251_s7 + $0x70] sm:$0xff] }
 0x3d3   :  { %12014 = vst [vmem:[#allocation2_spill] sm:$0xff] %v8702_v30  ;;  %v2149_v63 = vsub.f32 %v868_v15, %v2069_v39  ;;  %v863_v30 = vld [vmem:[%s11251_s7 + $0x48] sm:$0xff]  ;;  %v12026_v39 = vld [vmem:[#allocation97_spill] sm:$0xff]  ;;  %v12027_v15 = vld [vmem:[#allocation24_spill] sm:$0xff] }
 0x3d4   :  { %v2144_v27 = vsub.f32 %v863_v30, %v2064_v40  ;;  %v2066_v43 = vmul.f32 %v12027_v15, %v12026_v39  ;;  %v12034_v15 = vld [vmem:[#allocation129_spill] sm:$0xff] }
 0x3d5   :  { %v8708_v44 = vpop.permute.xlu0 %2367  ;;  %v2075_v3 = vmul.f32 %v7846_v12, %v12034_v15  ;;  %v12039_v12 = vld [vmem:[#allocation128_spill] sm:$0xff] }
 0x3d6   :  { %12019 = vst [vmem:[#allocation94_spill] sm:$0xff] %v8708_v44  ;;  %2722 = vperm.xlu1 %4978, %v2140_v55   ;;  %v8716_v61 = vpop.permute.xlu1 %2332  ;;  %2757 = vperm.xlu0 %4979, %v2147_v22   ;;  %v870_v55 = vld [vmem:[%s11251_s7 + $0x80] sm:$0xff] }
 0x3d7   :  { %12020 = vst [vmem:[#allocation135_spill] sm:$0xff] %v8716_v61  ;;  %v2151_v42 = vsub.f32 %v870_v55, %v2071_v35  ;;  %v865_v61 = vld [vmem:[%s11251_s7 + $0x58] sm:$0xff]  ;;  %v12032_v35 = vld [vmem:[#allocation98_spill] sm:$0xff] }
 0x3d8   :  { %v2146_v30 = vsub.f32 %v865_v61, %v2066_v43  ;;  %v12033_v55 = vld [vmem:[#allocation21_spill] sm:$0xff] }
 0x3d9   :  { %v8722_v44 = vpop.permute.xlu0 %2377  ;;  %v2068_v39 = vmul.f32 %v12033_v55, %v12032_v35  ;;  %v12040_v55 = vld [vmem:[#allocation146_spill] sm:$0xff] }
 0x3da   :  { %12025 = vst [vmem:[#allocation82_spill] sm:$0xff] %v8722_v44  ;;  %2732 = vperm.xlu1 %4978, %v2142_v45   ;;  %v8730_v22 = vpop.permute.xlu1 %2342  ;;  %2767 = vperm.xlu0 %4979, %v2149_v63   ;;  %v872_v45 = vld [vmem:[%s11251_s7 + $0x90] sm:$0xff]  ;;  %v2077_v15 = vmul.f32 %v12040_v55, %v12039_v12  ;;  %v12046_v12 = vld [vmem:[#allocation27_spill] sm:$0xff] }
 0x3db   :  { %v2153_v40 = vsub.f32 %v872_v45, %v2073_v2  ;;  %v12037_v2 = vld [vmem:[#allocation5_spill] sm:$0xff]  ;;  %v12038_v45 = vld [vmem:[#allocation30_spill] sm:$0xff] }
 0x3dc   :  { %v2070_v35 = vmul.f32 %v12038_v45, %v12037_v2  ;;  %v12045_v45 = vld [vmem:[#allocation8_spill] sm:$0xff] }
 0x3dd   :  { %v8736_v44 = vpop.permute.xlu0 %2387  ;;  %v2079_v55 = vmul.f32 %v12046_v12, %v12045_v45  ;;  %v12052_v45 = vld [vmem:[#allocation36_spill] sm:$0xff] }
 0x3de   :  { %12030 = vst [vmem:[#allocation4_spill] sm:$0xff] %v8736_v44  ;;  %2742 = vperm.xlu1 %4978, %v2144_v27   ;;  %v8744_v63 = vpop.permute.xlu1 %2352  ;;  %2777 = vperm.xlu0 %4979, %v2151_v42   ;;  %v867_v44 = vld [vmem:[%s11251_s7 + $0x68] sm:$0xff]  ;;  %v874_v27 = vld [vmem:[%s11251_s7 + $0xa0] sm:$0xff] }
 0x3df   :  { %12031 = vst [vmem:[#allocation81_spill] sm:$0xff] %v8744_v63  ;;  %v2148_v61 = vsub.f32 %v867_v44, %v2068_v39  ;;  %v2155_v43 = vsub.f32 %v874_v27, %v2075_v3  ;;  %v869_v63 = vld [vmem:[%s11251_s7 + $0x78] sm:$0xff]  ;;  %v12043_v3 = vld [vmem:[#allocation126_spill] sm:$0xff]  ;;  %v12044_v27 = vld [vmem:[#allocation159_spill] sm:$0xff] }
 0x3e0   :  { %v2150_v44 = vsub.f32 %v869_v63, %v2070_v35  ;;  %v2072_v2 = vmul.f32 %v12044_v27, %v12043_v3  ;;  %v12051_v27 = vld [vmem:[#allocation14_spill] sm:$0xff] }
 0x3e1   :  { %v8750_v18 = vpop.permute.xlu0 %2397  ;;  %v2081_v12 = vmul.f32 %v12052_v45, %v12051_v27  ;;  %v12058_v27 = vld [vmem:[#allocation165_spill] sm:$0xff] }
 0x3e2   :  { %12035 = vst [vmem:[#allocation16_spill] sm:$0xff] %v8750_v18  ;;  %2752 = vperm.xlu1 %4978, %v2146_v30   ;;  %v8758_v42 = vpop.permute.xlu1 %2362  ;;  %2787 = vperm.xlu0 %4979, %v2153_v40   ;;  %v876_v30 = vld [vmem:[%s11251_s7 + $0xb0] sm:$0xff] }
 0x3e3   :  { %12036 = vst [vmem:[#allocation61_spill] sm:$0xff] %v8758_v42  ;;  %v2157_v39 = vsub.f32 %v876_v30, %v2077_v15  ;;  %v871_v42 = vld [vmem:[%s11251_s7 + $0x88] sm:$0xff] }
 0x3e4   :  { %v2152_v63 = vsub.f32 %v871_v42, %v2072_v2  ;;  %v12049_v15 = vld [vmem:[#allocation139_spill] sm:$0xff] }
 0x3e5   :  { %v8764_v18 = vpop.permute.xlu0 %2407  ;;  %v12050_v30 = vld [vmem:[#allocation31_spill] sm:$0xff] }
 0x3e6   :  { %12041 = vst [vmem:[#allocation141_spill] sm:$0xff] %v8764_v18  ;;  %2762 = vperm.xlu1 %4978, %v2148_v61   ;;  %v8772_v40 = vpop.permute.xlu1 %2372  ;;  %2797 = vperm.xlu0 %4979, %v2155_v43   ;;  %v878_v61 = vld [vmem:[%s11251_s7 + $0xc0] sm:$0xff]  ;;  %v2074_v3 = vmul.f32 %v12050_v30, %v12049_v15  ;;  %v12057_v30 = vld [vmem:[#allocation137_spill] sm:$0xff] }
 0x3e7   :  { %12042 = vst [vmem:[#allocation95_spill] sm:$0xff] %v8772_v40  ;;  %v2159_v35 = vsub.f32 %v878_v61, %v2079_v55  ;;  %v873_v40 = vld [vmem:[%s11251_s7 + $0x98] sm:$0xff]  ;;  %v12056_v61 = vld [vmem:[#allocation154_spill] sm:$0xff]  ;;  %v2083_v45 = vmul.f32 %v12058_v27, %v12057_v30 }
 0x3e8   :  { %v2154_v42 = vsub.f32 %v873_v40, %v2074_v3  ;;  %v12055_v55 = vld [vmem:[#allocation9_spill] sm:$0xff]  ;;  %v12063_v30 = vld [vmem:[#allocation42_spill] sm:$0xff] }
 0x3e9   :  { %v8778_v18 = vpop.permute.xlu0 %2417  ;;  %v2076_v15 = vmul.f32 %v12056_v61, %v12055_v55  ;;  %v12062_v61 = vld [vmem:[#allocation20_spill] sm:$0xff] }
 0x3ea   :  { %12047 = vst [vmem:[#allocation134_spill] sm:$0xff] %v8778_v18  ;;  %2772 = vperm.xlu1 %4978, %v2150_v44   ;;  %v8786_v43 = vpop.permute.xlu1 %2382  ;;  %2807 = vperm.xlu0 %4979, %v2157_v39   ;;  %v880_v44 = vld [vmem:[%s11251_s7 + $0xd0] sm:$0xff]  ;;  %v2085_v27 = vmul.f32 %v12063_v30, %v12062_v61  ;;  %v879_v30 = vld [vmem:[%s11251_s7 + $0xc8] sm:$0xff] }
 0x3eb   :  { %12048 = vst [vmem:[#allocation74_spill] sm:$0xff] %v8786_v43  ;;  %v2161_v2 = vsub.f32 %v880_v44, %v2081_v12  ;;  %v875_v43 = vld [vmem:[%s11251_s7 + $0xa8] sm:$0xff]  ;;  %v12060_v12 = vld [vmem:[#allocation145_spill] sm:$0xff] }
 0x3ec   :  { %v2156_v40 = vsub.f32 %v875_v43, %v2076_v15  ;;  %v12061_v44 = vld [vmem:[#allocation167_spill] sm:$0xff] }
 0x3ed   :  { %v8792_v18 = vpop.permute.xlu0 %2427  ;;  %v2078_v55 = vmul.f32 %v12061_v44, %v12060_v12  ;;  %v12065_v12 = vld [vmem:[#allocation149_spill] sm:$0xff] }
 0x3ee   :  { %12053 = vst [vmem:[#allocation147_spill] sm:$0xff] %v8792_v18  ;;  %2782 = vperm.xlu1 %4978, %v2152_v63   ;;  %v8800_v39 = vpop.permute.xlu1 %2392  ;;  %2817 = vperm.xlu0 %4979, %v2159_v35   ;;  %v882_v63 = vld [vmem:[%s11251_s7 + $0xe0] sm:$0xff]  ;;  %v2087_v44 = vmul.f32 %v8012_v49, %v12065_v12  ;;  %v881_v12 = vld [vmem:[%s11251_s7 + $0xd8] sm:$0xff] }
 0x3ef   :  { %12054 = vst [vmem:[#allocation87_spill] sm:$0xff] %v8800_v39  ;;  %v2163_v3 = vsub.f32 %v882_v63, %v2083_v45  ;;  %v877_v39 = vld [vmem:[%s11251_s7 + $0xb8] sm:$0xff]  ;;  %v12064_v45 = vld [vmem:[#allocation22_spill] sm:$0xff] }
 0x3f0   :  { %v2158_v43 = vsub.f32 %v877_v39, %v2078_v55  ;;  %v2080_v63 = vmul.f32 %v8010_v25, %v12064_v45  ;;  %v12067_v25 = vld [vmem:[#allocation151_spill] sm:$0xff]  ;;  %v12068_v49 = vld [vmem:[#allocation142_spill] sm:$0xff] }
 0x3f1   :  { %v8806_v18 = vpop.permute.xlu0 %2437 }
 0x3f2   :  { %12059 = vst [vmem:[#allocation15_spill] sm:$0xff] %v8806_v18  ;;  %2792 = vperm.xlu1 %4978, %v2154_v42   ;;  %v8814_v35 = vpop.permute.xlu1 %2402  ;;  %2827 = vperm.xlu0 %4979, %v2161_v2   ;;  %v884_v42 = vld [vmem:[%s11251_s7 + $0xf0] sm:$0xff]  ;;  %v2160_v39 = vsub.f32 %v879_v30, %v2080_v63 }
 0x3f3   :  { %v2165_v15 = vsub.f32 %v884_v42, %v2085_v27  ;;  %v2082_v27 = vmul.f32 %v8040_v58, %v12067_v25  ;;  %v2089_v42 = vmul.f32 %v8043_v10, %v12068_v49  ;;  %v12071_v58 = vld [vmem:[#allocation19_spill] sm:$0xff]  ;;  %v12072_v30 = vld [vmem:[#allocation164_spill] sm:$0xff]  ;;  %v12074_v25 = vld [vmem:[#allocation181_spill] sm:$0xff] }
 0x3f4   :  { %v12073_v10 = vld [vmem:[#allocation23_spill] sm:$0xff] }
 0x3f5   :  { %v8820_v18 = vpop.permute.xlu0 %2447  ;;  %v2162_v63 = vsub.f32 %v881_v12, %v2082_v27  ;;  %v2091_v49 = vmul.f32 %v12074_v25, %v12073_v10  ;;  %v12077_v12 = vld [vmem:[#allocation144_spill] sm:$0xff] }
 0x3f6   :  { %2802 = vperm.xlu1 %4978, %v2156_v40   ;;  %v8828_v2 = vpop.permute.xlu1 %2412  ;;  %2837 = vperm.xlu0 %4979, %v2163_v3   ;;  %v886_v40 = vld [vmem:[%s11251_s7 + $0x100] sm:$0xff]  ;;  %v12080_v10 = vld [vmem:[#allocation52_spill] sm:$0xff] }
 0x3f7   :  { %v2167_v55 = vsub.f32 %v886_v40, %v2087_v44  ;;  %v2084_v40 = vmul.f32 %v12072_v30, %v12071_v58  ;;  %v12079_v30 = vld [vmem:[#allocation157_spill] sm:$0xff] }
 0x3f8   :  { %v2093_v25 = vmul.f32 %v12080_v10, %v12079_v30  ;;  %v12085_v30 = vld [vmem:[#allocation103_spill] sm:$0xff] }
 0x3f9   :  { %v8834_v61 = vpop.permute.xlu0 %2457 }
 0x3fa   :  { %2812 = vperm.xlu1 %4978, %v2158_v43   ;;  %v8842_v3 = vpop.permute.xlu1 %2422  ;;  %2847 = vperm.xlu0 %4979, %v2165_v15   ;;  %v888_v43 = vld [vmem:[%s11251_s7 + $0x110] sm:$0xff] }
 0x3fb   :  { %12066 = vst [vmem:[#allocation97_spill] sm:$0xff] %v8842_v3  ;;  %v2169_v44 = vsub.f32 %v888_v43, %v2089_v42  ;;  %v883_v3 = vld [vmem:[%s11251_s7 + $0xe8] sm:$0xff] }
 0x3fc   :  { %v2164_v27 = vsub.f32 %v883_v3, %v2084_v40  ;;  %v12078_v43 = vld [vmem:[#allocation183_spill] sm:$0xff] }
 0x3fd   :  { %v8848_v45 = vpop.permute.xlu0 %2467  ;;  %v2086_v58 = vmul.f32 %v12078_v43, %v12077_v12  ;;  %v12084_v43 = vld [vmem:[#allocation34_spill] sm:$0xff] }
 0x3fe   :  { %12069 = vst [vmem:[#allocation24_spill] sm:$0xff] %v8848_v45  ;;  %2822 = vperm.xlu1 %4978, %v2160_v39   ;;  %v8856_v15 = vpop.permute.xlu1 %2432  ;;  %2857 = vperm.xlu0 %4979, %v2167_v55   ;;  %v890_v39 = vld [vmem:[%s11251_s7 + $0x120] sm:$0xff]  ;;  %v2095_v10 = vmul.f32 %v12085_v30, %v12084_v43 }
 0x3ff   :  { %12070 = vst [vmem:[#allocation88_spill] sm:$0xff] %v8856_v15  ;;  %v2171_v42 = vsub.f32 %v890_v39, %v2091_v49  ;;  %v885_v15 = vld [vmem:[%s11251_s7 + $0xf8] sm:$0xff]  ;;  %v12082_v49 = vld [vmem:[#allocation32_spill] sm:$0xff] }
 0x400   :  { %v2166_v3 = vsub.f32 %v885_v15, %v2086_v58  ;;  %v12083_v39 = vld [vmem:[#allocation49_spill] sm:$0xff] }
 0x401   :  { %v8862_v45 = vpop.permute.xlu0 %2477  ;;  %v2088_v12 = vmul.f32 %v12083_v39, %v12082_v49  ;;  %v12089_v39 = vld [vmem:[#allocation152_spill] sm:$0xff] }
 0x402   :  { %12075 = vst [vmem:[#allocation140_spill] sm:$0xff] %v8862_v45  ;;  %2832 = vperm.xlu1 %4978, %v2162_v63   ;;  %v8870_v55 = vpop.permute.xlu1 %2442  ;;  %2867 = vperm.xlu0 %4979, %v2169_v44   ;;  %v892_v63 = vld [vmem:[%s11251_s7 + $0x130] sm:$0xff]  ;;  %v2097_v43 = vmul.f32 %v8154_v54, %v12089_v39  ;;  %v891_v39 = vld [vmem:[%s11251_s7 + $0x128] sm:$0xff] }
 0x403   :  { %12076 = vst [vmem:[#allocation98_spill] sm:$0xff] %v8870_v55  ;;  %v2173_v40 = vsub.f32 %v892_v63, %v2093_v25  ;;  %v887_v55 = vld [vmem:[%s11251_s7 + $0x108] sm:$0xff]  ;;  %v12087_v25 = vld [vmem:[#allocation29_spill] sm:$0xff]  ;;  %v12091_v54 = vld [vmem:[#allocation40_spill] sm:$0xff] }
 0x404   :  { %v2168_v15 = vsub.f32 %v887_v55, %v2088_v12  ;;  %v12088_v63 = vld [vmem:[#allocation189_spill] sm:$0xff] }
 0x405   :  { %v8876_v45 = vpop.permute.xlu0 %2487  ;;  %v2090_v49 = vmul.f32 %v12088_v63, %v12087_v25  ;;  %v2099_v25 = vmul.f32 %v8185_v4, %v12091_v54  ;;  %v12094_v4 = vld [vmem:[#allocation37_spill] sm:$0xff] }
 0x406   :  { %12081 = vst [vmem:[#allocation21_spill] sm:$0xff] %v8876_v45  ;;  %2842 = vperm.xlu1 %4978, %v2164_v27   ;;  %v8884_v44 = vpop.permute.xlu1 %2452  ;;  %2877 = vperm.xlu0 %4979, %v2171_v42   ;;  %v894_v27 = vld [vmem:[%s11251_s7 + $0x140] sm:$0xff]  ;;  %v893_v54 = vld [vmem:[%s11251_s7 + $0x138] sm:$0xff] }
 0x407   :  { %v2175_v58 = vsub.f32 %v894_v27, %v2095_v10  ;;  %v12090_v10 = vld [vmem:[#allocation33_spill] sm:$0xff] }
 0x408   :  { %v2092_v27 = vmul.f32 %v8182_v9, %v12090_v10  ;;  %v12093_v9 = vld [vmem:[#allocation158_spill] sm:$0xff] }
 0x409   :  { %v8890_v45 = vpop.permute.xlu0 %2497 }
 0x40a   :  { %12086 = vst [vmem:[#allocation129_spill] sm:$0xff] %v8890_v45  ;;  %2852 = vperm.xlu1 %4978, %v2166_v3   ;;  %v8898_v42 = vpop.permute.xlu1 %2462  ;;  %2887 = vperm.xlu0 %4979, %v2173_v40   ;;  %v889_v45 = vld [vmem:[%s11251_s7 + $0x118] sm:$0xff]  ;;  %v896_v3 = vld [vmem:[%s11251_s7 + $0x150] sm:$0xff] }
 0x40b   :  { %v2170_v55 = vsub.f32 %v889_v45, %v2090_v49  ;;  %v2177_v12 = vsub.f32 %v896_v3, %v2097_v43  ;;  %v2172_v45 = vsub.f32 %v891_v39, %v2092_v27  ;;  %v2094_v43 = vmul.f32 %v8211_v17, %v12093_v9  ;;  %v12097_v17 = vld [vmem:[#allocation160_spill] sm:$0xff] }
 0x40c   :  { %v2101_v3 = vmul.f32 %v8213_v41, %v12094_v4  ;;  %v2096_v39 = vmul.f32 %v8239_v62, %v12097_v17  ;;  %v12098_v41 = vld [vmem:[#allocation46_spill] sm:$0xff]  ;;  %v895_v4 = vld [vmem:[%s11251_s7 + $0x148] sm:$0xff]  ;;  %v12101_v62 = vld [vmem:[#allocation173_spill] sm:$0xff] }
 0x40d   :  { %v8904_v30 = vpop.permute.xlu0 %2507  ;;  %v2174_v27 = vsub.f32 %v893_v54, %v2094_v43  ;;  %v2098_v54 = vmul.f32 %v8267_v29, %v12101_v62  ;;  %v12105_v29 = vld [vmem:[#allocation43_spill] sm:$0xff] }
 0x40e   :  { %2862 = vperm.xlu1 %4978, %v2168_v15   ;;  %v8912_v40 = vpop.permute.xlu1 %2472  ;;  %2897 = vperm.xlu0 %4979, %v2175_v58   ;;  %v898_v15 = vld [vmem:[%s11251_s7 + $0x160] sm:$0xff]  ;;  %v2176_v43 = vsub.f32 %v895_v4, %v2096_v39  ;;  %v2100_v4 = vmul.f32 %v8292_v1, %v12105_v29  ;;  %v12109_v1 = vld [vmem:[#allocation168_spill] sm:$0xff] }
 0x40f   :  { %v2179_v49 = vsub.f32 %v898_v15, %v2099_v25  ;;  %v2103_v15 = vmul.f32 %v8241_v53, %v12098_v41  ;;  %v12102_v53 = vld [vmem:[#allocation41_spill] sm:$0xff] }
 0x410   :  { %v897_v41 = vld [vmem:[%s11251_s7 + $0x158] sm:$0xff] }
 0x411   :  { %v8918_v63 = vpop.permute.xlu0 %2517  ;;  %v2178_v39 = vsub.f32 %v897_v41, %v2098_v54  ;;  %v2102_v41 = vmul.f32 %v8318_v47, %v12109_v1  ;;  %v12113_v47 = vld [vmem:[#allocation176_spill] sm:$0xff] }
 0x412   :  { %2872 = vperm.xlu1 %4978, %v2170_v55   ;;  %v8926_v58 = vpop.permute.xlu1 %2482  ;;  %2907 = vperm.xlu0 %4979, %v2177_v12   ;;  %v900_v55 = vld [vmem:[%s11251_s7 + $0x170] sm:$0xff] }
 0x413   :  { %12092 = vst [vmem:[#allocation5_spill] sm:$0xff] %v8926_v58  ;;  %v2181_v25 = vsub.f32 %v900_v55, %v2101_v3  ;;  %v2105_v55 = vmul.f32 %v8269_v52, %v12102_v53  ;;  %v12106_v52 = vld [vmem:[#allocation50_spill] sm:$0xff]  ;;  %v899_v53 = vld [vmem:[%s11251_s7 + $0x168] sm:$0xff] }
 0x414   :  { %v2180_v54 = vsub.f32 %v899_v53, %v2100_v4  ;;  %v2104_v53 = vmul.f32 %v8348_v36, %v12113_v47  ;;  %v12117_v36 = vld [vmem:[#allocation51_spill] sm:$0xff]  ;;  %v905_v47 = vld [vmem:[%s11251_s7 + $0x198] sm:$0xff] }
 0x415   :  { %v8932_v10 = vpop.permute.xlu0 %2527 }
 0x416   :  { %12095 = vst [vmem:[#allocation30_spill] sm:$0xff] %v8932_v10  ;;  %2882 = vperm.xlu1 %4978, %v2172_v45   ;;  %v8940_v12 = vpop.permute.xlu1 %2492  ;;  %2917 = vperm.xlu0 %4979, %v2179_v49   ;;  %v902_v45 = vld [vmem:[%s11251_s7 + $0x180] sm:$0xff] }
 0x417   :  { %12096 = vst [vmem:[#allocation128_spill] sm:$0xff] %v8940_v12  ;;  %v2183_v3 = vsub.f32 %v902_v45, %v2103_v15  ;;  %v2107_v45 = vmul.f32 %v8294_v48, %v12106_v52  ;;  %v12110_v48 = vld [vmem:[#allocation54_spill] sm:$0xff]  ;;  %v901_v52 = vld [vmem:[%s11251_s7 + $0x178] sm:$0xff] }
 0x418   :  { %v2182_v4 = vsub.f32 %v901_v52, %v2102_v41  ;;  %v2106_v52 = vmul.f32 %v8375_v28, %v12117_v36  ;;  %v12120_v28 = vld [vmem:[#allocation107_spill] sm:$0xff]  ;;  %v12182_v12 = vld [vmem:[#allocation218_spill] sm:$0xff] }
 0x419   :  { %v8946_v9 = vpop.permute.xlu0 %2537 }
 0x41a   :  { %12099 = vst [vmem:[#allocation146_spill] sm:$0xff] %v8946_v9  ;;  %2892 = vperm.xlu1 %4978, %v2174_v27   ;;  %v8954_v49 = vpop.permute.xlu1 %2502  ;;  %2927 = vperm.xlu0 %4979, %v2181_v25   ;;  %v904_v27 = vld [vmem:[%s11251_s7 + $0x190] sm:$0xff]  ;;  %v12181_v9 = vld [vmem:[#allocation127_spill] sm:$0xff] }
 0x41b   :  { %12100 = vst [vmem:[#allocation126_spill] sm:$0xff] %v8954_v49  ;;  %v2185_v15 = vsub.f32 %v904_v27, %v2105_v55  ;;  %v2109_v27 = vmul.f32 %v8320_v33, %v12110_v48  ;;  %v12114_v33 = vld [vmem:[#allocation105_spill] sm:$0xff]  ;;  %v903_v48 = vld [vmem:[%s11251_s7 + $0x188] sm:$0xff] }
 0x41c   :  { %v2184_v41 = vsub.f32 %v903_v48, %v2104_v53  ;;  %v2186_v53 = vsub.f32 %v905_v47, %v2106_v52  ;;  %v907_v48 = vld [vmem:[%s11251_s7 + $0x1a8] sm:$0xff] }
 0x41d   :  { %v8960_v17 = vpop.permute.xlu0 %2547 }
 0x41e   :  { %12103 = vst [vmem:[#allocation159_spill] sm:$0xff] %v8960_v17  ;;  %2902 = vperm.xlu1 %4978, %v2176_v43   ;;  %v8968_v25 = vpop.permute.xlu1 %2512  ;;  %2937 = vperm.xlu0 %4979, %v2183_v3   ;;  %v906_v43 = vld [vmem:[%s11251_s7 + $0x1a0] sm:$0xff]  ;;  %v12169_v17 = vld [vmem:[#allocation136_spill] sm:$0xff] }
 0x41f   :  { %12104 = vst [vmem:[#allocation8_spill] sm:$0xff] %v8968_v25  ;;  %v2187_v55 = vsub.f32 %v906_v43, %v2107_v45  ;;  %v2111_v43 = vmul.f32 %v8351_v57, %v12114_v33  ;;  %v2113_v57 = vmul.f32 %v8377_v46, %v8165_v13  ;;  %v2115_v13 = vmul.f32 %v8403_v0, %v8190_v16  ;;  %v909_v16 = vld [vmem:[%s11251_s7 + $0x1b8] sm:$0xff]  ;;  %v12124_v0 = vld [vmem:[#allocation111_spill] sm:$0xff] }
 0x421   :  { %v8974_v62 = vpop.permute.xlu0 %2557 }
 0x422   :  { %12107 = vst [vmem:[#allocation27_spill] sm:$0xff] %v8974_v62  ;;  %2912 = vperm.xlu1 %4978, %v2178_v39   ;;  %v8982_v3 = vpop.permute.xlu1 %2522  ;;  %2947 = vperm.xlu0 %4979, %v2185_v15   ;;  %v908_v39 = vld [vmem:[%s11251_s7 + $0x1b0] sm:$0xff] }
 0x423   :  { %12108 = vst [vmem:[#allocation139_spill] sm:$0xff] %v8982_v3  ;;  %v2189_v45 = vsub.f32 %v908_v39, %v2109_v27 }
 0x425   :  { %v8988_v29 = vpop.permute.xlu0 %2567 }
 0x426   :  { %12111 = vst [vmem:[#allocation31_spill] sm:$0xff] %v8988_v29  ;;  %2922 = vperm.xlu1 %4978, %v2180_v54   ;;  %v8996_v15 = vpop.permute.xlu1 %2532  ;;  %2957 = vperm.xlu0 %4979, %v2187_v55   ;;  %v910_v54 = vld [vmem:[%s11251_s7 + $0x1c0] sm:$0xff] }
 0x427   :  { %12112 = vst [vmem:[#allocation14_spill] sm:$0xff] %v8996_v15  ;;  %v2191_v27 = vsub.f32 %v910_v54, %v2111_v43  ;;  %v2108_v43 = vmul.f32 %v8400_v21, %v12120_v28  ;;  %v914_v54 = vld [vmem:[%s11251_s7 + $0x1e0] sm:$0xff]  ;;  %v911_v28 = vld [vmem:[%s11251_s7 + $0x1c8] sm:$0xff] }
 0x428   :  { %v2195_v52 = vsub.f32 %v914_v54, %v2115_v13  ;;  %v12129_v13 = vld [vmem:[#allocation106_spill] sm:$0xff] }
 0x429   :  { %v9002_v1 = vpop.permute.xlu0 %2577  ;;  %v2188_v36 = vsub.f32 %v907_v48, %v2108_v43  ;;  %v12128_v43 = vld [vmem:[#allocation104_spill] sm:$0xff]  ;;  %v9065_v48 = vmul.f32 %v8501_v20, %v12129_v13  ;;  %v5286_v20 = vld [vmem:[%s11246_s3] sm:$0xff] }
 0x42a   :  { %12115 = vst [vmem:[#allocation36_spill] sm:$0xff] %v9002_v1  ;;  %2932 = vperm.xlu1 %4978, %v2182_v4   ;;  %v9010_v55 = vpop.permute.xlu1 %2542  ;;  %2967 = vperm.xlu0 %4979, %v2189_v45   ;;  %v912_v4 = vld [vmem:[%s11251_s7 + $0x1d0] sm:$0xff]  ;;  %v12154_v1 = vld [vmem:[#allocation171_spill] sm:$0xff] }
 0x42b   :  { %12116 = vst [vmem:[#allocation9_spill] sm:$0xff] %v9010_v55  ;;  %v2193_v33 = vsub.f32 %v912_v4, %v2113_v57  ;;  %v2117_v57 = vmul.f32 %v8431_v37, %v12124_v0  ;;  %v916_v4 = vld [vmem:[%s11251_s7 + $0x1f0] sm:$0xff]  ;;  %v9061_v37 = vmul.f32 %v8479_v59, %v12128_v43  ;;  %v12133_v43 = vld [vmem:[#allocation207_spill] sm:$0xff]  ;;  %v9224_v15 = vmul.f32 0.020408163, %v12154_v1 }
 0x42c   :  { %v12130_v59 = vld [vmem:[#allocation108_spill] sm:$0xff] }
 0x42d   :  { %v9016_v39 = vpop.permute.xlu0 %2587  ;;  %v2197_v0 = vsub.f32 %v916_v4, %v2117_v57  ;;  %v918_v57 = vld [vmem:[%s11251_s7 + $0x200] sm:$0xff]  ;;  %v12135_v4 = vld [vmem:[#allocation115_spill] sm:$0xff]  ;;  %12155 = vst [vmem:[#allocation142_spill] sm:$0xff] %v9224_v15 }
 0x42e   :  { %12118 = vst [vmem:[#allocation154_spill] sm:$0xff] %v9016_v39  ;;  %2942 = vperm.xlu1 %4978, %v2184_v41   ;;  %v9024_v45 = vpop.permute.xlu1 %2552  ;;  %2977 = vperm.xlu0 %4979, %v2191_v27   ;;  %v12123_v27 = vld [vmem:[#allocation109_spill] sm:$0xff] }
 0x42f   :  { %12119 = vst [vmem:[#allocation137_spill] sm:$0xff] %v9024_v45  ;;  %v2110_v21 = vmul.f32 %v8428_v26, %v12123_v27  ;;  %v9075_v27 = vld [vmem:[%s11251_s7 + $0x1e8] sm:$0xff] }
 0x431   :  { %v9030_v46 = vpop.permute.xlu0 %2597  ;;  %v2190_v54 = vsub.f32 %v909_v16, %v2110_v21  ;;  %v12131_v21 = vld [vmem:[#allocation206_spill] sm:$0xff] }
 0x432   :  { %12121 = vst [vmem:[#allocation165_spill] sm:$0xff] %v9030_v46  ;;  %2952 = vperm.xlu1 %4978, %v2186_v53   ;;  %v9038_v41 = vpop.permute.xlu1 %2562  ;;  %2987 = vperm.xlu0 %4979, %v2193_v33   ;;  %v12126_v53 = vld [vmem:[#allocation102_spill] sm:$0xff]  ;;  %v2615_v16 = vmul.f32 %v5286_v20, %v12131_v21  ;;  %v2121_v21 = vmul.f32 %v8484_v50, %v12135_v4  ;;  %v920_v50 = vld [vmem:[%s11251_s7 + $0x210] sm:$0xff] }
 0x433   :  { %12122 = vst [vmem:[#allocation145_spill] sm:$0xff] %v9038_v41  ;;  %v2112_v33 = vmul.f32 %v8456_v8, %v12126_v53  ;;  %v9070_v8 = vld [vmem:[%s11251_s7 + $0x1d8] sm:$0xff]  ;;  %v5287_v4 = vld [vmem:[%s11246_s3 + $0x10] sm:$0xff] }
 0x434   :  { %v12132_v53 = vld [vmem:[#allocation113_spill] sm:$0xff] }
 0x435   :  { %v9047_v47 = vpop.permute.xlu0 %2607  ;;  %v2119_v13 = vmul.f32 %v12133_v43, %v12132_v53  ;;  %v2192_v20 = vsub.f32 %v911_v28, %v2112_v33  ;;  %v9113_v53 = vld [vmem:[%s11251_s7 + $0x218] sm:$0xff]  ;;  %v12136_v43 = vld [vmem:[#allocation114_spill] sm:$0xff]  ;;  %v2194_v33 = vsub.f32 %v9070_v8, %v9061_v37  ;;  %v12139_v8 = vld [vmem:[#allocation116_spill] sm:$0xff] }
 0x436   :  { %12125 = vst [vmem:[#allocation167_spill] sm:$0xff] %v9047_v47  ;;  %2962 = vperm.xlu1 %4978, %v2188_v36   ;;  %v9054_v26 = vpop.permute.xlu1 %2572  ;;  %2997 = vperm.xlu0 %4979, %v2195_v52   ;;  %v9079_v36 = vmul.f32 %v8523_v5, %v8328_v11  ;;  %v9083_v52 = vmul.f32 %v8545_v24, %v12130_v59  ;;  %v9099_v11 = vld [vmem:[%s11251_s7 + $0x208] sm:$0xff]  ;;  %v12134_v5 = vld [vmem:[#allocation112_spill] sm:$0xff] }
 0x437   :  { %12127 = vst [vmem:[#allocation20_spill] sm:$0xff] %v9054_v26  ;;  %v9094_v26 = vld [vmem:[%s11251_s7 + $0x1f8] sm:$0xff]  ;;  %v9103_v24 = vmul.f32 %v8564_v31, %v12134_v5  ;;  %v9117_v47 = vmul.f32 %v8580_v51, %v12136_v43  ;;  %v9131_v51 = vld [vmem:[%s11251_s7 + $0x228] sm:$0xff]  ;;  %v12140_v43 = vld [vmem:[#allocation208_spill] sm:$0xff] }
 0x438   :  { %v2617_v28 = vmul.f32 %v5287_v4, %v12140_v43  ;;  %v12143_v4 = vld [vmem:[#allocation84_spill] sm:$0xff]  ;;  %v12146_v37 = vld [vmem:[#allocation119_spill] sm:$0xff] }
 0x439   :  { %v2698_v59 = vpop.permute.xlu0 %2697  ;;  %v9165_v43 = vmul.f32 0.020408163, %v12143_v4  ;;  %v12147_v4 = vld [vmem:[#allocation118_spill] sm:$0xff] }
 0x43a   :  { %v3095_v31 = vadd.f32 %v2698_v59, %v2615_v16  ;;  %2972 = vperm.xlu1 %4978, %v2190_v54   ;;  %v9119_v5 = vpop.permute.xlu1 %2582  ;;  %3007 = vperm.xlu0 %4979, %v2197_v0   ;;  %v12138_v16 = vld [vmem:[#allocation187_spill] sm:$0xff]  ;;  %v9142_v59 = vmul.f32 %v8596_v14, %v12139_v8  ;;  %v12141_v0 = vld [vmem:[#allocation117_spill] sm:$0xff]  ;;  %v12142_v8 = vld [vmem:[#allocation64_spill] sm:$0xff]  ;;  %v9180_v45 = vmul.f32 %v8614_v34, %v12147_v4 }
 0x43b   :  { %12137 = vst [vmem:[#allocation42_spill] sm:$0xff] %v9119_v5  ;;  %v9134_v54 = vmul.f32 0.020408163, %v12138_v16  ;;  %v2199_v16 = vsub.f32 %v918_v57, %v2119_v13  ;;  %v2123_v5 = vmul.f32 %v8504_v23, %v12141_v0  ;;  %v9159_v14 = vld [vmem:[%s11251_s7 + $0x238] sm:$0xff]  ;;  %v9162_v41 = vmul.f32 0.020408163, %v12142_v8 }
 0x43c   :  { %3175 = vst.msk [vmem:[%s11252_s8] sm:$0xff] %vm934_vm0, %v3095_v31  ;;  %12144 = vst [vmem:[#allocation22_spill] sm:$0xff] %v9165_v43  ;;  %v2201_v31 = vsub.f32 %v920_v50, %v2121_v21  ;;  %v922_v23 = vld [vmem:[%s11251_s7 + $0x220] sm:$0xff]  ;;  %v9176_v8 = vmul.f32 %v8526_v6, %v12146_v37  ;;  %v12148_v50 = vld [vmem:[#allocation83_spill] sm:$0xff]  ;;  %v3736_v55 = vmul.f32 %v9165_v43, %v9165_v43  ;;  %v3701_v43 = vmul.f32 0.020408163, %v12169_v17 }
 0x43d   :  { %v2708_v46 = vpop.permute.xlu0 %2707  ;;  %v9184_v21 = vmul.f32 %v9134_v54, %v9134_v54  ;;  %v9187_v39 = vmul.f32 0.020408163, %v12148_v50  ;;  %v9200_v34 = vld [vmem:[%s11251_s7 + $0x248] sm:$0xff]  ;;  %v12151_v37 = vld [vmem:[#allocation170_spill] sm:$0xff]  ;;  %v2203_v6 = vsub.f32 %v922_v23, %v2123_v5  ;;  %v12153_v13 = vld [vmem:[#allocation120_spill] sm:$0xff] }
 0x43e   :  { %v3097_v57 = vadd.f32 %v2708_v46, %v2617_v28  ;;  %2982 = vperm.xlu1 %4978, %v2192_v20   ;;  %v9172_v0 = vpop.permute.xlu1 %2592  ;;  %3017 = vperm.xlu0 %4979, %v2199_v16   ;;  %v12150_v46 = vld [vmem:[#allocation10_spill] sm:$0xff]  ;;  %v9193_v28 = vld [vmem:[%s11251_s7 + $0x230] sm:$0xff]  ;;  %v9203_v16 = vmul.f32 0.020408163, %v12151_v37  ;;  %v9219_v37 = vmul.f32 %v9162_v41, %v9162_v41 }
 0x43f   :  { %12145 = vst [vmem:[#allocation149_spill] sm:$0xff] %v9172_v0  ;;  %12149 = vst [vmem:[#allocation151_spill] sm:$0xff] %v9187_v39  ;;  %v3696_v20 = vmul.f32 0.020408163, %v12150_v46  ;;  %v5288_v4 = vld [vmem:[%s11246_s3 + $0x20] sm:$0xff]  ;;  %v9215_v0 = vmul.f32 %v8629_v60, %v12153_v13  ;;  %v9233_v60 = vld [vmem:[%s11251_s7 + $0x258] sm:$0xff]  ;;  %v2205_v1 = vsub.f32 %v9193_v28, %v9176_v8 }
 0x440   :  { %v12152_v50 = vld [vmem:[#allocation210_spill] sm:$0xff]  ;;  %3177 = vst.msk [vmem:[%s11252_s8 + $0x10] sm:$0xff] %vm934_vm0, %v3097_v57  ;;  %v3739_v8 = vmul.f32 %v9203_v16, %v9203_v16  ;;  %v5289_v28 = vld [vmem:[%s11246_s3 + $0x30] sm:$0xff] }
 0x441   :  { %v2619_v46 = vmul.f32 %v5288_v4, %v12152_v50  ;;  %v2718_v4 = vpop.permute.xlu0 %2717  ;;  %v12156_v50 = vld [vmem:[#allocation121_spill] sm:$0xff]  ;;  %v12157_v5 = vld [vmem:[#allocation58_spill] sm:$0xff] }
 0x442   :  { %v9228_v29 = vmul.f32 %v8548_v7, %v12156_v50  ;;  %v9236_v23 = vmul.f32 0.020408163, %v12157_v5  ;;  %2992 = vperm.xlu1 %4978, %v2194_v33   ;;  %v9238_v57 = vpop.permute.xlu1 %2602  ;;  %3027 = vperm.xlu0 %4979, %v2201_v31   ;;  %v9245_v7 = vld [vmem:[%s11251_s7 + $0x240] sm:$0xff]  ;;  %v9251_v5 = vmul.f32 %v9187_v39, %v9187_v39  ;;  %v12159_v33 = vld [vmem:[#allocation143_spill] sm:$0xff]  ;;  %v2621_v50 = vmul.f32 %v5289_v28, %v8561_v19 }
 0x443   :  { %v3099_v13 = vadd.f32 %v2718_v4, %v2619_v46  ;;  %12158 = vst [vmem:[#allocation19_spill] sm:$0xff] %v9238_v57  ;;  %v3776_v46 = vsub.f32 %v3696_v20, %v3736_v55  ;;  %v3699_v4 = vmul.f32 0.020408163, %v12159_v33  ;;  %v12160_v57 = vld [vmem:[#allocation122_spill] sm:$0xff]  ;;  %v12161_v55 = vld [vmem:[#allocation123_spill] sm:$0xff]  ;;  %v9281_v19 = vmul.f32 %v9224_v15, %v9224_v15  ;;  %v12162_v33 = vld [vmem:[#allocation56_spill] sm:$0xff] }
 0x444   :  { %v9256_v31 = vmul.f32 %v8644_v38, %v12160_v57  ;;  %v9270_v20 = vmul.f32 %v8566_v32, %v12161_v55  ;;  %v9277_v57 = vld [vmem:[%s11251_s7 + $0x268] sm:$0xff]  ;;  %v9284_v28 = vmul.f32 0.020408163, %v12162_v33  ;;  %v2207_v55 = vsub.f32 %v9245_v7, %v9228_v29  ;;  %v9294_v38 = vld [vmem:[%s11251_s7 + $0x250] sm:$0xff] }
 0x445   :  { %3179 = vst.msk [vmem:[%s11252_s8 + $0x20] sm:$0xff] %vm934_vm0, %v3099_v13  ;;  %v12164_v13 = vld [vmem:[#allocation77_spill] sm:$0xff]  ;;  %v2728_v32 = vpop.permute.xlu0 %2727  ;;  %v3741_v62 = vmul.f32 %v9236_v23, %v9236_v23  ;;  %v12166_v33 = vsub.f32 %v9075_v27, %v9065_v48  ;;  %v3816_v29 = vadd.f32 1e-05, %v3776_v46  ;;  %v3779_v7 = vsub.f32 %v3699_v4, %v3739_v8  ;;  %v12170_v48 = vld [vmem:[#allocation66_spill] sm:$0xff]  ;;  %v12174_v8 = vld [vmem:[#allocation215_spill] sm:$0xff] }
 0x446   :  { %12163 = vst [vmem:[#allocation164_spill] sm:$0xff] %v9284_v28  ;;  %v9287_v3 = vmul.f32 0.020408163, %v12164_v13  ;;  %v3101_v15 = vadd.f32 %v2728_v32, %v2621_v50  ;;  %v9301_v39 = vpop.permute.xlu1 %2612  ;;  %3037 = vperm.xlu0 %4979, %v2203_v6   ;;  %v12168_v13 = vld [vmem:[#allocation124_spill] sm:$0xff]  ;;  %v9313_v50 = vld [vmem:[%s11251_s7 + $0x278] sm:$0xff]  ;;  %v2209_v17 = vsub.f32 %v9294_v38, %v9270_v20  ;;  %v12177_v20 = vld [vmem:[#allocation186_spill] sm:$0xff] }
 0x447   :  { %3002 = vperm.xlu1 %4978, %v12166_v33   ;;  %12167 = vst [vmem:[#allocation181_spill] sm:$0xff] %v9301_v39  ;;  %v9305_v25 = vmul.f32 %v8659_v56, %v12168_v13  ;;  %v9316_v27 = vmul.f32 0.020408163, %v12170_v48  ;;  %v5290_v56 = vld [vmem:[%s11246_s3 + $0x40] sm:$0xff]  ;;  %v12172_v6 = vld [vmem:[#allocation217_spill] sm:$0xff]  ;;  %v9334_v33 = vmul.f32 %v9284_v28, %v9284_v28  ;;  %5140 = vrsqrt.f32 %v3816_v29 }
 0x448   :  { %12165 = vst [vmem:[#allocation23_spill] sm:$0xff] %v9287_v3  ;;  %v2623_v46 = vmul.f32 %v5290_v56, %v12172_v6  ;;  %3181 = vst.msk [vmem:[%s11252_s8 + $0x30] sm:$0xff] %vm934_vm0, %v3101_v15  ;;  %v12173_v4 = vld [vmem:[#allocation125_spill] sm:$0xff]  ;;  %v9338_v13 = vmul.f32 %v9287_v3, %v9287_v3  ;;  %v5291_v15 = vld [vmem:[%s11246_s3 + $0x8] sm:$0xff]  ;;  %v9360_v3 = vmul.f32 %v12182_v12, %v12181_v9 }
 0x449   :  { %12171 = vst [vmem:[#allocation144_spill] sm:$0xff] %v9316_v27  ;;  %v9330_v32 = vmul.f32 %v12174_v8, %v12173_v4  ;;  %v12175_v48 = vld [vmem:[#allocation65_spill] sm:$0xff]  ;;  %v2616_v38 = vmul.f32 %v5291_v15, %v12177_v20  ;;  %v2738_v6 = vpop.permute.xlu0 %2737  ;;  %v9350_v4 = vld [vmem:[%s11251_s7 + $0x260] sm:$0xff]  ;;  %v12178_v8 = vld [vmem:[#allocation91_spill] sm:$0xff]  ;;  %v3819_v20 = vadd.f32 1e-05, %v3779_v7  ;;  %v3781_v10 = vsub.f32 %v3701_v43, %v3741_v62 }
 0x44a   :  { %v9341_v56 = vmul.f32 0.020408163, %v12175_v48  ;;  %v9353_v49 = vmul.f32 0.020408163, %v12178_v8  ;;  %v3103_v39 = vadd.f32 %v2738_v6, %v2623_v46  ;;  %v12180_v48 = vsub.f32 %v9094_v26, %v9079_v36  ;;  %v2703_v28 = vpop.permute.xlu1 %2702  ;;  %3047 = vperm.xlu0 %4979, %v2205_v1   ;;  %v9367_v46 = vld [vmem:[%s11251_s7 + $0x270] sm:$0xff]  ;;  %v12183_v36 = vld [vmem:[#allocation17_spill] sm:$0xff] }
 0x44b   :  { %v3096_v58 = vadd.f32 %v2703_v28, %v2616_v38  ;;  %v9371_v26 = vmul.f32 %v9316_v27, %v9316_v27  ;;  %v3703_v1 = vmul.f32 0.020408163, %v12183_v36  ;;  %v5292_v12 = vld [vmem:[%s11246_s3 + $0x50] sm:$0xff]  ;;  %v2211_v62 = vsub.f32 %v9350_v4, %v9330_v32  ;;  %v12185_v28 = vld [vmem:[#allocation89_spill] sm:$0xff]  ;;  %v12187_v38 = vld [vmem:[#allocation59_spill] sm:$0xff] }
 0x44c   :  { %12176 = vst [vmem:[#allocation183_spill] sm:$0xff] %v9341_v56  ;;  %12179 = vst [vmem:[#allocation157_spill] sm:$0xff] %v9353_v49  ;;  %3012 = vperm.xlu1 %4978, %v12180_v48   ;;  %v12184_v9 = vld [vmem:[#allocation212_spill] sm:$0xff]  ;;  %v9386_v43 = vmul.f32 %v9341_v56, %v9341_v56  ;;  %v9389_v7 = vmul.f32 0.020408163, %v12185_v28  ;;  %v5293_v8 = vld [vmem:[%s11246_s3 + $0x18] sm:$0xff]  ;;  %v9404_v32 = vmul.f32 %v9353_v49, %v9353_v49  ;;  %5142 = vrsqrt.f32 %v3819_v20 }
 0x44d   :  { %v2625_v29 = vmul.f32 %v5292_v12, %v12184_v9  ;;  %3183 = vst.msk [vmem:[%s11252_s8 + $0x40] sm:$0xff] %vm934_vm0, %v3103_v39  ;;  %v9392_v6 = vmul.f32 0.020408163, %v12187_v38  ;;  %v12189_v48 = vld [vmem:[#allocation209_spill] sm:$0xff]  ;;  %3176 = vst.msk [vmem:[%s11252_s8 + $0x8] sm:$0xff] %vm934_vm0, %v3096_v58  ;;  %v2748_v39 = vpop.permute.xlu0 %2747  ;;  %v12190_v12 = vsub.f32 %v9099_v11, %v9083_v52  ;;  %v12191_v38 = vld [vmem:[#allocation12_spill] sm:$0xff]  ;;  %v3783_v49 = vsub.f32 %v3703_v1, %v9338_v13 }
 0x44e   :  { %12186 = vst [vmem:[#allocation52_spill] sm:$0xff] %v9389_v7  ;;  %v2618_v36 = vmul.f32 %v5293_v8, %v12189_v48  ;;  %v2713_v9 = vpop.permute.xlu1 %2712  ;;  %3057 = vperm.xlu0 %4979, %v2207_v55   ;;  %v3695_v8 = vmul.f32 0.020408163, %v12191_v38  ;;  %v3821_v48 = vadd.f32 1e-05, %v3781_v10  ;;  %v12192_v15 = vld [vmem:[#allocation57_spill] sm:$0xff]  ;;  %v9427_v10 = vmul.f32 %v9389_v7, %v9389_v7 }
 0x44f   :  { %12188 = vst [vmem:[#allocation32_spill] sm:$0xff] %v9392_v6  ;;  %v3105_v4 = vadd.f32 %v2748_v39, %v2625_v29  ;;  %v9413_v27 = vmul.f32 0.020408163, %v12192_v15  ;;  %v12193_v29 = vld [vmem:[#allocation153_spill] sm:$0xff]  ;;  %v5294_v52 = vld [vmem:[%s11246_s3 + $0x60] sm:$0xff]  ;;  %v9431_v13 = vmul.f32 %v9392_v6, %v9392_v6  ;;  %v12195_v15 = vld [vmem:[#allocation76_spill] sm:$0xff]  ;;  %v12202_v6 = vsub.f32 %v9113_v53, %v9103_v24 }
 0x450   :  { %3022 = vperm.xlu1 %4978, %v12190_v12   ;;  %v3098_v58 = vadd.f32 %v2713_v9, %v2618_v36  ;;  %v3705_v39 = vmul.f32 0.020408163, %v12193_v29  ;;  %v12194_v11 = vld [vmem:[#allocation213_spill] sm:$0xff]  ;;  %v9434_v20 = vmul.f32 0.020408163, %v12195_v15  ;;  %v5295_v1 = vld [vmem:[%s11246_s3 + $0x28] sm:$0xff]  ;;  %5144 = vrsqrt.f32 %v3821_v48 }
 0x451   :  { %v2627_v55 = vmul.f32 %v5294_v52, %v12194_v11  ;;  %3185 = vst.msk [vmem:[%s11252_s8 + $0x50] sm:$0xff] %vm934_vm0, %v3105_v4  ;;  %v12197_v36 = vld [vmem:[#allocation211_spill] sm:$0xff]  ;;  %v2758_v4 = vpop.permute.xlu0 %2757  ;;  %v12198_v9 = vld [vmem:[#allocation70_spill] sm:$0xff]  ;;  %v12199_v29 = vld [vmem:[#allocation68_spill] sm:$0xff] }
 0x452   :  { %12196 = vst [vmem:[#allocation49_spill] sm:$0xff] %v9434_v20  ;;  %v2620_v12 = vmul.f32 %v5295_v1, %v12197_v36  ;;  %3178 = vst.msk [vmem:[%s11252_s8 + $0x18] sm:$0xff] %vm934_vm0, %v3098_v58  ;;  %v9445_v38 = vmul.f32 0.020408163, %v12198_v9  ;;  %v9448_v52 = vmul.f32 0.020408163, %v12199_v29  ;;  %v2723_v1 = vpop.permute.xlu1 %2722  ;;  %3067 = vperm.xlu0 %4979, %v2209_v17   ;;  %v3775_v36 = vsub.f32 %v3695_v8, %v9184_v21 }
 0x453   :  { %v12201_v11 = vld [vmem:[#allocation132_spill] sm:$0xff]  ;;  %v3107_v28 = vadd.f32 %v2758_v4, %v2627_v55  ;;  %v12203_v58 = vld [vmem:[#allocation155_spill] sm:$0xff]  ;;  %v9458_v9 = vmul.f32 %v9413_v27, %v9413_v27  ;;  %v3823_v29 = vadd.f32 1e-05, %v3783_v49  ;;  %v9471_v21 = vmul.f32 %v9434_v20, %v9434_v20  ;;  %v12206_v49 = vld [vmem:[#allocation90_spill] sm:$0xff] }
 0x454   :  { %12200 = vst [vmem:[#allocation34_spill] sm:$0xff] %v9448_v52  ;;  %v3697_v15 = vmul.f32 0.020408163, %v12201_v11  ;;  %3032 = vperm.xlu1 %4978, %v12202_v6   ;;  %v3707_v7 = vmul.f32 0.020408163, %v12203_v58  ;;  %v3100_v56 = vadd.f32 %v2723_v1, %v2620_v12  ;;  %v3785_v11 = vsub.f32 %v3705_v39, %v9386_v43  ;;  %v5296_v24 = vld [vmem:[%s11246_s3 + $0x70] sm:$0xff]  ;;  %v5141_v20 = vpop.eup %5140 }
 0x455   :  { %v12204_v53 = vld [vmem:[#allocation216_spill] sm:$0xff]  ;;  %3187 = vst.msk [vmem:[%s11252_s8 + $0x60] sm:$0xff] %vm934_vm0, %v3107_v28  ;;  %v9477_v43 = vmul.f32 0.020408163, %v12206_v49  ;;  %v5297_v48 = vld [vmem:[%s11246_s3 + $0x38] sm:$0xff]  ;;  %v12208_v39 = vld [vmem:[#allocation214_spill] sm:$0xff]  ;;  %v2768_v28 = vpop.permute.xlu0 %2767  ;;  %v9489_v12 = vmul.f32 %v9445_v38, %v9445_v38  ;;  %v9498_v49 = vmul.f32 %v9448_v52, %v9448_v52  ;;  %5146 = vrsqrt.f32 %v3823_v29 }
 0x456   :  { %v2629_v6 = vmul.f32 %v5296_v24, %v12204_v53  ;;  %v12205_v17 = vld [vmem:[#allocation92_spill] sm:$0xff]  ;;  %v2622_v55 = vmul.f32 %v5297_v48, %v12208_v39  ;;  %3180 = vst.msk [vmem:[%s11252_s8 + $0x28] sm:$0xff] %vm934_vm0, %v3100_v56  ;;  %v3777_v4 = vsub.f32 %v3697_v15, %v9219_v37  ;;  %v12209_v1 = vld [vmem:[#allocation11_spill] sm:$0xff]  ;;  %v12210_v53 = vsub.f32 %v9131_v51, %v9117_v47  ;;  %v5298_v47 = vld [vmem:[%s11246_s3 + $0x80] sm:$0xff] }
 0x457   :  { %v9474_v8 = vmul.f32 0.020408163, %v12205_v17  ;;  %12207 = vst [vmem:[#allocation103_spill] sm:$0xff] %v9477_v43  ;;  %v3698_v58 = vmul.f32 0.020408163, %v12209_v1  ;;  %v2733_v17 = vpop.permute.xlu1 %2732  ;;  %3077 = vperm.xlu0 %4979, %v2211_v62   ;;  %v3787_v48 = vsub.f32 %v3707_v7, %v9427_v10  ;;  %v12211_v15 = vld [vmem:[#allocation148_spill] sm:$0xff]  ;;  %v9519_v10 = vmul.f32 %v9477_v43, %v9477_v43 }
 0x458   :  { %v3109_v24 = vadd.f32 %v2768_v28, %v2629_v6  ;;  %3042 = vperm.xlu1 %4978, %v12210_v53   ;;  %v3815_v56 = vadd.f32 1e-05, %v3775_v36  ;;  %v3102_v39 = vadd.f32 %v2733_v17, %v2622_v55  ;;  %v3825_v37 = vadd.f32 1e-05, %v3785_v11  ;;  %v12212_v51 = vld [vmem:[#allocation219_spill] sm:$0xff]  ;;  %v12214_v55 = vld [vmem:[#allocation220_spill] sm:$0xff] }
 0x459   :  { %v3709_v1 = vmul.f32 0.020408163, %v12211_v15  ;;  %v2631_v6 = vmul.f32 %v5298_v47, %v12212_v51  ;;  %v3296_v62 = vld [vmem:[%s11250_s6 + $0x288] sm:$0xff]  ;;  %v9515_v7 = vmul.f32 %v9474_v8, %v9474_v8  ;;  %v3817_v53 = vadd.f32 1e-05, %v3777_v4  ;;  %v12215_v15 = vld [vmem:[#allocation13_spill] sm:$0xff]  ;;  %v5143_v4 = vpop.eup %5142 }
 0x45a   :  { %3189 = vst.msk [vmem:[%s11252_s8 + $0x70] sm:$0xff] %vm934_vm0, %v3109_v24  ;;  %v12213_v36 = vld [vmem:[#allocation179_spill] sm:$0xff]  ;;  %3182 = vst.msk [vmem:[%s11252_s8 + $0x38] sm:$0xff] %vm934_vm0, %v3102_v39  ;;  %v2778_v24 = vpop.permute.xlu0 %2777  ;;  %v3778_v17 = vsub.f32 %v3698_v58, %v9251_v5  ;;  %v3700_v47 = vmul.f32 0.020408163, %v12215_v15  ;;  %5148 = vrsqrt.f32 %v3815_v56  ;;  %v9540_v39 = vmul.f32 %v5141_v20, %v3296_v62  ;;  %v12218_v58 = vld [vmem:[#allocation161_spill] sm:$0xff] }
 0x45b   :  { %v9522_v29 = vmul.f32 0.020408163, %v12213_v36  ;;  %v5299_v11 = vld [vmem:[%s11246_s3 + $0x48] sm:$0xff]  ;;  %v3111_v51 = vadd.f32 %v2778_v24, %v2631_v6  ;;  %v12216_v36 = vsub.f32 %v9159_v14, %v9142_v59  ;;  %v2743_v43 = vpop.permute.xlu1 %2742  ;;  %5150 = vrsqrt.f32 %v3825_v37  ;;  %v5300_v59 = vld [vmem:[%s11246_s3 + $0x90] sm:$0xff]  ;;  %v12219_v14 = vld [vmem:[#allocation221_spill] sm:$0xff] }
 0x45c   :  { %v2624_v28 = vmul.f32 %v5299_v11, %v12214_v55  ;;  %v12217_v11 = vsub.f32 %v9367_v46, %v9360_v3  ;;  %v3827_v55 = vadd.f32 1e-05, %v3787_v48  ;;  %v3789_v5 = vsub.f32 %v3709_v1, %v9458_v9  ;;  %v3299_v3 = vld [vmem:[%s11250_s6 + $0x2a0] sm:$0xff]  ;;  %v12220_v20 = vld [vmem:[#allocation69_spill] sm:$0xff] }
 0x45d   :  { %3052 = vperm.xlu1 %4978, %v12216_v36   ;;  %v3711_v6 = vmul.f32 0.020408163, %v12218_v58  ;;  %v2633_v24 = vmul.f32 %v5300_v59, %v12219_v14  ;;  %3191 = vst.msk [vmem:[%s11252_s8 + $0x80] sm:$0xff] %vm934_vm0, %v3111_v51  ;;  %v9557_v46 = vmul.f32 %v9522_v29, %v9522_v29  ;;  %v9560_v9 = vmul.f32 0.020408163, %v12220_v20  ;;  %v5301_v48 = vld [vmem:[%s11246_s3 + $0x58] sm:$0xff] }
 0x45e   :  { %3087 = vperm.xlu0 %4979, %v12217_v11   ;;  %v3104_v52 = vadd.f32 %v2743_v43, %v2624_v28  ;;  %v12222_v43 = vld [vmem:[#allocation67_spill] sm:$0xff]  ;;  %v12223_v37 = vld [vmem:[#allocation222_spill] sm:$0xff]  ;;  %v2788_v62 = vpop.permute.xlu0 %2787  ;;  %5152 = vrsqrt.f32 %v3817_v53  ;;  %v3818_v28 = vadd.f32 1e-05, %v3778_v17  ;;  %v3780_v15 = vsub.f32 %v3700_v47, %v9281_v19 }
 0x45f   :  { %12221 = vst [vmem:[#allocation29_spill] sm:$0xff] %v9560_v9  ;;  %v9563_v56 = vmul.f32 0.020408163, %v12222_v43  ;;  %v2626_v1 = vmul.f32 %v5301_v48, %v12223_v37  ;;  %v3113_v51 = vadd.f32 %v2788_v62, %v2633_v24  ;;  %v12224_v36 = vsub.f32 %v9200_v34, %v9180_v45  ;;  %v2753_v11 = vpop.permute.xlu1 %2752  ;;  %v12225_v58 = vld [vmem:[#allocation138_spill] sm:$0xff]  ;;  %v12227_v34 = vld [vmem:[#allocation223_spill] sm:$0xff]  ;;  %v12231_v48 = vld [vmem:[#allocation224_spill] sm:$0xff] }
 0x460   :  { %3184 = vst.msk [vmem:[%s11252_s8 + $0x48] sm:$0xff] %vm934_vm0, %v3104_v52  ;;  %v3702_v59 = vmul.f32 0.020408163, %v12225_v58  ;;  %5154 = vrsqrt.f32 %v3827_v55  ;;  %v9579_v20 = vmul.f32 %v5143_v4, %v3299_v3  ;;  %v5145_v52 = vpop.eup %5144  ;;  %v3829_v43 = vadd.f32 1e-05, %v3789_v5  ;;  %v12226_v17 = vld [vmem:[#allocation38_spill] sm:$0xff] }
 0x461   :  { %3062 = vperm.xlu1 %4978, %v12224_v36   ;;  %v3106_v14 = vadd.f32 %v2753_v11, %v2626_v1  ;;  %v3791_v53 = vsub.f32 %v3711_v6, %v9489_v12  ;;  %v3713_v19 = vmul.f32 0.020408163, %v12226_v17  ;;  %v5302_v45 = vld [vmem:[%s11246_s3 + $0xa0] sm:$0xff]  ;;  %3193 = vst.msk [vmem:[%s11252_s8 + $0x90] sm:$0xff] %vm934_vm0, %v3113_v51  ;;  %v3301_v55 = vld [vmem:[%s11250_s6 + $0x2b0] sm:$0xff]  ;;  %v9596_v12 = vmul.f32 %v9560_v9, %v9560_v9  ;;  %v5303_v3 = vld [vmem:[%s11246_s3 + $0x68] sm:$0xff] }
 0x462   :  { %4022 = vperm.xlu0 %4979, %v9540_v39   ;;  %v2635_v47 = vmul.f32 %v5302_v45, %v12227_v34  ;;  %v12228_v4 = vld [vmem:[#allocation60_spill] sm:$0xff]  ;;  %v12230_v6 = vld [vmem:[#allocation26_spill] sm:$0xff]  ;;  %v2628_v37 = vmul.f32 %v5303_v3, %v12231_v48  ;;  %v2798_v1 = vpop.permute.xlu0 %2797  ;;  %5156 = vrsqrt.f32 %v3818_v28  ;;  %v12235_v17 = vsub.f32 %v9233_v60, %v9215_v0  ;;  %v12236_v48 = vld [vmem:[#allocation225_spill] sm:$0xff]  ;;  %v5147_v60 = vpop.eup %5146 }
 0x463   :  { %v9599_v5 = vmul.f32 0.020408163, %v12228_v4  ;;  %v3704_v24 = vmul.f32 0.020408163, %v12230_v6  ;;  %3186 = vst.msk [vmem:[%s11252_s8 + $0x58] sm:$0xff] %vm934_vm0, %v3106_v14  ;;  %v12232_v62 = vld [vmem:[#allocation80_spill] sm:$0xff]  ;;  %v2763_v45 = vpop.permute.xlu1 %2762  ;;  %v3782_v4 = vsub.f32 %v3702_v59, %v9334_v33  ;;  %v9619_v14 = vmul.f32 %v5145_v52, %v3301_v55 }
 0x464   :  { %v9611_v51 = vmul.f32 0.020408163, %v12232_v62  ;;  %v12234_v36 = vld [vmem:[#allocation156_spill] sm:$0xff]  ;;  %v3115_v58 = vadd.f32 %v2798_v1, %v2635_v47  ;;  %v3820_v34 = vadd.f32 1e-05, %v3780_v15  ;;  %v3108_v6 = vadd.f32 %v2763_v45, %v2628_v37  ;;  %v5305_v59 = vld [vmem:[%s11246_s3 + $0x78] sm:$0xff] }
 0x465   :  { %12229 = vst [vmem:[#allocation189_spill] sm:$0xff] %v9599_v5  ;;  %v3715_v11 = vmul.f32 0.020408163, %v12234_v36  ;;  %3072 = vperm.xlu1 %4978, %v12235_v17   ;;  %5158 = vrsqrt.f32 %v3829_v43  ;;  %v3831_v3 = vadd.f32 1e-05, %v3791_v53  ;;  %v3793_v28 = vsub.f32 %v3713_v19, %v9515_v7  ;;  %v5304_v47 = vld [vmem:[%s11246_s3 + $0xb0] sm:$0xff] }
 0x466   :  { %12233 = vst [vmem:[#allocation152_spill] sm:$0xff] %v9611_v51  ;;  %4037 = vperm.xlu0 %4979, %v9579_v20   ;;  %v2637_v0 = vmul.f32 %v5304_v47, %v12236_v48  ;;  %3195 = vst.msk [vmem:[%s11252_s8 + $0xa0] sm:$0xff] %vm934_vm0, %v3115_v58  ;;  %v9632_v33 = vmul.f32 %v9563_v56, %v9563_v56  ;;  %v9636_v15 = vmul.f32 %v9599_v5, %v9599_v5  ;;  %v12237_v52 = vld [vmem:[#allocation226_spill] sm:$0xff]  ;;  %v2808_v53 = vpop.permute.xlu0 %2807  ;;  %v12240_v17 = vld [vmem:[#allocation44_spill] sm:$0xff] }
 0x467   :  { %v3784_v7 = vsub.f32 %v3704_v24, %v9371_v26  ;;  %v2630_v43 = vmul.f32 %v5305_v59, %v12237_v52  ;;  %3188 = vst.msk [vmem:[%s11252_s8 + $0x68] sm:$0xff] %vm934_vm0, %v3108_v6  ;;  %v3303_v19 = vld [vmem:[%s11250_s6 + $0x2c0] sm:$0xff]  ;;  %v9652_v55 = vmul.f32 %v9611_v51, %v9611_v51  ;;  %v12238_v26 = vld [vmem:[#allocation28_spill] sm:$0xff]  ;;  %v3795_v37 = vsub.f32 %v3715_v11, %v9557_v46  ;;  %v2773_v36 = vpop.permute.xlu1 %2772  ;;  %v5149_v47 = vpop.eup %5148  ;;  %v12244_v52 = vld [vmem:[#allocation25_spill] sm:$0xff] }
 0x468   :  { %v3706_v24 = vmul.f32 0.020408163, %v12238_v26  ;;  %v3117_v1 = vadd.f32 %v2808_v53, %v2637_v0  ;;  %v12239_v62 = vsub.f32 %v9277_v57, %v9256_v31  ;;  %5160 = vrsqrt.f32 %v3820_v34  ;;  %v5306_v46 = vld [vmem:[%s11246_s3 + $0xc0] sm:$0xff]  ;;  %v3305_v34 = vld [vmem:[%s11250_s6 + $0x2d0] sm:$0xff]  ;;  %v12245_v53 = vld [vmem:[#allocation7_spill] sm:$0xff] }
 0x469   :  { %v3822_v58 = vadd.f32 1e-05, %v3782_v4  ;;  %v3717_v45 = vmul.f32 0.020408163, %v12240_v17  ;;  %v3110_v6 = vadd.f32 %v2773_v36, %v2630_v43  ;;  %5162 = vrsqrt.f32 %v3831_v3  ;;  %v12241_v11 = vld [vmem:[#allocation62_spill] sm:$0xff]  ;;  %v5151_v4 = vpop.eup %5150  ;;  %v12242_v3 = vld [vmem:[#allocation96_spill] sm:$0xff] }
 0x46a   :  { %3082 = vperm.xlu1 %4978, %v12239_v62   ;;  %4047 = vperm.xlu0 %4979, %v9619_v14   ;;  %v3833_v48 = vadd.f32 1e-05, %v3793_v28  ;;  %v2639_v0 = vmul.f32 %v5306_v46, %v12241_v11  ;;  %3197 = vst.msk [vmem:[%s11252_s8 + $0xb0] sm:$0xff] %vm934_vm0, %v3117_v1  ;;  %v9669_v31 = vmul.f32 %v5147_v60, %v3303_v19  ;;  %v3295_v57 = vld [vmem:[%s11250_s6 + $0x280] sm:$0xff]  ;;  %v9678_v28 = vmul.f32 0.020408163, %v12242_v3  ;;  %v2818_v26 = vpop.permute.xlu0 %2817 }
 0x46b   :  { %v3824_v59 = vadd.f32 1e-05, %v3784_v7  ;;  %v3708_v43 = vmul.f32 0.020408163, %v12244_v52  ;;  %v5307_v60 = vld [vmem:[%s11246_s3 + $0x88] sm:$0xff]  ;;  %3190 = vst.msk [vmem:[%s11252_s8 + $0x78] sm:$0xff] %vm934_vm0, %v3110_v6  ;;  %v3786_v36 = vsub.f32 %v3706_v24, %v9404_v32  ;;  %v12248_v46 = vsub.f32 %v9313_v50, %v9305_v25  ;;  %v2783_v11 = vpop.permute.xlu1 %2782  ;;  %v5153_v3 = vpop.eup %5152 }
 0x46c   :  { %12243 = vst [vmem:[#allocation33_spill] sm:$0xff] %v9678_v28  ;;  %v2632_v19 = vmul.f32 %v5307_v60, %v12245_v53  ;;  %v12246_v1 = vld [vmem:[#allocation63_spill] sm:$0xff]  ;;  %v3835_v7 = vadd.f32 1e-05, %v3795_v37  ;;  %v3119_v17 = vadd.f32 %v2818_v26, %v2639_v0  ;;  %5164 = vrsqrt.f32 %v3822_v58  ;;  %v12249_v6 = vld [vmem:[#allocation162_spill] sm:$0xff]  ;;  %v5308_v32 = vld [vmem:[%s11246_s3 + $0xd0] sm:$0xff] }
 0x46d   :  { %v9690_v62 = vmul.f32 0.020408163, %v12246_v1  ;;  %v3797_v52 = vsub.f32 %v3717_v45, %v9632_v33  ;;  %v3719_v60 = vmul.f32 0.020408163, %v12249_v6  ;;  %v5155_v1 = vpop.eup %5154  ;;  %5166 = vrsqrt.f32 %v3833_v48  ;;  %v12250_v24 = vld [vmem:[#allocation71_spill] sm:$0xff]  ;;  %v5309_v45 = vld [vmem:[%s11246_s3 + $0x98] sm:$0xff] }
 0x46e   :  { %3092 = vperm.xlu1 %4978, %v12248_v46   ;;  %4057 = vperm.xlu0 %4979, %v9669_v31   ;;  %v3112_v53 = vadd.f32 %v2783_v11, %v2632_v19  ;;  %v2641_v37 = vmul.f32 %v5308_v32, %v12250_v24  ;;  %3199 = vst.msk [vmem:[%s11252_s8 + $0xc0] sm:$0xff] %vm934_vm0, %v3119_v17  ;;  %5168 = vrsqrt.f32 %v3824_v59  ;;  %v12251_v48 = vld [vmem:[#allocation18_spill] sm:$0xff]  ;;  %v12253_v11 = vld [vmem:[#allocation48_spill] sm:$0xff] }
 0x46f   :  { %12247 = vst [vmem:[#allocation40_spill] sm:$0xff] %v9690_v62  ;;  %v9707_v25 = vmul.f32 %v5149_v47, %v3295_v57  ;;  %v9709_v50 = vmul.f32 %v5151_v4, %v3305_v34  ;;  %v9713_v33 = vmul.f32 %v9678_v28, %v9678_v28  ;;  %v3788_v58 = vsub.f32 %v3708_v43, %v9431_v13  ;;  %v2828_v47 = vpop.permute.xlu0 %2827  ;;  %v3297_v57 = vld [vmem:[%s11250_s6 + $0x290] sm:$0xff]  ;;  %v3307_v13 = vld [vmem:[%s11250_s6 + $0x2e0] sm:$0xff]  ;;  %v2793_v19 = vpop.permute.xlu1 %2792 }
 0x470   :  { %v2634_v0 = vmul.f32 %v5309_v45, %v12251_v48  ;;  %3192 = vst.msk [vmem:[%s11252_s8 + $0x88] sm:$0xff] %vm934_vm0, %v3112_v53  ;;  %v3826_v34 = vadd.f32 1e-05, %v3786_v36  ;;  %v12252_v4 = vld [vmem:[#allocation150_spill] sm:$0xff]  ;;  %5170 = vrsqrt.f32 %v3835_v7  ;;  %v3121_v43 = vadd.f32 %v2828_v47, %v2641_v37  ;;  %v5157_v26 = vpop.eup %5156  ;;  %v3309_v37 = vld [vmem:[%s11250_s6 + $0x2f0] sm:$0xff]  ;;  %v12255_v48 = vld [vmem:[#allocation73_spill] sm:$0xff] }
 0x471   :  { %v3710_v59 = vmul.f32 0.020408163, %v12252_v4  ;;  %v3837_v17 = vadd.f32 1e-05, %v3797_v52  ;;  %v3799_v46 = vsub.f32 %v3719_v60, %v9652_v55  ;;  %v3721_v6 = vmul.f32 0.020408163, %v12253_v11 }
 0x472   :  { %4017 = vperm.xlu1 %4978, %v9707_v25   ;;  %4067 = vperm.xlu0 %4979, %v9709_v50   ;;  %v3114_v53 = vadd.f32 %v2793_v19, %v2634_v0  ;;  %v3761_v32 = vmul.f32 %v9690_v62, %v9690_v62  ;;  %v5310_v36 = vld [vmem:[%s11246_s3 + $0xe0] sm:$0xff]  ;;  %3201 = vst.msk [vmem:[%s11252_s8 + $0xd0] sm:$0xff] %vm934_vm0, %v3121_v43  ;;  %v3298_v60 = vld [vmem:[%s11250_s6 + $0x298] sm:$0xff]  ;;  %v5159_v45 = vpop.eup %5158  ;;  %v9756_v0 = vmul.f32 0.020408163, %v12255_v48  ;;  %v12257_v47 = vld [vmem:[#allocation79_spill] sm:$0xff]  ;;  %5172 = vrsqrt.f32 %v3826_v34 }
 0x473   :  { %v12254_v7 = vld [vmem:[#allocation178_spill] sm:$0xff]  ;;  %v9745_v52 = vmul.f32 %v5153_v3, %v3297_v57  ;;  %v9747_v55 = vmul.f32 %v5155_v1, %v3307_v13  ;;  %v9759_v4 = vmul.f32 0.020408163, %v12257_v47  ;;  %v3828_v43 = vadd.f32 1e-05, %v3788_v58  ;;  %v5311_v3 = vld [vmem:[%s11246_s3 + $0xa8] sm:$0xff]  ;;  %v2838_v13 = vpop.permute.xlu0 %2837  ;;  %v2803_v58 = vpop.permute.xlu1 %2802 }
 0x474   :  { %v2643_v24 = vmul.f32 %v5310_v36, %v12254_v7  ;;  %12256 = vst [vmem:[#allocation158_spill] sm:$0xff] %v9756_v0  ;;  %v12259_v1 = vld [vmem:[#allocation2_spill] sm:$0xff]  ;;  %3194 = vst.msk [vmem:[%s11252_s8 + $0x98] sm:$0xff] %vm934_vm0, %v3114_v53  ;;  %v3790_v19 = vsub.f32 %v3710_v59, %v9471_v21  ;;  %v12260_v11 = vld [vmem:[#allocation163_spill] sm:$0xff]  ;;  %5174 = vrsqrt.f32 %v3837_v17  ;;  %v3839_v48 = vadd.f32 1e-05, %v3799_v46 }
 0x475   :  { %12258 = vst [vmem:[#allocation37_spill] sm:$0xff] %v9759_v4  ;;  %v2636_v57 = vmul.f32 %v5311_v3, %v12259_v1  ;;  %v3712_v36 = vmul.f32 0.020408163, %v12260_v11  ;;  %v3801_v47 = vsub.f32 %v3721_v6, %v3761_v32  ;;  %v5161_v1 = vpop.eup %5160  ;;  %v12261_v28 = vld [vmem:[#allocation166_spill] sm:$0xff]  ;;  %v5312_v34 = vld [vmem:[%s11246_s3 + $0xf0] sm:$0xff]  ;;  %v9782_v53 = vmul.f32 %v5157_v26, %v3298_v60  ;;  %v3300_v46 = vld [vmem:[%s11250_s6 + $0x2a8] sm:$0xff] }
 0x476   :  { %v3123_v7 = vadd.f32 %v2838_v13, %v2643_v24  ;;  %4027 = vperm.xlu1 %4978, %v9745_v52   ;;  %4077 = vperm.xlu0 %4979, %v9747_v55   ;;  %v3723_v5 = vmul.f32 0.020408163, %v12261_v28  ;;  %v12262_v21 = vld [vmem:[#allocation94_spill] sm:$0xff]  ;;  %v9784_v17 = vmul.f32 %v5159_v45, %v3309_v37  ;;  %v5163_v28 = vpop.eup %5162  ;;  %v12263_v6 = vld [vmem:[#allocation72_spill] sm:$0xff]  ;;  %5176 = vrsqrt.f32 %v3828_v43  ;;  %v12265_v24 = vld [vmem:[#allocation35_spill] sm:$0xff] }
 0x477   :  { %v3116_v3 = vadd.f32 %v2803_v58, %v2636_v57  ;;  %v2645_v59 = vmul.f32 %v5312_v34, %v12262_v21  ;;  %v9790_v32 = vmul.f32 0.020408163, %v12263_v6  ;;  %v3714_v57 = vmul.f32 0.020408163, %v12265_v24  ;;  %v5313_v13 = vld [vmem:[%s11246_s3 + $0xb8] sm:$0xff]  ;;  %v12266_v11 = vld [vmem:[#allocation135_spill] sm:$0xff]  ;;  %v2848_v60 = vpop.permute.xlu0 %2847  ;;  %v2813_v34 = vpop.permute.xlu1 %2812 }
 0x478   :  { %3203 = vst.msk [vmem:[%s11252_s8 + $0xe0] sm:$0xff] %vm934_vm0, %v3123_v7  ;;  %v2638_v26 = vmul.f32 %v5313_v13, %v12266_v11  ;;  %v3311_v37 = vld [vmem:[%s11250_s6 + $0x300] sm:$0xff]  ;;  %v3763_v45 = vmul.f32 %v9759_v4, %v9759_v4  ;;  %v3830_v43 = vadd.f32 1e-05, %v3790_v19  ;;  %v3792_v7 = vsub.f32 %v3712_v36, %v9498_v49  ;;  %v12267_v11 = vld [vmem:[#allocation172_spill] sm:$0xff]  ;;  %v12278_v62 = vld [vmem:[#allocation55_spill] sm:$0xff] }
 0x479   :  { %12264 = vst [vmem:[#allocation160_spill] sm:$0xff] %v9790_v32  ;;  %3196 = vst.msk [vmem:[%s11252_s8 + $0xa8] sm:$0xff] %vm934_vm0, %v3116_v3  ;;  %v3125_v58 = vadd.f32 %v2848_v60, %v2645_v59  ;;  %5178 = vrsqrt.f32 %v3839_v48  ;;  %v3841_v21 = vadd.f32 1e-05, %v3801_v47  ;;  %v9809_v6 = vmul.f32 %v5161_v1, %v3300_v46  ;;  %v5165_v24 = vpop.eup %5164  ;;  %v5314_v19 = vld [vmem:[%s11246_s3 + $0x100] sm:$0xff]  ;;  %v3302_v47 = vld [vmem:[%s11250_s6 + $0x2b8] sm:$0xff] }
 0x47a   :  { %4032 = vperm.xlu1 %4978, %v9782_v53   ;;  %4087 = vperm.xlu0 %4979, %v9784_v17   ;;  %v3118_v3 = vadd.f32 %v2813_v34, %v2638_v26  ;;  %v3803_v13 = vsub.f32 %v3723_v5, %v3763_v45  ;;  %v3725_v9 = vmul.f32 0.020408163, %v12267_v11  ;;  %v12268_v49 = vld [vmem:[#allocation82_spill] sm:$0xff]  ;;  %v9820_v48 = vmul.f32 %v5163_v28, %v3311_v37  ;;  %v5167_v5 = vpop.eup %5166  ;;  %v12269_v59 = vld [vmem:[#allocation99_spill] sm:$0xff]  ;;  %v3313_v45 = vld [vmem:[%s11250_s6 + $0x310] sm:$0xff] }
 0x47b   :  { %v2647_v36 = vmul.f32 %v5314_v19, %v12268_v49  ;;  %3205 = vst.msk [vmem:[%s11252_s8 + $0xf0] sm:$0xff] %vm934_vm0, %v3125_v58  ;;  %v3765_v1 = vmul.f32 %v9790_v32, %v9790_v32  ;;  %v9828_v46 = vmul.f32 0.020408163, %v12269_v59  ;;  %v3794_v26 = vsub.f32 %v3714_v57, %v9519_v10  ;;  %v5315_v60 = vld [vmem:[%s11246_s3 + $0xc8] sm:$0xff]  ;;  %v2858_v37 = vpop.permute.xlu0 %2857  ;;  %v5169_v58 = vpop.eup %5168  ;;  %v12271_v10 = vld [vmem:[#allocation169_spill] sm:$0xff]  ;;  %v12272_v49 = vld [vmem:[#allocation188_spill] sm:$0xff] }
 0x47c   :  { %v2640_v28 = vmul.f32 %v5315_v60, %v8730_v22  ;;  %3198 = vst.msk [vmem:[%s11252_s8 + $0xb8] sm:$0xff] %vm934_vm0, %v3118_v3  ;;  %5180 = vrsqrt.f32 %v3830_v43  ;;  %v3832_v34 = vadd.f32 1e-05, %v3792_v7  ;;  %v3716_v57 = vmul.f32 0.020408163, %v12271_v10  ;;  %v2823_v19 = vpop.permute.xlu1 %2822  ;;  %v5316_v43 = vld [vmem:[%s11246_s3 + $0x110] sm:$0xff] }
 0x47d   :  { %12270 = vst [vmem:[#allocation46_spill] sm:$0xff] %v9828_v46  ;;  %v3127_v11 = vadd.f32 %v2858_v37, %v2647_v36  ;;  %v5171_v22 = vpop.eup %5170  ;;  %5182 = vrsqrt.f32 %v3841_v21  ;;  %v3727_v3 = vmul.f32 0.020408163, %v12272_v49  ;;  %v9846_v60 = vmul.f32 %v5165_v24, %v3302_v47  ;;  %v12273_v7 = vld [vmem:[#allocation4_spill] sm:$0xff]  ;;  %v3304_v21 = vld [vmem:[%s11250_s6 + $0x2c8] sm:$0xff] }
 0x47e   :  { %4042 = vperm.xlu1 %4978, %v9809_v6   ;;  %4097 = vperm.xlu0 %4979, %v9820_v48   ;;  %v3120_v59 = vadd.f32 %v2823_v19, %v2640_v28  ;;  %v3843_v32 = vadd.f32 1e-05, %v3803_v13  ;;  %v3805_v4 = vsub.f32 %v3725_v9, %v3765_v1  ;;  %v2649_v36 = vmul.f32 %v5316_v43, %v12273_v7  ;;  %v3315_v9 = vld [vmem:[%s11250_s6 + $0x320] sm:$0xff]  ;;  %v12274_v13 = vld [vmem:[#allocation101_spill] sm:$0xff]  ;;  %v12277_v19 = vld [vmem:[#allocation39_spill] sm:$0xff] }
 0x47f   :  { %3207 = vst.msk [vmem:[%s11252_s8 + $0x100] sm:$0xff] %vm934_vm0, %v3127_v11  ;;  %v9856_v37 = vmul.f32 %v5167_v5, %v3313_v45  ;;  %v3767_v24 = vmul.f32 %v9828_v46, %v9828_v46  ;;  %v9867_v47 = vmul.f32 0.020408163, %v12274_v13  ;;  %v3834_v1 = vadd.f32 1e-05, %v3794_v26  ;;  %v5317_v5 = vld [vmem:[%s11246_s3 + $0xd8] sm:$0xff]  ;;  %v2868_v10 = vpop.permute.xlu0 %2867  ;;  %v5173_v7 = vpop.eup %5172 }
 0x480   :  { %v12276_v28 = vld [vmem:[#allocation81_spill] sm:$0xff]  ;;  %3200 = vst.msk [vmem:[%s11252_s8 + $0xc8] sm:$0xff] %vm934_vm0, %v3120_v59  ;;  %5184 = vrsqrt.f32 %v3832_v34  ;;  %v3796_v11 = vsub.f32 %v3716_v57, %v9596_v12  ;;  %v3718_v49 = vmul.f32 0.020408163, %v12277_v19  ;;  %v3129_v43 = vadd.f32 %v2868_v10, %v2649_v36  ;;  %v2833_v26 = vpop.permute.xlu1 %2832  ;;  %v5318_v57 = vld [vmem:[%s11246_s3 + $0x120] sm:$0xff]  ;;  %v12279_v36 = vld [vmem:[#allocation16_spill] sm:$0xff] }
 0x481   :  { %12275 = vst [vmem:[#allocation173_spill] sm:$0xff] %v9867_v47  ;;  %v2642_v45 = vmul.f32 %v5317_v5, %v12276_v28  ;;  %v3807_v13 = vsub.f32 %v3727_v3, %v3767_v24  ;;  %v9881_v28 = vmul.f32 %v5169_v58, %v3304_v21  ;;  %v9883_v46 = vmul.f32 %v5171_v22, %v3315_v9  ;;  %v5175_v59 = vpop.eup %5174  ;;  %v3306_v58 = vld [vmem:[%s11250_s6 + $0x2d8] sm:$0xff]  ;;  %v5319_v3 = vld [vmem:[%s11246_s3 + $0xe8] sm:$0xff] }
 0x482   :  { %4052 = vperm.xlu1 %4978, %v9846_v60   ;;  %4107 = vperm.xlu0 %4979, %v9856_v37   ;;  %5186 = vrsqrt.f32 %v3843_v32  ;;  %v3845_v34 = vadd.f32 1e-05, %v3805_v4  ;;  %v3729_v12 = vmul.f32 0.020408163, %v12278_v62  ;;  %v2651_v10 = vmul.f32 %v5318_v57, %v12279_v36  ;;  %3209 = vst.msk [vmem:[%s11252_s8 + $0x110] sm:$0xff] %vm934_vm0, %v3129_v43  ;;  %v3317_v4 = vld [vmem:[%s11250_s6 + $0x330] sm:$0xff] }
 0x483   :  { %v3122_v5 = vadd.f32 %v2833_v26, %v2642_v45  ;;  %v3769_v62 = vmul.f32 %v9867_v47, %v9867_v47  ;;  %v12280_v32 = vld [vmem:[#allocation131_spill] sm:$0xff]  ;;  %5188 = vrsqrt.f32 %v3834_v1  ;;  %v12282_v21 = vld [vmem:[#allocation61_spill] sm:$0xff]  ;;  %v2878_v24 = vpop.permute.xlu0 %2877  ;;  %v5177_v45 = vpop.eup %5176  ;;  %v3836_v19 = vadd.f32 1e-05, %v3796_v11 }
 0x484   :  { %v9903_v22 = vmul.f32 0.020408163, %v12280_v32  ;;  %v2644_v9 = vmul.f32 %v5319_v3, %v12282_v21  ;;  %v3798_v43 = vsub.f32 %v3718_v49, %v9636_v15  ;;  %v12283_v26 = vld [vmem:[#allocation177_spill] sm:$0xff]  ;;  %v3131_v36 = vadd.f32 %v2878_v24, %v2651_v10  ;;  %v2843_v1 = vpop.permute.xlu1 %2842  ;;  %v3308_v32 = vld [vmem:[%s11250_s6 + $0x2e8] sm:$0xff]  ;;  %v12285_v49 = vld [vmem:[#allocation100_spill] sm:$0xff] }
 0x485   :  { %3202 = vst.msk [vmem:[%s11252_s8 + $0xd8] sm:$0xff] %vm934_vm0, %v3122_v5  ;;  %v3720_v57 = vmul.f32 0.020408163, %v12283_v26  ;;  %v3847_v3 = vadd.f32 1e-05, %v3807_v13  ;;  %v9920_v5 = vmul.f32 %v5173_v7, %v3306_v58  ;;  %v9922_v47 = vmul.f32 %v5175_v59, %v3317_v4  ;;  %v5320_v24 = vld [vmem:[%s11246_s3 + $0x130] sm:$0xff] }
 0x486   :  { %12281 = vst [vmem:[#allocation41_spill] sm:$0xff] %v9903_v22  ;;  %4062 = vperm.xlu1 %4978, %v9881_v28   ;;  %4117 = vperm.xlu0 %4979, %v9883_v46   ;;  %v3124_v21 = vadd.f32 %v2843_v1, %v2644_v9  ;;  %v5179_v11 = vpop.eup %5178  ;;  %5190 = vrsqrt.f32 %v3845_v34  ;;  %v3809_v15 = vsub.f32 %v3729_v12, %v3769_v62  ;;  %v3731_v10 = vmul.f32 0.020408163, %v12285_v49  ;;  %v12286_v26 = vld [vmem:[#allocation141_spill] sm:$0xff]  ;;  %v3319_v7 = vld [vmem:[%s11250_s6 + $0x340] sm:$0xff]  ;;  %v12289_v58 = vld [vmem:[#allocation95_spill] sm:$0xff] }
 0x487   :  { %12284 = vst [vmem:[#allocation43_spill] sm:$0xff] %v9922_v47  ;;  %v2653_v51 = vmul.f32 %v5320_v24, %v12286_v26  ;;  %3211 = vst.msk [vmem:[%s11252_s8 + $0x120] sm:$0xff] %vm934_vm0, %v3131_v36  ;;  %v3771_v13 = vmul.f32 %v9903_v22, %v9903_v22  ;;  %v12287_v59 = vld [vmem:[#allocation133_spill] sm:$0xff]  ;;  %v2888_v62 = vpop.permute.xlu0 %2887  ;;  %v9949_v9 = vmul.f32 %v5177_v45, %v3308_v32  ;;  %5192 = vrsqrt.f32 %v3836_v19  ;;  %v5322_v32 = vld [vmem:[%s11246_s3 + $0x140] sm:$0xff] }
 0x488   :  { %v9939_v34 = vmul.f32 0.020408163, %v12287_v59  ;;  %v5321_v12 = vld [vmem:[%s11246_s3 + $0xf8] sm:$0xff]  ;;  %3204 = vst.msk [vmem:[%s11252_s8 + $0xe8] sm:$0xff] %vm934_vm0, %v3124_v21  ;;  %v3838_v36 = vadd.f32 1e-05, %v3798_v43  ;;  %v3800_v1 = vsub.f32 %v3720_v57, %v9713_v33  ;;  %v2853_v24 = vpop.permute.xlu1 %2852  ;;  %5194 = vrsqrt.f32 %v3847_v3 }
 0x489   :  { %v2646_v4 = vmul.f32 %v5321_v12, %v12289_v58  ;;  %v3133_v49 = vadd.f32 %v2888_v62, %v2653_v51  ;;  %v5181_v26 = vpop.eup %5180  ;;  %v12290_v59 = vld [vmem:[#allocation45_spill] sm:$0xff]  ;;  %v9955_v22 = vmul.f32 %v5179_v11, %v3319_v7  ;;  %v3849_v43 = vadd.f32 1e-05, %v3809_v15  ;;  %v12291_v51 = vld [vmem:[#allocation191_spill] sm:$0xff]  ;;  %v12292_v21 = vld [vmem:[#allocation134_spill] sm:$0xff] }
 0x48a   :  { %12288 = vst [vmem:[#allocation50_spill] sm:$0xff] %v9939_v34  ;;  %4072 = vperm.xlu1 %4978, %v9920_v5   ;;  %4127 = vperm.xlu0 %4979, %v9922_v47   ;;  %v3722_v12 = vmul.f32 0.020408163, %v12290_v59  ;;  %v3310_v45 = vld [vmem:[%s11250_s6 + $0x2f8] sm:$0xff]  ;;  %v5183_v19 = vpop.eup %5182  ;;  %v3811_v33 = vsub.f32 %v3731_v10, %v3771_v13  ;;  %v3733_v57 = vmul.f32 0.020408163, %v12291_v51  ;;  %v2655_v62 = vmul.f32 %v5322_v32, %v12292_v21 }
 0x48b   :  { %v3126_v58 = vadd.f32 %v2853_v24, %v2646_v4  ;;  %3213 = vst.msk [vmem:[%s11252_s8 + $0x130] sm:$0xff] %vm934_vm0, %v3133_v49  ;;  %v3321_v3 = vld [vmem:[%s11250_s6 + $0x350] sm:$0xff]  ;;  %v3762_v11 = vmul.f32 %v9756_v0, %v9756_v0  ;;  %v12293_v15 = vld [vmem:[#allocation93_spill] sm:$0xff]  ;;  %v3773_v7 = vmul.f32 %v9939_v34, %v9939_v34  ;;  %v5323_v13 = vld [vmem:[%s11246_s3 + $0x108] sm:$0xff]  ;;  %v2898_v49 = vpop.permute.xlu0 %2897  ;;  %5196 = vrsqrt.f32 %v3838_v36 }
 0x48c   :  { %v9975_v10 = vmul.f32 0.020408163, %v12293_v15  ;;  %v12295_v4 = vld [vmem:[#allocation74_spill] sm:$0xff]  ;;  %v3840_v59 = vadd.f32 1e-05, %v3800_v1  ;;  %v3135_v51 = vadd.f32 %v2898_v49, %v2655_v62  ;;  %v2863_v32 = vpop.permute.xlu1 %2862  ;;  %v9989_v21 = vmul.f32 %v5181_v26, %v3310_v45  ;;  %v12296_v0 = vld [vmem:[#allocation47_spill] sm:$0xff] }
 0x48d   :  { %v2648_v24 = vmul.f32 %v5323_v13, %v12295_v4  ;;  %3206 = vst.msk [vmem:[%s11252_s8 + $0xf8] sm:$0xff] %vm934_vm0, %v3126_v58  ;;  %v5185_v15 = vpop.eup %5184  ;;  %v3802_v34 = vsub.f32 %v3722_v12, %v3762_v11  ;;  %v3724_v13 = vmul.f32 0.020408163, %v12296_v0  ;;  %v9992_v47 = vmul.f32 %v5183_v19, %v3321_v3  ;;  %v3312_v36 = vld [vmem:[%s11250_s6 + $0x308] sm:$0xff]  ;;  %v5324_v62 = vld [vmem:[%s11246_s3 + $0x150] sm:$0xff]  ;;  %v5325_v19 = vld [vmem:[%s11246_s3 + $0x118] sm:$0xff] }
 0x48e   :  { %12294 = vst [vmem:[#allocation168_spill] sm:$0xff] %v9975_v10  ;;  %4082 = vperm.xlu1 %4978, %v9949_v9   ;;  %4137 = vperm.xlu0 %4979, %v9955_v22   ;;  %5198 = vrsqrt.f32 %v3849_v43  ;;  %v3851_v1 = vadd.f32 1e-05, %v3811_v33  ;;  %v3813_v58 = vsub.f32 %v3733_v57, %v3773_v7  ;;  %v12297_v26 = vld [vmem:[#allocation147_spill] sm:$0xff]  ;;  %3215 = vst.msk [vmem:[%s11252_s8 + $0x140] sm:$0xff] %vm934_vm0, %v3135_v51  ;;  %v3323_v3 = vld [vmem:[%s11250_s6 + $0x360] sm:$0xff] }
 0x48f   :  { %v3128_v4 = vadd.f32 %v2863_v32, %v2648_v24  ;;  %v2657_v45 = vmul.f32 %v5324_v62, %v12297_v26  ;;  %v5187_v0 = vpop.eup %5186  ;;  %v3764_v12 = vmul.f32 %v9975_v10, %v9975_v10  ;;  %v12298_v43 = vld [vmem:[#allocation87_spill] sm:$0xff]  ;;  %v2908_v57 = vpop.permute.xlu0 %2907  ;;  %v12299_v7 = vld [vmem:[#allocation85_spill] sm:$0xff]  ;;  %5200 = vrsqrt.f32 %v3840_v59  ;;  %v5326_v59 = vld [vmem:[%s11246_s3 + $0x160] sm:$0xff] }
 0x490   :  { %v2650_v33 = vmul.f32 %v5325_v19, %v12298_v43  ;;  %v5189_v11 = vpop.eup %5188  ;;  %v10019_v24 = vmul.f32 0.020408163, %v12299_v7  ;;  %v2873_v51 = vpop.permute.xlu1 %2872  ;;  %v10023_v32 = vmul.f32 %v5185_v15, %v3312_v36  ;;  %v3842_v62 = vadd.f32 1e-05, %v3802_v34  ;;  %v12301_v26 = vld [vmem:[#allocation53_spill] sm:$0xff] }
 0x491   :  { %3208 = vst.msk [vmem:[%s11252_s8 + $0x108] sm:$0xff] %vm934_vm0, %v3128_v4  ;;  %v3137_v49 = vadd.f32 %v2908_v57, %v2657_v45  ;;  %v3804_v4 = vsub.f32 %v3724_v13, %v3764_v12  ;;  %v3726_v19 = vmul.f32 0.020408163, %v12301_v26  ;;  %v3314_v10 = vld [vmem:[%s11250_s6 + $0x318] sm:$0xff]  ;;  %5202 = vrsqrt.f32 %v3851_v1  ;;  %v12302_v45 = vld [vmem:[#allocation15_spill] sm:$0xff]  ;;  %v12303_v13 = vld [vmem:[#allocation86_spill] sm:$0xff] }
 0x492   :  { %12300 = vst [vmem:[#allocation54_spill] sm:$0xff] %v10019_v24  ;;  %4092 = vperm.xlu1 %4978, %v9989_v21   ;;  %4147 = vperm.xlu0 %4979, %v9992_v47   ;;  %v3130_v43 = vadd.f32 %v2873_v51, %v2650_v33  ;;  %v3853_v7 = vadd.f32 1e-05, %v3813_v58  ;;  %v2659_v57 = vmul.f32 %v5326_v59, %v12302_v45  ;;  %v10040_v36 = vmul.f32 0.020408163, %v12303_v13  ;;  %v5327_v1 = vld [vmem:[%s11246_s3 + $0x128] sm:$0xff] }
 0x493   :  { %3217 = vst.msk [vmem:[%s11252_s8 + $0x150] sm:$0xff] %vm934_vm0, %v3137_v49  ;;  %v10037_v34 = vmul.f32 %v5187_v0, %v3323_v3  ;;  %v5191_v15 = vpop.eup %5190  ;;  %v2652_v58 = vmul.f32 %v5327_v1, %v8814_v35  ;;  %v2918_v12 = vpop.permute.xlu0 %2917  ;;  %v3325_v0 = vld [vmem:[%s11250_s6 + $0x370] sm:$0xff]  ;;  %v3766_v33 = vmul.f32 %v10019_v24, %v10019_v24  ;;  %v10057_v35 = vmul.f32 %v5189_v11, %v3314_v10  ;;  %v3316_v11 = vld [vmem:[%s11250_s6 + $0x328] sm:$0xff] }
 0x494   :  { %12304 = vst [vmem:[#allocation176_spill] sm:$0xff] %v10040_v36  ;;  %3210 = vst.msk [vmem:[%s11252_s8 + $0x118] sm:$0xff] %vm934_vm0, %v3130_v43  ;;  %v3139_v3 = vadd.f32 %v2918_v12, %v2659_v57  ;;  %v2883_v49 = vpop.permute.xlu1 %2882  ;;  %v5193_v51 = vpop.eup %5192  ;;  %5204 = vrsqrt.f32 %v3842_v62  ;;  %v3844_v26 = vadd.f32 1e-05, %v3804_v4  ;;  %v12305_v43 = vld [vmem:[#allocation180_spill] sm:$0xff]  ;;  %v10068_v10 = vmul.f32 %v5191_v15, %v3325_v0  ;;  %v12306_v4 = vld [vmem:[#allocation3_spill] sm:$0xff] }
 0x495   :  { %v3728_v59 = vmul.f32 0.020408163, %v12305_v43  ;;  %v3132_v45 = vadd.f32 %v2883_v49, %v2652_v58  ;;  %v5195_v13 = vpop.eup %5194  ;;  %v3806_v1 = vsub.f32 %v3726_v19, %v3766_v33  ;;  %5206 = vrsqrt.f32 %v3853_v7  ;;  %v5328_v57 = vld [vmem:[%s11246_s3 + $0x170] sm:$0xff]  ;;  %v3327_v58 = vld [vmem:[%s11250_s6 + $0x380] sm:$0xff] }
 0x496   :  { %4102 = vperm.xlu1 %4978, %v10023_v32   ;;  %4157 = vperm.xlu0 %4979, %v10037_v34   ;;  %v2661_v12 = vmul.f32 %v5328_v57, %v8820_v18  ;;  %3219 = vst.msk [vmem:[%s11252_s8 + $0x160] sm:$0xff] %vm934_vm0, %v3139_v3  ;;  %v3768_v62 = vmul.f32 %v10040_v36, %v10040_v36  ;;  %v10076_v19 = vmul.f32 0.020408163, %v12306_v4  ;;  %v5329_v18 = vld [vmem:[%s11246_s3 + $0x138] sm:$0xff]  ;;  %v12308_v43 = vld [vmem:[#allocation182_spill] sm:$0xff]  ;;  %5208 = vrsqrt.f32 %v3844_v26  ;;  %v12315_v24 = vld [vmem:[#allocation24_spill] sm:$0xff] }
 0x497   :  { %v2654_v7 = vmul.f32 %v5329_v18, %v8828_v2  ;;  %3212 = vst.msk [vmem:[%s11252_s8 + $0x128] sm:$0xff] %vm934_vm0, %v3132_v45  ;;  %v2928_v15 = vpop.permute.xlu0 %2927  ;;  %v3730_v2 = vmul.f32 0.020408163, %v12308_v43  ;;  %v10092_v4 = vmul.f32 %v5193_v51, %v3316_v11  ;;  %v3846_v45 = vadd.f32 1e-05, %v3806_v1  ;;  %v5330_v18 = vld [vmem:[%s11246_s3 + $0x180] sm:$0xff] }
 0x498   :  { %12307 = vst [vmem:[#allocation105_spill] sm:$0xff] %v10076_v19  ;;  %v3141_v0 = vadd.f32 %v2928_v15, %v2661_v12  ;;  %v2893_v33 = vpop.permute.xlu1 %2892  ;;  %v5197_v3 = vpop.eup %5196  ;;  %v3808_v49 = vsub.f32 %v3728_v59, %v3768_v62  ;;  %v2663_v12 = vmul.f32 %v5330_v18, %v8834_v61  ;;  %v10102_v15 = vmul.f32 %v5195_v13, %v3327_v58  ;;  %v3318_v51 = vld [vmem:[%s11250_s6 + $0x338] sm:$0xff]  ;;  %v5331_v1 = vld [vmem:[%s11246_s3 + $0x148] sm:$0xff]  ;;  %v3329_v62 = vld [vmem:[%s11250_s6 + $0x390] sm:$0xff] }
 0x499   :  { %v3134_v57 = vadd.f32 %v2893_v33, %v2654_v7  ;;  %12309 = vst [vmem:[#allocation51_spill] sm:$0xff] %v10092_v4  ;;  %v3770_v26 = vmul.f32 %v10076_v19, %v10076_v19  ;;  %v12311_v61 = vld [vmem:[#allocation97_spill] sm:$0xff]  ;;  %v12312_v7 = vld [vmem:[#allocation6_spill] sm:$0xff]  ;;  %v10125_v19 = vmul.f32 %v5197_v3, %v3318_v51  ;;  %5210 = vrsqrt.f32 %v3846_v45  ;;  %v3320_v3 = vld [vmem:[%s11250_s6 + $0x348] sm:$0xff] }
 0x49a   :  { %4112 = vperm.xlu1 %4978, %v10057_v35   ;;  %4167 = vperm.xlu0 %4979, %v10068_v10   ;;  %3221 = vst.msk [vmem:[%s11252_s8 + $0x170] sm:$0xff] %vm934_vm0, %v3141_v0  ;;  %12310 = vst [vmem:[#allocation107_spill] sm:$0xff] %v10102_v15  ;;  %v2656_v11 = vmul.f32 %v5331_v1, %v12311_v61  ;;  %v10121_v58 = vmul.f32 0.020408163, %v12312_v7  ;;  %v3848_v18 = vadd.f32 1e-05, %v3808_v49 }
 0x49b   :  { %v5199_v59 = vpop.eup %5198  ;;  %3214 = vst.msk [vmem:[%s11252_s8 + $0x138] sm:$0xff] %vm934_vm0, %v3134_v57  ;;  %v2938_v13 = vpop.permute.xlu0 %2937  ;;  %v3810_v1 = vsub.f32 %v3730_v2, %v3770_v26  ;;  %v12314_v57 = vld [vmem:[#allocation190_spill] sm:$0xff]  ;;  %v5332_v7 = vld [vmem:[%s11246_s3 + $0x190] sm:$0xff]  ;;  %v5333_v2 = vld [vmem:[%s11246_s3 + $0x158] sm:$0xff] }
 0x49c   :  { %12313 = vst [vmem:[#allocation109_spill] sm:$0xff] %v10121_v58  ;;  %v3143_v0 = vadd.f32 %v2938_v13, %v2663_v12  ;;  %v2903_v33 = vpop.permute.xlu1 %2902  ;;  %v5201_v43 = vpop.eup %5200  ;;  %v3732_v36 = vmul.f32 0.020408163, %v12314_v57  ;;  %v2665_v12 = vmul.f32 %v5332_v7, %v12315_v24  ;;  %v10136_v13 = vmul.f32 %v5199_v59, %v3329_v62  ;;  %v12316_v45 = vld [vmem:[#allocation88_spill] sm:$0xff]  ;;  %v3331_v59 = vld [vmem:[%s11250_s6 + $0x3a0] sm:$0xff] }
 0x49d   :  { %v3136_v61 = vadd.f32 %v2903_v33, %v2656_v11  ;;  %v2658_v51 = vmul.f32 %v5333_v2, %v12316_v45  ;;  %v3772_v26 = vmul.f32 %v10121_v58, %v10121_v58  ;;  %v12317_v11 = vld [vmem:[#allocation130_spill] sm:$0xff]  ;;  %5212 = vrsqrt.f32 %v3848_v18  ;;  %v12319_v58 = vld [vmem:[#allocation140_spill] sm:$0xff] }
 0x49e   :  { %4122 = vperm.xlu1 %4978, %v10092_v4   ;;  %4177 = vperm.xlu0 %4979, %v10102_v15   ;;  %3223 = vst.msk [vmem:[%s11252_s8 + $0x180] sm:$0xff] %vm934_vm0, %v3143_v0  ;;  %v5203_v49 = vpop.eup %5202  ;;  %v10155_v62 = vmul.f32 0.020408163, %v12317_v11  ;;  %v3850_v57 = vadd.f32 1e-05, %v3810_v1  ;;  %v10159_v7 = vmul.f32 %v5201_v43, %v3320_v3  ;;  %v12318_v15 = vld [vmem:[#allocation192_spill] sm:$0xff] }
 0x49f   :  { %3216 = vst.msk [vmem:[%s11252_s8 + $0x148] sm:$0xff] %vm934_vm0, %v3136_v61  ;;  %v2948_v24 = vpop.permute.xlu0 %2947  ;;  %v3812_v45 = vsub.f32 %v3732_v36, %v3772_v26  ;;  %v3734_v4 = vmul.f32 0.020408163, %v12318_v15  ;;  %v5334_v11 = vld [vmem:[%s11246_s3 + $0x1a0] sm:$0xff]  ;;  %v10170_v18 = vmul.f32 %v5203_v49, %v3331_v59  ;;  %v3322_v43 = vld [vmem:[%s11250_s6 + $0x358] sm:$0xff]  ;;  %v5335_v15 = vld [vmem:[%s11246_s3 + $0x168] sm:$0xff] }
 0x4a0   :  { %v3145_v0 = vadd.f32 %v2948_v24, %v2665_v12  ;;  %v2913_v33 = vpop.permute.xlu1 %2912  ;;  %v2667_v12 = vmul.f32 %v5334_v11, %v12319_v58  ;;  %v12320_v1 = vld [vmem:[#allocation98_spill] sm:$0xff]  ;;  %v3333_v49 = vld [vmem:[%s11250_s6 + $0x3b0] sm:$0xff]  ;;  %5214 = vrsqrt.f32 %v3850_v57 }
 0x4a1   :  { %v3138_v61 = vadd.f32 %v2913_v33, %v2658_v51  ;;  %v5205_v2 = vpop.eup %5204  ;;  %v2660_v3 = vmul.f32 %v5335_v15, %v12320_v1  ;;  %v3774_v51 = vmul.f32 %v10155_v62, %v10155_v62  ;;  %v3935_v33 = vmul.f32 %v9707_v25, %v9134_v54  ;;  %v5336_v15 = vld [vmem:[%s11246_s3 + $0x1b0] sm:$0xff]  ;;  %v12321_v1 = vld [vmem:[#allocation21_spill] sm:$0xff] }
 0x4a2   :  { %4132 = vperm.xlu1 %4978, %v10125_v19   ;;  %4187 = vperm.xlu0 %4979, %v10136_v13   ;;  %3225 = vst.msk [vmem:[%s11252_s8 + $0x190] sm:$0xff] %vm934_vm0, %v3145_v0  ;;  %v5207_v36 = vpop.eup %5206  ;;  %v10190_v0 = vmul.f32 %v5205_v2, %v3322_v43  ;;  %v3335_v2 = vld [vmem:[%s11251_s7 + $0x280] sm:$0xff]  ;;  %v5337_v25 = vld [vmem:[%s11246_s3 + $0x178] sm:$0xff]  ;;  %v3324_v43 = vld [vmem:[%s11250_s6 + $0x368] sm:$0xff] }
 0x4a3   :  { %3218 = vst.msk [vmem:[%s11252_s8 + $0x158] sm:$0xff] %vm934_vm0, %v3138_v61  ;;  %v2958_v58 = vpop.permute.xlu0 %2957  ;;  %v3852_v61 = vadd.f32 1e-05, %v3812_v45  ;;  %v3814_v11 = vsub.f32 %v3734_v4, %v3774_v51  ;;  %v10202_v57 = vmul.f32 %v5207_v36, %v3333_v49  ;;  %v5209_v54 = vpop.eup %5208  ;;  %v2662_v4 = vmul.f32 %v5337_v25, %v8884_v44 }
 0x4a4   :  { %v3147_v24 = vadd.f32 %v2958_v58, %v2667_v12  ;;  %v2923_v59 = vpop.permute.xlu1 %2922  ;;  %v2669_v12 = vmul.f32 %v5336_v15, %v12321_v1  ;;  %v3975_v49 = vsub.f32 %v3335_v2, %v3935_v33  ;;  %v3937_v44 = vmul.f32 %v9745_v52, %v9162_v41  ;;  %v3337_v33 = vld [vmem:[%s11251_s7 + $0x290] sm:$0xff]  ;;  %v5339_v52 = vld [vmem:[%s11246_s3 + $0x188] sm:$0xff]  ;;  %v3326_v1 = vld [vmem:[%s11250_s6 + $0x378] sm:$0xff] }
 0x4a5   :  { %v3140_v26 = vadd.f32 %v2923_v59, %v2660_v3  ;;  %5216 = vrsqrt.f32 %v3852_v61  ;;  %v3854_v51 = vadd.f32 1e-05, %v3814_v11  ;;  %v12322_v59 = vld [vmem:[#allocation129_spill] sm:$0xff]  ;;  %v10230_v15 = vmul.f32 %v5209_v54, %v3324_v43 }
 0x4a6   :  { %4142 = vperm.xlu1 %4978, %v10159_v7   ;;  %4197 = vperm.xlu0 %4979, %v10170_v18   ;;  %3227 = vst.msk [vmem:[%s11252_s8 + $0x1a0] sm:$0xff] %vm934_vm0, %v3147_v24  ;;  %v5338_v24 = vld [vmem:[%s11246_s3 + $0x1c0] sm:$0xff]  ;;  %v5211_v41 = vpop.eup %5210  ;;  %v2664_v61 = vmul.f32 %v5339_v52, %v8898_v42  ;;  %v3977_v25 = vsub.f32 %v3337_v33, %v3937_v44  ;;  %v5340_v42 = vld [vmem:[%s11246_s3 + $0x1d0] sm:$0xff]  ;;  %v5343_v52 = vld [vmem:[%s11246_s3 + $0x1a8] sm:$0xff] }
 0x4a7   :  { %3220 = vst.msk [vmem:[%s11252_s8 + $0x168] sm:$0xff] %vm934_vm0, %v3140_v26  ;;  %v2968_v45 = vpop.permute.xlu0 %2967  ;;  %v2671_v26 = vmul.f32 %v5338_v24, %v12322_v59  ;;  %5218 = vrsqrt.f32 %v3854_v51  ;;  %v10255_v43 = vmul.f32 %v5211_v41, %v3326_v1  ;;  %v5342_v24 = vld [vmem:[%s11246_s3 + $0x1e0] sm:$0xff]  ;;  %v3941_v41 = vmul.f32 %v9619_v14, %v9236_v23  ;;  %v3330_v1 = vld [vmem:[%s11250_s6 + $0x398] sm:$0xff]  ;;  %v3341_v23 = vld [vmem:[%s11251_s7 + $0x2b0] sm:$0xff] }
 0x4a8   :  { %v3149_v36 = vadd.f32 %v2968_v45, %v2669_v12  ;;  %v2933_v3 = vpop.permute.xlu1 %2932  ;;  %v2673_v45 = vmul.f32 %v5340_v42, %v8904_v30  ;;  %v2675_v59 = vmul.f32 %v5342_v24, %v8918_v63 }
 0x4a9   :  { %v3142_v58 = vadd.f32 %v2933_v3, %v2662_v4  ;;  %v5341_v3 = vld [vmem:[%s11246_s3 + $0x198] sm:$0xff] }
 0x4aa   :  { %4152 = vperm.xlu1 %4978, %v10190_v0   ;;  %4207 = vperm.xlu0 %4979, %v10202_v57   ;;  %3229 = vst.msk [vmem:[%s11252_s8 + $0x1b0] sm:$0xff] %vm934_vm0, %v3149_v36  ;;  %v5213_v4 = vpop.eup %5212  ;;  %v3939_v36 = vmul.f32 %v9579_v20, %v9203_v16  ;;  %v3339_v16 = vld [vmem:[%s11251_s7 + $0x2a0] sm:$0xff] }
 0x4ab   :  { %3222 = vst.msk [vmem:[%s11252_s8 + $0x178] sm:$0xff] %vm934_vm0, %v3142_v58  ;;  %v2978_v11 = vpop.permute.xlu0 %2977  ;;  %v2666_v58 = vmul.f32 %v5341_v3, %v8912_v40 }
 0x4ac   :  { %v3151_v12 = vadd.f32 %v2978_v11, %v2671_v26  ;;  %v2943_v2 = vpop.permute.xlu1 %2942  ;;  %v3979_v33 = vsub.f32 %v3339_v16, %v3939_v36  ;;  %v12325_v36 = vld [vmem:[#allocation23_spill] sm:$0xff] }
 0x4ad   :  { %v3144_v54 = vadd.f32 %v2943_v2, %v2664_v61  ;;  %v5215_v51 = vpop.eup %5214  ;;  %v12323_v61 = vld [vmem:[#allocation5_spill] sm:$0xff]  ;;  %v3943_v3 = vmul.f32 %v9669_v31, %v12325_v36  ;;  %v3343_v31 = vld [vmem:[%s11251_s7 + $0x2c0] sm:$0xff] }
 0x4ae   :  { %4162 = vperm.xlu1 %4978, %v10230_v15   ;;  %4257 = vperm.xlu0 %4979, %v3975_v49   ;;  %3231 = vst.msk [vmem:[%s11252_s8 + $0x1c0] sm:$0xff] %vm934_vm0, %v3151_v12  ;;  %v3328_v49 = vld [vmem:[%s11250_s6 + $0x388] sm:$0xff]  ;;  %v2668_v11 = vmul.f32 %v5343_v52, %v12323_v61  ;;  %v10309_v42 = vmul.f32 %v5215_v51, %v3330_v1  ;;  %v12330_v36 = vld [vmem:[#allocation22_spill] sm:$0xff] }
 0x4af   :  { %3224 = vst.msk [vmem:[%s11252_s8 + $0x188] sm:$0xff] %vm934_vm0, %v3144_v54  ;;  %v2988_v30 = vpop.permute.xlu0 %2987  ;;  %v10282_v26 = vmul.f32 %v5213_v4, %v3328_v49  ;;  %v5344_v54 = vld [vmem:[%s11246_s3 + $0x1f0] sm:$0xff]  ;;  %v3983_v61 = vsub.f32 %v3343_v31, %v3943_v3  ;;  %v3936_v3 = vmul.f32 %v9540_v39, %v12330_v36  ;;  %v5349_v39 = vld [vmem:[%s11246_s3 + $0x1d8] sm:$0xff] }
 0x4b0   :  { %v3153_v20 = vadd.f32 %v2988_v30, %v2673_v45  ;;  %v2953_v44 = vpop.permute.xlu1 %2952  ;;  %v3981_v45 = vsub.f32 %v3341_v23, %v3941_v41  ;;  %v5345_v30 = vld [vmem:[%s11246_s3 + $0x1b8] sm:$0xff]  ;;  %v12326_v49 = vld [vmem:[#allocation128_spill] sm:$0xff]  ;;  %v5347_v23 = vld [vmem:[%s11246_s3 + $0x1c8] sm:$0xff] }
 0x4b1   :  { %v3146_v40 = vadd.f32 %v2953_v44, %v2666_v58  ;;  %v2670_v16 = vmul.f32 %v5345_v30, %v12326_v49  ;;  %v3332_v44 = vld [vmem:[%s11250_s6 + $0x3a8] sm:$0xff]  ;;  %v3349_v36 = vld [vmem:[%s11251_s7 + $0x2f0] sm:$0xff] }
 0x4b2   :  { %4172 = vperm.xlu1 %4978, %v10255_v43   ;;  %4267 = vperm.xlu0 %4979, %v3977_v25   ;;  %3233 = vst.msk [vmem:[%s11252_s8 + $0x1d0] sm:$0xff] %vm934_vm0, %v3153_v20  ;;  %v12324_v25 = vld [vmem:[#allocation30_spill] sm:$0xff]  ;;  %v5217_v58 = vpop.eup %5216  ;;  %v12331_v30 = vld [vmem:[#allocation159_spill] sm:$0xff] }
 0x4b3   :  { %3226 = vst.msk [vmem:[%s11252_s8 + $0x198] sm:$0xff] %vm934_vm0, %v3146_v40  ;;  %v2998_v63 = vpop.permute.xlu0 %2997  ;;  %v2677_v4 = vmul.f32 %v5344_v54, %v12324_v25  ;;  %v10336_v52 = vmul.f32 %v5217_v58, %v3332_v44  ;;  %v3334_v54 = vld [vmem:[%s11250_s6 + $0x3b8] sm:$0xff]  ;;  %v5348_v58 = vld [vmem:[%s11246_s3 + $0x210] sm:$0xff] }
 0x4b4   :  { %v3155_v14 = vadd.f32 %v2998_v63, %v2675_v59  ;;  %v2963_v12 = vpop.permute.xlu1 %2962  ;;  %v5346_v59 = vld [vmem:[%s11246_s3 + $0x200] sm:$0xff]  ;;  %v5219_v1 = vpop.eup %5218  ;;  %v2681_v49 = vmul.f32 %v5348_v58, %v12331_v30  ;;  %v12332_v44 = vld [vmem:[#allocation52_spill] sm:$0xff] }
 0x4b5   :  { %v3148_v2 = vadd.f32 %v2963_v12, %v2668_v11  ;;  %v12328_v11 = vld [vmem:[#allocation183_spill] sm:$0xff]  ;;  %v3947_v31 = vmul.f32 %v9747_v55, %v12332_v44  ;;  %v3347_v55 = vld [vmem:[%s11251_s7 + $0x2e0] sm:$0xff]  ;;  %v5352_v30 = vld [vmem:[%s11246_s3 + $0x230] sm:$0xff] }
 0x4b6   :  { %4182 = vperm.xlu1 %4978, %v10282_v26   ;;  %4277 = vperm.xlu0 %4979, %v3979_v33   ;;  %3235 = vst.msk [vmem:[%s11252_s8 + $0x1e0] sm:$0xff] %vm934_vm0, %v3155_v14  ;;  %v12327_v33 = vld [vmem:[#allocation146_spill] sm:$0xff]  ;;  %v3945_v63 = vmul.f32 %v9709_v50, %v12328_v11  ;;  %v3345_v50 = vld [vmem:[%s11251_s7 + $0x2d0] sm:$0xff]  ;;  %v12334_v11 = vld [vmem:[#allocation151_spill] sm:$0xff] }
 0x4b7   :  { %3228 = vst.msk [vmem:[%s11252_s8 + $0x1a8] sm:$0xff] %vm934_vm0, %v3148_v2  ;;  %v3008_v20 = vpop.permute.xlu0 %3007  ;;  %v2679_v41 = vmul.f32 %v5346_v59, %v12327_v33  ;;  %v12329_v14 = vld [vmem:[#allocation126_spill] sm:$0xff]  ;;  %v3336_v59 = vld [vmem:[%s11251_s7 + $0x288] sm:$0xff] }
 0x4b8   :  { %v3157_v40 = vadd.f32 %v3008_v20, %v2677_v4  ;;  %v2973_v51 = vpop.permute.xlu1 %2972  ;;  %v2672_v12 = vmul.f32 %v5347_v23, %v12329_v14  ;;  %v3985_v20 = vsub.f32 %v3345_v50, %v3945_v63  ;;  %v3938_v63 = vmul.f32 %v9782_v53, %v12334_v11  ;;  %v12335_v23 = vld [vmem:[#allocation27_spill] sm:$0xff] }
 0x4b9   :  { %v3150_v24 = vadd.f32 %v2973_v51, %v2670_v16  ;;  %v10365_v16 = vmul.f32 %v5219_v1, %v3334_v54  ;;  %v5350_v1 = vld [vmem:[%s11246_s3 + $0x220] sm:$0xff]  ;;  %v3338_v54 = vld [vmem:[%s11251_s7 + $0x298] sm:$0xff]  ;;  %v3949_v53 = vmul.f32 %v9784_v17, %v9413_v27  ;;  %v5351_v50 = vld [vmem:[%s11246_s3 + $0x1e8] sm:$0xff] }
 0x4ba   :  { %4192 = vperm.xlu1 %4978, %v10309_v42   ;;  %4287 = vperm.xlu0 %4979, %v3981_v45   ;;  %3237 = vst.msk [vmem:[%s11252_s8 + $0x1f0] sm:$0xff] %vm934_vm0, %v3157_v40  ;;  %v12333_v40 = vld [vmem:[#allocation8_spill] sm:$0xff]  ;;  %v2683_v14 = vmul.f32 %v5350_v1, %v12335_v23  ;;  %v3978_v17 = vsub.f32 %v3338_v54, %v3938_v63  ;;  %v5354_v63 = vld [vmem:[%s11246_s3 + $0x240] sm:$0xff]  ;;  %v5355_v54 = vld [vmem:[%s11246_s3 + $0x208] sm:$0xff] }
 0x4bb   :  { %3230 = vst.msk [vmem:[%s11252_s8 + $0x1b8] sm:$0xff] %vm934_vm0, %v3150_v24  ;;  %v3018_v2 = vpop.permute.xlu0 %3017  ;;  %v2674_v51 = vmul.f32 %v5349_v39, %v12333_v40  ;;  %v3989_v44 = vsub.f32 %v3349_v36, %v3949_v53  ;;  %v3951_v40 = vmul.f32 %v9820_v48, %v9445_v38  ;;  %v3351_v38 = vld [vmem:[%s11251_s7 + $0x300] sm:$0xff]  ;;  %v12341_v1 = vld [vmem:[#allocation36_spill] sm:$0xff]  ;;  %v12342_v53 = vld [vmem:[#allocation9_spill] sm:$0xff] }
 0x4bc   :  { %v3159_v25 = vadd.f32 %v3018_v2, %v2679_v41  ;;  %v2983_v4 = vpop.permute.xlu1 %2982  ;;  %v3987_v2 = vsub.f32 %v3347_v55, %v3947_v31  ;;  %v12338_v31 = vld [vmem:[#allocation142_spill] sm:$0xff]  ;;  %v2687_v23 = vmul.f32 %v5354_v63, %v12341_v1  ;;  %v5359_v63 = vld [vmem:[%s11246_s3 + $0x228] sm:$0xff]  ;;  %v12349_v1 = vld [vmem:[#allocation145_spill] sm:$0xff] }
 0x4bd   :  { %v3152_v45 = vadd.f32 %v2983_v4, %v2672_v12  ;;  %v3976_v12 = vsub.f32 %v3336_v59, %v3936_v3  ;;  %v3940_v39 = vmul.f32 %v9809_v6, %v12338_v31  ;;  %v12345_v31 = vld [vmem:[#allocation137_spill] sm:$0xff] }
 0x4be   :  { %4202 = vperm.xlu1 %4978, %v10336_v52   ;;  %4297 = vperm.xlu0 %4979, %v3983_v61   ;;  %3239 = vst.msk [vmem:[%s11252_s8 + $0x200] sm:$0xff] %vm934_vm0, %v3159_v25  ;;  %v12336_v25 = vld [vmem:[#allocation139_spill] sm:$0xff] }
 0x4bf   :  { %3232 = vst.msk [vmem:[%s11252_s8 + $0x1c8] sm:$0xff] %vm934_vm0, %v3152_v45  ;;  %v3028_v24 = vpop.permute.xlu0 %3027  ;;  %v2676_v4 = vmul.f32 %v5351_v50, %v12336_v25  ;;  %v2680_v50 = vmul.f32 %v5355_v54, %v12342_v53  ;;  %v5360_v53 = vld [vmem:[%s11246_s3 + $0x270] sm:$0xff] }
 0x4c0   :  { %v3161_v33 = vadd.f32 %v3028_v24, %v2681_v49  ;;  %v2993_v41 = vpop.permute.xlu1 %2992  ;;  %v12337_v49 = vld [vmem:[#allocation31_spill] sm:$0xff]  ;;  %v12339_v24 = vld [vmem:[#allocation14_spill] sm:$0xff] }
 0x4c1   :  { %v3154_v61 = vadd.f32 %v2993_v41, %v2674_v51  ;;  %v5353_v51 = vld [vmem:[%s11246_s3 + $0x1f8] sm:$0xff] }
 0x4c2   :  { %4212 = vperm.xlu1 %4978, %v10365_v16   ;;  %4307 = vperm.xlu0 %4979, %v3985_v20   ;;  %3241 = vst.msk [vmem:[%s11252_s8 + $0x210] sm:$0xff] %vm934_vm0, %v3161_v33  ;;  %v2685_v20 = vmul.f32 %v5352_v30, %v12337_v49  ;;  %v2678_v59 = vmul.f32 %v5353_v51, %v12339_v24  ;;  %v3340_v33 = vld [vmem:[%s11251_s7 + $0x2a8] sm:$0xff]  ;;  %v12344_v30 = vld [vmem:[#allocation144_spill] sm:$0xff] }
 0x4c3   :  { %3234 = vst.msk [vmem:[%s11252_s8 + $0x1d8] sm:$0xff] %vm934_vm0, %v3154_v61  ;;  %v3038_v45 = vpop.permute.xlu0 %3037  ;;  %v12340_v61 = vld [vmem:[#allocation164_spill] sm:$0xff]  ;;  %v3944_v49 = vmul.f32 %v9881_v28, %v12344_v30  ;;  %v3344_v51 = vld [vmem:[%s11251_s7 + $0x2c8] sm:$0xff] }
 0x4c4   :  { %v3163_v3 = vadd.f32 %v3038_v45, %v2683_v14  ;;  %v3003_v58 = vpop.permute.xlu1 %3002  ;;  %v3942_v11 = vmul.f32 %v9846_v60, %v12340_v61  ;;  %v3980_v14 = vsub.f32 %v3340_v33, %v3940_v39  ;;  %v3953_v60 = vmul.f32 %v9856_v37, %v9474_v8  ;;  %v5358_v33 = vld [vmem:[%s11246_s3 + $0x260] sm:$0xff]  ;;  %v3346_v61 = vld [vmem:[%s11251_s7 + $0x2d8] sm:$0xff]  ;;  %v3348_v30 = vld [vmem:[%s11251_s7 + $0x2e8] sm:$0xff] }
 0x4c5   :  { %v3156_v27 = vadd.f32 %v3003_v58, %v2676_v4  ;;  %v3353_v4 = vld [vmem:[%s11251_s7 + $0x310] sm:$0xff]  ;;  %v12343_v58 = vld [vmem:[#allocation154_spill] sm:$0xff] }
 0x4c6   :  { %4262 = vperm.xlu1 %4978, %v3976_v12   ;;  %4317 = vperm.xlu0 %4979, %v3987_v2   ;;  %3243 = vst.msk [vmem:[%s11252_s8 + $0x220] sm:$0xff] %vm934_vm0, %v3163_v3  ;;  %v3991_v12 = vsub.f32 %v3351_v38, %v3951_v40  ;;  %v3342_v2 = vld [vmem:[%s11251_s7 + $0x2b8] sm:$0xff]  ;;  %v5356_v3 = vld [vmem:[%s11246_s3 + $0x250] sm:$0xff] }
 0x4c7   :  { %3236 = vst.msk [vmem:[%s11252_s8 + $0x1e8] sm:$0xff] %vm934_vm0, %v3156_v27  ;;  %v3048_v55 = vpop.permute.xlu0 %3047  ;;  %v3982_v37 = vsub.f32 %v3342_v2, %v3942_v11  ;;  %v2689_v27 = vmul.f32 %v5356_v3, %v12343_v58  ;;  %v12347_v38 = vld [vmem:[#allocation165_spill] sm:$0xff]  ;;  %v12348_v11 = vld [vmem:[#allocation43_spill] sm:$0xff]  ;;  %v12353_v58 = vld [vmem:[#allocation20_spill] sm:$0xff] }
 0x4c8   :  { %v3165_v6 = vadd.f32 %v3048_v55, %v2685_v20  ;;  %v3013_v48 = vpop.permute.xlu1 %3012  ;;  %v3955_v20 = vmul.f32 %v9883_v46, %v9522_v29  ;;  %v3355_v29 = vld [vmem:[%s11251_s7 + $0x320] sm:$0xff]  ;;  %v5361_v3 = vld [vmem:[%s11246_s3 + $0x238] sm:$0xff] }
 0x4c9   :  { %v3158_v41 = vadd.f32 %v3013_v48, %v2678_v59  ;;  %v12346_v59 = vld [vmem:[#allocation157_spill] sm:$0xff]  ;;  %v3984_v48 = vsub.f32 %v3344_v51, %v3944_v49  ;;  %v12356_v51 = vld [vmem:[#allocation198_spill] sm:$0xff] }
 0x4ca   :  { %4272 = vperm.xlu1 %4978, %v3978_v17   ;;  %4327 = vperm.xlu0 %4979, %v3989_v44   ;;  %3245 = vst.msk [vmem:[%s11252_s8 + $0x230] sm:$0xff] %vm934_vm0, %v3165_v6  ;;  %v3993_v17 = vsub.f32 %v3353_v4, %v3953_v60  ;;  %v5357_v44 = vld [vmem:[%s11246_s3 + $0x218] sm:$0xff]  ;;  %v3946_v55 = vmul.f32 %v9920_v5, %v12346_v59  ;;  %v12357_v59 = vld [vmem:[#allocation40_spill] sm:$0xff] }
 0x4cb   :  { %3238 = vst.msk [vmem:[%s11252_s8 + $0x1f8] sm:$0xff] %vm934_vm0, %v3158_v41  ;;  %v3058_v25 = vpop.permute.xlu0 %3057  ;;  %v2682_v39 = vmul.f32 %v5357_v44, %v12345_v31  ;;  %v2691_v6 = vmul.f32 %v5358_v33, %v12347_v38  ;;  %v3995_v41 = vsub.f32 %v3355_v29, %v3955_v20  ;;  %v3957_v5 = vmul.f32 %v12348_v11, %v9563_v56  ;;  %v12358_v33 = vld [vmem:[#allocation196_spill] sm:$0xff] }
 0x4cc   :  { %v3167_v45 = vadd.f32 %v3058_v25, %v2687_v23  ;;  %v3023_v36 = vpop.permute.xlu1 %3022  ;;  %v2684_v23 = vmul.f32 %v5359_v63, %v12349_v1  ;;  %v3986_v54 = vsub.f32 %v3346_v61, %v3946_v55  ;;  %v4575_v29 = vmul.f32 0.020408163, %v12356_v51  ;;  %v12360_v61 = vld [vmem:[#allocation193_spill] sm:$0xff]  ;;  %v12361_v1 = vld [vmem:[#allocation200_spill] sm:$0xff] }
 0x4cd   :  { %v3160_v8 = vadd.f32 %v3023_v36, %v2680_v50  ;;  %v12350_v50 = vld [vmem:[#allocation167_spill] sm:$0xff]  ;;  %v3961_v55 = vmul.f32 %v9992_v47, %v12357_v59  ;;  %v10556_v38 = vmul.f32 0.020408163, %v12358_v33  ;;  %v3361_v47 = vld [vmem:[%s11251_s7 + $0x350] sm:$0xff]  ;;  %v10572_v11 = vmul.f32 0.020408163, %v12360_v61 }
 0x4ce   :  { %4282 = vperm.xlu1 %4978, %v3980_v14   ;;  %4337 = vperm.xlu0 %4979, %v3991_v12   ;;  %3247 = vst.msk [vmem:[%s11252_s8 + $0x240] sm:$0xff] %vm934_vm0, %v3167_v45  ;;  %v3357_v12 = vld [vmem:[%s11251_s7 + $0x330] sm:$0xff]  ;;  %v2693_v25 = vmul.f32 %v5360_v53, %v12350_v50 }
 0x4cf   :  { %3240 = vst.msk [vmem:[%s11252_s8 + $0x208] sm:$0xff] %vm934_vm0, %v3160_v8  ;;  %v3068_v40 = vpop.permute.xlu0 %3067  ;;  %v3997_v4 = vsub.f32 %v3357_v12, %v3957_v5  ;;  %v12351_v45 = vld [vmem:[#allocation32_spill] sm:$0xff]  ;;  %v4001_v50 = vsub.f32 %v3361_v47, %v3961_v55 }
 0x4d0   :  { %v3169_v46 = vadd.f32 %v3068_v40, %v2689_v27  ;;  %v3033_v28 = vpop.permute.xlu1 %3032  ;;  %v3948_v36 = vmul.f32 %v9949_v9, %v12351_v45  ;;  %v12352_v8 = vld [vmem:[#allocation152_spill] sm:$0xff]  ;;  %v2686_v27 = vmul.f32 %v5361_v3, %v12353_v58  ;;  %v12354_v9 = vld [vmem:[#allocation194_spill] sm:$0xff]  ;;  %v4580_v58 = vmul.f32 %v10572_v11, %v10572_v11 }
 0x4d1   :  { %v3162_v24 = vadd.f32 %v3033_v28, %v2682_v39  ;;  %v10541_v49 = vmul.f32 0.020408163, %v12354_v9  ;;  %v12355_v39 = vld [vmem:[#allocation49_spill] sm:$0xff]  ;;  %v12366_v9 = vld [vmem:[#allocation103_spill] sm:$0xff]  ;;  %v12367_v51 = vld [vmem:[#allocation160_spill] sm:$0xff] }
 0x4d2   :  { %4292 = vperm.xlu1 %4978, %v3982_v37   ;;  %4347 = vperm.xlu0 %4979, %v3993_v17   ;;  %3249 = vst.msk [vmem:[%s11252_s8 + $0x250] sm:$0xff] %vm934_vm0, %v3169_v46  ;;  %v3959_v37 = vmul.f32 %v9955_v22, %v12352_v8  ;;  %v3359_v22 = vld [vmem:[%s11251_s7 + $0x340] sm:$0xff]  ;;  %v3950_v40 = vmul.f32 %v9989_v21, %v12355_v39  ;;  %v5362_v21 = vld [vmem:[%s11246_s3 + $0x248] sm:$0xff]  ;;  %v5363_v8 = vld [vmem:[%s11246_s3 + $0x258] sm:$0xff] }
 0x4d3   :  { %3242 = vst.msk [vmem:[%s11252_s8 + $0x218] sm:$0xff] %vm934_vm0, %v3162_v24  ;;  %v3078_v14 = vpop.permute.xlu0 %3077  ;;  %v3988_v46 = vsub.f32 %v3348_v30, %v3948_v36  ;;  %v3350_v24 = vld [vmem:[%s11251_s7 + $0x2f8] sm:$0xff]  ;;  %v4579_v5 = vmul.f32 %v10541_v49, %v10541_v49  ;;  %v4581_v36 = vmul.f32 %v10556_v38, %v10556_v38  ;;  %v3365_v59 = vld [vmem:[%s11251_s7 + $0x370] sm:$0xff] }
 0x4d4   :  { %v3171_v2 = vadd.f32 %v3078_v14, %v2691_v6  ;;  %v3043_v60 = vpop.permute.xlu1 %3042  ;;  %v3999_v28 = vsub.f32 %v3359_v22, %v3959_v37  ;;  %v12359_v6 = vld [vmem:[#allocation42_spill] sm:$0xff]  ;;  %v3990_v12 = vsub.f32 %v3350_v24, %v3950_v40  ;;  %v12365_v37 = vld [vmem:[#allocation149_spill] sm:$0xff] }
 0x4d5   :  { %v3164_v56 = vadd.f32 %v3043_v60, %v2684_v23  ;;  %v4577_v23 = vmul.f32 0.020408163, %v12361_v1  ;;  %v3354_v40 = vld [vmem:[%s11251_s7 + $0x318] sm:$0xff]  ;;  %v12371_v1 = vld [vmem:[#allocation46_spill] sm:$0xff] }
 0x4d6   :  { %4302 = vperm.xlu1 %4978, %v3984_v48   ;;  %4357 = vperm.xlu0 %4979, %v3995_v41   ;;  %3251 = vst.msk [vmem:[%s11252_s8 + $0x260] sm:$0xff] %vm934_vm0, %v3171_v2  ;;  %v2688_v48 = vmul.f32 %v5362_v21, %v12359_v6  ;;  %v12362_v2 = vld [vmem:[#allocation34_spill] sm:$0xff]  ;;  %v12369_v6 = vld [vmem:[#allocation29_spill] sm:$0xff] }
 0x4d7   :  { %3244 = vst.msk [vmem:[%s11252_s8 + $0x228] sm:$0xff] %vm934_vm0, %v3164_v56  ;;  %v3952_v60 = vmul.f32 %v10023_v32, %v12362_v2  ;;  %v4583_v56 = vsub.f32 %v4575_v29, %v4579_v5  ;;  %v2690_v32 = vmul.f32 %v5363_v8, %v12365_v37  ;;  %v3965_v29 = vmul.f32 %v10068_v10, %v12367_v51  ;;  %v12373_v2 = vld [vmem:[#allocation181_spill] sm:$0xff]  ;;  %v12376_v37 = vld [vmem:[#allocation202_spill] sm:$0xff]  ;;  %v12380_v51 = vld [vmem:[#allocation204_spill] sm:$0xff] }
 0x4d8   :  { %v3053_v44 = vpop.permute.xlu1 %3052 }
 0x4d9   :  { %v3088_v17 = vpop.permute.xlu0 %3087  ;;  %v3166_v31 = vadd.f32 %v3053_v44, %v2686_v27  ;;  %v4587_v44 = vadd.f32 1e-05, %v4583_v56  ;;  %v4005_v5 = vsub.f32 %v3365_v59, %v3965_v29  ;;  %v4705_v29 = vmul.f32 0.020408163, %v12380_v51 }
 0x4da   :  { %v3173_v20 = vadd.f32 %v3088_v17, %v2693_v25  ;;  %4312 = vperm.xlu1 %4978, %v3986_v54   ;;  %4367 = vperm.xlu0 %4979, %v3997_v4   ;;  %v12363_v54 = vld [vmem:[#allocation203_spill] sm:$0xff]  ;;  %v12364_v4 = vld [vmem:[#allocation37_spill] sm:$0xff]  ;;  %v4585_v17 = vsub.f32 %v4577_v23, %v4581_v36 }
 0x4db   :  { %3246 = vst.msk [vmem:[%s11252_s8 + $0x238] sm:$0xff] %vm934_vm0, %v3166_v31  ;;  %v4576_v53 = vmul.f32 0.020408163, %v12363_v54  ;;  %v3352_v25 = vld [vmem:[%s11251_s7 + $0x308] sm:$0xff]  ;;  %v3963_v45 = vmul.f32 %v10037_v34, %v12364_v4  ;;  %v3363_v34 = vld [vmem:[%s11251_s7 + $0x360] sm:$0xff]  ;;  %5220 = vrsqrt.f32 %v4587_v44  ;;  %v12375_v36 = vld [vmem:[#allocation189_spill] sm:$0xff] }
 0x4dc   :  { %3253 = vst.msk [vmem:[%s11252_s8 + $0x270] sm:$0xff] %vm934_vm0, %v3173_v20  ;;  %v3063_v63 = vpop.permute.xlu1 %3062  ;;  %v3992_v22 = vsub.f32 %v3352_v25, %v3952_v60  ;;  %v3954_v20 = vmul.f32 %v10057_v35, %v12366_v9  ;;  %v4589_v10 = vadd.f32 1e-05, %v4585_v17  ;;  %v12372_v23 = vld [vmem:[#allocation107_spill] sm:$0xff]  ;;  %v3367_v54 = vld [vmem:[%s11251_s7 + $0x380] sm:$0xff]  ;;  %v3958_v8 = vmul.f32 %v10125_v19, %v12375_v36  ;;  %v3369_v19 = vld [vmem:[%s11251_s7 + $0x390] sm:$0xff] }
 0x4dd   :  { %v10566_v41 = vpop.permute.xlu0 %4022  ;;  %v3168_v14 = vadd.f32 %v3063_v63, %v2688_v48  ;;  %v4584_v31 = vsub.f32 %v4576_v53, %v4580_v58  ;;  %v4003_v39 = vsub.f32 %v3363_v34, %v3963_v45  ;;  %v12370_v48 = vld [vmem:[#allocation51_spill] sm:$0xff]  ;;  %v3358_v58 = vld [vmem:[%s11251_s7 + $0x338] sm:$0xff] }
 0x4de   :  { %4322 = vperm.xlu1 %4978, %v3988_v46   ;;  %4377 = vperm.xlu0 %4979, %v3999_v28   ;;  %v5364_v46 = vld [vmem:[%s11246_s3 + $0x268] sm:$0xff]  ;;  %v3994_v21 = vsub.f32 %v3354_v40, %v3954_v20  ;;  %v3956_v47 = vmul.f32 %v12370_v48, %v12369_v6  ;;  %5222 = vrsqrt.f32 %v4589_v10  ;;  %v12378_v9 = vld [vmem:[#allocation197_spill] sm:$0xff]  ;;  %v3371_v10 = vld [vmem:[%s11251_s7 + $0x3a0] sm:$0xff] }
 0x4df   :  { %3248 = vst.msk [vmem:[%s11252_s8 + $0x248] sm:$0xff] %vm934_vm0, %v3168_v14  ;;  %v12368_v28 = vld [vmem:[#allocation19_spill] sm:$0xff]  ;;  %v4588_v61 = vadd.f32 1e-05, %v4584_v31  ;;  %v3967_v14 = vmul.f32 %v12372_v23, %v12371_v1  ;;  %v10665_v20 = vmul.f32 0.020408163, %v12378_v9 }
 0x4e0   :  { %v3073_v27 = vpop.permute.xlu1 %3072  ;;  %v2692_v24 = vmul.f32 %v5364_v46, %v12368_v28  ;;  %v3356_v63 = vld [vmem:[%s11251_s7 + $0x328] sm:$0xff]  ;;  %v12379_v31 = vld [vmem:[#allocation33_spill] sm:$0xff]  ;;  %v12382_v6 = vld [vmem:[#allocation158_spill] sm:$0xff] }
 0x4e1   :  { %v10595_v3 = vpop.permute.xlu0 %4037  ;;  %v3170_v30 = vadd.f32 %v3073_v27, %v2690_v32  ;;  %v12374_v53 = vld [vmem:[#allocation195_spill] sm:$0xff]  ;;  %v3996_v45 = vsub.f32 %v3356_v63, %v3956_v47  ;;  %v4703_v32 = vmul.f32 0.020408163, %v12376_v37  ;;  %5224 = vrsqrt.f32 %v4588_v61  ;;  %v12377_v27 = vld [vmem:[#allocation173_spill] sm:$0xff]  ;;  %v12383_v63 = vld [vmem:[#allocation50_spill] sm:$0xff] }
 0x4e2   :  { %4332 = vperm.xlu1 %4978, %v3990_v12   ;;  %4387 = vperm.xlu0 %4979, %v4001_v50   ;;  %v5365_v12 = vld [vmem:[%s11246_s3 + $0x278] sm:$0xff]  ;;  %v10643_v50 = vmul.f32 0.020408163, %v12374_v53  ;;  %v4007_v34 = vsub.f32 %v3367_v54, %v3967_v14  ;;  %v3969_v17 = vmul.f32 %v10136_v13, %v12377_v27  ;;  %v3998_v13 = vsub.f32 %v3358_v58, %v3958_v8  ;;  %v3360_v28 = vld [vmem:[%s11251_s7 + $0x348] sm:$0xff]  ;;  %v12384_v54 = vld [vmem:[#allocation168_spill] sm:$0xff] }
 0x4e3   :  { %3250 = vst.msk [vmem:[%s11252_s8 + $0x258] sm:$0xff] %vm934_vm0, %v3170_v30  ;;  %v2694_v60 = vmul.f32 %v5365_v12, %v12373_v2  ;;  %v3962_v48 = vmul.f32 %v10190_v0, %v12382_v6  ;;  %v3973_v1 = vmul.f32 %v10202_v57, %v12383_v63  ;;  %v3373_v12 = vld [vmem:[%s11251_s7 + $0x3b0] sm:$0xff]  ;;  %v4535_v0 = vld [vmem:[%s11250_s6 + $0x3c0] sm:$0xff]  ;;  %v3964_v53 = vmul.f32 %v10230_v15, %v12384_v54 }
 0x4e4   :  { %v4009_v46 = vsub.f32 %v3369_v19, %v3969_v17  ;;  %v4537_v15 = vld [vmem:[%s11250_s6 + $0x3d0] sm:$0xff]  ;;  %v12385_v27 = vld [vmem:[#allocation54_spill] sm:$0xff] }
 0x4e5   :  { %v10617_v35 = vpop.permute.xlu0 %4047  ;;  %v3083_v55 = vpop.permute.xlu1 %3082  ;;  %v3966_v17 = vmul.f32 %v10255_v43, %v12385_v27  ;;  %v4541_v6 = vld [vmem:[%s11251_s7 + $0x3d0] sm:$0xff]  ;;  %v12392_v27 = vld [vmem:[#allocation201_spill] sm:$0xff] }
 0x4e6   :  { %4342 = vperm.xlu1 %4978, %v3992_v22   ;;  %4397 = vperm.xlu0 %4979, %v4003_v39   ;;  %v3172_v33 = vadd.f32 %v3083_v55, %v2692_v24  ;;  %v4707_v22 = vmul.f32 %v10643_v50, %v10643_v50  ;;  %v3960_v39 = vmul.f32 %v10159_v7, %v12379_v31  ;;  %v12381_v24 = vld [vmem:[#allocation41_spill] sm:$0xff] }
 0x4e7   :  { %v3971_v59 = vmul.f32 %v10170_v18, %v12381_v24  ;;  %v4709_v7 = vmul.f32 %v10665_v20, %v10665_v20  ;;  %v12388_v24 = vld [vmem:[#allocation176_spill] sm:$0xff] }
 0x4e8   :  { %3252 = vst.msk [vmem:[%s11252_s8 + $0x268] sm:$0xff] %vm934_vm0, %v3172_v33  ;;  %v4711_v40 = vsub.f32 %v4703_v32, %v4707_v22  ;;  %v5221_v23 = vpop.eup %5220  ;;  %v4536_v32 = vld [vmem:[%s11250_s6 + $0x3c8] sm:$0xff]  ;;  %v3366_v22 = vld [vmem:[%s11251_s7 + $0x378] sm:$0xff] }
 0x4e9   :  { %v10637_v56 = vpop.permute.xlu0 %4057  ;;  %v3093_v25 = vpop.permute.xlu1 %3092  ;;  %v4713_v61 = vsub.f32 %v4705_v29, %v4709_v7  ;;  %v4011_v18 = vsub.f32 %v3371_v10, %v3971_v59  ;;  %v10708_v36 = vmul.f32 %v5221_v23, %v4535_v0  ;;  %v4006_v29 = vsub.f32 %v3366_v22, %v3966_v17  ;;  %v3370_v23 = vld [vmem:[%s11251_s7 + $0x398] sm:$0xff] }
 0x4ea   :  { %4352 = vperm.xlu1 %4978, %v3994_v21   ;;  %4407 = vperm.xlu0 %4979, %v4005_v5   ;;  %v3174_v4 = vadd.f32 %v3093_v25, %v2694_v60  ;;  %v4000_v21 = vsub.f32 %v3360_v28, %v3960_v39  ;;  %v4715_v47 = vadd.f32 1e-05, %v4711_v40  ;;  %v3362_v5 = vld [vmem:[%s11251_s7 + $0x358] sm:$0xff]  ;;  %v4539_v39 = vld [vmem:[%s11251_s7 + $0x3c0] sm:$0xff]  ;;  %v3968_v59 = vmul.f32 %v10282_v26, %v12388_v24 }
 0x4eb   :  { %v4002_v60 = vsub.f32 %v3362_v5, %v3962_v48  ;;  %v5223_v57 = vpop.eup %5222  ;;  %v4717_v25 = vadd.f32 1e-05, %v4713_v61  ;;  %v4599_v9 = vmul.f32 %v10708_v36, %v10541_v49  ;;  %v12386_v40 = vld [vmem:[#allocation110_spill] sm:$0xff]  ;;  %v10789_v17 = vmul.f32 0.020408163, %v12392_v27 }
 0x4ec   :  { %3254 = vst.msk [vmem:[%s11252_s8 + $0x278] sm:$0xff] %vm934_vm0, %v3174_v4  ;;  %5226 = vrsqrt.f32 %v4715_v47  ;;  %v4013_v4 = vsub.f32 %v3373_v12, %v3973_v1  ;;  %v10737_v43 = vmul.f32 0.020408163, %v12386_v40  ;;  %v4663_v12 = vld [vmem:[%s11250_s6 + $0x3e0] sm:$0xff] }
 0x4ed   :  { %v10657_v30 = vpop.permute.xlu0 %4067  ;;  %v10667_v44 = vpop.permute.xlu1 %4017  ;;  %5228 = vrsqrt.f32 %v4717_v25  ;;  %v4603_v49 = vsub.f32 %v4539_v39, %v4599_v9  ;;  %v3974_v9 = vmul.f32 %v10365_v16, %v10155_v62  ;;  %v12393_v39 = vld [vmem:[#allocation184_spill] sm:$0xff]  ;;  %v4667_v24 = vld [vmem:[%s11251_s7 + $0x3e0] sm:$0xff]  ;;  %v4710_v62 = vmul.f32 %v10789_v17, %v10789_v17 }
 0x4ee   :  { %4362 = vperm.xlu1 %4978, %v3996_v45   ;;  %4417 = vperm.xlu0 %4979, %v4007_v34   ;;  %v3364_v45 = vld [vmem:[%s11251_s7 + $0x368] sm:$0xff]  ;;  %v5225_v8 = vpop.eup %5224  ;;  %v4582_v48 = vmul.f32 %v10737_v43, %v10737_v43  ;;  %v4704_v40 = vmul.f32 0.020408163, %v12393_v39 }
 0x4ef   :  { %v4004_v58 = vsub.f32 %v3364_v45, %v3964_v53  ;;  %v10722_v19 = vmul.f32 %v5225_v8, %v4536_v32  ;;  %v12391_v53 = vld [vmem:[#allocation109_spill] sm:$0xff]  ;;  %v3372_v45 = vld [vmem:[%s11251_s7 + $0x3a8] sm:$0xff] }
 0x4f0   :  { %v4664_v39 = vld [vmem:[%s11250_s6 + $0x3e8] sm:$0xff] }
 0x4f1   :  { %v10677_v55 = vpop.permute.xlu0 %4077  ;;  %v10684_v33 = vpop.permute.xlu1 %4027 }
 0x4f2   :  { %4372 = vperm.xlu1 %4978, %v3998_v13   ;;  %4427 = vperm.xlu0 %4979, %v4009_v46   ;;  %v10729_v13 = vmul.f32 %v5223_v57, %v4537_v15  ;;  %v12387_v46 = vld [vmem:[#allocation205_spill] sm:$0xff]  ;;  %v4665_v15 = vld [vmem:[%s11250_s6 + $0x3f0] sm:$0xff] }
 0x4f3   :  { %v4578_v28 = vmul.f32 0.020408163, %v12387_v46  ;;  %v3374_v46 = vld [vmem:[%s11251_s7 + $0x3b8] sm:$0xff] }
 0x4f4   :  { %v4601_v10 = vmul.f32 %v10729_v13, %v10556_v38  ;;  %v4014_v16 = vsub.f32 %v3374_v46, %v3974_v9 }
 0x4f5   :  { %v10693_v14 = vpop.permute.xlu0 %4087  ;;  %v10701_v2 = vpop.permute.xlu1 %4032  ;;  %v4586_v26 = vsub.f32 %v4578_v28, %v4582_v48 }
 0x4f6   :  { %4382 = vperm.xlu1 %4978, %v4000_v21   ;;  %4437 = vperm.xlu0 %4979, %v4011_v18   ;;  %v3368_v21 = vld [vmem:[%s11251_s7 + $0x388] sm:$0xff]  ;;  %v4605_v38 = vsub.f32 %v4541_v6, %v4601_v10  ;;  %v12389_v18 = vld [vmem:[#allocation105_spill] sm:$0xff] }
 0x4f7   :  { %v4008_v61 = vsub.f32 %v3368_v21, %v3968_v59  ;;  %v3970_v5 = vmul.f32 %v10309_v42, %v12389_v18  ;;  %v3972_v42 = vmul.f32 %v10336_v52, %v12391_v53  ;;  %v4590_v57 = vadd.f32 1e-05, %v4586_v26  ;;  %v12394_v21 = vld [vmem:[#allocation185_spill] sm:$0xff] }
 0x4f8   :  { %v4706_v6 = vmul.f32 0.020408163, %v12394_v21  ;;  %v5367_v21 = vld [vmem:[%s11248_s4 + $0x10] sm:$0xff] }
 0x4f9   :  { %v10710_v37 = vpop.permute.xlu0 %4097  ;;  %v10718_v34 = vpop.permute.xlu1 %4042  ;;  %v4010_v25 = vsub.f32 %v3370_v23, %v3970_v5  ;;  %v4012_v22 = vsub.f32 %v3372_v45, %v3972_v42  ;;  %5230 = vrsqrt.f32 %v4590_v57  ;;  %v4538_v42 = vld [vmem:[%s11250_s6 + $0x3d8] sm:$0xff]  ;;  %v4540_v45 = vld [vmem:[%s11251_s7 + $0x3c8] sm:$0xff] }
 0x4fa   :  { %4392 = vperm.xlu1 %4978, %v4002_v60   ;;  %4447 = vperm.xlu0 %4979, %v4013_v4   ;;  %v5227_v63 = vpop.eup %5226  ;;  %v12390_v60 = vld [vmem:[#allocation199_spill] sm:$0xff]  ;;  %v4714_v5 = vsub.f32 %v4706_v6, %v4710_v62  ;;  %v4666_v62 = vld [vmem:[%s11250_s6 + $0x3f8] sm:$0xff]  ;;  %v4217_v6 = vmul.f32 %v5367_v21, %v10684_v33  ;;  %v5368_v33 = vld [vmem:[%s11248_s4 + $0x20] sm:$0xff] }
 0x4fb   :  { %v10772_v54 = vmul.f32 0.020408163, %v12390_v60  ;;  %v4723_v4 = vmul.f32 %v5227_v63, %v4663_v12  ;;  %v5229_v8 = vpop.eup %5228 }
 0x4fd   :  { %v10731_v31 = vpop.permute.xlu0 %4107  ;;  %v10739_v51 = vpop.permute.xlu1 %4052  ;;  %v4708_v52 = vmul.f32 %v10772_v54, %v10772_v54  ;;  %v4727_v28 = vmul.f32 %v4723_v4, %v10643_v50 }
 0x4fe   :  { %4402 = vperm.xlu1 %4978, %v4004_v58   ;;  %4614 = vperm.xlu0 %4979, %v10722_v19  }
 0x4ff   :  { %v4712_v10 = vsub.f32 %v4704_v40, %v4708_v52  ;;  %v4731_v48 = vsub.f32 %v4667_v24, %v4727_v28 }
 0x501   :  { %v10747_v7 = vpop.permute.xlu0 %4117  ;;  %v10757_v47 = vpop.permute.xlu1 %4062  ;;  %v4716_v18 = vadd.f32 1e-05, %v4712_v10 }
 0x502   :  { %4412 = vperm.xlu1 %4978, %v4006_v29   ;;  %4633 = vperm.xlu0 %4979, %v4603_v49   ;;  %v4725_v29 = vmul.f32 %v5229_v8, %v4665_v15 }
 0x503   :  { %5232 = vrsqrt.f32 %v4716_v18 }
 0x504   :  { %v4729_v50 = vmul.f32 %v4725_v29, %v10665_v20  ;;  %v4718_v20 = vadd.f32 1e-05, %v4714_v5 }
 0x505   :  { %v10761_v1 = vpop.permute.xlu0 %4127  ;;  %v10769_v0 = vpop.permute.xlu1 %4072 }
 0x506   :  { %4422 = vperm.xlu1 %4978, %v4008_v61   ;;  %4643 = vperm.xlu0 %4979, %v4605_v38   ;;  %v4669_v61 = vld [vmem:[%s11251_s7 + $0x3f0] sm:$0xff]  ;;  %v5231_v60 = vpop.eup %5230  ;;  %5234 = vrsqrt.f32 %v4718_v20 }
 0x507   :  { %v4733_v63 = vsub.f32 %v4669_v61, %v4729_v50  ;;  %v4668_v61 = vld [vmem:[%s11251_s7 + $0x3e8] sm:$0xff] }
 0x509   :  { %v10779_v32 = vpop.permute.xlu0 %4137  ;;  %v10784_v58 = vpop.permute.xlu1 %4082 }
 0x50a   :  { %4432 = vperm.xlu1 %4978, %v4010_v25   ;;  %4737 = vperm.xlu0 %4979, %v4723_v4   ;;  %v4598_v25 = vmul.f32 %v5231_v60, %v4538_v42  ;;  %v4600_v4 = vmul.f32 %v10722_v19, %v10572_v11  ;;  %v4670_v42 = vld [vmem:[%s11251_s7 + $0x3f8] sm:$0xff] }
 0x50c   :  { %v4604_v15 = vsub.f32 %v4540_v45, %v4600_v4  ;;  %v4602_v52 = vmul.f32 %v4598_v25, %v10737_v43  ;;  %v5366_v43 = vld [vmem:[%s11248_s4] sm:$0xff] }
 0x50d   :  { %v10798_v49 = vpop.permute.xlu0 %4147  ;;  %v10803_v59 = vpop.permute.xlu1 %4092 }
 0x50e   :  { %4442 = vperm.xlu1 %4978, %v4012_v22   ;;  %4747 = vperm.xlu0 %4979, %v4725_v29   ;;  %v4215_v29 = vmul.f32 %v5366_v43, %v10667_v44 }
 0x510   :  { %v5233_v19 = vpop.eup %5232 }
 0x511   :  { %v10809_v26 = vpop.permute.xlu0 %4157  ;;  %v10814_v38 = vpop.permute.xlu1 %4102  ;;  %v4724_v46 = vmul.f32 %v5233_v19, %v4664_v39 }
 0x512   :  { %4452 = vperm.xlu1 %4978, %v4014_v16   ;;  %4761 = vperm.xlu0 %4979, %v4731_v48  }
 0x513   :  { %v5235_v28 = vpop.eup %5234  ;;  %v4728_v48 = vmul.f32 %v4724_v46, %v10772_v54 }
 0x514   :  { %v4726_v44 = vmul.f32 %v5235_v28, %v4666_v62  ;;  %v5372_v62 = vld [vmem:[%s11248_s4 + $0x60] sm:$0xff] }
 0x515   :  { %v10816_v23 = vpop.permute.xlu0 %4167  ;;  %v10818_v12 = vpop.permute.xlu1 %4112  ;;  %v4732_v54 = vsub.f32 %v4668_v61, %v4728_v48  ;;  %v5374_v61 = vld [vmem:[%s11248_s4 + $0x70] sm:$0xff] }
 0x516   :  { %4609 = vperm.xlu1 %4978, %v10708_v36   ;;  %4771 = vperm.xlu0 %4979, %v4733_v63   ;;  %v4219_v63 = vmul.f32 %v5368_v33, %v10595_v3  ;;  %v4730_v20 = vmul.f32 %v4726_v44, %v10789_v17  ;;  %v5369_v3 = vld [vmem:[%s11248_s4 + $0x30] sm:$0xff] }
 0x517   :  { %v4221_v45 = vmul.f32 %v5369_v3, %v10617_v35 }
 0x518   :  { %v4734_v17 = vsub.f32 %v4670_v42, %v4730_v20  ;;  %v5376_v20 = vld [vmem:[%s11248_s4 + $0x80] sm:$0xff] }
 0x519   :  { %v10821_v53 = vpop.permute.xlu0 %4177  ;;  %v10826_v57 = vpop.permute.xlu1 %4122 }
 0x51a   :  { %4619 = vperm.xlu1 %4978, %v10729_v13   ;;  %v4542_v13 = vld [vmem:[%s11251_s7 + $0x3d8] sm:$0xff] }
 0x51b   :  { %v4606_v11 = vsub.f32 %v4542_v13, %v4602_v52 }
 0x51d   :  { %v10831_v36 = vpop.permute.xlu0 %4187  ;;  %v10836_v8 = vpop.permute.xlu1 %4132 }
 0x51e   :  { %4624 = vperm.xlu1 %4978, %v4598_v25  }
 0x521   :  { %v10839_v27 = vpop.permute.xlu0 %4197  ;;  %v10844_v22 = vpop.permute.xlu1 %4142 }
 0x522   :  { %4638 = vperm.xlu1 %4978, %v4604_v15  }
 0x525   :  { %v10846_v9 = vpop.permute.xlu0 %4207  ;;  %v10851_v40 = vpop.permute.xlu1 %4152 }
 0x526   :  { %4648 = vperm.xlu1 %4978, %v4606_v11   ;;  %v5370_v11 = vld [vmem:[%s11248_s4 + $0x40] sm:$0xff] }
 0x527   :  { %v4223_v19 = vmul.f32 %v5370_v11, %v10637_v56 }
 0x529   :  { %v4258_v24 = vpop.permute.xlu0 %4257  ;;  %v10860_v10 = vpop.permute.xlu1 %4162 }
 0x52a   :  { %v4455_v16 = vadd.f32 %v4258_v24, %v4215_v29  ;;  %4742 = vperm.xlu1 %4978, %v4724_v46   ;;  %v5371_v29 = vld [vmem:[%s11248_s4 + $0x50] sm:$0xff] }
 0x52b   :  { %v4225_v46 = vmul.f32 %v5371_v29, %v10657_v30  ;;  %v5373_v30 = vld [vmem:[%s11248_s4 + $0x8] sm:$0xff] }
 0x52c   :  { %4495 = vst.msk [vmem:[%s11252_s8 + $0x280] sm:$0xff] %vm934_vm0, %v4455_v16  ;;  %v4227_v16 = vmul.f32 %v5372_v62, %v10677_v55  ;;  %v4216_v21 = vmul.f32 %v5373_v30, %v10566_v41  ;;  %v4229_v55 = vmul.f32 %v5374_v61, %v10693_v14 }
 0x52d   :  { %v4268_v50 = vpop.permute.xlu0 %4267  ;;  %v10874_v5 = vpop.permute.xlu1 %4172 }
 0x52e   :  { %v4457_v18 = vadd.f32 %v4268_v50, %v4217_v6  ;;  %4752 = vperm.xlu1 %4978, %v4726_v44  }
 0x530   :  { %4497 = vst.msk [vmem:[%s11252_s8 + $0x290] sm:$0xff] %vm934_vm0, %v4457_v18  ;;  %v5375_v18 = vld [vmem:[%s11248_s4 + $0x18] sm:$0xff] }
 0x531   :  { %v4278_v60 = vpop.permute.xlu0 %4277  ;;  %v10888_v4 = vpop.permute.xlu1 %4182  ;;  %v4218_v41 = vmul.f32 %v5375_v18, %v10701_v2  ;;  %v5377_v2 = vld [vmem:[%s11248_s4 + $0x28] sm:$0xff] }
 0x532   :  { %v4459_v25 = vadd.f32 %v4278_v60, %v4219_v63  ;;  %4766 = vperm.xlu1 %4978, %v4732_v54   ;;  %v4231_v60 = vmul.f32 %v5376_v20, %v10710_v37  ;;  %v4220_v42 = vmul.f32 %v5377_v2, %v10718_v34  ;;  %v5379_v34 = vld [vmem:[%s11248_s4 + $0x38] sm:$0xff] }
 0x534   :  { %4499 = vst.msk [vmem:[%s11252_s8 + $0x2a0] sm:$0xff] %vm934_vm0, %v4459_v25 }
 0x535   :  { %v4288_v15 = vpop.permute.xlu0 %4287  ;;  %v10898_v13 = vpop.permute.xlu1 %4192 }
 0x536   :  { %v4461_v52 = vadd.f32 %v4288_v15, %v4221_v45  ;;  %4776 = vperm.xlu1 %4978, %v4734_v17   ;;  %v5378_v17 = vld [vmem:[%s11248_s4 + $0x90] sm:$0xff] }
 0x537   :  { %v4233_v15 = vmul.f32 %v5378_v17, %v10731_v31 }
 0x538   :  { %4501 = vst.msk [vmem:[%s11252_s8 + $0x2b0] sm:$0xff] %vm934_vm0, %v4461_v52  ;;  %v4222_v52 = vmul.f32 %v5379_v34, %v10739_v51  ;;  %v5381_v51 = vld [vmem:[%s11248_s4 + $0x48] sm:$0xff] }
 0x539   :  { %v4298_v35 = vpop.permute.xlu0 %4297  ;;  %v10908_v43 = vpop.permute.xlu1 %4202 }
 0x53a   :  { %v4463_v39 = vadd.f32 %v4298_v35, %v4223_v19 }
 0x53c   :  { %4503 = vst.msk [vmem:[%s11252_s8 + $0x2c0] sm:$0xff] %vm934_vm0, %v4463_v39  ;;  %v5380_v39 = vld [vmem:[%s11248_s4 + $0xa0] sm:$0xff] }
 0x53d   :  { %v4308_v56 = vpop.permute.xlu0 %4307  ;;  %v10918_v24 = vpop.permute.xlu1 %4212  ;;  %v4235_v29 = vmul.f32 %v5380_v39, %v10747_v7 }
 0x53e   :  { %v4465_v28 = vadd.f32 %v4308_v56, %v4225_v46  ;;  %v4224_v46 = vmul.f32 %v5381_v51, %v10757_v47  ;;  %v5383_v47 = vld [vmem:[%s11248_s4 + $0x58] sm:$0xff] }
 0x540   :  { %4505 = vst.msk [vmem:[%s11252_s8 + $0x2d0] sm:$0xff] %vm934_vm0, %v4465_v28 }
 0x541   :  { %v4318_v6 = vpop.permute.xlu0 %4317  ;;  %v4263_v48 = vpop.permute.xlu1 %4262 }
 0x542   :  { %v4467_v44 = vadd.f32 %v4318_v6, %v4227_v16  ;;  %v4456_v50 = vadd.f32 %v4263_v48, %v4216_v21  ;;  %v5382_v16 = vld [vmem:[%s11248_s4 + $0xb0] sm:$0xff]  ;;  %v4226_v21 = vmul.f32 %v5383_v47, %v10769_v0  ;;  %v5385_v0 = vld [vmem:[%s11248_s4 + $0x68] sm:$0xff] }
 0x543   :  { %v4237_v30 = vmul.f32 %v5382_v16, %v10761_v1 }
 0x544   :  { %4507 = vst.msk [vmem:[%s11252_s8 + $0x2e0] sm:$0xff] %vm934_vm0, %v4467_v44  ;;  %4496 = vst.msk [vmem:[%s11252_s8 + $0x288] sm:$0xff] %vm934_vm0, %v4456_v50  ;;  %v5384_v50 = vld [vmem:[%s11248_s4 + $0xc0] sm:$0xff] }
 0x545   :  { %v4328_v33 = vpop.permute.xlu0 %4327  ;;  %v4273_v54 = vpop.permute.xlu1 %4272  ;;  %v4239_v61 = vmul.f32 %v5384_v50, %v10779_v32 }
 0x546   :  { %v4469_v63 = vadd.f32 %v4328_v33, %v4229_v55  ;;  %v4458_v14 = vadd.f32 %v4273_v54, %v4218_v41  ;;  %v4228_v55 = vmul.f32 %v5385_v0, %v10784_v58  ;;  %v5387_v58 = vld [vmem:[%s11248_s4 + $0x78] sm:$0xff] }
 0x548   :  { %4509 = vst.msk [vmem:[%s11252_s8 + $0x2f0] sm:$0xff] %vm934_vm0, %v4469_v63  ;;  %4498 = vst.msk [vmem:[%s11252_s8 + $0x298] sm:$0xff] %vm934_vm0, %v4458_v14  ;;  %v5386_v63 = vld [vmem:[%s11248_s4 + $0xd0] sm:$0xff]  ;;  %v4230_v14 = vmul.f32 %v5387_v58, %v10803_v59  ;;  %v5389_v59 = vld [vmem:[%s11248_s4 + $0x88] sm:$0xff] }
 0x549   :  { %v4338_v25 = vpop.permute.xlu0 %4337  ;;  %v4283_v45 = vpop.permute.xlu1 %4282  ;;  %v4241_v54 = vmul.f32 %v5386_v63, %v10798_v49 }
 0x54a   :  { %v4471_v3 = vadd.f32 %v4338_v25, %v4231_v60  ;;  %v4460_v37 = vadd.f32 %v4283_v45, %v4220_v42  ;;  %v5388_v42 = vld [vmem:[%s11248_s4 + $0xe0] sm:$0xff] }
 0x54b   :  { %v4243_v25 = vmul.f32 %v5388_v42, %v10809_v26 }
 0x54c   :  { %4511 = vst.msk [vmem:[%s11252_s8 + $0x300] sm:$0xff] %vm934_vm0, %v4471_v3  ;;  %4500 = vst.msk [vmem:[%s11252_s8 + $0x2a8] sm:$0xff] %vm934_vm0, %v4460_v37  ;;  %v4232_v3 = vmul.f32 %v5389_v59, %v10814_v38  ;;  %v5391_v38 = vld [vmem:[%s11248_s4 + $0x98] sm:$0xff] }
 0x54d   :  { %v4348_v11 = vpop.permute.xlu0 %4347  ;;  %v4293_v35 = vpop.permute.xlu1 %4292 }
 0x54e   :  { %v4473_v19 = vadd.f32 %v4348_v11, %v4233_v15  ;;  %v4462_v31 = vadd.f32 %v4293_v35, %v4222_v52  ;;  %v5390_v15 = vld [vmem:[%s11248_s4 + $0xf0] sm:$0xff]  ;;  %v4234_v52 = vmul.f32 %v5391_v38, %v10818_v12  ;;  %v5393_v12 = vld [vmem:[%s11248_s4 + $0xa8] sm:$0xff] }
 0x54f   :  { %v4245_v34 = vmul.f32 %v5390_v15, %v10816_v23 }
 0x550   :  { %4513 = vst.msk [vmem:[%s11252_s8 + $0x310] sm:$0xff] %vm934_vm0, %v4473_v19  ;;  %4502 = vst.msk [vmem:[%s11252_s8 + $0x2b8] sm:$0xff] %vm934_vm0, %v4462_v31  ;;  %v5392_v31 = vld [vmem:[%s11248_s4 + $0x100] sm:$0xff] }
 0x551   :  { %v4358_v56 = vpop.permute.xlu0 %4357  ;;  %v4303_v62 = vpop.permute.xlu1 %4302  ;;  %v4247_v39 = vmul.f32 %v5392_v31, %v10821_v53 }
 0x552   :  { %v4475_v28 = vadd.f32 %v4358_v56, %v4235_v29  ;;  %v4464_v7 = vadd.f32 %v4303_v62, %v4224_v46  ;;  %v4236_v29 = vmul.f32 %v5393_v12, %v10826_v57  ;;  %v5395_v57 = vld [vmem:[%s11248_s4 + $0xb8] sm:$0xff]  ;;  %v5407_v12 = vld [vmem:[%s11249_s5 + $0x10] sm:$0xff] }
 0x554   :  { %4515 = vst.msk [vmem:[%s11252_s8 + $0x320] sm:$0xff] %vm934_vm0, %v4475_v28  ;;  %4504 = vst.msk [vmem:[%s11252_s8 + $0x2c8] sm:$0xff] %vm934_vm0, %v4464_v7  ;;  %v5394_v28 = vld [vmem:[%s11248_s4 + $0x110] sm:$0xff]  ;;  %v4238_v7 = vmul.f32 %v5395_v57, %v10836_v8  ;;  %v5397_v8 = vld [vmem:[%s11248_s4 + $0xc8] sm:$0xff] }
 0x555   :  { %v4368_v6 = vpop.permute.xlu0 %4367  ;;  %v4313_v48 = vpop.permute.xlu1 %4312  ;;  %v4249_v62 = vmul.f32 %v5394_v28, %v10831_v36  ;;  %v12396_v57 = vld [vmem:[#allocation175_spill] sm:$0xff] }
 0x556   :  { %v4477_v44 = vadd.f32 %v4368_v6, %v4237_v30  ;;  %v4466_v1 = vadd.f32 %v4313_v48, %v4226_v21  ;;  %v5396_v21 = vld [vmem:[%s11248_s4 + $0x120] sm:$0xff] }
 0x557   :  { %v4251_v6 = vmul.f32 %v5396_v21, %v10839_v27 }
 0x558   :  { %4517 = vst.msk [vmem:[%s11252_s8 + $0x330] sm:$0xff] %vm934_vm0, %v4477_v44  ;;  %4506 = vst.msk [vmem:[%s11252_s8 + $0x2d8] sm:$0xff] %vm934_vm0, %v4466_v1  ;;  %v4240_v44 = vmul.f32 %v5397_v8, %v10844_v22  ;;  %v5399_v22 = vld [vmem:[%s11248_s4 + $0xd8] sm:$0xff]  ;;  %v12398_v8 = vld [vmem:[#allocation78_spill] sm:$0xff] }
 0x559   :  { %v4378_v18 = vpop.permute.xlu0 %4377  ;;  %v4323_v33 = vpop.permute.xlu1 %4322 }
 0x55a   :  { %v4479_v41 = vadd.f32 %v4378_v18, %v4239_v61  ;;  %v4468_v32 = vadd.f32 %v4323_v33, %v4228_v55  ;;  %v5398_v61 = vld [vmem:[%s11248_s4 + $0x130] sm:$0xff]  ;;  %v4242_v55 = vmul.f32 %v5399_v22, %v10851_v40 }
 0x55b   :  { %v4253_v0 = vmul.f32 %v5398_v61, %v10846_v9  ;;  %v5408_v61 = vld [vmem:[%s11249_s5 + $0x8] sm:$0xff] }
 0x55c   :  { %4519 = vst.msk [vmem:[%s11252_s8 + $0x340] sm:$0xff] %vm934_vm0, %v4479_v41  ;;  %4508 = vst.msk [vmem:[%s11252_s8 + $0x2e8] sm:$0xff] %vm934_vm0, %v4468_v32  ;;  %v5400_v32 = vld [vmem:[%s11248_s4 + $0xe8] sm:$0xff] }
 0x55d   :  { %v4388_v20 = vpop.permute.xlu0 %4387  ;;  %v4333_v2 = vpop.permute.xlu1 %4332  ;;  %v4244_v40 = vmul.f32 %v5400_v32, %v10860_v10 }
 0x55e   :  { %v4481_v60 = vadd.f32 %v4388_v20, %v4241_v54  ;;  %v4470_v49 = vadd.f32 %v4333_v2, %v4230_v14  ;;  %v5401_v14 = vld [vmem:[%s11248_s4 + $0xf8] sm:$0xff] }
 0x55f   :  { %v4246_v20 = vmul.f32 %v5401_v14, %v10874_v5 }
 0x560   :  { %4521 = vst.msk [vmem:[%s11252_s8 + $0x350] sm:$0xff] %vm934_vm0, %v4481_v60  ;;  %4510 = vst.msk [vmem:[%s11252_s8 + $0x2f8] sm:$0xff] %vm934_vm0, %v4470_v49  ;;  %v5402_v49 = vld [vmem:[%s11248_s4 + $0x108] sm:$0xff] }
 0x561   :  { %v4398_v45 = vpop.permute.xlu0 %4397  ;;  %v4343_v17 = vpop.permute.xlu1 %4342  ;;  %v4248_v42 = vmul.f32 %v5402_v49, %v10888_v4 }
 0x562   :  { %v4483_v37 = vadd.f32 %v4398_v45, %v4243_v25  ;;  %v4472_v26 = vadd.f32 %v4343_v17, %v4232_v3  ;;  %v5403_v3 = vld [vmem:[%s11248_s4 + $0x118] sm:$0xff] }
 0x563   :  { %v4250_v45 = vmul.f32 %v5403_v3, %v10898_v13 }
 0x564   :  { %4523 = vst.msk [vmem:[%s11252_s8 + $0x360] sm:$0xff] %vm934_vm0, %v4483_v37  ;;  %4512 = vst.msk [vmem:[%s11252_s8 + $0x308] sm:$0xff] %vm934_vm0, %v4472_v26  ;;  %v5404_v26 = vld [vmem:[%s11248_s4 + $0x128] sm:$0xff] }
 0x565   :  { %v4408_v11 = vpop.permute.xlu0 %4407  ;;  %v4353_v35 = vpop.permute.xlu1 %4352  ;;  %v4252_v15 = vmul.f32 %v5404_v26, %v10908_v43 }
 0x566   :  { %v4485_v19 = vadd.f32 %v4408_v11, %v4245_v34  ;;  %v4474_v23 = vadd.f32 %v4353_v35, %v4234_v52  ;;  %v5405_v52 = vld [vmem:[%s11249_s5] sm:$0xff] }
 0x568   :  { %4525 = vst.msk [vmem:[%s11252_s8 + $0x370] sm:$0xff] %vm934_vm0, %v4485_v19  ;;  %4514 = vst.msk [vmem:[%s11252_s8 + $0x318] sm:$0xff] %vm934_vm0, %v4474_v23  ;;  %v5406_v19 = vld [vmem:[%s11248_s4 + $0x138] sm:$0xff] }
 0x569   :  { %v4418_v51 = vpop.permute.xlu0 %4417  ;;  %v4363_v56 = vpop.permute.xlu1 %4362  ;;  %v4254_v35 = vmul.f32 %v5406_v19, %v10918_v24 }
 0x56a   :  { %v4487_v46 = vadd.f32 %v4418_v51, %v4247_v39  ;;  %v4476_v53 = vadd.f32 %v4363_v56, %v4236_v29  ;;  %v12395_v56 = vld [vmem:[#allocation174_spill] sm:$0xff] }
 0x56c   :  { %4527 = vst.msk [vmem:[%s11252_s8 + $0x380] sm:$0xff] %vm934_vm0, %v4487_v46  ;;  %4516 = vst.msk [vmem:[%s11252_s8 + $0x328] sm:$0xff] %vm934_vm0, %v4476_v53 }
 0x56d   :  { %v4428_v16 = vpop.permute.xlu0 %4427  ;;  %v4373_v47 = vpop.permute.xlu1 %4372 }
 0x56e   :  { %v4489_v30 = vadd.f32 %v4428_v16, %v4249_v62  ;;  %v4478_v36 = vadd.f32 %v4373_v47, %v4238_v7  ;;  %v12397_v47 = vld [vmem:[#allocation75_spill] sm:$0xff] }
 0x570   :  { %4529 = vst.msk [vmem:[%s11252_s8 + $0x390] sm:$0xff] %vm934_vm0, %v4489_v30  ;;  %4518 = vst.msk [vmem:[%s11252_s8 + $0x338] sm:$0xff] %vm934_vm0, %v4478_v36 }
 0x571   :  { %v4438_v48 = vpop.permute.xlu0 %4437  ;;  %v4383_v50 = vpop.permute.xlu1 %4382 }
 0x572   :  { %v4491_v1 = vadd.f32 %v4438_v48, %v4251_v6  ;;  %v4480_v27 = vadd.f32 %v4383_v50, %v4240_v44 }
 0x574   :  { %4531 = vst.msk [vmem:[%s11252_s8 + $0x3a0] sm:$0xff] %vm934_vm0, %v4491_v1  ;;  %4520 = vst.msk [vmem:[%s11252_s8 + $0x348] sm:$0xff] %vm934_vm0, %v4480_v27 }
 0x575   :  { %v4448_v18 = vpop.permute.xlu0 %4447  ;;  %v4393_v33 = vpop.permute.xlu1 %4392 }
 0x576   :  { %v4493_v41 = vadd.f32 %v4448_v18, %v4253_v0  ;;  %v4482_v9 = vadd.f32 %v4393_v33, %v4242_v55  ;;  %v5409_v18 = vld [vmem:[%s11249_s5 + $0x18] sm:$0xff] }
 0x578   :  { %4533 = vst.msk [vmem:[%s11252_s8 + $0x3b0] sm:$0xff] %vm934_vm0, %v4493_v41  ;;  %4522 = vst.msk [vmem:[%s11252_s8 + $0x358] sm:$0xff] %vm934_vm0, %v4482_v9 }
 0x579   :  { %v4615_v63 = vpop.permute.xlu0 %4614  ;;  %v4403_v54 = vpop.permute.xlu1 %4402 }
 0x57a   :  { %v4484_v58 = vadd.f32 %v4403_v54, %v4244_v40  ;;  %v4628_v36 = vmul.f32 %v4615_v63, %v12397_v47 }
 0x57c   :  { %4524 = vst.msk [vmem:[%s11252_s8 + $0x368] sm:$0xff] %vm934_vm0, %v4484_v58 }
 0x57d   :  { %v4634_v10 = vpop.permute.xlu0 %4633  ;;  %v4413_v60 = vpop.permute.xlu1 %4412 }
 0x57e   :  { %v4486_v2 = vadd.f32 %v4413_v60, %v4246_v20 }
 0x580   :  { %4526 = vst.msk [vmem:[%s11252_s8 + $0x378] sm:$0xff] %vm934_vm0, %v4486_v2 }
 0x581   :  { %v4644_v5 = vpop.permute.xlu0 %4643  ;;  %v4423_v25 = vpop.permute.xlu1 %4422 }
 0x582   :  { %v4488_v59 = vadd.f32 %v4423_v25, %v4248_v42 }
 0x584   :  { %4528 = vst.msk [vmem:[%s11252_s8 + $0x388] sm:$0xff] %vm934_vm0, %v4488_v59 }
 0x585   :  { %v4738_v4 = vpop.permute.xlu0 %4737  ;;  %v4433_v37 = vpop.permute.xlu1 %4432 }
 0x586   :  { %v4490_v17 = vadd.f32 %v4433_v37, %v4250_v45  ;;  %v4755_v11 = vmul.f32 %v5405_v52, %v4738_v4 }
 0x588   :  { %4530 = vst.msk [vmem:[%s11252_s8 + $0x398] sm:$0xff] %vm934_vm0, %v4490_v17 }
 0x589   :  { %v4748_v13 = vpop.permute.xlu0 %4747  ;;  %v4443_v34 = vpop.permute.xlu1 %4442 }
 0x58a   :  { %v4492_v38 = vadd.f32 %v4443_v34, %v4252_v15  ;;  %v4757_v29 = vmul.f32 %v5407_v12, %v4748_v13 }
 0x58c   :  { %4532 = vst.msk [vmem:[%s11252_s8 + $0x3a8] sm:$0xff] %vm934_vm0, %v4492_v38 }
 0x58d   :  { %v4762_v43 = vpop.permute.xlu0 %4761  ;;  %v4453_v31 = vpop.permute.xlu1 %4452 }
 0x58e   :  { %v4779_v23 = vadd.f32 %v4762_v43, %v4755_v11  ;;  %v4494_v39 = vadd.f32 %v4453_v31, %v4254_v35 }
 0x590   :  { %4783 = vst.msk [vmem:[%s11252_s8 + $0x3e0] sm:$0xff] %vm934_vm0, %v4779_v23  ;;  %4534 = vst.msk [vmem:[%s11252_s8 + $0x3b8] sm:$0xff] %vm934_vm0, %v4494_v39 }
 0x591   :  { %v4772_v24 = vpop.permute.xlu0 %4771  ;;  %v4610_v46 = vpop.permute.xlu1 %4609 }
 0x592   :  { %v4781_v51 = vadd.f32 %v4772_v24, %v4757_v29  ;;  %v4627_v53 = vmul.f32 %v4610_v46, %v12395_v56 }
 0x594   :  { %4785 = vst.msk [vmem:[%s11252_s8 + $0x3f0] sm:$0xff] %vm934_vm0, %v4781_v51  ;;  %v4651_v28 = vadd.f32 %v4634_v10, %v4627_v53 }
 0x595   :  { %v4620_v62 = vpop.permute.xlu1 %4619 }
 0x596   :  { %4655 = vst.msk [vmem:[%s11252_s8 + $0x3c0] sm:$0xff] %vm934_vm0, %v4651_v28  ;;  %v4629_v7 = vmul.f32 %v4620_v62, %v12396_v57 }
 0x598   :  { %v4653_v16 = vadd.f32 %v4644_v5, %v4629_v7 }
 0x599   :  { %v4625_v30 = vpop.permute.xlu1 %4624 }
 0x59a   :  { %4657 = vst.msk [vmem:[%s11252_s8 + $0x3d0] sm:$0xff] %vm934_vm0, %v4653_v16  ;;  %v4630_v44 = vmul.f32 %v4625_v30, %v12398_v8 }
 0x59d   :  { %v4639_v21 = vpop.permute.xlu1 %4638 }
 0x59e   :  { %v4652_v6 = vadd.f32 %v4639_v21, %v4628_v36 }
 0x5a0   :  { %4656 = vst.msk [vmem:[%s11252_s8 + $0x3c8] sm:$0xff] %vm934_vm0, %v4652_v6 }
 0x5a1   :  { %v4649_v48 = vpop.permute.xlu1 %4648 }
 0x5a2   :  { %v4654_v1 = vadd.f32 %v4649_v48, %v4630_v44 }
 0x5a4   :  { %4658 = vst.msk [vmem:[%s11252_s8 + $0x3d8] sm:$0xff] %vm934_vm0, %v4654_v1 }
 0x5a5   :  { %v4743_v50 = vpop.permute.xlu1 %4742 }
 0x5a6   :  { %v4756_v0 = vmul.f32 %v5408_v61, %v4743_v50 }
 0x5a9   :  { %v4753_v27 = vpop.permute.xlu1 %4752 }
 0x5aa   :  { %v4758_v41 = vmul.f32 %v5409_v18, %v4753_v27 }
 0x5ad   :  { %v4767_v22 = vpop.permute.xlu1 %4766 }
 0x5ae   :  { %v4780_v55 = vadd.f32 %v4767_v22, %v4756_v0 }
 0x5b0   :  { %4784 = vst.msk [vmem:[%s11252_s8 + $0x3e8] sm:$0xff] %vm934_vm0, %v4780_v55 }
 0x5b1   :  { %v4777_v33 = vpop.permute.xlu1 %4776 }
 0x5b2   :  { %v4782_v9 = vadd.f32 %v4777_v33, %v4758_v41 }
 0x5b4   :  { %4786 = vst.msk [vmem:[%s11252_s8 + $0x3f8] sm:$0xff] %vm934_vm0, %v4782_v9 }

</bundles_post_ra>
